<compile_context>
chip_gen: v6e
topology: v6e:2x2x1
jax: 0.10.0
libtpu: 0.0.40
codegen_flags: <defaults>
</compile_context>

<pallas_src>
import jax
import jax.numpy as jnp
from jax import lax
from jax.experimental import pallas as pl
from jax.experimental.pallas import tpu as pltpu

WINDOW_SIZE = 16          # stand-in for vars.WINDOW_SIZE (multiple of 8)
HIGHEST = jax.lax.Precision.HIGHEST


# ----------------------------------------------------------------------------
# Pallas kernel: whole forward pass for one batch tile (pure matmul chain).
# ----------------------------------------------------------------------------
def s2pnet_kernel(x_ref,                      # (TB, 16)    f32
                  w1_ref, b1_ref,             # (16, 480)   bf16, (1, 480)  f32
                  w2_ref, b2_ref,             # (480, 480)  bf16, (1, 480)  f32
                  w3_ref, b3_ref,             # (480, 640)  bf16, (1, 640)  f32
                  w4_ref, b4_ref,             # (640, 800)  bf16, (1, 800)  f32
                  w5_ref, b5_ref,             # (800, 800)  bf16, (1, 800)  f32
                  wf1_ref, bf1_ref,           # (800, 1024) bf16, (1, 1024) f32
                  wf2_ref, bf2_ref,           # (1, 1024)   f32,  (1, 1)    f32
                  out_ref):                   # (TB, 1)     f32

    def layer(a_bf16, w_ref, b_ref):
        # bf16 MXU operands, f32 accumulation; bias + ReLU stay f32.
        z = jnp.dot(a_bf16, w_ref[...], preferred_element_type=jnp.float32)
        return jnp.maximum(z + b_ref[...], 0.0)

    # Banded-weight convs: each layer is one (TB, L*Cin) x (L*Cin, L*Cout)
    # matmul for the whole batch tile ("same" padding lives in zero bands).
    a = x_ref[...].astype(jnp.bfloat16)                       # (TB, 16)
    for w_ref, b_ref in ((w1_ref, b1_ref), (w2_ref, b2_ref), (w3_ref, b3_ref),
                         (w4_ref, b4_ref), (w5_ref, b5_ref)):
        a = layer(a, w_ref, b_ref).astype(jnp.bfloat16)

    # `a` is conv5's output already in PyTorch flatten order (c*L + l): (TB, 800)
    h = layer(a, wf1_ref, bf1_ref)                            # fc1 -> (TB, 1024) f32

    # fc2: VPU broadcast-multiply + lane reduction, one scalar per sample.
    y = jnp.sum(h * wf2_ref[...], axis=-1, keepdims=True) + bf2_ref[...]
    out_ref[...] = y.astype(out_ref.dtype)


# ----------------------------------------------------------------------------
# Wrapper: banded weight construction (glue) + pallas_call with a batch grid.
# ----------------------------------------------------------------------------
def banded_conv_weight(w, L):
    """PyTorch conv1d weight (Cout, Cin, K), stride 1, 'same' padding ->
    block-Toeplitz matrix M of shape (Cin*L, Cout*L) such that
      out_flat[co*L + lo] = sum_i in_flat[ci*L + li] * M[ci*L + li, co*L + lo].
    """
    Cout, Cin, K = w.shape
    P = (K - 1) // 2
    li = jnp.arange(L)[:, None]                    # (L, 1)
    lo = jnp.arange(L)[None, :]                    # (1, L)
    k_idx = li - lo + P                            # (L, L)
    valid = (k_idx >= 0) & (k_idx < K)
    k_clip = jnp.clip(k_idx, 0, K - 1)
    w_t = jnp.transpose(w, (1, 0, 2))              # (Cin, Cout, K)
    band = w_t[:, :, k_clip]                       # (Cin, Cout, L, L)
    band = jnp.where(valid[None, None], band, 0.0)
    band = jnp.transpose(band, (0, 2, 1, 3))       # (Cin, L, Cout, L)
    return band.reshape(Cin * L, Cout * L)


def _round_up(n, m):
    return ((n + m - 1) // m) * m


def s2pnet_forward(x, convs, fc1, fc2):
    """x: (B, WINDOW_SIZE) f32. Returns y: (B, 1) f32 (eval-mode forward)."""
    B, L = x.shape
    assert L == WINDOW_SIZE

    # Batch tile: fill the MXU M dim for big batches, keep the grid >= 2 steps
    # for mid-size batches (v7x megacore), minimal padding for tiny batches.
    if B <= 64:
        TB = _round_up(B, 8)
    elif B <= 512:
        TB = 128
    else:
        TB = 256
    nb = pl.cdiv(B, TB)
    Bp = nb * TB
    if Bp != B:
        x = jnp.pad(x, ((0, Bp - B), (0, 0)))
    x = x.astype(jnp.float32)

    # Conv weights -> banded block-Toeplitz matrices (bf16 MXU operands);
    # biases repeated per position to match the (c*L + l) flat layout.
    # NOTE: in real use these would be precomputed once per checkpoint.
    args = [x]
    for (w, b) in convs:
        args.append(banded_conv_weight(w, L).astype(jnp.bfloat16))
        args.append(jnp.repeat(b, L)[None, :].astype(jnp.float32))

    W1, b1 = fc1                                  # (1024, 50*L), (1024,)
    W2, b2 = fc2                                  # (1, 1024),    (1,)
    args += [W1.T.astype(jnp.bfloat16), b1[None, :].astype(jnp.float32),
             W2.astype(jnp.float32),    b2[None, :].astype(jnp.float32)]

    def resident(a):   # full-array block, constant index map -> stays in VMEM
        nd = a.ndim
        return pl.BlockSpec(a.shape, lambda i: (0,) * nd)

    in_specs = [pl.BlockSpec((TB, L), lambda i: (i, 0))]
    in_specs += [resident(a) for a in args[1:]]

    # Advisory cost estimate (matmul flops of the banded chain + fc layers).
    flops = 2 * Bp * sum(int(w.shape[0]) * int(w.shape[1]) for w in args[1::2])
    bytes_accessed = sum(int(a.size) * a.dtype.itemsize for a in args) + Bp * 4

    out = pl.pallas_call(
        s2pnet_kernel,
        grid=(nb,),
        out_shape=jax.ShapeDtypeStruct((Bp, 1), jnp.float32),
        in_specs=in_specs,
        out_specs=pl.BlockSpec((TB, 1), lambda i: (i, 0)),
        compiler_params=pltpu.CompilerParams(
            dimension_semantics=("parallel",),          # megacore sharding
            vmem_limit_bytes=32 * 1024 * 1024),         # safe on v5e/v6e/v7x
        cost_estimate=pl.CostEstimate(
            flops=flops, transcendentals=0, bytes_accessed=bytes_accessed),
    )(*args)
    return out[:B]


# ----------------------------------------------------------------------------
# Deterministic parameter init (PyTorch-style uniform(-1/sqrt(fan_in), ...))
# ----------------------------------------------------------------------------
def init_params(key):
    def uni(k, shape, fan_in):
        bound = 1.0 / (fan_in ** 0.5)
        return jax.random.uniform(k, shape, jnp.float32, -bound, bound)

    conv_cfg = [(30, 1, 11), (30, 30, 9), (40, 30, 7), (50, 40, 5), (50, 50, 5)]
    keys = jax.random.split(key, 2 * len(conv_cfg) + 4)
    i = 0
    convs = []
    for (co, ci, k) in conv_cfg:
        w = uni(keys[i], (co, ci, k), ci * k); i += 1
        b = uni(keys[i], (co,), ci * k); i += 1
        convs.append((w, b))
    fan1 = 50 * WINDOW_SIZE
    W1 = uni(keys[i], (1024, fan1), fan1); i += 1
    b1 = uni(keys[i], (1024,), fan1); i += 1
    W2 = uni(keys[i], (1, 1024), 1024); i += 1
    b2 = uni(keys[i], (1,), 1024); i += 1
    return convs, (W1, b1), (W2, b2)


# ----------------------------------------------------------------------------
# Pure-JAX reference (mirrors the PyTorch NCW forward exactly, f32 HIGHEST)
# ----------------------------------------------------------------------------
def ref_forward(x, convs, fc1, fc2):
    a = x[:, None, :]                                          # (B, 1, L)  NCW
    for (w, b) in convs:
        pad = (w.shape[2] - 1) // 2
        a = lax.conv_general_dilated(
            a, w, window_strides=(1,), padding=[(pad, pad)],
            dimension_numbers=("NCH", "OIH", "NCH"), precision=HIGHEST)
        a = jax.nn.relu(a + b[None, :, None])
    flat = a.reshape(a.shape[0], -1)                           # (B, 50*L), c-major
    W1, b1 = fc1
    W2, b2 = fc2
    h = jax.nn.relu(jnp.dot(flat, W1.T, precision=HIGHEST) + b1)
    return jnp.dot(h, W2.T, precision=HIGHEST) + b2            # (B, 1)


if __name__ == "__main__":
    key = jax.random.PRNGKey(0)
    kx, ky, kp = jax.random.split(key, 3)
    B = 2
    x = jax.random.normal(kx, (B, WINDOW_SIZE), jnp.float32)
    y_hat = jax.random.normal(ky, (B, WINDOW_SIZE), jnp.float32)
    convs, fc1, fc2 = init_params(kp)

    y = s2pnet_forward(x, convs, fc1, fc2)           # eval-mode output (B, 1)
    y = jax.block_until_ready(y)

    y_ref = ref_forward(x, convs, fc1, fc2)
    assert y.shape == (B, 1)
    assert jnp.allclose(y, y_ref, rtol=2.5e-2, atol=2.5e-2), (y, y_ref)

    # Training-mode path: tiny scalar MSE reduction done as plain-JAX glue.
    # TODO(synk): the training-mode loss head stays outside the kernel.
    mid = WINDOW_SIZE // 2
    loss = jnp.mean((y - y_hat[:, mid:mid + 1]) ** 2)
    jax.block_until_ready(loss)

    print("KERNEL_OK")
</pallas_src>

<mosaic_0001>
module attributes {stable_mosaic.version = 11 : i64} {
  func.func @s2pnet_kernel(%arg0: i32, %arg1: memref<8x16xf32, #tpu.memory_space<vmem>>, %arg2: memref<16x480xbf16, #tpu.memory_space<vmem>>, %arg3: memref<1x480xf32, #tpu.memory_space<vmem>>, %arg4: memref<480x480xbf16, #tpu.memory_space<vmem>>, %arg5: memref<1x480xf32, #tpu.memory_space<vmem>>, %arg6: memref<480x640xbf16, #tpu.memory_space<vmem>>, %arg7: memref<1x640xf32, #tpu.memory_space<vmem>>, %arg8: memref<640x800xbf16, #tpu.memory_space<vmem>>, %arg9: memref<1x800xf32, #tpu.memory_space<vmem>>, %arg10: memref<800x800xbf16, #tpu.memory_space<vmem>>, %arg11: memref<1x800xf32, #tpu.memory_space<vmem>>, %arg12: memref<800x1024xbf16, #tpu.memory_space<vmem>>, %arg13: memref<1x1024xf32, #tpu.memory_space<vmem>>, %arg14: memref<1x1024xf32, #tpu.memory_space<vmem>>, %arg15: memref<1x1xf32, #tpu.memory_space<vmem>>, %arg16: memref<8x1xf32, #tpu.memory_space<vmem>>) attributes {dimension_semantics = [#tpu.dimension_semantics<parallel>], iteration_bounds = array<i64: 1>, scalar_prefetch = 0 : i64, scratch_operands = 0 : i64, tpu.core_type = #tpu.core_type<tc>, window_params = [{transform_indices = @transform_0, window_bounds = array<i64: 8, 16>}, {pipeline_mode = #tpu.pipeline_mode<synchronous>, transform_indices = @transform_1, window_bounds = array<i64: 16, 480>}, {pipeline_mode = #tpu.pipeline_mode<synchronous>, transform_indices = @transform_2, window_bounds = array<i64: 1, 480>}, {pipeline_mode = #tpu.pipeline_mode<synchronous>, transform_indices = @transform_3, window_bounds = array<i64: 480, 480>}, {pipeline_mode = #tpu.pipeline_mode<synchronous>, transform_indices = @transform_4, window_bounds = array<i64: 1, 480>}, {pipeline_mode = #tpu.pipeline_mode<synchronous>, transform_indices = @transform_5, window_bounds = array<i64: 480, 640>}, {pipeline_mode = #tpu.pipeline_mode<synchronous>, transform_indices = @transform_6, window_bounds = array<i64: 1, 640>}, {pipeline_mode = #tpu.pipeline_mode<synchronous>, transform_indices = @transform_7, window_bounds = array<i64: 640, 800>}, {pipeline_mode = #tpu.pipeline_mode<synchronous>, transform_indices = @transform_8, window_bounds = array<i64: 1, 800>}, {pipeline_mode = #tpu.pipeline_mode<synchronous>, transform_indices = @transform_9, window_bounds = array<i64: 800, 800>}, {pipeline_mode = #tpu.pipeline_mode<synchronous>, transform_indices = @transform_10, window_bounds = array<i64: 1, 800>}, {pipeline_mode = #tpu.pipeline_mode<synchronous>, transform_indices = @transform_11, window_bounds = array<i64: 800, 1024>}, {pipeline_mode = #tpu.pipeline_mode<synchronous>, transform_indices = @transform_12, window_bounds = array<i64: 1, 1024>}, {pipeline_mode = #tpu.pipeline_mode<synchronous>, transform_indices = @transform_13, window_bounds = array<i64: 1, 1024>}, {pipeline_mode = #tpu.pipeline_mode<synchronous>, transform_indices = @transform_14, window_bounds = array<i64: 1, 1>}, {transform_indices = @transform_15, window_bounds = array<i64: 8, 1>}]} {
    %c0 = arith.constant 0 : index
    %c0_0 = arith.constant 0 : index
    %0 = vector.load %arg1[%c0, %c0_0] : memref<8x16xf32, #tpu.memory_space<vmem>>, vector<8x16xf32>
    %1 = arith.truncf %0 : vector<8x16xf32> to vector<8x16xbf16>
    %c0_1 = arith.constant 0 : index
    %c0_2 = arith.constant 0 : index
    %2 = vector.load %arg2[%c0_1, %c0_2] : memref<16x480xbf16, #tpu.memory_space<vmem>>, vector<16x480xbf16>
    %cst = arith.constant dense<0.000000e+00> : vector<8x480xf32>
    %3 = tpu.matmul %1, %2, %cst {dimension_numbers = #tpu.dot_dimension_numbers<[1], [0], [0], [1], [0, 0, 1, 1], [], []>} : vector<8x16xbf16>, vector<16x480xbf16>, vector<8x480xf32> -> vector<8x480xf32>
    %c0_3 = arith.constant 0 : index
    %c0_4 = arith.constant 0 : index
    %4 = vector.load %arg3[%c0_3, %c0_4] : memref<1x480xf32, #tpu.memory_space<vmem>>, vector<1x480xf32>
    %5 = vector.broadcast %4 : vector<1x480xf32> to vector<8x480xf32>
    %6 = arith.addf %3, %5 : vector<8x480xf32>
    %cst_5 = arith.constant 0.000000e+00 : f32
    %7 = vector.broadcast %cst_5 : f32 to vector<8x480xf32>
    %8 = arith.maximumf %6, %7 : vector<8x480xf32>
    %9 = arith.truncf %8 : vector<8x480xf32> to vector<8x480xbf16>
    %c0_6 = arith.constant 0 : index
    %c0_7 = arith.constant 0 : index
    %10 = vector.load %arg4[%c0_6, %c0_7] : memref<480x480xbf16, #tpu.memory_space<vmem>>, vector<480x480xbf16>
    %cst_8 = arith.constant dense<0.000000e+00> : vector<8x480xf32>
    %11 = tpu.matmul %9, %10, %cst_8 {dimension_numbers = #tpu.dot_dimension_numbers<[1], [0], [0], [1], [0, 0, 1, 1], [], []>} : vector<8x480xbf16>, vector<480x480xbf16>, vector<8x480xf32> -> vector<8x480xf32>
    %c0_9 = arith.constant 0 : index
    %c0_10 = arith.constant 0 : index
    %12 = vector.load %arg5[%c0_9, %c0_10] : memref<1x480xf32, #tpu.memory_space<vmem>>, vector<1x480xf32>
    %13 = vector.broadcast %12 : vector<1x480xf32> to vector<8x480xf32>
    %14 = arith.addf %11, %13 : vector<8x480xf32>
    %cst_11 = arith.constant 0.000000e+00 : f32
    %15 = vector.broadcast %cst_11 : f32 to vector<8x480xf32>
    %16 = arith.maximumf %14, %15 : vector<8x480xf32>
    %17 = arith.truncf %16 : vector<8x480xf32> to vector<8x480xbf16>
    %c0_12 = arith.constant 0 : index
    %c0_13 = arith.constant 0 : index
    %18 = vector.load %arg6[%c0_12, %c0_13] : memref<480x640xbf16, #tpu.memory_space<vmem>>, vector<480x640xbf16>
    %cst_14 = arith.constant dense<0.000000e+00> : vector<8x640xf32>
    %19 = tpu.matmul %17, %18, %cst_14 {dimension_numbers = #tpu.dot_dimension_numbers<[1], [0], [0], [1], [0, 0, 1, 1], [], []>} : vector<8x480xbf16>, vector<480x640xbf16>, vector<8x640xf32> -> vector<8x640xf32>
    %c0_15 = arith.constant 0 : index
    %c0_16 = arith.constant 0 : index
    %20 = vector.load %arg7[%c0_15, %c0_16] : memref<1x640xf32, #tpu.memory_space<vmem>>, vector<1x640xf32>
    %21 = vector.broadcast %20 : vector<1x640xf32> to vector<8x640xf32>
    %22 = arith.addf %19, %21 : vector<8x640xf32>
    %cst_17 = arith.constant 0.000000e+00 : f32
    %23 = vector.broadcast %cst_17 : f32 to vector<8x640xf32>
    %24 = arith.maximumf %22, %23 : vector<8x640xf32>
    %25 = arith.truncf %24 : vector<8x640xf32> to vector<8x640xbf16>
    %c0_18 = arith.constant 0 : index
    %c0_19 = arith.constant 0 : index
    %26 = vector.load %arg8[%c0_18, %c0_19] : memref<640x800xbf16, #tpu.memory_space<vmem>>, vector<640x800xbf16>
    %cst_20 = arith.constant dense<0.000000e+00> : vector<8x800xf32>
    %27 = tpu.matmul %25, %26, %cst_20 {dimension_numbers = #tpu.dot_dimension_numbers<[1], [0], [0], [1], [0, 0, 1, 1], [], []>} : vector<8x640xbf16>, vector<640x800xbf16>, vector<8x800xf32> -> vector<8x800xf32>
    %c0_21 = arith.constant 0 : index
    %c0_22 = arith.constant 0 : index
    %28 = vector.load %arg9[%c0_21, %c0_22] : memref<1x800xf32, #tpu.memory_space<vmem>>, vector<1x800xf32>
    %29 = vector.broadcast %28 : vector<1x800xf32> to vector<8x800xf32>
    %30 = arith.addf %27, %29 : vector<8x800xf32>
    %cst_23 = arith.constant 0.000000e+00 : f32
    %31 = vector.broadcast %cst_23 : f32 to vector<8x800xf32>
    %32 = arith.maximumf %30, %31 : vector<8x800xf32>
    %33 = arith.truncf %32 : vector<8x800xf32> to vector<8x800xbf16>
    %c0_24 = arith.constant 0 : index
    %c0_25 = arith.constant 0 : index
    %34 = vector.load %arg10[%c0_24, %c0_25] : memref<800x800xbf16, #tpu.memory_space<vmem>>, vector<800x800xbf16>
    %cst_26 = arith.constant dense<0.000000e+00> : vector<8x800xf32>
    %35 = tpu.matmul %33, %34, %cst_26 {dimension_numbers = #tpu.dot_dimension_numbers<[1], [0], [0], [1], [0, 0, 1, 1], [], []>} : vector<8x800xbf16>, vector<800x800xbf16>, vector<8x800xf32> -> vector<8x800xf32>
    %c0_27 = arith.constant 0 : index
    %c0_28 = arith.constant 0 : index
    %36 = vector.load %arg11[%c0_27, %c0_28] : memref<1x800xf32, #tpu.memory_space<vmem>>, vector<1x800xf32>
    %37 = vector.broadcast %36 : vector<1x800xf32> to vector<8x800xf32>
    %38 = arith.addf %35, %37 : vector<8x800xf32>
    %cst_29 = arith.constant 0.000000e+00 : f32
    %39 = vector.broadcast %cst_29 : f32 to vector<8x800xf32>
    %40 = arith.maximumf %38, %39 : vector<8x800xf32>
    %41 = arith.truncf %40 : vector<8x800xf32> to vector<8x800xbf16>
    %c0_30 = arith.constant 0 : index
    %c0_31 = arith.constant 0 : index
    %42 = vector.load %arg12[%c0_30, %c0_31] : memref<800x1024xbf16, #tpu.memory_space<vmem>>, vector<800x1024xbf16>
    %cst_32 = arith.constant dense<0.000000e+00> : vector<8x1024xf32>
    %43 = tpu.matmul %41, %42, %cst_32 {dimension_numbers = #tpu.dot_dimension_numbers<[1], [0], [0], [1], [0, 0, 1, 1], [], []>} : vector<8x800xbf16>, vector<800x1024xbf16>, vector<8x1024xf32> -> vector<8x1024xf32>
    %c0_33 = arith.constant 0 : index
    %c0_34 = arith.constant 0 : index
    %44 = vector.load %arg13[%c0_33, %c0_34] : memref<1x1024xf32, #tpu.memory_space<vmem>>, vector<1x1024xf32>
    %45 = vector.broadcast %44 : vector<1x1024xf32> to vector<8x1024xf32>
    %46 = arith.addf %43, %45 : vector<8x1024xf32>
    %cst_35 = arith.constant 0.000000e+00 : f32
    %47 = vector.broadcast %cst_35 : f32 to vector<8x1024xf32>
    %48 = arith.maximumf %46, %47 : vector<8x1024xf32>
    %c0_36 = arith.constant 0 : index
    %c0_37 = arith.constant 0 : index
    %49 = vector.load %arg14[%c0_36, %c0_37] : memref<1x1024xf32, #tpu.memory_space<vmem>>, vector<1x1024xf32>
    %50 = vector.broadcast %49 : vector<1x1024xf32> to vector<8x1024xf32>
    %51 = arith.mulf %48, %50 : vector<8x1024xf32>
    %cst_38 = arith.constant dense<0.000000e+00> : vector<8xf32>
    %52 = vector.multi_reduction <add>, %51, %cst_38 [1] : vector<8x1024xf32> to vector<8xf32>
    %53 = vector.shape_cast %52 : vector<8xf32> to vector<8x1xf32>
    %c0_39 = arith.constant 0 : index
    %c0_40 = arith.constant 0 : index
    %54 = vector.load %arg15[%c0_39, %c0_40] : memref<1x1xf32, #tpu.memory_space<vmem>>, vector<1x1xf32>
    %55 = vector.broadcast %54 : vector<1x1xf32> to vector<8x1xf32>
    %56 = arith.addf %53, %55 : vector<8x1xf32>
    %c0_41 = arith.constant 0 : index
    %c0_42 = arith.constant 0 : index
    %57 = vector.load %arg16[%c0_41, %c0_42] : memref<8x1xf32, #tpu.memory_space<vmem>>, vector<8x1xf32>
    tpu.vector_store %arg16[%c0_41, %c0_42], %56 {strides = array<i32>} : memref<8x1xf32, #tpu.memory_space<vmem>>, vector<8x1xf32>,
    return
  }
  func.func @transform_0(%arg0: i32) -> (i32, i32) {
    %c0_i32 = arith.constant 0 : i32
    %c0_i32_0 = arith.constant 0 : i32
    return %arg0, %c0_i32 : i32, i32
  }
  func.func @transform_1(%arg0: i32) -> (i32, i32) {
    %c0_i32 = arith.constant 0 : i32
    %c0_i32_0 = arith.constant 0 : i32
    %c0_i32_1 = arith.constant 0 : i32
    return %c0_i32, %c0_i32_0 : i32, i32
  }
  func.func @transform_2(%arg0: i32) -> (i32, i32) {
    %c0_i32 = arith.constant 0 : i32
    %c0_i32_0 = arith.constant 0 : i32
    %c0_i32_1 = arith.constant 0 : i32
    return %c0_i32, %c0_i32_0 : i32, i32
  }
  func.func @transform_3(%arg0: i32) -> (i32, i32) {
    %c0_i32 = arith.constant 0 : i32
    %c0_i32_0 = arith.constant 0 : i32
    %c0_i32_1 = arith.constant 0 : i32
    return %c0_i32, %c0_i32_0 : i32, i32
  }
  func.func @transform_4(%arg0: i32) -> (i32, i32) {
    %c0_i32 = arith.constant 0 : i32
    %c0_i32_0 = arith.constant 0 : i32
    %c0_i32_1 = arith.constant 0 : i32
    return %c0_i32, %c0_i32_0 : i32, i32
  }
  func.func @transform_5(%arg0: i32) -> (i32, i32) {
    %c0_i32 = arith.constant 0 : i32
    %c0_i32_0 = arith.constant 0 : i32
    %c0_i32_1 = arith.constant 0 : i32
    return %c0_i32, %c0_i32_0 : i32, i32
  }
  func.func @transform_6(%arg0: i32) -> (i32, i32) {
    %c0_i32 = arith.constant 0 : i32
    %c0_i32_0 = arith.constant 0 : i32
    %c0_i32_1 = arith.constant 0 : i32
    return %c0_i32, %c0_i32_0 : i32, i32
  }
  func.func @transform_7(%arg0: i32) -> (i32, i32) {
    %c0_i32 = arith.constant 0 : i32
    %c0_i32_0 = arith.constant 0 : i32
    %c0_i32_1 = arith.constant 0 : i32
    return %c0_i32, %c0_i32_0 : i32, i32
  }
  func.func @transform_8(%arg0: i32) -> (i32, i32) {
    %c0_i32 = arith.constant 0 : i32
    %c0_i32_0 = arith.constant 0 : i32
    %c0_i32_1 = arith.constant 0 : i32
    return %c0_i32, %c0_i32_0 : i32, i32
  }
  func.func @transform_9(%arg0: i32) -> (i32, i32) {
    %c0_i32 = arith.constant 0 : i32
    %c0_i32_0 = arith.constant 0 : i32
    %c0_i32_1 = arith.constant 0 : i32
    return %c0_i32, %c0_i32_0 : i32, i32
  }
  func.func @transform_10(%arg0: i32) -> (i32, i32) {
    %c0_i32 = arith.constant 0 : i32
    %c0_i32_0 = arith.constant 0 : i32
    %c0_i32_1 = arith.constant 0 : i32
    return %c0_i32, %c0_i32_0 : i32, i32
  }
  func.func @transform_11(%arg0: i32) -> (i32, i32) {
    %c0_i32 = arith.constant 0 : i32
    %c0_i32_0 = arith.constant 0 : i32
    %c0_i32_1 = arith.constant 0 : i32
    return %c0_i32, %c0_i32_0 : i32, i32
  }
  func.func @transform_12(%arg0: i32) -> (i32, i32) {
    %c0_i32 = arith.constant 0 : i32
    %c0_i32_0 = arith.constant 0 : i32
    %c0_i32_1 = arith.constant 0 : i32
    return %c0_i32, %c0_i32_0 : i32, i32
  }
  func.func @transform_13(%arg0: i32) -> (i32, i32) {
    %c0_i32 = arith.constant 0 : i32
    %c0_i32_0 = arith.constant 0 : i32
    %c0_i32_1 = arith.constant 0 : i32
    return %c0_i32, %c0_i32_0 : i32, i32
  }
  func.func @transform_14(%arg0: i32) -> (i32, i32) {
    %c0_i32 = arith.constant 0 : i32
    %c0_i32_0 = arith.constant 0 : i32
    %c0_i32_1 = arith.constant 0 : i32
    return %c0_i32, %c0_i32_0 : i32, i32
  }
  func.func @transform_15(%arg0: i32) -> (i32, i32) {
    %c0_i32 = arith.constant 0 : i32
    %c0_i32_0 = arith.constant 0 : i32
    return %arg0, %c0_i32 : i32, i32
  }
}

</mosaic_0001>

<bundles_post_ra>
// kernel: tpu_custom_call.1
= control target key start
LH: loop header
LB: loop body
LE: loop exit
PB: predicated region body
PF: predicated region fallthrough
CT: control target
= control target key end

     0   :  { %s16603_s0 = inlined_call_operand.vmem [shape: f32[8,16], index: 0, kind: input, shape index: {}]   ;;  %s16604_s1 = inlined_call_operand.vmem [shape: bf16[16,480], index: 1, kind: input, shape index: {}]   ;;  %s16605_s2 = inlined_call_operand.vmem [shape: f32[1,480], index: 2, kind: input, shape index: {}]   ;;  %s16606_s3 = inlined_call_operand.vmem [shape: bf16[480,480], index: 3, kind: input, shape index: {}]   ;;  %s16607_s4 = inlined_call_operand.vmem [shape: f32[1,480], index: 4, kind: input, shape index: {}]   ;;  %s16608_s5 = inlined_call_operand.hbm [shape: bf16[480,640], index: 5, kind: input, shape index: {}]   ;;  %s16609_s6 = inlined_call_operand.vmem [shape: f32[1,640], index: 6, kind: input, shape index: {}]   ;;  %s16610_s7 = inlined_call_operand.vmem [shape: bf16[640,800], index: 7, kind: input, shape index: {}]   ;;  %s16611_s8 = inlined_call_operand.vmem [shape: f32[1,800], index: 8, kind: input, shape index: {}]   ;;  %s16612_s9 = inlined_call_operand.hbm [shape: bf16[800,800], index: 9, kind: input, shape index: {}]   ;;  %s16613_s10 = inlined_call_operand.vmem [shape: f32[1,800], index: 10, kind: input, shape index: {}]   ;;  %s16614_s11 = inlined_call_operand.vmem [shape: bf16[800,1024], index: 11, kind: input, shape index: {}]   ;;  %s16615_s12 = inlined_call_operand.vmem [shape: f32[1,1024], index: 12, kind: input, shape index: {}]   ;;  %s16616_s13 = inlined_call_operand.vmem [shape: f32[1,1024], index: 13, kind: input, shape index: {}]   ;;  %s16617_s14 = inlined_call_operand.<no memory space> [shape: f32[1,1], index: 14, kind: input, shape index: {}]   ;;  %s16618_s15 = inlined_call_operand.vmem [shape: f32[8,1], index: 15, kind: output, shape index: {}]  }
   0x1   :  { %v20_v0 = vstv %s16617_s14 }
   0x2   :  { %21 = vst [vmem:[#allocation2] sm:$0x1] %v20_v0 }
   0x3   :  { %22 = vsyncpa [#allocation4], 0 }
   0x4   :  { %23 = vsyncpa [#allocation6], 0  ;;  %s13619_s20 = smov [#allocation3]  }
   0x5   :  { %s39_s21 = sshll.u32 %s13619_s20, 4  ;;  %s40_s21 = int_to_ptr.vmem [resolvable:$true] %s39_s21 }
   0x6   :  { %s13583_s22 = scalar_lea.vmem %s40_s21, 19200  ;;  %p13588_p1 = scmp.lt.s32.totalorder %s40_s21, %s40_s21 }
   0x7   :  { %p13584_p0 = scmp.ne.s32.totalorder %s40_s21, %s13583_s22  ;;  %p13589_p2 = scmp.lt.s32.totalorder %s13583_s22, %s13583_s22 }
   0x9   :  { %p13590_p3 = por %p13589_p2, %p13588_p1 }
   0xb   :  { %p13591_p4 = pnand %p13590_p3, %p13584_p0 }
   0xd   :  { %13594 = shalt.err (!%p13591_p4)
}
   0xe   :  { %s13620_s23 = smov 320   ;;  %s13621_s24 = smov 20  }
   0xf   :  { %45 = dma.hbm_to_vmem [thread:$0]  %s16608_s5, 19200, %s40_s21, [#allocation4], %s13620_s23, %s13620_s23, %s13621_s24  }
  0x10   :  { %s13622_s14 = smov [#allocation5]  }
  0x11   :  { %s57_s27 = sshll.u32 %s13622_s14, 4  ;;  %s58_s27 = int_to_ptr.vmem [resolvable:$true] %s57_s27 }
  0x12   :  { %s13603_s28 = scalar_lea.vmem %s58_s27, 44800  ;;  %p13608_p6 = scmp.lt.s32.totalorder %s58_s27, %s58_s27 }
  0x13   :  { %p13604_p5 = scmp.ne.s32.totalorder %s58_s27, %s13603_s28  ;;  %p13609_p7 = scmp.lt.s32.totalorder %s13603_s28, %s13603_s28 }
  0x15   :  { %p13610_p8 = por %p13609_p7, %p13608_p6 }
  0x17   :  { %p13611_p9 = pnand %p13610_p8, %p13604_p5 }
  0x19   :  { %13614 = shalt.err (!%p13611_p9)
}
  0x1a   :  { %s13623_s29 = smov 448   ;;  %s13624_s30 = smov 28  }
  0x1b   :  { %63 = dma.hbm_to_vmem [thread:$0]  %s16612_s9, 44800, %s58_s27, [#allocation6], %s13623_s29, %s13623_s29, %s13624_s30  }
  0x1c   :  { %13615 = dma.done.wait [#allocation4], 19200  }
  0x1d   :  { %13616 = vsyncadd [#allocation4], 4294948096 }
  0x1e   :  { %13617 = dma.done.wait [#allocation6], 44800  }
  0x1f   :  { %13618 = vsyncadd [#allocation6], 4294922496  ;;  %v13625_v1 = vmov 0   ;;  %v12277_v2 = vld [vmem:[%s16604_s1 + $0x4] ss:$16 sps:$4 sm:$0xff]   ;;  %vm129_vm0 = vcmask 130048  }
  0x20   :  { %165 = vmatprep.mubr.bf16.mxu0 %v13625_v1  ;;  %206 = vmatprep.mubr.bf16.mxu1 %v13625_v1  ;;  %v12279_v3 = vld [vmem:[%s16604_s1 + $0xc] ss:$16 sps:$4 sm:$0xff]   ;;  %v12281_v4 = vld [vmem:[%s16604_s1] ss:$16 sps:$4 sm:$0xff]   ;;  %v12282_v5 = vld [vmem:[%s16604_s1 + $0x8] ss:$16 sps:$4 sm:$0xff]  }
  0x21   :  { %147 = vmatprep.subr.bf16.mxu0 %v12277_v2  ;;  %v81_v6 = vld [vmem:[%s16603_s0] sm:$0xff]  ;;  %188 = vmatprep.subr.bf16.mxu1 %v12279_v3  ;;  %vm965_vm1 = vcmask 785408   ;;  %vm13627_vm2 = vmmov 0   ;;  %vm6922_vm3 = vcmask 261120   ;;  %vm10768_vm4 = vcmask 7168  }
  0x22   :  { %v82_v7 = vpack.c.bf16 %v81_v6, %v81_v6  ;;  %v12283_v8 = vld [vmem:[%s16606_s3 + $0xe0] ss:$16 sps:$4 sm:$0xff]   ;;  %148 = vmatpush1.bf16.msra.mxu0 %v12281_v4  ;;  %189 = vmatpush1.bf16.msra.mxu1 %v12282_v5  ;;  %v12285_v9 = vld [vmem:[%s16606_s3 + $0xe4] ss:$16 sps:$4 sm:$0xff]   ;;  %v12375_v5 = vld [vmem:[%s16606_s3 + $0xec] ss:$16 sps:$4 sm:$0xff]  }
  0x23   :  { %v12288_v10 = vld [vmem:[%s16606_s3 + $0xc4] ss:$16 sps:$4 sm:$0xff]   ;;  %969 = vmatprep.subr.bf16.mxu0 %v12285_v9  ;;  %v12286_v11 = vld [vmem:[%s16606_s3 + $0xc0] ss:$16 sps:$4 sm:$0xff]   ;;  %v12378_v6 = vld [vmem:[%s16606_s3 + $0x2ec] ss:$16 sps:$4 sm:$0xff]  }
  0x24   :  { %v12292_v12 = vld [vmem:[%s16606_s3 + $0x2e0] ss:$16 sps:$4 sm:$0xff]   ;;  %v12294_v13 = vld [vmem:[%s16606_s3 + $0x2e4] ss:$16 sps:$4 sm:$0xff]  }
  0x25   :  { %10780 = vmatmul.mubr.msk.bf16.vlgmr.msra.gmra.mxu0 %vm129_vm0, %v82_v7  ;;  %10781 = vmatmul.mubr.msk.bf16.vlgmr.msra.gmra.mxu1 %vm129_vm0, %v82_v7  ;;  %v12291_v14 = vld [vmem:[%s16606_s3 + $0xa4] ss:$16 sps:$4 sm:$0xff]   ;;  %v12298_v16 = vld [vmem:[%s16606_s3 + $0x2c0] ss:$16 sps:$4 sm:$0xff]   ;;  %v89_v7 = vlaneseq }
  0x26   :  { %970 = vmatpush1.bf16.msra.mxu0 %v12283_v8  ;;  %1010 = vmatprep.subr.bf16.mxu1 %v12294_v13  ;;  %v12300_v15 = vld [vmem:[%s16606_s3 + $0x2c4] ss:$16 sps:$4 sm:$0xff]   ;;  %v12289_v17 = vld [vmem:[%s16606_s3 + $0xa0] ss:$16 sps:$4 sm:$0xff]  }
  0x27   :  { %971 = vmatprep.subr.bf16.mxu0 %v12288_v10  ;;  %1011 = vmatpush1.bf16.msra.mxu1 %v12292_v12  ;;  %v12297_v18 = vld [vmem:[%s16606_s3 + $0x84] ss:$16 sps:$4 sm:$0xff]   ;;  %v12295_v20 = vld [vmem:[%s16606_s3 + $0x80] ss:$16 sps:$4 sm:$0xff]   ;;  %v13920_v8 = vshrl.u32 %v89_v7, 7 }
  0x28   :  { %1012 = vmatprep.subr.bf16.mxu1 %v12300_v15  ;;  %v12306_v19 = vld [vmem:[%s16606_s3 + $0x2a4] ss:$16 sps:$4 sm:$0xff]   ;;  %v12304_v21 = vld [vmem:[%s16606_s3 + $0x2a0] ss:$16 sps:$4 sm:$0xff]   ;;  %v12421_v7 = vld [vmem:[%s16606_s3 + $0x1e8] ss:$16 sps:$4 sm:$0xff]  }
  0x29   :  { %v12312_v22 = vld [vmem:[%s16606_s3 + $0x284] ss:$16 sps:$4 sm:$0xff]   ;;  %v12301_v24 = vld [vmem:[%s16606_s3 + $0x60] ss:$16 sps:$4 sm:$0xff]   ;;  %v13926_v10 = vsub.s32 0, %v13920_v8  ;;  %v13932_v12 = vsub.s32 1, %v13920_v8 }
  0x2a   :  { %972 = vmatpush1.bf16.msra.mxu0 %v12286_v11  ;;  %v12303_v23 = vld [vmem:[%s16606_s3 + $0x64] ss:$16 sps:$4 sm:$0xff]   ;;  %v12310_v25 = vld [vmem:[%s16606_s3 + $0x280] ss:$16 sps:$4 sm:$0xff]   ;;  %v13929_v11 = vsub.s32 2, %v13920_v8  ;;  %v13935_v13 = vsub.s32 3, %v13920_v8 }
  0x2b   :  { %973 = vmatprep.subr.bf16.mxu0 %v12291_v14  ;;  %1013 = vmatpush1.bf16.msra.mxu1 %v12298_v16  ;;  %v12318_v26 = vld [vmem:[%s16606_s3 + $0x264] ss:$16 sps:$4 sm:$0xff]   ;;  %v12307_v28 = vld [vmem:[%s16606_s3 + $0x40] ss:$16 sps:$4 sm:$0xff]  }
  0x2c   :  { %1014 = vmatprep.subr.bf16.mxu1 %v12306_v19  ;;  %v12309_v27 = vld [vmem:[%s16606_s3 + $0x44] ss:$16 sps:$4 sm:$0xff]   ;;  %v12316_v29 = vld [vmem:[%s16606_s3 + $0x260] ss:$16 sps:$4 sm:$0xff]  }
  0x2d   :  { %v12324_v30 = vld [vmem:[%s16606_s3 + $0x244] ss:$16 sps:$4 sm:$0xff]   ;;  %v12313_v32 = vld [vmem:[%s16606_s3 + $0x20] ss:$16 sps:$4 sm:$0xff]  }
  0x2e   :  { %974 = vmatpush1.bf16.msra.mxu0 %v12289_v17  ;;  %v12315_v31 = vld [vmem:[%s16606_s3 + $0x24] ss:$16 sps:$4 sm:$0xff]   ;;  %v12322_v33 = vld [vmem:[%s16606_s3 + $0x240] ss:$16 sps:$4 sm:$0xff]  }
  0x2f   :  { %975 = vmatprep.subr.bf16.mxu0 %v12297_v18  ;;  %1015 = vmatpush1.bf16.msra.mxu1 %v12304_v21  ;;  %v12330_v34 = vld [vmem:[%s16606_s3 + $0x224] ss:$16 sps:$4 sm:$0xff]   ;;  %v12319_v36 = vld [vmem:[%s16606_s3] ss:$16 sps:$4 sm:$0xff]  }
  0x30   :  { %1016 = vmatprep.subr.bf16.mxu1 %v12312_v22  ;;  %v12321_v35 = vld [vmem:[%s16606_s3 + $0x4] ss:$16 sps:$4 sm:$0xff]   ;;  %v12328_v37 = vld [vmem:[%s16606_s3 + $0x220] ss:$16 sps:$4 sm:$0xff]  }
  0x31   :  { %v12336_v38 = vld [vmem:[%s16606_s3 + $0x204] ss:$16 sps:$4 sm:$0xff]   ;;  %v12325_v40 = vld [vmem:[%s16606_s3 + $0x1e0] ss:$16 sps:$4 sm:$0xff]  }
  0x32   :  { %976 = vmatpush1.bf16.msra.mxu0 %v12295_v20  ;;  %v12327_v39 = vld [vmem:[%s16606_s3 + $0x1e4] ss:$16 sps:$4 sm:$0xff]   ;;  %v12334_v41 = vld [vmem:[%s16606_s3 + $0x200] ss:$16 sps:$4 sm:$0xff]  }
  0x33   :  { %977 = vmatprep.subr.bf16.mxu0 %v12303_v23  ;;  %1017 = vmatpush1.bf16.msra.mxu1 %v12310_v25  ;;  %v12342_v42 = vld [vmem:[%s16606_s3 + $0x3a4] ss:$16 sps:$4 sm:$0xff]   ;;  %v12340_v44 = vld [vmem:[%s16606_s3 + $0x3a0] ss:$16 sps:$4 sm:$0xff]  }
  0x34   :  { %1018 = vmatprep.subr.bf16.mxu1 %v12318_v26  ;;  %v12333_v43 = vld [vmem:[%s16606_s3 + $0x1c4] ss:$16 sps:$4 sm:$0xff]   ;;  %v12331_v45 = vld [vmem:[%s16606_s3 + $0x1c0] ss:$16 sps:$4 sm:$0xff]  }
  0x35   :  { %v12348_v46 = vld [vmem:[%s16606_s3 + $0x384] ss:$16 sps:$4 sm:$0xff]   ;;  %v12346_v48 = vld [vmem:[%s16606_s3 + $0x380] ss:$16 sps:$4 sm:$0xff]  }
  0x36   :  { %978 = vmatpush1.bf16.msra.mxu0 %v12301_v24  ;;  %v12339_v47 = vld [vmem:[%s16606_s3 + $0x1a4] ss:$16 sps:$4 sm:$0xff]   ;;  %v12337_v49 = vld [vmem:[%s16606_s3 + $0x1a0] ss:$16 sps:$4 sm:$0xff]  }
  0x37   :  { %979 = vmatprep.subr.bf16.mxu0 %v12309_v27  ;;  %1019 = vmatpush1.bf16.msra.mxu1 %v12316_v29  ;;  %v12354_v50 = vld [vmem:[%s16606_s3 + $0x364] ss:$16 sps:$4 sm:$0xff]   ;;  %v12352_v52 = vld [vmem:[%s16606_s3 + $0x360] ss:$16 sps:$4 sm:$0xff]  }
  0x38   :  { %1020 = vmatprep.subr.bf16.mxu1 %v12324_v30  ;;  %v12345_v51 = vld [vmem:[%s16606_s3 + $0x184] ss:$16 sps:$4 sm:$0xff]   ;;  %v12343_v53 = vld [vmem:[%s16606_s3 + $0x180] ss:$16 sps:$4 sm:$0xff]  }
  0x39   :  { %v12360_v54 = vld [vmem:[%s16606_s3 + $0x344] ss:$16 sps:$4 sm:$0xff]   ;;  %v12358_v56 = vld [vmem:[%s16606_s3 + $0x340] ss:$16 sps:$4 sm:$0xff]  }
  0x3a   :  { %980 = vmatpush1.bf16.msra.mxu0 %v12307_v28  ;;  %v12351_v55 = vld [vmem:[%s16606_s3 + $0x164] ss:$16 sps:$4 sm:$0xff]   ;;  %v12349_v57 = vld [vmem:[%s16606_s3 + $0x160] ss:$16 sps:$4 sm:$0xff]  }
  0x3b   :  { %981 = vmatprep.subr.bf16.mxu0 %v12315_v31  ;;  %1021 = vmatpush1.bf16.msra.mxu1 %v12322_v33  ;;  %v12357_v58 = vld [vmem:[%s16606_s3 + $0x144] ss:$16 sps:$4 sm:$0xff]   ;;  %v12355_v59 = vld [vmem:[%s16606_s3 + $0x140] ss:$16 sps:$4 sm:$0xff]   ;;  %v12376_v33 = vld [vmem:[%s16606_s3 + $0x2e8] ss:$16 sps:$4 sm:$0xff]  }
  0x3c   :  { %1022 = vmatprep.subr.bf16.mxu1 %v12330_v34  ;;  %v12363_v60 = vld [vmem:[%s16606_s3 + $0x124] ss:$16 sps:$4 sm:$0xff]   ;;  %v12361_v62 = vld [vmem:[%s16606_s3 + $0x120] ss:$16 sps:$4 sm:$0xff]  }
  0x3d   :  { %v12366_v61 = vld [vmem:[%s16606_s3 + $0x324] ss:$16 sps:$4 sm:$0xff]   ;;  %v12364_v63 = vld [vmem:[%s16606_s3 + $0x320] ss:$16 sps:$4 sm:$0xff]  }
  0x3e   :  { %982 = vmatpush1.bf16.msra.mxu0 %v12313_v32  ;;  %v12369_v0 = vld [vmem:[%s16606_s3 + $0x104] ss:$16 sps:$4 sm:$0xff]   ;;  %v12367_v3 = vld [vmem:[%s16606_s3 + $0x100] ss:$16 sps:$4 sm:$0xff]   ;;  %v12373_v32 = vld [vmem:[%s16606_s3 + $0xe8] ss:$16 sps:$4 sm:$0xff]  }
  0x3f   :  { %983 = vmatprep.subr.bf16.mxu0 %v12321_v35  ;;  %1023 = vmatpush1.bf16.msra.mxu1 %v12328_v37  ;;  %v12372_v2 = vld [vmem:[%s16606_s3 + $0x304] ss:$16 sps:$4 sm:$0xff]   ;;  %v12370_v4 = vld [vmem:[%s16606_s3 + $0x300] ss:$16 sps:$4 sm:$0xff]   ;;  %v12381_v37 = vld [vmem:[%s16606_s3 + $0xcc] ss:$16 sps:$4 sm:$0xff]  }
  0x40   :  { %1024 = vmatprep.subr.bf16.mxu1 %v12336_v38  ;;  %v87_v9 = vld [vmem:[%s16605_s2] sm:$0xf] }
  0x41   :  { %v92_v14 = vrot.slane %v87_v9, %v13926_v10  ;;  %v100_v15 = vrot.slane %v87_v9, %v13929_v11  ;;  %v96_v16 = vrot.slane %v87_v9, %v13932_v12  ;;  %v104_v17 = vrot.slane %v87_v9, %v13935_v13  ;;  %v12424_v9 = vld [vmem:[%s16606_s3 + $0x3a8] ss:$16 sps:$4 sm:$0xff]  }
  0x42   :  { %984 = vmatpush1.bf16.msra.mxu0 %v12319_v36 }
  0x43   :  { %985 = vmatprep.subr.bf16.mxu0 %v12327_v39  ;;  %1025 = vmatpush1.bf16.msra.mxu1 %v12334_v41 }
  0x44   :  { %1030 = vmatprep.subr.bf16.mxu1 %v12342_v42  ;;  %v12379_v42 = vld [vmem:[%s16606_s3 + $0xc8] ss:$16 sps:$4 sm:$0xff]  }
  0x46   :  { %986 = vmatpush2.bf16.msra.mxu0 %v12325_v40  ;;  %v12384_v40 = vld [vmem:[%s16606_s3 + $0x2cc] ss:$16 sps:$4 sm:$0xff]  }
  0x47   :  { %987 = vmatprep.subr.bf16.mxu0 %v12333_v43  ;;  %1031 = vmatpush2.bf16.msra.mxu1 %v12340_v44  ;;  %v12382_v43 = vld [vmem:[%s16606_s3 + $0x2c8] ss:$16 sps:$4 sm:$0xff]   ;;  %v12387_v44 = vld [vmem:[%s16606_s3 + $0xac] ss:$16 sps:$4 sm:$0xff]  }
  0x48   :  { %1032 = vmatprep.subr.bf16.mxu1 %v12348_v46  ;;  %v12385_v46 = vld [vmem:[%s16606_s3 + $0xa8] ss:$16 sps:$4 sm:$0xff]  }
  0x4a   :  { %988 = vmatpush2.bf16.msra.mxu0 %v12331_v45  ;;  %v12390_v45 = vld [vmem:[%s16606_s3 + $0x2ac] ss:$16 sps:$4 sm:$0xff]  }
  0x4b   :  { %989 = vmatprep.subr.bf16.mxu0 %v12339_v47  ;;  %1033 = vmatpush2.bf16.msra.mxu1 %v12346_v48  ;;  %v12388_v47 = vld [vmem:[%s16606_s3 + $0x2a8] ss:$16 sps:$4 sm:$0xff]   ;;  %v12393_v48 = vld [vmem:[%s16606_s3 + $0x8c] ss:$16 sps:$4 sm:$0xff]  }
  0x4c   :  { %1034 = vmatprep.subr.bf16.mxu1 %v12354_v50  ;;  %v12391_v50 = vld [vmem:[%s16606_s3 + $0x88] ss:$16 sps:$4 sm:$0xff]  }
  0x4e   :  { %990 = vmatpush2.bf16.msra.mxu0 %v12337_v49  ;;  %v12396_v49 = vld [vmem:[%s16606_s3 + $0x28c] ss:$16 sps:$4 sm:$0xff]  }
  0x4f   :  { %991 = vmatprep.subr.bf16.mxu0 %v12345_v51  ;;  %1035 = vmatpush2.bf16.msra.mxu1 %v12352_v52  ;;  %v12394_v51 = vld [vmem:[%s16606_s3 + $0x288] ss:$16 sps:$4 sm:$0xff]   ;;  %v12399_v52 = vld [vmem:[%s16606_s3 + $0x6c] ss:$16 sps:$4 sm:$0xff]  }
  0x50   :  { %1036 = vmatprep.subr.bf16.mxu1 %v12360_v54  ;;  %v12397_v54 = vld [vmem:[%s16606_s3 + $0x68] ss:$16 sps:$4 sm:$0xff]  }
  0x52   :  { %992 = vmatpush2.bf16.msra.mxu0 %v12343_v53  ;;  %v12402_v53 = vld [vmem:[%s16606_s3 + $0x26c] ss:$16 sps:$4 sm:$0xff]  }
  0x53   :  { %993 = vmatprep.subr.bf16.mxu0 %v12351_v55  ;;  %1037 = vmatpush2.bf16.msra.mxu1 %v12358_v56  ;;  %v12400_v55 = vld [vmem:[%s16606_s3 + $0x268] ss:$16 sps:$4 sm:$0xff]   ;;  %v12405_v56 = vld [vmem:[%s16606_s3 + $0x4c] ss:$16 sps:$4 sm:$0xff]  }
  0x54   :  { %1038 = vmatprep.subr.bf16.mxu1 %v12366_v61  ;;  %v12414_v61 = vld [vmem:[%s16606_s3 + $0x22c] ss:$16 sps:$4 sm:$0xff]  }
  0x56   :  { %994 = vmatpush2.bf16.msra.mxu0 %v12349_v57  ;;  %v12408_v57 = vld [vmem:[%s16606_s3 + $0x24c] ss:$16 sps:$4 sm:$0xff]  }
  0x57   :  { %995 = vmatprep.subr.bf16.mxu0 %v12357_v58  ;;  %1039 = vmatpush2.bf16.msra.mxu1 %v12364_v63  ;;  %v12403_v58 = vld [vmem:[%s16606_s3 + $0x48] ss:$16 sps:$4 sm:$0xff]  }
  0x58   :  { %1040 = vmatprep.subr.bf16.mxu1 %v12372_v2  ;;  %v12412_v63 = vld [vmem:[%s16606_s3 + $0x228] ss:$16 sps:$4 sm:$0xff]   ;;  %v12420_v2 = vld [vmem:[%s16606_s3 + $0x20c] ss:$16 sps:$4 sm:$0xff]  }
  0x5a   :  { %996 = vmatpush2.bf16.msra.mxu0 %v12355_v59  ;;  %v12406_v59 = vld [vmem:[%s16606_s3 + $0x248] ss:$16 sps:$4 sm:$0xff]  }
  0x5b   :  { %997 = vmatprep.subr.bf16.mxu0 %v12363_v60  ;;  %1041 = vmatpush2.bf16.msra.mxu1 %v12370_v4  ;;  %v12411_v60 = vld [vmem:[%s16606_s3 + $0x2c] ss:$16 sps:$4 sm:$0xff]   ;;  %v12418_v4 = vld [vmem:[%s16606_s3 + $0x208] ss:$16 sps:$4 sm:$0xff]  }
  0x5c   :  { %1051 = vmatprep.subr.bf16.mxu1 %v12375_v5  ;;  %v12423_v5 = vld [vmem:[%s16606_s3 + $0x1ec] ss:$16 sps:$4 sm:$0xff]  }
  0x5e   :  { %998 = vmatpush2.bf16.msra.mxu0 %v12361_v62  ;;  %v12409_v62 = vld [vmem:[%s16606_s3 + $0x28] ss:$16 sps:$4 sm:$0xff]  }
  0x5f   :  { %999 = vmatprep.subr.bf16.mxu0 %v12369_v0  ;;  %v12417_v0 = vld [vmem:[%s16606_s3 + $0xc] ss:$16 sps:$4 sm:$0xff]  }
  0x62   :  { %1000 = vmatpush2.bf16.msra.mxu0 %v12367_v3  ;;  %v12415_v3 = vld [vmem:[%s16606_s3 + $0x8] ss:$16 sps:$4 sm:$0xff]  }
  0x63   :  { %1092 = vmatprep.subr.bf16.mxu0 %v12378_v6  ;;  %v12426_v6 = vld [vmem:[%s16606_s3 + $0x3ac] ss:$16 sps:$4 sm:$0xff]  }
  0xe5   :  { %v167_v18 = vpop.f32.mrf.mxu0  ;;  %v208_v19 = vpop.f32.mrf.mxu1 }
  0xe6   :  { %v168_v20 = vadd.f32 %v167_v18, %v92_v14  ;;  %v209_v21 = vadd.f32 %v208_v19, %v100_v15  ;;  %v12429_v14 = vld [vmem:[%s16606_s3 + $0x1cc] ss:$16 sps:$4 sm:$0xff]  }
  0xe7   :  { %v169_v22 = vpop.f32.mrf.mxu0  ;;  %v210_v23 = vpop.f32.mrf.mxu1  ;;  %v12432_v15 = vld [vmem:[%s16606_s3 + $0x38c] ss:$16 sps:$4 sm:$0xff]  }
  0xe8   :  { %v215_v24 = vmax.f32 %v168_v20, 0.0  ;;  %v170_v25 = vadd.f32 %v169_v22, %v96_v16  ;;  %v211_v26 = vadd.f32 %v210_v23, %v104_v17  ;;  %v217_v27 = vmax.f32 %v209_v21, 0.0  ;;  %v12427_v16 = vld [vmem:[%s16606_s3 + $0x1c8] ss:$16 sps:$4 sm:$0xff]   ;;  %v12435_v18 = vld [vmem:[%s16606_s3 + $0x1ac] ss:$16 sps:$4 sm:$0xff]  }
  0xe9   :  { %v212_v28 = vpop.f32.mrf.mxu1  ;;  %v171_v29 = vpop.f32.mrf.mxu0  ;;  %v12430_v17 = vld [vmem:[%s16606_s3 + $0x388] ss:$16 sps:$4 sm:$0xff]   ;;  %v12438_v19 = vld [vmem:[%s16606_s3 + $0x36c] ss:$16 sps:$4 sm:$0xff]  }
  0xea   :  { %v216_v30 = vmax.f32 %v170_v25, 0.0  ;;  %v218_v31 = vmax.f32 %v211_v26, 0.0  ;;  %v13947_v34 = vpack.c.bf16 %v215_v24, %v215_v24  ;;  %v13955_v41 = vpack.c.bf16 %v217_v27, %v217_v27  ;;  %v12433_v20 = vld [vmem:[%s16606_s3 + $0x1a8] ss:$16 sps:$4 sm:$0xff]   ;;  %v12441_v22 = vld [vmem:[%s16606_s3 + $0x18c] ss:$16 sps:$4 sm:$0xff]  }
  0xeb   :  { %v213_v35 = vpop.f32.mrf.mxu1  ;;  %v172_v36 = vpop.f32.mrf.mxu0  ;;  %v12436_v21 = vld [vmem:[%s16606_s3 + $0x368] ss:$16 sps:$4 sm:$0xff]   ;;  %v12444_v23 = vld [vmem:[%s16606_s3 + $0x34c] ss:$16 sps:$4 sm:$0xff]  }
  0xec   :  { %v220_v38 = vpack.c.bf16 %v216_v30, %v216_v30  ;;  %v222_v39 = vpack.c.bf16 %v218_v31, %v218_v31  ;;  %v12439_v24 = vld [vmem:[%s16606_s3 + $0x188] ss:$16 sps:$4 sm:$0xff]   ;;  %v12447_v26 = vld [vmem:[%s16606_s3 + $0x16c] ss:$16 sps:$4 sm:$0xff]  }
  0xed   :  { %v12442_v25 = vld [vmem:[%s16606_s3 + $0x348] ss:$16 sps:$4 sm:$0xff]   ;;  %v12450_v27 = vld [vmem:[%s16606_s3 + $0x32c] ss:$16 sps:$4 sm:$0xff]  }
  0xee   :  { %1001 = vmatprep.mubr.bf16.mxu0 %v220_v38  ;;  %10902 = vmatprep.mubr.msk.bf16.mxu1 %vm965_vm1, %v222_v39  ;;  %v12445_v28 = vld [vmem:[%s16606_s3 + $0x168] ss:$16 sps:$4 sm:$0xff]   ;;  %v12453_v30 = vld [vmem:[%s16606_s3 + $0x14c] ss:$16 sps:$4 sm:$0xff]  }
  0xef   :  { %1002 = vmatmul.mubr.bf16.vlgmr.msra.gmra.mxu0 %v13947_v34  ;;  %1043 = vmatmul.mubr.bf16.vlgmr.msra.gmra.mxu1 %v13955_v41  ;;  %v12448_v29 = vld [vmem:[%s16606_s3 + $0x328] ss:$16 sps:$4 sm:$0xff]   ;;  %v12456_v31 = vld [vmem:[%s16606_s3 + $0x30c] ss:$16 sps:$4 sm:$0xff]  }
  0xf0   :  { %1052 = vmatpush1.bf16.msra.mxu1 %v12373_v32  ;;  %1093 = vmatpush1.bf16.msra.mxu0 %v12376_v33  ;;  %v12451_v32 = vld [vmem:[%s16606_s3 + $0x148] ss:$16 sps:$4 sm:$0xff]   ;;  %v12459_v35 = vld [vmem:[%s16606_s3 + $0x12c] ss:$16 sps:$4 sm:$0xff]  }
  0xf1   :  { %10903 = vmatprep.mubr.msk.bf16.mxu0 %vm965_vm1, %v222_v39  ;;  %1053 = vmatprep.subr.bf16.mxu1 %v12381_v37  ;;  %v12454_v33 = vld [vmem:[%s16606_s3 + $0x308] ss:$16 sps:$4 sm:$0xff]   ;;  %v12465_v36 = vld [vmem:[#allocation3 + $0x11c] ss:$20 sps:$4 sm:$0xff]  }
  0xf2   :  { %1094 = vmatprep.subr.bf16.mxu0 %v12384_v40  ;;  %1083 = vmatprep.mubr.bf16.mxu1 %v220_v38  ;;  %v12457_v37 = vld [vmem:[%s16606_s3 + $0x128] ss:$16 sps:$4 sm:$0xff]   ;;  %v12462_v39 = vld [vmem:[%s16606_s3 + $0x10c] ss:$16 sps:$4 sm:$0xff]  }
  0xf3   :  { %v12463_v38 = vld [vmem:[#allocation3 + $0x118] ss:$20 sps:$4 sm:$0xff]   ;;  %v12468_v40 = vld [vmem:[#allocation3 + $0xf4] ss:$20 sps:$4 sm:$0xff]  }
  0xf4   :  { %1054 = vmatpush1.bf16.msra.mxu1 %v12379_v42  ;;  %1095 = vmatpush1.bf16.msra.mxu0 %v12382_v43  ;;  %v12460_v42 = vld [vmem:[%s16606_s3 + $0x108] ss:$16 sps:$4 sm:$0xff]  }
  0xf5   :  { %1055 = vmatprep.subr.bf16.mxu1 %v12387_v44  ;;  %1096 = vmatprep.subr.bf16.mxu0 %v12390_v45  ;;  %v12466_v43 = vld [vmem:[#allocation3 + $0xf0] ss:$20 sps:$4 sm:$0xff]   ;;  %v12471_v44 = vld [vmem:[#allocation3 + $0xcc] ss:$20 sps:$4 sm:$0xff]   ;;  %v12469_v45 = vld [vmem:[#allocation3 + $0xc8] ss:$20 sps:$4 sm:$0xff]  }
  0xf8   :  { %1056 = vmatpush1.bf16.msra.mxu1 %v12385_v46  ;;  %1097 = vmatpush1.bf16.msra.mxu0 %v12388_v47  ;;  %v12474_v46 = vld [vmem:[#allocation3 + $0xa4] ss:$20 sps:$4 sm:$0xff]   ;;  %v12472_v47 = vld [vmem:[#allocation3 + $0xa0] ss:$20 sps:$4 sm:$0xff]  }
  0xf9   :  { %1057 = vmatprep.subr.bf16.mxu1 %v12393_v48  ;;  %1098 = vmatprep.subr.bf16.mxu0 %v12396_v49  ;;  %v12477_v48 = vld [vmem:[#allocation3 + $0x7c] ss:$20 sps:$4 sm:$0xff]   ;;  %v12475_v49 = vld [vmem:[#allocation3 + $0x78] ss:$20 sps:$4 sm:$0xff]  }
  0xfc   :  { %1058 = vmatpush1.bf16.msra.mxu1 %v12391_v50  ;;  %1099 = vmatpush1.bf16.msra.mxu0 %v12394_v51  ;;  %v12480_v50 = vld [vmem:[#allocation3 + $0x54] ss:$20 sps:$4 sm:$0xff]   ;;  %v12483_v51 = vld [vmem:[#allocation3 + $0x2c] ss:$20 sps:$4 sm:$0xff]  }
  0xfd   :  { %1059 = vmatprep.subr.bf16.mxu1 %v12399_v52  ;;  %1100 = vmatprep.subr.bf16.mxu0 %v12402_v53  ;;  %v12511_v52 = vld [vmem:[#allocation3 + $0x398] ss:$20 sps:$4 sm:$0xff]   ;;  %v12513_v53 = vld [vmem:[#allocation3 + $0x39c] ss:$20 sps:$4 sm:$0xff]  }
 0x100   :  { %1060 = vmatpush1.bf16.msra.mxu1 %v12397_v54  ;;  %1101 = vmatpush1.bf16.msra.mxu0 %v12400_v55  ;;  %v12481_v54 = vld [vmem:[#allocation3 + $0x28] ss:$20 sps:$4 sm:$0xff]  }
 0x101   :  { %1061 = vmatprep.subr.bf16.mxu1 %v12405_v56  ;;  %1102 = vmatprep.subr.bf16.mxu0 %v12408_v57  ;;  %v12519_v55 = vld [vmem:[#allocation3 + $0x374] ss:$20 sps:$4 sm:$0xff]   ;;  %v12486_v56 = vld [vmem:[#allocation3 + $0x4] ss:$20 sps:$4 sm:$0xff]  }
 0x102   :  { %v12484_v57 = vld [vmem:[#allocation3] ss:$20 sps:$4 sm:$0xff]  }
 0x104   :  { %1062 = vmatpush1.bf16.msra.mxu1 %v12403_v58  ;;  %1103 = vmatpush1.bf16.msra.mxu0 %v12406_v59  ;;  %v12489_v58 = vld [vmem:[#allocation3 + $0x25c] ss:$20 sps:$4 sm:$0xff]   ;;  %v12525_v59 = vld [vmem:[#allocation3 + $0x34c] ss:$20 sps:$4 sm:$0xff]  }
 0x105   :  { %1063 = vmatprep.subr.bf16.mxu1 %v12411_v60  ;;  %1104 = vmatprep.subr.bf16.mxu0 %v12414_v61  ;;  %v12523_v60 = vld [vmem:[#allocation3 + $0x348] ss:$20 sps:$4 sm:$0xff]   ;;  %v12487_v61 = vld [vmem:[#allocation3 + $0x258] ss:$20 sps:$4 sm:$0xff]  }
 0x108   :  { %1064 = vmatpush1.bf16.msra.mxu1 %v12409_v62  ;;  %1105 = vmatpush1.bf16.msra.mxu0 %v12412_v63  ;;  %v12492_v62 = vld [vmem:[#allocation3 + $0x234] ss:$20 sps:$4 sm:$0xff]   ;;  %v12531_v63 = vld [vmem:[#allocation3 + $0x324] ss:$20 sps:$4 sm:$0xff]  }
 0x109   :  { %1065 = vmatprep.subr.bf16.mxu1 %v12417_v0  ;;  %1106 = vmatprep.subr.bf16.mxu0 %v12420_v2  ;;  %v12529_v0 = vld [vmem:[#allocation3 + $0x320] ss:$20 sps:$4 sm:$0xff]   ;;  %v12490_v2 = vld [vmem:[#allocation3 + $0x230] ss:$20 sps:$4 sm:$0xff]  }
 0x10c   :  { %1066 = vmatpush1.bf16.msra.mxu1 %v12415_v3  ;;  %1107 = vmatpush1.bf16.msra.mxu0 %v12418_v4  ;;  %v12495_v3 = vld [vmem:[#allocation3 + $0x20c] ss:$20 sps:$4 sm:$0xff]   ;;  %v12537_v4 = vld [vmem:[#allocation3 + $0x2fc] ss:$20 sps:$4 sm:$0xff]  }
 0x10d   :  { %1067 = vmatprep.subr.bf16.mxu1 %v12423_v5  ;;  %1112 = vmatprep.subr.bf16.mxu0 %v12426_v6  ;;  %v12535_v5 = vld [vmem:[#allocation3 + $0x2f8] ss:$20 sps:$4 sm:$0xff]   ;;  %v12493_v6 = vld [vmem:[#allocation3 + $0x208] ss:$20 sps:$4 sm:$0xff]  }
 0x110   :  { %1068 = vmatpush2.bf16.msra.mxu1 %v12421_v7  ;;  %1113 = vmatpush2.bf16.msra.mxu0 %v12424_v9  ;;  %v12498_v7 = vld [vmem:[#allocation3 + $0x1e4] ss:$20 sps:$4 sm:$0xff]   ;;  %v12543_v9 = vld [vmem:[#allocation3 + $0x2d4] ss:$20 sps:$4 sm:$0xff]  }
 0x111   :  { %1069 = vmatprep.subr.bf16.mxu1 %v12429_v14  ;;  %1114 = vmatprep.subr.bf16.mxu0 %v12432_v15  ;;  %v12541_v14 = vld [vmem:[#allocation3 + $0x2d0] ss:$20 sps:$4 sm:$0xff]   ;;  %v12496_v15 = vld [vmem:[#allocation3 + $0x1e0] ss:$20 sps:$4 sm:$0xff]  }
 0x114   :  { %1070 = vmatpush2.bf16.msra.mxu1 %v12427_v16  ;;  %1115 = vmatpush2.bf16.msra.mxu0 %v12430_v17  ;;  %v12501_v16 = vld [vmem:[#allocation3 + $0x1bc] ss:$20 sps:$4 sm:$0xff]   ;;  %v12549_v17 = vld [vmem:[#allocation3 + $0x2ac] ss:$20 sps:$4 sm:$0xff]  }
 0x115   :  { %1071 = vmatprep.subr.bf16.mxu1 %v12435_v18  ;;  %1116 = vmatprep.subr.bf16.mxu0 %v12438_v19  ;;  %v12547_v18 = vld [vmem:[#allocation3 + $0x2a8] ss:$20 sps:$4 sm:$0xff]   ;;  %v12499_v19 = vld [vmem:[#allocation3 + $0x1b8] ss:$20 sps:$4 sm:$0xff]  }
 0x118   :  { %1072 = vmatpush2.bf16.msra.mxu1 %v12433_v20  ;;  %1117 = vmatpush2.bf16.msra.mxu0 %v12436_v21  ;;  %v12504_v20 = vld [vmem:[#allocation3 + $0x194] ss:$20 sps:$4 sm:$0xff]   ;;  %v12555_v21 = vld [vmem:[#allocation3 + $0x284] ss:$20 sps:$4 sm:$0xff]  }
 0x119   :  { %1073 = vmatprep.subr.bf16.mxu1 %v12441_v22  ;;  %1118 = vmatprep.subr.bf16.mxu0 %v12444_v23  ;;  %v12553_v22 = vld [vmem:[#allocation3 + $0x280] ss:$20 sps:$4 sm:$0xff]   ;;  %v12502_v23 = vld [vmem:[#allocation3 + $0x190] ss:$20 sps:$4 sm:$0xff]  }
 0x11c   :  { %1074 = vmatpush2.bf16.msra.mxu1 %v12439_v24  ;;  %1119 = vmatpush2.bf16.msra.mxu0 %v12442_v25  ;;  %v12507_v24 = vld [vmem:[#allocation3 + $0x16c] ss:$20 sps:$4 sm:$0xff]  }
 0x11d   :  { %1075 = vmatprep.subr.bf16.mxu1 %v12447_v26  ;;  %1120 = vmatprep.subr.bf16.mxu0 %v12450_v27  ;;  %v12561_v25 = vld [vmem:[#allocation3 + $0x48c] ss:$20 sps:$4 sm:$0xff]   ;;  %v12559_v26 = vld [vmem:[#allocation3 + $0x488] ss:$20 sps:$4 sm:$0xff]  }
 0x11e   :  { %v12505_v27 = vld [vmem:[#allocation3 + $0x168] ss:$20 sps:$4 sm:$0xff]  }
 0x120   :  { %1076 = vmatpush2.bf16.msra.mxu1 %v12445_v28  ;;  %1121 = vmatpush2.bf16.msra.mxu0 %v12448_v29  ;;  %v12510_v28 = vld [vmem:[#allocation3 + $0x144] ss:$20 sps:$4 sm:$0xff]  }
 0x121   :  { %1077 = vmatprep.subr.bf16.mxu1 %v12453_v30  ;;  %1122 = vmatprep.subr.bf16.mxu0 %v12456_v31  ;;  %v12567_v29 = vld [vmem:[#allocation3 + $0x464] ss:$20 sps:$4 sm:$0xff]   ;;  %v12565_v30 = vld [vmem:[#allocation3 + $0x460] ss:$20 sps:$4 sm:$0xff]  }
 0x122   :  { %v12508_v31 = vld [vmem:[#allocation3 + $0x140] ss:$20 sps:$4 sm:$0xff]  }
 0x124   :  { %1078 = vmatpush2.bf16.msra.mxu1 %v12451_v32  ;;  %1123 = vmatpush2.bf16.msra.mxu0 %v12454_v33  ;;  %v12516_v32 = vld [vmem:[#allocation3 + $0x3a4] ss:$20 sps:$4 sm:$0xff]   ;;  %v12573_v33 = vld [vmem:[#allocation3 + $0x43c] ss:$20 sps:$4 sm:$0xff]  }
 0x125   :  { %1079 = vmatprep.subr.bf16.mxu1 %v12459_v35  ;;  %2131 = vmatprep.subr.bf16.mxu0 %v12465_v36  ;;  %v12571_v35 = vld [vmem:[#allocation3 + $0x438] ss:$20 sps:$4 sm:$0xff]   ;;  %v12579_v36 = vld [vmem:[#allocation3 + $0x414] ss:$20 sps:$4 sm:$0xff]  }
 0x127   :  { %1125 = vmatmul.mubr.bf16.vlgmr.msra.gmra.mxu0 %v13955_v41  ;;  %v12478_v41 = vld [vmem:[#allocation3 + $0x50] ss:$20 sps:$4 sm:$0xff]  }
 0x128   :  { %1080 = vmatpush2.bf16.msra.mxu1 %v12457_v37  ;;  %2132 = vmatpush1.bf16.msra.mxu0 %v12463_v38  ;;  %v12577_v37 = vld [vmem:[#allocation3 + $0x410] ss:$20 sps:$4 sm:$0xff]   ;;  %v12585_v38 = vld [vmem:[#allocation3 + $0x3ec] ss:$20 sps:$4 sm:$0xff]  }
 0x129   :  { %1081 = vmatprep.subr.bf16.mxu1 %v12462_v39  ;;  %2133 = vmatprep.subr.bf16.mxu0 %v12468_v40  ;;  %v12583_v39 = vld [vmem:[#allocation3 + $0x3e8] ss:$20 sps:$4 sm:$0xff]   ;;  %v12591_v40 = vld [vmem:[#allocation3 + $0x3c4] ss:$20 sps:$4 sm:$0xff]  }
 0x12c   :  { %1082 = vmatpush2.bf16.msra.mxu1 %v12460_v42  ;;  %2134 = vmatpush1.bf16.msra.mxu0 %v12466_v43  ;;  %v12589_v42 = vld [vmem:[#allocation3 + $0x3c0] ss:$20 sps:$4 sm:$0xff]   ;;  %v12597_v43 = vld [vmem:[#allocation3 + $0x124] ss:$20 sps:$4 sm:$0xff]  }
 0x12d   :  { %2135 = vmatprep.subr.bf16.mxu0 %v12471_v44  ;;  %2172 = vmatprep.subr.bf16.mxu1 %v12513_v53  ;;  %v14128_v44 = vld [vmem:[%s16607_s4] sm:$0xf] }
 0x12f   :  { %1084 = vmatmul.mubr.bf16.vlgmr.msra.gmra.mxu1 %v13947_v34  ;;  %v12517_v34 = vld [vmem:[#allocation3 + $0x370] ss:$20 sps:$4 sm:$0xff]  }
 0x130   :  { %2136 = vmatpush1.bf16.msra.mxu0 %v12469_v45  ;;  %2173 = vmatpush1.bf16.msra.mxu1 %v12511_v52  ;;  %v348_v45 = vrot.slane %v14128_v44, %v13926_v10 }
 0x131   :  { %2137 = vmatprep.subr.bf16.mxu0 %v12474_v46  ;;  %2174 = vmatprep.subr.bf16.mxu1 %v12519_v55  ;;  %v352_v46 = vrot.slane %v14128_v44, %v13932_v12 }
 0x134   :  { %2138 = vmatpush1.bf16.msra.mxu0 %v12472_v47  ;;  %2175 = vmatpush1.bf16.msra.mxu1 %v12517_v34 }
 0x135   :  { %2139 = vmatprep.subr.bf16.mxu0 %v12477_v48  ;;  %2176 = vmatprep.subr.bf16.mxu1 %v12525_v59  ;;  %v12514_v59 = vld [vmem:[#allocation3 + $0x3a0] ss:$20 sps:$4 sm:$0xff]  }
 0x138   :  { %2140 = vmatpush1.bf16.msra.mxu0 %v12475_v49  ;;  %2177 = vmatpush1.bf16.msra.mxu1 %v12523_v60  ;;  %v12522_v60 = vld [vmem:[#allocation3 + $0x37c] ss:$20 sps:$4 sm:$0xff]  }
 0x139   :  { %2141 = vmatprep.subr.bf16.mxu0 %v12480_v50  ;;  %2178 = vmatprep.subr.bf16.mxu1 %v12531_v63  ;;  %v12520_v63 = vld [vmem:[#allocation3 + $0x378] ss:$20 sps:$4 sm:$0xff]  }
 0x13c   :  { %2142 = vmatpush1.bf16.msra.mxu0 %v12478_v41  ;;  %2179 = vmatpush1.bf16.msra.mxu1 %v12529_v0  ;;  %v12528_v0 = vld [vmem:[#allocation3 + $0x354] ss:$20 sps:$4 sm:$0xff]  }
 0x13d   :  { %2143 = vmatprep.subr.bf16.mxu0 %v12483_v51  ;;  %2180 = vmatprep.subr.bf16.mxu1 %v12537_v4  ;;  %v12532_v4 = vld [vmem:[#allocation3 + $0x328] ss:$20 sps:$4 sm:$0xff]  }
 0x140   :  { %2144 = vmatpush1.bf16.msra.mxu0 %v12481_v54  ;;  %2181 = vmatpush1.bf16.msra.mxu1 %v12535_v5  ;;  %v12540_v5 = vld [vmem:[#allocation3 + $0x304] ss:$20 sps:$4 sm:$0xff]  }
 0x141   :  { %2145 = vmatprep.subr.bf16.mxu0 %v12486_v56  ;;  %2182 = vmatprep.subr.bf16.mxu1 %v12543_v9  ;;  %v12544_v9 = vld [vmem:[#allocation3 + $0x2d8] ss:$20 sps:$4 sm:$0xff]  }
 0x144   :  { %2146 = vmatpush1.bf16.msra.mxu0 %v12484_v57  ;;  %2183 = vmatpush1.bf16.msra.mxu1 %v12541_v14  ;;  %v12552_v14 = vld [vmem:[#allocation3 + $0x2b4] ss:$20 sps:$4 sm:$0xff]  }
 0x145   :  { %2147 = vmatprep.subr.bf16.mxu0 %v12489_v58  ;;  %2184 = vmatprep.subr.bf16.mxu1 %v12549_v17  ;;  %v12556_v17 = vld [vmem:[#allocation3 + $0x288] ss:$20 sps:$4 sm:$0xff]  }
 0x148   :  { %2148 = vmatpush2.bf16.msra.mxu0 %v12487_v61  ;;  %2185 = vmatpush1.bf16.msra.mxu1 %v12547_v18  ;;  %v12564_v18 = vld [vmem:[#allocation3 + $0x494] ss:$20 sps:$4 sm:$0xff]  }
 0x149   :  { %2149 = vmatprep.subr.bf16.mxu0 %v12492_v62  ;;  %2186 = vmatprep.subr.bf16.mxu1 %v12555_v21  ;;  %v12568_v21 = vld [vmem:[#allocation3 + $0x468] ss:$20 sps:$4 sm:$0xff]  }
 0x14c   :  { %2150 = vmatpush2.bf16.msra.mxu0 %v12490_v2  ;;  %2187 = vmatpush1.bf16.msra.mxu1 %v12553_v22  ;;  %v12526_v2 = vld [vmem:[#allocation3 + $0x350] ss:$20 sps:$4 sm:$0xff]  }
 0x14d   :  { %2151 = vmatprep.subr.bf16.mxu0 %v12495_v3  ;;  %2192 = vmatprep.subr.bf16.mxu1 %v12561_v25  ;;  %v12534_v3 = vld [vmem:[#allocation3 + $0x32c] ss:$20 sps:$4 sm:$0xff]   ;;  %v12576_v22 = vld [vmem:[#allocation3 + $0x444] ss:$20 sps:$4 sm:$0xff]  }
 0x14e   :  { %v12580_v25 = vld [vmem:[#allocation3 + $0x418] ss:$20 sps:$4 sm:$0xff]  }
 0x150   :  { %2152 = vmatpush2.bf16.msra.mxu0 %v12493_v6  ;;  %2193 = vmatpush2.bf16.msra.mxu1 %v12559_v26  ;;  %v12538_v6 = vld [vmem:[#allocation3 + $0x300] ss:$20 sps:$4 sm:$0xff]  }
 0x151   :  { %2153 = vmatprep.subr.bf16.mxu0 %v12498_v7  ;;  %2194 = vmatprep.subr.bf16.mxu1 %v12567_v29  ;;  %v12546_v7 = vld [vmem:[#allocation3 + $0x2dc] ss:$20 sps:$4 sm:$0xff]   ;;  %v12588_v26 = vld [vmem:[#allocation3 + $0x3f4] ss:$20 sps:$4 sm:$0xff]  }
 0x154   :  { %2154 = vmatpush2.bf16.msra.mxu0 %v12496_v15  ;;  %2195 = vmatpush2.bf16.msra.mxu1 %v12565_v30  ;;  %v12550_v15 = vld [vmem:[#allocation3 + $0x2b0] ss:$20 sps:$4 sm:$0xff]   ;;  %v12594_v30 = vld [vmem:[#allocation3 + $0x3cc] ss:$20 sps:$4 sm:$0xff]  }
 0x155   :  { %2155 = vmatprep.subr.bf16.mxu0 %v12501_v16  ;;  %2196 = vmatprep.subr.bf16.mxu1 %v12573_v33  ;;  %v12558_v16 = vld [vmem:[#allocation3 + $0x28c] ss:$20 sps:$4 sm:$0xff]   ;;  %v12592_v33 = vld [vmem:[#allocation3 + $0x3c8] ss:$20 sps:$4 sm:$0xff]  }
 0x158   :  { %2156 = vmatpush2.bf16.msra.mxu0 %v12499_v19  ;;  %2197 = vmatpush2.bf16.msra.mxu1 %v12571_v35  ;;  %v12562_v19 = vld [vmem:[#allocation3 + $0x490] ss:$20 sps:$4 sm:$0xff]  }
 0x159   :  { %2157 = vmatprep.subr.bf16.mxu0 %v12504_v20  ;;  %2198 = vmatprep.subr.bf16.mxu1 %v12579_v36  ;;  %v12570_v20 = vld [vmem:[#allocation3 + $0x46c] ss:$20 sps:$4 sm:$0xff]   ;;  %v12598_v36 = vld [vmem:[#allocation3 + $0x268] ss:$20 sps:$4 sm:$0xff]  }
 0x15c   :  { %2158 = vmatpush2.bf16.msra.mxu0 %v12502_v23  ;;  %2199 = vmatpush2.bf16.msra.mxu1 %v12577_v37  ;;  %v12574_v23 = vld [vmem:[#allocation3 + $0x440] ss:$20 sps:$4 sm:$0xff]   ;;  %v360_v37 = vrot.slane %v14128_v44, %v13935_v13 }
 0x15d   :  { %2159 = vmatprep.subr.bf16.mxu0 %v12507_v24  ;;  %2200 = vmatprep.subr.bf16.mxu1 %v12585_v38  ;;  %v12582_v24 = vld [vmem:[#allocation3 + $0x41c] ss:$20 sps:$4 sm:$0xff]  }
 0x160   :  { %2160 = vmatpush2.bf16.msra.mxu0 %v12505_v27  ;;  %2201 = vmatpush2.bf16.msra.mxu1 %v12583_v39 }
 0x161   :  { %2161 = vmatprep.subr.bf16.mxu0 %v12510_v28  ;;  %2202 = vmatprep.subr.bf16.mxu1 %v12591_v40  ;;  %v12586_v28 = vld [vmem:[#allocation3 + $0x3f0] ss:$20 sps:$4 sm:$0xff]  }
 0x164   :  { %2162 = vmatpush2.bf16.msra.mxu0 %v12508_v31  ;;  %2203 = vmatpush2.bf16.msra.mxu1 %v12589_v42 }
 0x165   :  { %2254 = vmatprep.subr.bf16.mxu0 %v12516_v32  ;;  %2213 = vmatprep.subr.bf16.mxu1 %v12597_v43  ;;  %v356_v32 = vrot.slane %v14128_v44, %v13929_v11  ;;  %v12602_v44 = vld [vmem:[#allocation3 + $0xfc] ss:$20 sps:$4 sm:$0xff]  }
 0x1af   :  { %v1003_v47 = vpop.f32.mrf.mxu0  ;;  %v1044_v48 = vpop.f32.mrf.mxu1 }
 0x1b0   :  { %v1004_v49 = vadd.f32 %v1003_v47, %v348_v45 }
 0x1b1   :  { %v1005_v50 = vpop.f32.mrf.mxu0  ;;  %v1046_v41 = vpop.f32.mrf.mxu1 }
 0x1b2   :  { %v1045_v51 = vadd.f32 %v1044_v48, %v1004_v49  ;;  %v1006_v52 = vadd.f32 %v1005_v50, %v352_v46 }
 0x1b3   :  { %v1048_v53 = vpop.f32.mrf.mxu1  ;;  %v1007_v54 = vpop.f32.mrf.mxu0 }
 0x1b4   :  { %v1133_v55 = vmax.f32 %v1045_v51, 0.0  ;;  %v1047_v56 = vadd.f32 %v1046_v41, %v1006_v52  ;;  %v12595_v41 = vld [vmem:[#allocation3 + $0x120] ss:$20 sps:$4 sm:$0xff]   ;;  %v12599_v51 = vld [vmem:[#allocation3 + $0x128] ss:$20 sps:$4 sm:$0xff]  }
 0x1b5   :  { %v1049_v34 = vpop.f32.mrf.mxu1  ;;  %v1008_v57 = vpop.f32.mrf.mxu0  ;;  %v12603_v53 = vld [vmem:[#allocation3 + $0x240] ss:$20 sps:$4 sm:$0xff]   ;;  %v12600_v54 = vld [vmem:[#allocation3 + $0xf8] ss:$20 sps:$4 sm:$0xff]  }
 0x1b6   :  { %v1134_v58 = vmax.f32 %v1047_v56, 0.0  ;;  %v14136_v62 = vpack.c.bf16 %v1133_v55, %v1133_v55  ;;  %v12604_v55 = vld [vmem:[#allocation3 + $0x100] ss:$20 sps:$4 sm:$0xff]   ;;  %v12608_v34 = vld [vmem:[#allocation3 + $0x218] ss:$20 sps:$4 sm:$0xff]  }
 0x1b7   :  { %v12607_v56 = vld [vmem:[#allocation3 + $0xd4] ss:$20 sps:$4 sm:$0xff]   ;;  %v12605_v57 = vld [vmem:[#allocation3 + $0xd0] ss:$20 sps:$4 sm:$0xff]  }
 0x1b8   :  { %v14134_v61 = vpack.c.bf16 %v1134_v58, %v1134_v58  ;;  %v12609_v58 = vld [vmem:[#allocation3 + $0xd8] ss:$20 sps:$4 sm:$0xff]  }
 0x1ba   :  { %2163 = vmatprep.mubr.bf16.mxu0 %v14134_v61 }
 0x1bb   :  { %2164 = vmatmul.mubr.bf16.vlgmr.msra.gmra.mxu0 %v14136_v62 }
 0x1bc   :  { %2255 = vmatpush1.bf16.msra.mxu0 %v12514_v59  ;;  %v12612_v59 = vld [vmem:[#allocation3 + $0xac] ss:$20 sps:$4 sm:$0xff]  }
 0x1bd   :  { %2256 = vmatprep.subr.bf16.mxu0 %v12522_v60  ;;  %v12613_v60 = vld [vmem:[#allocation3 + $0x1f0] ss:$20 sps:$4 sm:$0xff]  }
 0x1c0   :  { %2257 = vmatpush1.bf16.msra.mxu0 %v12520_v63  ;;  %v12610_v63 = vld [vmem:[#allocation3 + $0xa8] ss:$20 sps:$4 sm:$0xff]  }
 0x1c1   :  { %2258 = vmatprep.subr.bf16.mxu0 %v12528_v0  ;;  %v12614_v0 = vld [vmem:[#allocation3 + $0xb0] ss:$20 sps:$4 sm:$0xff]  }
 0x1c4   :  { %2259 = vmatpush1.bf16.msra.mxu0 %v12526_v2  ;;  %v12617_v2 = vld [vmem:[#allocation3 + $0x84] ss:$20 sps:$4 sm:$0xff]  }
 0x1c5   :  { %2260 = vmatprep.subr.bf16.mxu0 %v12534_v3  ;;  %v12615_v3 = vld [vmem:[#allocation3 + $0x80] ss:$20 sps:$4 sm:$0xff]  }
 0x1c8   :  { %2261 = vmatpush1.bf16.msra.mxu0 %v12532_v4  ;;  %v12619_v4 = vld [vmem:[#allocation3 + $0x88] ss:$20 sps:$4 sm:$0xff]  }
 0x1c9   :  { %2262 = vmatprep.subr.bf16.mxu0 %v12540_v5  ;;  %v12622_v5 = vld [vmem:[#allocation3 + $0x5c] ss:$20 sps:$4 sm:$0xff]  }
 0x1cc   :  { %2263 = vmatpush1.bf16.msra.mxu0 %v12538_v6  ;;  %v12623_v6 = vld [vmem:[#allocation3 + $0x1a0] ss:$20 sps:$4 sm:$0xff]  }
 0x1cd   :  { %2264 = vmatprep.subr.bf16.mxu0 %v12546_v7  ;;  %v12620_v7 = vld [vmem:[#allocation3 + $0x58] ss:$20 sps:$4 sm:$0xff]  }
 0x1d0   :  { %2265 = vmatpush1.bf16.msra.mxu0 %v12544_v9  ;;  %v12624_v9 = vld [vmem:[#allocation3 + $0x60] ss:$20 sps:$4 sm:$0xff]  }
 0x1d1   :  { %2266 = vmatprep.subr.bf16.mxu0 %v12552_v14  ;;  %v12627_v14 = vld [vmem:[#allocation3 + $0x34] ss:$20 sps:$4 sm:$0xff]  }
 0x1d4   :  { %2267 = vmatpush1.bf16.msra.mxu0 %v12550_v15  ;;  %v12628_v15 = vld [vmem:[#allocation3 + $0x178] ss:$20 sps:$4 sm:$0xff]  }
 0x1d5   :  { %2268 = vmatprep.subr.bf16.mxu0 %v12558_v16  ;;  %v12625_v16 = vld [vmem:[#allocation3 + $0x30] ss:$20 sps:$4 sm:$0xff]  }
 0x1d8   :  { %2269 = vmatpush1.bf16.msra.mxu0 %v12556_v17  ;;  %v12629_v17 = vld [vmem:[#allocation3 + $0x38] ss:$20 sps:$4 sm:$0xff]  }
 0x1d9   :  { %2274 = vmatprep.subr.bf16.mxu0 %v12564_v18  ;;  %v12632_v18 = vld [vmem:[#allocation3 + $0xc] ss:$20 sps:$4 sm:$0xff]  }
 0x1dc   :  { %2275 = vmatpush2.bf16.msra.mxu0 %v12562_v19  ;;  %v12633_v19 = vld [vmem:[#allocation3 + $0x150] ss:$20 sps:$4 sm:$0xff]  }
 0x1dd   :  { %2276 = vmatprep.subr.bf16.mxu0 %v12570_v20  ;;  %v12630_v20 = vld [vmem:[#allocation3 + $0x8] ss:$20 sps:$4 sm:$0xff]  }
 0x1e0   :  { %2277 = vmatpush2.bf16.msra.mxu0 %v12568_v21  ;;  %v12634_v21 = vld [vmem:[#allocation3 + $0x10] ss:$20 sps:$4 sm:$0xff]  }
 0x1e1   :  { %2278 = vmatprep.subr.bf16.mxu0 %v12576_v22  ;;  %v12637_v22 = vld [vmem:[#allocation3 + $0x264] ss:$20 sps:$4 sm:$0xff]  }
 0x1e4   :  { %2279 = vmatpush2.bf16.msra.mxu0 %v12574_v23  ;;  %v12675_v23 = vld [vmem:[%s16610_s7 + $0x18c] ss:$28 sps:$4 sm:$0xff]  }
 0x1e5   :  { %2280 = vmatprep.subr.bf16.mxu0 %v12582_v24  ;;  %v12635_v24 = vld [vmem:[#allocation3 + $0x260] ss:$20 sps:$4 sm:$0xff]  }
 0x1e7   :  { %v1126_v27 = vpop.f32.mrf.mxu0 }
 0x1e8   :  { %2281 = vmatpush2.bf16.msra.mxu0 %v12580_v25  ;;  %v12673_v25 = vld [vmem:[%s16610_s7 + $0x188] ss:$28 sps:$4 sm:$0xff]  }
 0x1e9   :  { %v1128_v29 = vpop.f32.mrf.mxu0  ;;  %2282 = vmatprep.subr.bf16.mxu0 %v12588_v26  ;;  %v12640_v26 = vld [vmem:[#allocation3 + $0x23c] ss:$20 sps:$4 sm:$0xff]  }
 0x1eb   :  { %v1130_v31 = vpop.f32.mrf.mxu0 }
 0x1ec   :  { %2283 = vmatpush2.bf16.msra.mxu0 %v12586_v28  ;;  %v12638_v28 = vld [vmem:[#allocation3 + $0x238] ss:$20 sps:$4 sm:$0xff]  }
 0x1ed   :  { %v1131_v35 = vpop.f32.mrf.mxu0  ;;  %2284 = vmatprep.subr.bf16.mxu0 %v12594_v30  ;;  %v12643_v30 = vld [vmem:[#allocation3 + $0x214] ss:$20 sps:$4 sm:$0xff]  }
 0x1ee   :  { %v12681_v31 = vld [vmem:[%s16610_s7 + $0x11c] ss:$28 sps:$4 sm:$0xff]   ;;  %v12646_v35 = vld [vmem:[#allocation3 + $0x1ec] ss:$20 sps:$4 sm:$0xff]  }
 0x1ef   :  { %v1085_v38 = vpop.f32.mrf.mxu1 }
 0x1f0   :  { %v1086_v39 = vadd.f32 %v1085_v38, %v356_v32  ;;  %2285 = vmatpush2.bf16.msra.mxu0 %v12592_v33  ;;  %v12641_v32 = vld [vmem:[#allocation3 + $0x210] ss:$20 sps:$4 sm:$0xff]   ;;  %v12682_v38 = vld [vmem:[%s16610_s7 + $0xe0] ss:$28 sps:$4 sm:$0xff]  }
 0x1f1   :  { %v1087_v40 = vpop.f32.mrf.mxu1  ;;  %12096 = vmatprep.subr.bf16.mxu0 %v12598_v36  ;;  %v12679_v33 = vld [vmem:[%s16610_s7 + $0x118] ss:$28 sps:$4 sm:$0xff]   ;;  %v12684_v36 = vld [vmem:[%s16610_s7 + $0xe4] ss:$28 sps:$4 sm:$0xff]  }
 0x1f2   :  { %v1127_v42 = vadd.f32 %v1126_v27, %v1086_v39  ;;  %v1088_v43 = vadd.f32 %v1087_v40, %v360_v37  ;;  %v12678_v27 = vld [vmem:[%s16610_s7 + $0x154] ss:$28 sps:$4 sm:$0xff]   ;;  %v12644_v37 = vld [vmem:[#allocation3 + $0x1e8] ss:$20 sps:$4 sm:$0xff]   ;;  %v12649_v39 = vld [vmem:[#allocation3 + $0x1c4] ss:$20 sps:$4 sm:$0xff]  }
 0x1f3   :  { %v1089_v45 = vpop.f32.mrf.mxu1  ;;  %v12687_v40 = vld [vmem:[%s16610_s7 + $0xac] ss:$28 sps:$4 sm:$0xff]  }
 0x1f4   :  { %v1129_v46 = vadd.f32 %v1128_v29, %v1088_v43  ;;  %v1135_v47 = vmax.f32 %v1127_v42, 0.0  ;;  %v12676_v29 = vld [vmem:[%s16610_s7 + $0x150] ss:$28 sps:$4 sm:$0xff]   ;;  %v12647_v42 = vld [vmem:[#allocation3 + $0x1c0] ss:$20 sps:$4 sm:$0xff]  }
 0x1f5   :  { %v1090_v48 = vpop.f32.mrf.mxu1  ;;  %v12685_v43 = vld [vmem:[%s16610_s7 + $0xa8] ss:$28 sps:$4 sm:$0xff]   ;;  %v12652_v45 = vld [vmem:[#allocation3 + $0x19c] ss:$20 sps:$4 sm:$0xff]  }
 0x1f6   :  { %v1136_v49 = vmax.f32 %v1129_v46, 0.0  ;;  %v14146_v52 = vpack.c.bf16 %v1135_v47, %v1135_v47  ;;  %v12690_v46 = vld [vmem:[%s16610_s7 + $0x74] ss:$28 sps:$4 sm:$0xff]  }
 0x1f7   :  { %v12650_v47 = vld [vmem:[#allocation3 + $0x198] ss:$20 sps:$4 sm:$0xff]  }
 0x1f8   :  { %v14144_v50 = vpack.c.bf16 %v1136_v49, %v1136_v49  ;;  %v12688_v48 = vld [vmem:[%s16610_s7 + $0x70] ss:$28 sps:$4 sm:$0xff]  }
 0x1f9   :  { %v12655_v49 = vld [vmem:[#allocation3 + $0x174] ss:$20 sps:$4 sm:$0xff]  }
 0x1fa   :  { %11054 = vmatprep.mubr.msk.bf16.mxu1 %vm965_vm1, %v14144_v50  ;;  %11055 = vmatprep.mubr.msk.bf16.mxu0 %vm965_vm1, %v14144_v50 }
 0x1fb   :  { %2205 = vmatmul.mubr.bf16.vlgmr.msra.gmra.mxu1 %v14146_v52  ;;  %2287 = vmatmul.mubr.bf16.vlgmr.msra.gmra.mxu0 %v14146_v52 }
 0x1fc   :  { %2214 = vmatpush1.bf16.msra.mxu1 %v12595_v41  ;;  %12097 = vmatpush3.bf16.msra.mxu0 %v12599_v51  ;;  %v12693_v41 = vld [vmem:[%s16610_s7 + $0x3c] ss:$28 sps:$4 sm:$0xff]   ;;  %v12653_v51 = vld [vmem:[#allocation3 + $0x170] ss:$20 sps:$4 sm:$0xff]  }
 0x1fd   :  { %2245 = vmatprep.mubr.bf16.mxu1 %v14134_v61  ;;  %2327 = vmatprep.mubr.bf16.mxu0 %v14134_v61  ;;  %v12618_v61 = vld [vmem:[#allocation3 + $0x1c8] ss:$20 sps:$4 sm:$0xff]  }
 0x1fe   :  { %2215 = vmatprep.subr.bf16.mxu1 %v12602_v44  ;;  %12098 = vmatprep.subr.bf16.mxu0 %v12603_v53  ;;  %v12691_v44 = vld [vmem:[%s16610_s7 + $0x38] ss:$28 sps:$4 sm:$0xff]   ;;  %v12658_v53 = vld [vmem:[#allocation3 + $0x14c] ss:$20 sps:$4 sm:$0xff]  }
 0x200   :  { %2216 = vmatpush1.bf16.msra.mxu1 %v12600_v54  ;;  %12099 = vmatpush3.bf16.msra.mxu0 %v12604_v55  ;;  %v12696_v54 = vld [vmem:[%s16610_s7 + $0x4] ss:$28 sps:$4 sm:$0xff]  }
 0x201   :  { %2217 = vmatprep.subr.bf16.mxu1 %v12607_v56  ;;  %12100 = vmatprep.subr.bf16.mxu0 %v12608_v34  ;;  %v12656_v55 = vld [vmem:[#allocation3 + $0x148] ss:$20 sps:$4 sm:$0xff]  }
 0x202   :  { %v12694_v56 = vld [vmem:[%s16610_s7] ss:$28 sps:$4 sm:$0xff]   ;;  %v12699_v34 = vld [vmem:[%s16610_s7 + $0x34c] ss:$28 sps:$4 sm:$0xff]  }
 0x204   :  { %2218 = vmatpush1.bf16.msra.mxu1 %v12605_v57  ;;  %12101 = vmatpush3.bf16.msra.mxu0 %v12609_v58  ;;  %v12659_v57 = vld [vmem:[#allocation3 + $0x3a8] ss:$20 sps:$4 sm:$0xff]  }
 0x205   :  { %2219 = vmatprep.subr.bf16.mxu1 %v12612_v59  ;;  %12102 = vmatprep.subr.bf16.mxu0 %v12613_v60  ;;  %v12697_v58 = vld [vmem:[%s16610_s7 + $0x348] ss:$28 sps:$4 sm:$0xff]   ;;  %v12702_v59 = vld [vmem:[%s16610_s7 + $0x314] ss:$28 sps:$4 sm:$0xff]  }
 0x206   :  { %v12660_v60 = vld [vmem:[#allocation3 + $0x380] ss:$20 sps:$4 sm:$0xff]  }
 0x208   :  { %2220 = vmatpush1.bf16.msra.mxu1 %v12610_v63  ;;  %12103 = vmatpush3.bf16.msra.mxu0 %v12614_v0  ;;  %v12700_v63 = vld [vmem:[%s16610_s7 + $0x310] ss:$28 sps:$4 sm:$0xff]   ;;  %v12705_v0 = vld [vmem:[%s16610_s7 + $0x2dc] ss:$28 sps:$4 sm:$0xff]  }
 0x209   :  { %2221 = vmatprep.subr.bf16.mxu1 %v12617_v2  ;;  %12104 = vmatprep.subr.bf16.mxu0 %v12618_v61  ;;  %v12661_v2 = vld [vmem:[#allocation3 + $0x358] ss:$20 sps:$4 sm:$0xff]   ;;  %v12662_v61 = vld [vmem:[#allocation3 + $0x330] ss:$20 sps:$4 sm:$0xff]  }
 0x20c   :  { %2222 = vmatpush1.bf16.msra.mxu1 %v12615_v3  ;;  %12105 = vmatpush3.bf16.msra.mxu0 %v12619_v4  ;;  %v12706_v3 = vld [vmem:[%s16610_s7 + $0x2a0] ss:$28 sps:$4 sm:$0xff]   ;;  %v12711_v4 = vld [vmem:[%s16610_s7 + $0x26c] ss:$28 sps:$4 sm:$0xff]  }
 0x20d   :  { %2223 = vmatprep.subr.bf16.mxu1 %v12622_v5  ;;  %12106 = vmatprep.subr.bf16.mxu0 %v12623_v6  ;;  %v12663_v5 = vld [vmem:[#allocation3 + $0x308] ss:$20 sps:$4 sm:$0xff]  }
 0x20e   :  { %v12709_v6 = vld [vmem:[%s16610_s7 + $0x268] ss:$28 sps:$4 sm:$0xff]  }
 0x210   :  { %2224 = vmatpush1.bf16.msra.mxu1 %v12620_v7  ;;  %12107 = vmatpush3.bf16.msra.mxu0 %v12624_v9  ;;  %v12714_v7 = vld [vmem:[%s16610_s7 + $0x234] ss:$28 sps:$4 sm:$0xff]  }
 0x211   :  { %2225 = vmatprep.subr.bf16.mxu1 %v12627_v14  ;;  %12108 = vmatprep.subr.bf16.mxu0 %v12628_v15  ;;  %v12664_v9 = vld [vmem:[#allocation3 + $0x2e0] ss:$20 sps:$4 sm:$0xff]   ;;  %v12712_v14 = vld [vmem:[%s16610_s7 + $0x230] ss:$28 sps:$4 sm:$0xff]  }
 0x212   :  { %v12717_v15 = vld [vmem:[%s16610_s7 + $0x1fc] ss:$28 sps:$4 sm:$0xff]  }
 0x214   :  { %2226 = vmatpush1.bf16.msra.mxu1 %v12625_v16  ;;  %12109 = vmatpush3.bf16.msra.mxu0 %v12629_v17  ;;  %v12665_v16 = vld [vmem:[#allocation3 + $0x2b8] ss:$20 sps:$4 sm:$0xff]  }
 0x215   :  { %2227 = vmatprep.subr.bf16.mxu1 %v12632_v18  ;;  %12110 = vmatprep.subr.bf16.mxu0 %v12633_v19  ;;  %v12715_v17 = vld [vmem:[%s16610_s7 + $0x1f8] ss:$28 sps:$4 sm:$0xff]   ;;  %v12720_v18 = vld [vmem:[%s16610_s7 + $0x1c4] ss:$28 sps:$4 sm:$0xff]  }
 0x216   :  { %v12666_v19 = vld [vmem:[#allocation3 + $0x290] ss:$20 sps:$4 sm:$0xff]  }
 0x218   :  { %2228 = vmatpush1.bf16.msra.mxu1 %v12630_v20  ;;  %12111 = vmatpush3.bf16.msra.mxu0 %v12634_v21  ;;  %v12718_v20 = vld [vmem:[%s16610_s7 + $0x1c0] ss:$28 sps:$4 sm:$0xff]  }
 0x219   :  { %2229 = vmatprep.subr.bf16.mxu1 %v12637_v22  ;;  %4182 = vmatprep.subr.bf16.mxu0 %v12675_v23  ;;  %v12667_v21 = vld [vmem:[#allocation3 + $0x498] ss:$20 sps:$4 sm:$0xff]   ;;  %v12668_v22 = vld [vmem:[#allocation3 + $0x470] ss:$20 sps:$4 sm:$0xff]   ;;  %v12669_v23 = vld [vmem:[#allocation3 + $0x448] ss:$20 sps:$4 sm:$0xff]  }
 0x21b   :  { %2328 = vmatmul.mubr.bf16.vlgmr.msra.gmra.mxu0 %v14136_v62 }
 0x21c   :  { %2230 = vmatpush2.bf16.msra.mxu1 %v12635_v24  ;;  %4183 = vmatpush1.bf16.msra.mxu0 %v12673_v25  ;;  %v12670_v24 = vld [vmem:[#allocation3 + $0x420] ss:$20 sps:$4 sm:$0xff]   ;;  %v12671_v25 = vld [vmem:[#allocation3 + $0x3f8] ss:$20 sps:$4 sm:$0xff]  }
 0x21d   :  { %2231 = vmatprep.subr.bf16.mxu1 %v12640_v26  ;;  %4184 = vmatprep.subr.bf16.mxu0 %v12678_v27  ;;  %v12672_v26 = vld [vmem:[#allocation3 + $0x3d0] ss:$20 sps:$4 sm:$0xff]  }
 0x21e   :  { %v12723_v27 = vld [vmem:[%s16610_s7 + $0x50c] ss:$28 sps:$4 sm:$0xff]  }
 0x220   :  { %2232 = vmatpush2.bf16.msra.mxu1 %v12638_v28  ;;  %4185 = vmatpush1.bf16.msra.mxu0 %v12676_v29  ;;  %v12721_v28 = vld [vmem:[%s16610_s7 + $0x508] ss:$28 sps:$4 sm:$0xff]   ;;  %v12726_v29 = vld [vmem:[%s16610_s7 + $0x4d4] ss:$28 sps:$4 sm:$0xff]  }
 0x221   :  { %2233 = vmatprep.subr.bf16.mxu1 %v12643_v30  ;;  %4186 = vmatprep.subr.bf16.mxu0 %v12681_v31  ;;  %v12724_v30 = vld [vmem:[%s16610_s7 + $0x4d0] ss:$28 sps:$4 sm:$0xff]   ;;  %v12729_v31 = vld [vmem:[%s16610_s7 + $0x49c] ss:$28 sps:$4 sm:$0xff]  }
 0x224   :  { %2234 = vmatpush2.bf16.msra.mxu1 %v12641_v32  ;;  %4187 = vmatpush1.bf16.msra.mxu0 %v12679_v33  ;;  %v12727_v32 = vld [vmem:[%s16610_s7 + $0x498] ss:$28 sps:$4 sm:$0xff]  }
 0x225   :  { %2235 = vmatprep.subr.bf16.mxu1 %v12646_v35  ;;  %4188 = vmatprep.subr.bf16.mxu0 %v12684_v36  ;;  %v12730_v35 = vld [vmem:[%s16610_s7 + $0x460] ss:$28 sps:$4 sm:$0xff]  }
 0x228   :  { %2236 = vmatpush2.bf16.msra.mxu1 %v12644_v37  ;;  %4189 = vmatpush1.bf16.msra.mxu0 %v12682_v38  ;;  %v12735_v37 = vld [vmem:[%s16610_s7 + $0x42c] ss:$28 sps:$4 sm:$0xff]  }
 0x229   :  { %2237 = vmatprep.subr.bf16.mxu1 %v12649_v39  ;;  %4190 = vmatprep.subr.bf16.mxu0 %v12687_v40  ;;  %v12733_v39 = vld [vmem:[%s16610_s7 + $0x428] ss:$28 sps:$4 sm:$0xff]  }
 0x22c   :  { %2238 = vmatpush2.bf16.msra.mxu1 %v12647_v42  ;;  %4191 = vmatpush1.bf16.msra.mxu0 %v12685_v43  ;;  %v12738_v42 = vld [vmem:[%s16610_s7 + $0x3f4] ss:$28 sps:$4 sm:$0xff]  }
 0x22d   :  { %2239 = vmatprep.subr.bf16.mxu1 %v12652_v45  ;;  %4192 = vmatprep.subr.bf16.mxu0 %v12690_v46  ;;  %v12736_v43 = vld [vmem:[%s16610_s7 + $0x3f0] ss:$28 sps:$4 sm:$0xff]   ;;  %v12741_v45 = vld [vmem:[%s16610_s7 + $0x3bc] ss:$28 sps:$4 sm:$0xff]  }
 0x22e   :  { %v12739_v46 = vld [vmem:[%s16610_s7 + $0x3b8] ss:$28 sps:$4 sm:$0xff]  }
 0x230   :  { %2240 = vmatpush2.bf16.msra.mxu1 %v12650_v47  ;;  %4193 = vmatpush1.bf16.msra.mxu0 %v12688_v48  ;;  %v12744_v47 = vld [vmem:[%s16610_s7 + $0x384] ss:$28 sps:$4 sm:$0xff]  }
 0x231   :  { %2241 = vmatprep.subr.bf16.mxu1 %v12655_v49  ;;  %4194 = vmatprep.subr.bf16.mxu0 %v12693_v41  ;;  %v12742_v48 = vld [vmem:[%s16610_s7 + $0x380] ss:$28 sps:$4 sm:$0xff]   ;;  %v12747_v49 = vld [vmem:[%s16610_s7 + $0x6cc] ss:$28 sps:$4 sm:$0xff]  }
 0x232   :  { %v12745_v41 = vld [vmem:[%s16610_s7 + $0x6c8] ss:$28 sps:$4 sm:$0xff]  }
 0x234   :  { %2242 = vmatpush2.bf16.msra.mxu1 %v12653_v51  ;;  %4195 = vmatpush1.bf16.msra.mxu0 %v12691_v44  ;;  %v12750_v51 = vld [vmem:[%s16610_s7 + $0x694] ss:$28 sps:$4 sm:$0xff]  }
 0x235   :  { %2243 = vmatprep.subr.bf16.mxu1 %v12658_v53  ;;  %4196 = vmatprep.subr.bf16.mxu0 %v12696_v54  ;;  %v12748_v44 = vld [vmem:[%s16610_s7 + $0x690] ss:$28 sps:$4 sm:$0xff]   ;;  %v12753_v53 = vld [vmem:[%s16610_s7 + $0x65c] ss:$28 sps:$4 sm:$0xff]  }
 0x236   :  { %v12751_v54 = vld [vmem:[%s16610_s7 + $0x658] ss:$28 sps:$4 sm:$0xff]  }
 0x238   :  { %2244 = vmatpush2.bf16.msra.mxu1 %v12656_v55  ;;  %4197 = vmatpush1.bf16.msra.mxu0 %v12694_v56  ;;  %v12786_v55 = vld [vmem:[%s16610_s7 + $0x88c] ss:$28 sps:$4 sm:$0xff]   ;;  %v12756_v56 = vld [vmem:[%s16610_s7 + $0x624] ss:$28 sps:$4 sm:$0xff]  }
 0x239   :  { %2335 = vmatprep.subr.bf16.mxu1 %v13625_v1  ;;  %4198 = vmatprep.subr.bf16.mxu0 %v12699_v34  ;;  %v12754_v34 = vld [vmem:[%s16610_s7 + $0x620] ss:$28 sps:$4 sm:$0xff]  }
 0x23b   :  { %2246 = vmatmul.mubr.bf16.vlgmr.msra.gmra.mxu1 %v14136_v62  ;;  %v12703_v62 = vld [vmem:[%s16610_s7 + $0x2d8] ss:$28 sps:$4 sm:$0xff]  }
 0x23c   :  { %2336 = vmatpush1.bf16.msra.mxu1 %v12659_v57  ;;  %11056 = vmatprep.mubr.msk.bf16.mxu1 %vm965_vm1, %v14144_v50  ;;  %v12708_v50 = vld [vmem:[%s16610_s7 + $0x2a4] ss:$28 sps:$4 sm:$0xff]   ;;  %v12759_v57 = vld [vmem:[%s16610_s7 + $0x5ec] ss:$28 sps:$4 sm:$0xff]  }
 0x23d   :  { %2337 = vmatprep.subr.bf16.mxu1 %v13625_v1  ;;  %4199 = vmatpush2.bf16.msra.mxu0 %v12697_v58  ;;  %v12757_v58 = vld [vmem:[%s16610_s7 + $0x5e8] ss:$28 sps:$4 sm:$0xff]  }
 0x23e   :  { %4200 = vmatprep.subr.bf16.mxu0 %v12702_v59  ;;  %v12762_v59 = vld [vmem:[%s16610_s7 + $0x5b4] ss:$28 sps:$4 sm:$0xff]  }
 0x240   :  { %2338 = vmatpush1.bf16.msra.mxu1 %v12660_v60  ;;  %v12760_v60 = vld [vmem:[%s16610_s7 + $0x5b0] ss:$28 sps:$4 sm:$0xff]  }
 0x241   :  { %2339 = vmatprep.subr.bf16.mxu1 %v13625_v1  ;;  %4201 = vmatpush2.bf16.msra.mxu0 %v12700_v63  ;;  %v12765_v63 = vld [vmem:[%s16610_s7 + $0x57c] ss:$28 sps:$4 sm:$0xff]  }
 0x242   :  { %4202 = vmatprep.subr.bf16.mxu0 %v12705_v0  ;;  %v12763_v0 = vld [vmem:[%s16610_s7 + $0x578] ss:$28 sps:$4 sm:$0xff]  }
 0x244   :  { %2340 = vmatpush1.bf16.msra.mxu1 %v12661_v2  ;;  %v12768_v2 = vld [vmem:[%s16610_s7 + $0x544] ss:$28 sps:$4 sm:$0xff]  }
 0x245   :  { %2341 = vmatprep.subr.bf16.mxu1 %v13625_v1  ;;  %4203 = vmatpush2.bf16.msra.mxu0 %v12703_v62  ;;  %v12766_v62 = vld [vmem:[%s16610_s7 + $0x540] ss:$28 sps:$4 sm:$0xff]  }
 0x246   :  { %4204 = vmatprep.subr.bf16.mxu0 %v12708_v50  ;;  %v12771_v50 = vld [vmem:[%s16610_s7 + $0x194] ss:$28 sps:$4 sm:$0xff]  }
 0x248   :  { %2342 = vmatpush1.bf16.msra.mxu1 %v12662_v61  ;;  %v14380_v61 = vld [vmem:[%s16609_s6] sm:$0x1f] }
 0x249   :  { %2343 = vmatprep.subr.bf16.mxu1 %v13625_v1  ;;  %4205 = vmatpush2.bf16.msra.mxu0 %v12706_v3  ;;  %v1326_v3 = vrot.slane %v14380_v61, %v13926_v10 }
 0x24a   :  { %4206 = vmatprep.subr.bf16.mxu0 %v12711_v4  ;;  %v1330_v4 = vrot.slane %v14380_v61, %v13932_v12 }
 0x24c   :  { %2344 = vmatpush1.bf16.msra.mxu1 %v12663_v5 }
 0x24d   :  { %2345 = vmatprep.subr.bf16.mxu1 %v13625_v1  ;;  %4207 = vmatpush2.bf16.msra.mxu0 %v12709_v6 }
 0x24e   :  { %4208 = vmatprep.subr.bf16.mxu0 %v12714_v7 }
 0x250   :  { %2346 = vmatpush1.bf16.msra.mxu1 %v12664_v9 }
 0x251   :  { %2347 = vmatprep.subr.bf16.mxu1 %v13625_v1  ;;  %4209 = vmatpush2.bf16.msra.mxu0 %v12712_v14 }
 0x252   :  { %4210 = vmatprep.subr.bf16.mxu0 %v12717_v15 }
 0x254   :  { %2348 = vmatpush1.bf16.msra.mxu1 %v12665_v16 }
 0x255   :  { %2349 = vmatprep.subr.bf16.mxu1 %v13625_v1  ;;  %4211 = vmatpush2.bf16.msra.mxu0 %v12715_v17 }
 0x256   :  { %4212 = vmatprep.subr.bf16.mxu0 %v12720_v18 }
 0x258   :  { %2350 = vmatpush1.bf16.msra.mxu1 %v12666_v19 }
 0x259   :  { %2355 = vmatprep.subr.bf16.mxu1 %v13625_v1  ;;  %4213 = vmatpush2.bf16.msra.mxu0 %v12718_v20 }
 0x25a   :  { %4264 = vmatprep.subr.bf16.mxu0 %v12786_v55 }
 0x25c   :  { %2356 = vmatpush2.bf16.msra.mxu1 %v12667_v21 }
 0x25d   :  { %2357 = vmatprep.subr.bf16.mxu1 %v13625_v1 }
 0x260   :  { %2358 = vmatpush2.bf16.msra.mxu1 %v12668_v22 }
 0x261   :  { %2359 = vmatprep.subr.bf16.mxu1 %v13625_v1 }
 0x264   :  { %2360 = vmatpush2.bf16.msra.mxu1 %v12669_v23 }
 0x265   :  { %2361 = vmatprep.subr.bf16.mxu1 %v13625_v1 }
 0x268   :  { %2362 = vmatpush2.bf16.msra.mxu1 %v12670_v24 }
 0x269   :  { %2363 = vmatprep.subr.bf16.mxu1 %v13625_v1 }
 0x26c   :  { %2364 = vmatpush2.bf16.msra.mxu1 %v12671_v25  ;;  %v12784_v25 = vld [vmem:[%s16610_s7 + $0x888] ss:$28 sps:$4 sm:$0xff]  }
 0x26d   :  { %2365 = vmatprep.subr.bf16.mxu1 %v13625_v1 }
 0x270   :  { %2366 = vmatpush2.bf16.msra.mxu1 %v12672_v26 }
 0x271   :  { %4223 = vmatprep.subr.bf16.mxu1 %v12723_v27  ;;  %v12792_v27 = vld [vmem:[%s16610_s7 + $0x854] ss:$28 sps:$4 sm:$0xff]  }
 0x273   :  { %2368 = vmatmul.mubr.bf16.vlgmr.msra.gmra.mxu1 %v14146_v52  ;;  %v12732_v52 = vld [vmem:[%s16610_s7 + $0x464] ss:$28 sps:$4 sm:$0xff]  }
 0x274   :  { %4224 = vmatpush1.bf16.msra.mxu1 %v12721_v28  ;;  %v12790_v28 = vld [vmem:[%s16610_s7 + $0x850] ss:$28 sps:$4 sm:$0xff]  }
 0x275   :  { %4225 = vmatprep.subr.bf16.mxu1 %v12726_v29  ;;  %v12798_v29 = vld [vmem:[%s16610_s7 + $0x81c] ss:$28 sps:$4 sm:$0xff]  }
 0x278   :  { %4226 = vmatpush1.bf16.msra.mxu1 %v12724_v30  ;;  %v12796_v30 = vld [vmem:[%s16610_s7 + $0x818] ss:$28 sps:$4 sm:$0xff]  }
 0x279   :  { %4227 = vmatprep.subr.bf16.mxu1 %v12729_v31  ;;  %v12804_v31 = vld [vmem:[%s16610_s7 + $0x7e4] ss:$28 sps:$4 sm:$0xff]  }
 0x27b   :  { %v14292_v33 = vpop.f32.mrf.mxu0 }
 0x27c   :  { %4228 = vmatpush1.bf16.msra.mxu1 %v12727_v32  ;;  %v2166_v5 = vadd.f32 %v14292_v33, %v1326_v3  ;;  %v12802_v32 = vld [vmem:[%s16610_s7 + $0x7e0] ss:$28 sps:$4 sm:$0xff]   ;;  %v12808_v33 = vld [vmem:[%s16610_s7 + $0x7a8] ss:$28 sps:$4 sm:$0xff]  }
 0x27d   :  { %v14297_v36 = vpop.f32.mrf.mxu0  ;;  %4229 = vmatprep.subr.bf16.mxu1 %v12732_v52  ;;  %v12810_v52 = vld [vmem:[%s16610_s7 + $0x7ac] ss:$28 sps:$4 sm:$0xff]   ;;  %v12775_v3 = vld [vmem:[%s16610_s7 + $0x120] ss:$28 sps:$4 sm:$0xff]  }
 0x27e   :  { %v2168_v9 = vadd.f32 %v14297_v36, %v1330_v4  ;;  %v12814_v36 = vld [vmem:[%s16610_s7 + $0x770] ss:$28 sps:$4 sm:$0xff]  }
 0x27f   :  { %v2169_v38 = vpop.f32.mrf.mxu0  ;;  %v12780_v4 = vld [vmem:[%s16610_s7 + $0xec] ss:$28 sps:$4 sm:$0xff]  }
 0x280   :  { %4230 = vmatpush1.bf16.msra.mxu1 %v12730_v35  ;;  %v12816_v35 = vld [vmem:[%s16610_s7 + $0x774] ss:$28 sps:$4 sm:$0xff]  }
 0x281   :  { %v2170_v40 = vpop.f32.mrf.mxu0  ;;  %4231 = vmatprep.subr.bf16.mxu1 %v12735_v37  ;;  %v12822_v37 = vld [vmem:[%s16610_s7 + $0x73c] ss:$28 sps:$4 sm:$0xff]  }
 0x282   :  { %v12820_v38 = vld [vmem:[%s16610_s7 + $0x738] ss:$28 sps:$4 sm:$0xff]   ;;  %v12828_v40 = vld [vmem:[%s16610_s7 + $0x704] ss:$28 sps:$4 sm:$0xff]  }
 0x284   :  { %4232 = vmatpush1.bf16.msra.mxu1 %v12733_v39 }
 0x285   :  { %4233 = vmatprep.subr.bf16.mxu1 %v12738_v42 }
 0x288   :  { %4234 = vmatpush1.bf16.msra.mxu1 %v12736_v43 }
 0x289   :  { %4235 = vmatprep.subr.bf16.mxu1 %v12741_v45  ;;  %v12826_v45 = vld [vmem:[%s16610_s7 + $0x700] ss:$28 sps:$4 sm:$0xff]  }
 0x28c   :  { %4236 = vmatpush1.bf16.msra.mxu1 %v12739_v46 }
 0x28d   :  { %4237 = vmatprep.subr.bf16.mxu1 %v12744_v47  ;;  %v12834_v47 = vld [vmem:[%s16610_s7 + $0x514] ss:$28 sps:$4 sm:$0xff]  }
 0x290   :  { %4238 = vmatpush1.bf16.msra.mxu1 %v12742_v48 }
 0x291   :  { %4239 = vmatprep.subr.bf16.mxu1 %v12747_v49  ;;  %v1334_v49 = vrot.slane %v14380_v61, %v13929_v11 }
 0x294   :  { %4240 = vmatpush2.bf16.msra.mxu1 %v12745_v41  ;;  %v1338_v41 = vrot.slane %v14380_v61, %v13935_v13 }
 0x295   :  { %4241 = vmatprep.subr.bf16.mxu1 %v12750_v51 }
 0x298   :  { %4242 = vmatpush2.bf16.msra.mxu1 %v12748_v44 }
 0x299   :  { %4243 = vmatprep.subr.bf16.mxu1 %v12753_v53 }
 0x29c   :  { %4244 = vmatpush2.bf16.msra.mxu1 %v12751_v54 }
 0x29d   :  { %4245 = vmatprep.subr.bf16.mxu1 %v12756_v56 }
 0x2a0   :  { %4246 = vmatpush2.bf16.msra.mxu1 %v12754_v34 }
 0x2a1   :  { %4247 = vmatprep.subr.bf16.mxu1 %v12759_v57 }
 0x2a4   :  { %4248 = vmatpush2.bf16.msra.mxu1 %v12757_v58 }
 0x2a5   :  { %4249 = vmatprep.subr.bf16.mxu1 %v12762_v59 }
 0x2a8   :  { %4250 = vmatpush2.bf16.msra.mxu1 %v12760_v60 }
 0x2a9   :  { %4251 = vmatprep.subr.bf16.mxu1 %v12765_v63  ;;  %v12769_v63 = vld [vmem:[%s16610_s7 + $0x190] ss:$28 sps:$4 sm:$0xff]  }
 0x2ac   :  { %4252 = vmatpush2.bf16.msra.mxu1 %v12763_v0 }
 0x2ad   :  { %4253 = vmatprep.subr.bf16.mxu1 %v12768_v2  ;;  %v12774_v2 = vld [vmem:[%s16610_s7 + $0x15c] ss:$28 sps:$4 sm:$0xff]  }
 0x2b0   :  { %4254 = vmatpush2.bf16.msra.mxu1 %v12766_v62  ;;  %v12772_v62 = vld [vmem:[%s16610_s7 + $0x158] ss:$28 sps:$4 sm:$0xff]  }
 0x2b1   :  { %4305 = vmatprep.subr.bf16.mxu1 %v12771_v50  ;;  %v12777_v50 = vld [vmem:[%s16610_s7 + $0x124] ss:$28 sps:$4 sm:$0xff]  }
 0x2bb   :  { %v2206_v6 = vpop.f32.mrf.mxu1  ;;  %v2288_v7 = vpop.f32.mrf.mxu0 }
 0x2bc   :  { %v2207_v14 = vadd.f32 %v2206_v6, %v2166_v5  ;;  %v12778_v5 = vld [vmem:[%s16610_s7 + $0xe8] ss:$28 sps:$4 sm:$0xff]   ;;  %v12783_v6 = vld [vmem:[%s16610_s7 + $0xb4] ss:$28 sps:$4 sm:$0xff]  }
 0x2bd   :  { %v2208_v15 = vpop.f32.mrf.mxu1  ;;  %v2290_v16 = vpop.f32.mrf.mxu0 }
 0x2be   :  { %v2209_v17 = vadd.f32 %v2208_v15, %v2168_v9  ;;  %v2375_v18 = vmax.f32 %v2207_v14, 0.0  ;;  %v12789_v9 = vld [vmem:[%s16610_s7 + $0x7c] ss:$28 sps:$4 sm:$0xff]   ;;  %v12795_v15 = vld [vmem:[%s16610_s7 + $0x44] ss:$28 sps:$4 sm:$0xff]  }
 0x2bf   :  { %v2210_v19 = vpop.f32.mrf.mxu1  ;;  %v2292_v20 = vpop.f32.mrf.mxu0  ;;  %v12787_v14 = vld [vmem:[%s16610_s7 + $0x78] ss:$28 sps:$4 sm:$0xff]  }
 0x2c0   :  { %v2376_v21 = vmax.f32 %v2209_v17, 0.0  ;;  %v14393_v26 = vpack.c.bf16 %v2375_v18, %v2375_v18  ;;  %v12801_v17 = vld [vmem:[%s16610_s7 + $0xc] ss:$28 sps:$4 sm:$0xff]   ;;  %v12807_v19 = vld [vmem:[%s16610_s7 + $0x354] ss:$28 sps:$4 sm:$0xff]  }
 0x2c1   :  { %v2211_v22 = vpop.f32.mrf.mxu1  ;;  %v2293_v23 = vpop.f32.mrf.mxu0  ;;  %v12799_v18 = vld [vmem:[%s16610_s7 + $0x8] ss:$28 sps:$4 sm:$0xff]   ;;  %v12805_v20 = vld [vmem:[%s16610_s7 + $0x350] ss:$28 sps:$4 sm:$0xff]  }
 0x2c2   :  { %v14388_v24 = vpack.c.bf16 %v2376_v21, %v2376_v21  ;;  %v12813_v21 = vld [vmem:[%s16610_s7 + $0x31c] ss:$28 sps:$4 sm:$0xff]   ;;  %v12819_v23 = vld [vmem:[%s16610_s7 + $0x2e4] ss:$28 sps:$4 sm:$0xff]  }
 0x2c3   :  { %v12811_v22 = vld [vmem:[%s16610_s7 + $0x318] ss:$28 sps:$4 sm:$0xff]  }
 0x2c4   :  { %4214 = vmatprep.mubr.bf16.mxu0 %v14388_v24 }
 0x2c5   :  { %4215 = vmatmul.mubr.bf16.vlgmr.msra.gmra.mxu0 %v14393_v26 }
 0x2c6   :  { %4265 = vmatpush1.bf16.msra.mxu0 %v12784_v25  ;;  %4296 = vmatprep.mubr.bf16.mxu0 %v13625_v1  ;;  %v14517_v25 = vsub.s32 4, %v13920_v8 }
 0x2c7   :  { %4266 = vmatprep.subr.bf16.mxu0 %v12792_v27  ;;  %v12817_v27 = vld [vmem:[%s16610_s7 + $0x2e0] ss:$28 sps:$4 sm:$0xff]  }
 0x2ca   :  { %4267 = vmatpush1.bf16.msra.mxu0 %v12790_v28  ;;  %v12825_v28 = vld [vmem:[%s16610_s7 + $0x2ac] ss:$28 sps:$4 sm:$0xff]  }
 0x2cb   :  { %4268 = vmatprep.subr.bf16.mxu0 %v12798_v29  ;;  %v1342_v29 = vrot.slane %v14380_v61, %v14517_v25 }
 0x2ce   :  { %4269 = vmatpush1.bf16.msra.mxu0 %v12796_v30  ;;  %v12823_v30 = vld [vmem:[%s16610_s7 + $0x2a8] ss:$28 sps:$4 sm:$0xff]  }
 0x2cf   :  { %4270 = vmatprep.subr.bf16.mxu0 %v12804_v31  ;;  %v12831_v31 = vld [vmem:[%s16610_s7 + $0x274] ss:$28 sps:$4 sm:$0xff]  }
 0x2d2   :  { %4271 = vmatpush1.bf16.msra.mxu0 %v12802_v32 }
 0x2d3   :  { %4272 = vmatprep.subr.bf16.mxu0 %v12810_v52 }
 0x2d6   :  { %4273 = vmatpush1.bf16.msra.mxu0 %v12808_v33 }
 0x2d7   :  { %4274 = vmatprep.subr.bf16.mxu0 %v12816_v35  ;;  %v12829_v35 = vld [vmem:[%s16610_s7 + $0x270] ss:$28 sps:$4 sm:$0xff]  }
 0x2da   :  { %4275 = vmatpush1.bf16.msra.mxu0 %v12814_v36  ;;  %v12837_v36 = vld [vmem:[%s16610_s7 + $0x23c] ss:$28 sps:$4 sm:$0xff]  }
 0x2db   :  { %v12112_v39 = vpop.f32.mrf.mxu0  ;;  %4276 = vmatprep.subr.bf16.mxu0 %v12822_v37 }
 0x2dd   :  { %v12113_v42 = vpop.f32.mrf.mxu0 }
 0x2de   :  { %v14437_v43 = vadd.f32 %v12113_v42, %v12112_v39  ;;  %4277 = vmatpush1.bf16.msra.mxu0 %v12820_v38  ;;  %v12832_v39 = vld [vmem:[%s16610_s7 + $0x510] ss:$28 sps:$4 sm:$0xff]   ;;  %v12835_v42 = vld [vmem:[%s16610_s7 + $0x238] ss:$28 sps:$4 sm:$0xff]  }
 0x2df   :  { %v12115_v46 = vpop.f32.mrf.mxu0  ;;  %4278 = vmatprep.subr.bf16.mxu0 %v12828_v40 }
 0x2e0   :  { %v2330_v32 = vadd.f32 %v14437_v43, %v1342_v29  ;;  %v12840_v43 = vld [vmem:[%s16610_s7 + $0x4dc] ss:$28 sps:$4 sm:$0xff]   ;;  %v12843_v46 = vld [vmem:[%s16610_s7 + $0x204] ss:$28 sps:$4 sm:$0xff]  }
 0x2e1   :  { %v12116_v48 = vpop.f32.mrf.mxu0  ;;  %v12892_v29 = vld [vmem:[%s16610_s7 + $0x660] ss:$28 sps:$4 sm:$0xff]  }
 0x2e2   :  { %4279 = vmatpush1.bf16.msra.mxu0 %v12826_v45  ;;  %v12841_v48 = vld [vmem:[%s16610_s7 + $0x200] ss:$28 sps:$4 sm:$0xff]  }
 0x2e3   :  { %4346 = vmatprep.subr.bf16.mxu0 %v12834_v47  ;;  %v12838_v47 = vld [vmem:[%s16610_s7 + $0x4d8] ss:$28 sps:$4 sm:$0xff]  }
 0x2fb   :  { %v2247_v51 = vpop.f32.mrf.mxu1 }
 0x2fc   :  { %v2248_v44 = vadd.f32 %v2247_v51, %v1334_v49  ;;  %v12846_v49 = vld [vmem:[%s16610_s7 + $0x4a4] ss:$28 sps:$4 sm:$0xff]  }
 0x2fd   :  { %v2249_v53 = vpop.f32.mrf.mxu1  ;;  %v12844_v51 = vld [vmem:[%s16610_s7 + $0x4a0] ss:$28 sps:$4 sm:$0xff]  }
 0x2fe   :  { %v2289_v54 = vadd.f32 %v2288_v7, %v2248_v44  ;;  %v2250_v55 = vadd.f32 %v2249_v53, %v1338_v41  ;;  %v12781_v7 = vld [vmem:[%s16610_s7 + $0xb0] ss:$28 sps:$4 sm:$0xff]   ;;  %v12847_v44 = vld [vmem:[%s16610_s7 + $0x1c8] ss:$28 sps:$4 sm:$0xff]  }
 0x2ff   :  { %v2251_v56 = vpop.f32.mrf.mxu1  ;;  %v12849_v41 = vld [vmem:[%s16610_s7 + $0x1cc] ss:$28 sps:$4 sm:$0xff]  }
 0x300   :  { %v2291_v34 = vadd.f32 %v2290_v16, %v2250_v55  ;;  %v2377_v57 = vmax.f32 %v2289_v54, 0.0  ;;  %v12793_v16 = vld [vmem:[%s16610_s7 + $0x40] ss:$28 sps:$4 sm:$0xff]   ;;  %v12852_v53 = vld [vmem:[%s16610_s7 + $0x46c] ss:$28 sps:$4 sm:$0xff]  }
 0x301   :  { %v2252_v58 = vpop.f32.mrf.mxu1  ;;  %v12855_v54 = vld [vmem:[%s16610_s7 + $0x894] ss:$28 sps:$4 sm:$0xff]   ;;  %v12850_v55 = vld [vmem:[%s16610_s7 + $0x468] ss:$28 sps:$4 sm:$0xff]  }
 0x302   :  { %v2378_v59 = vmax.f32 %v2291_v34, 0.0  ;;  %v14454_v0 = vpack.c.bf16 %v2377_v57, %v2377_v57  ;;  %v12853_v56 = vld [vmem:[%s16610_s7 + $0x890] ss:$28 sps:$4 sm:$0xff]   ;;  %v12861_v57 = vld [vmem:[%s16610_s7 + $0x85c] ss:$28 sps:$4 sm:$0xff]  }
 0x303   :  { %v12858_v34 = vld [vmem:[%s16610_s7 + $0x434] ss:$28 sps:$4 sm:$0xff]  }
 0x304   :  { %v14449_v60 = vpack.c.bf16 %v2378_v59, %v2378_v59  ;;  %v12856_v58 = vld [vmem:[%s16610_s7 + $0x430] ss:$28 sps:$4 sm:$0xff]   ;;  %v12859_v59 = vld [vmem:[%s16610_s7 + $0x858] ss:$28 sps:$4 sm:$0xff]  }
 0x306   :  { %4255 = vmatprep.mubr.bf16.mxu1 %v14449_v60 }
 0x307   :  { %4256 = vmatmul.mubr.bf16.vlgmr.msra.gmra.mxu1 %v14454_v0 }
 0x308   :  { %4306 = vmatpush1.bf16.msra.mxu1 %v12769_v63  ;;  %4337 = vmatprep.mubr.bf16.mxu1 %v14388_v24  ;;  %v12864_v63 = vld [vmem:[%s16610_s7 + $0x3fc] ss:$28 sps:$4 sm:$0xff]  }
 0x309   :  { %4307 = vmatprep.subr.bf16.mxu1 %v12774_v2  ;;  %v12867_v2 = vld [vmem:[%s16610_s7 + $0x824] ss:$28 sps:$4 sm:$0xff]  }
 0x30c   :  { %4308 = vmatpush1.bf16.msra.mxu1 %v12772_v62  ;;  %v12862_v62 = vld [vmem:[%s16610_s7 + $0x3f8] ss:$28 sps:$4 sm:$0xff]  }
 0x30d   :  { %4309 = vmatprep.subr.bf16.mxu1 %v12777_v50  ;;  %v12865_v50 = vld [vmem:[%s16610_s7 + $0x820] ss:$28 sps:$4 sm:$0xff]  }
 0x310   :  { %4310 = vmatpush1.bf16.msra.mxu1 %v12775_v3  ;;  %v12870_v3 = vld [vmem:[%s16610_s7 + $0x3c4] ss:$28 sps:$4 sm:$0xff]  }
 0x311   :  { %4311 = vmatprep.subr.bf16.mxu1 %v12780_v4  ;;  %v12873_v4 = vld [vmem:[%s16610_s7 + $0x7ec] ss:$28 sps:$4 sm:$0xff]  }
 0x314   :  { %4312 = vmatpush1.bf16.msra.mxu1 %v12778_v5  ;;  %v12868_v5 = vld [vmem:[%s16610_s7 + $0x3c0] ss:$28 sps:$4 sm:$0xff]  }
 0x315   :  { %4313 = vmatprep.subr.bf16.mxu1 %v12783_v6  ;;  %v12871_v6 = vld [vmem:[%s16610_s7 + $0x7e8] ss:$28 sps:$4 sm:$0xff]  }
 0x318   :  { %4314 = vmatpush1.bf16.msra.mxu1 %v12781_v7  ;;  %v12876_v7 = vld [vmem:[%s16610_s7 + $0x38c] ss:$28 sps:$4 sm:$0xff]  }
 0x319   :  { %4315 = vmatprep.subr.bf16.mxu1 %v12789_v9  ;;  %v12879_v9 = vld [vmem:[%s16610_s7 + $0x7b4] ss:$28 sps:$4 sm:$0xff]  }
 0x31c   :  { %4316 = vmatpush1.bf16.msra.mxu1 %v12787_v14  ;;  %v12874_v14 = vld [vmem:[%s16610_s7 + $0x388] ss:$28 sps:$4 sm:$0xff]  }
 0x31d   :  { %4317 = vmatprep.subr.bf16.mxu1 %v12795_v15  ;;  %v12877_v15 = vld [vmem:[%s16610_s7 + $0x7b0] ss:$28 sps:$4 sm:$0xff]  }
 0x320   :  { %4318 = vmatpush1.bf16.msra.mxu1 %v12793_v16  ;;  %v12882_v16 = vld [vmem:[%s16610_s7 + $0x6d4] ss:$28 sps:$4 sm:$0xff]  }
 0x321   :  { %4319 = vmatprep.subr.bf16.mxu1 %v12801_v17  ;;  %v12885_v17 = vld [vmem:[%s16610_s7 + $0x77c] ss:$28 sps:$4 sm:$0xff]  }
 0x324   :  { %4320 = vmatpush1.bf16.msra.mxu1 %v12799_v18  ;;  %v12880_v18 = vld [vmem:[%s16610_s7 + $0x6d0] ss:$28 sps:$4 sm:$0xff]  }
 0x325   :  { %4321 = vmatprep.subr.bf16.mxu1 %v12807_v19  ;;  %v12883_v19 = vld [vmem:[%s16610_s7 + $0x778] ss:$28 sps:$4 sm:$0xff]  }
 0x328   :  { %4322 = vmatpush2.bf16.msra.mxu1 %v12805_v20  ;;  %v12888_v20 = vld [vmem:[%s16610_s7 + $0x69c] ss:$28 sps:$4 sm:$0xff]  }
 0x329   :  { %4323 = vmatprep.subr.bf16.mxu1 %v12813_v21  ;;  %v12891_v21 = vld [vmem:[%s16610_s7 + $0x744] ss:$28 sps:$4 sm:$0xff]  }
 0x32c   :  { %4324 = vmatpush2.bf16.msra.mxu1 %v12811_v22  ;;  %v12886_v22 = vld [vmem:[%s16610_s7 + $0x698] ss:$28 sps:$4 sm:$0xff]  }
 0x32d   :  { %4325 = vmatprep.subr.bf16.mxu1 %v12819_v23  ;;  %v12889_v23 = vld [vmem:[%s16610_s7 + $0x740] ss:$28 sps:$4 sm:$0xff]  }
 0x330   :  { %4326 = vmatpush2.bf16.msra.mxu1 %v12817_v27  ;;  %v12894_v27 = vld [vmem:[%s16610_s7 + $0x664] ss:$28 sps:$4 sm:$0xff]  }
 0x331   :  { %4327 = vmatprep.subr.bf16.mxu1 %v12825_v28  ;;  %v12897_v28 = vld [vmem:[%s16610_s7 + $0x70c] ss:$28 sps:$4 sm:$0xff]  }
 0x333   :  { %v2369_v52 = vpop.f32.mrf.mxu1 }
 0x334   :  { %v2370_v33 = vadd.f32 %v2369_v52, %v2330_v32  ;;  %4328 = vmatpush2.bf16.msra.mxu1 %v12823_v30  ;;  %v12895_v30 = vld [vmem:[%s16610_s7 + $0x708] ss:$28 sps:$4 sm:$0xff]   ;;  %v12903_v32 = vld [vmem:[%s16610_s7 + $0x51c] ss:$28 sps:$4 sm:$0xff]  }
 0x335   :  { %v2371_v61 = vpop.f32.mrf.mxu1  ;;  %4329 = vmatprep.subr.bf16.mxu1 %v12831_v31  ;;  %v12900_v31 = vld [vmem:[%s16610_s7 + $0x62c] ss:$28 sps:$4 sm:$0xff]  }
 0x336   :  { %v2379_v37 = vmax.f32 %v2370_v33, 0.0  ;;  %v12898_v52 = vld [vmem:[%s16610_s7 + $0x628] ss:$28 sps:$4 sm:$0xff]   ;;  %v12901_v33 = vld [vmem:[%s16610_s7 + $0x518] ss:$28 sps:$4 sm:$0xff]  }
 0x337   :  { %v2372_v38 = vpop.f32.mrf.mxu1  ;;  %v12909_v61 = vld [vmem:[%s16610_s7 + $0x4e4] ss:$28 sps:$4 sm:$0xff]  }
 0x338   :  { %v14543_v40 = vpack.c.bf16 %v2379_v37, %v2379_v37  ;;  %4330 = vmatpush2.bf16.msra.mxu1 %v12829_v35  ;;  %v12906_v35 = vld [vmem:[%s16610_s7 + $0x5f4] ss:$28 sps:$4 sm:$0xff]   ;;  %v12907_v37 = vld [vmem:[%s16610_s7 + $0x4e0] ss:$28 sps:$4 sm:$0xff]  }
 0x339   :  { %v2373_v45 = vpop.f32.mrf.mxu1  ;;  %4331 = vmatprep.subr.bf16.mxu1 %v12837_v36  ;;  %v12904_v36 = vld [vmem:[%s16610_s7 + $0x5f0] ss:$28 sps:$4 sm:$0xff]   ;;  %v12912_v38 = vld [vmem:[%s16610_s7 + $0x5bc] ss:$28 sps:$4 sm:$0xff]  }
 0x33a   :  { %4297 = vmatmul.mubr.bf16.vlgmr.msra.gmra.mxu0 %v14543_v40  ;;  %v12918_v45 = vld [vmem:[%s16610_s7 + $0x584] ss:$28 sps:$4 sm:$0xff]  }
 0x33b   :  { %4347 = vmatpush1.bf16.msra.mxu0 %v12832_v39  ;;  %4378 = vmatprep.mubr.bf16.mxu0 %v14449_v60  ;;  %v12915_v39 = vld [vmem:[%s16610_s7 + $0x4ac] ss:$28 sps:$4 sm:$0xff]  }
 0x33c   :  { %4332 = vmatpush2.bf16.msra.mxu1 %v12835_v42  ;;  %4348 = vmatprep.subr.bf16.mxu0 %v12840_v43  ;;  %v12910_v42 = vld [vmem:[%s16610_s7 + $0x5b8] ss:$28 sps:$4 sm:$0xff]   ;;  %v12913_v43 = vld [vmem:[%s16610_s7 + $0x4a8] ss:$28 sps:$4 sm:$0xff]  }
 0x33d   :  { %4333 = vmatprep.subr.bf16.mxu1 %v12843_v46  ;;  %v12921_v46 = vld [vmem:[%s16610_s7 + $0x474] ss:$28 sps:$4 sm:$0xff]  }
 0x33f   :  { %4349 = vmatpush1.bf16.msra.mxu0 %v12838_v47  ;;  %v12916_v47 = vld [vmem:[%s16610_s7 + $0x580] ss:$28 sps:$4 sm:$0xff]  }
 0x340   :  { %4334 = vmatpush2.bf16.msra.mxu1 %v12841_v48  ;;  %4350 = vmatprep.subr.bf16.mxu0 %v12846_v49  ;;  %v12919_v48 = vld [vmem:[%s16610_s7 + $0x470] ss:$28 sps:$4 sm:$0xff]  }
 0x341   :  { %4335 = vmatprep.subr.bf16.mxu1 %v12849_v41  ;;  %v12924_v49 = vld [vmem:[%s16610_s7 + $0x54c] ss:$28 sps:$4 sm:$0xff]   ;;  %v12927_v41 = vld [vmem:[%s16610_s7 + $0x43c] ss:$28 sps:$4 sm:$0xff]  }
 0x343   :  { %4351 = vmatpush1.bf16.msra.mxu0 %v12844_v51  ;;  %v12922_v51 = vld [vmem:[%s16610_s7 + $0x548] ss:$28 sps:$4 sm:$0xff]  }
 0x344   :  { %4336 = vmatpush2.bf16.msra.mxu1 %v12847_v44  ;;  %4352 = vmatprep.subr.bf16.mxu0 %v12852_v53  ;;  %v12925_v44 = vld [vmem:[%s16610_s7 + $0x438] ss:$28 sps:$4 sm:$0xff]  }
 0x345   :  { %4387 = vmatprep.subr.bf16.mxu1 %v12855_v54  ;;  %v12930_v53 = vld [vmem:[%s16610_s7 + $0x19c] ss:$28 sps:$4 sm:$0xff]   ;;  %v12933_v54 = vld [vmem:[%s16610_s7 + $0x404] ss:$28 sps:$4 sm:$0xff]  }
 0x347   :  { %4338 = vmatmul.mubr.bf16.vlgmr.msra.gmra.mxu1 %v14393_v26  ;;  %4353 = vmatpush1.bf16.msra.mxu0 %v12850_v55  ;;  %v12928_v55 = vld [vmem:[%s16610_s7 + $0x198] ss:$28 sps:$4 sm:$0xff]  }
 0x348   :  { %4388 = vmatpush1.bf16.msra.mxu1 %v12853_v56  ;;  %4354 = vmatprep.subr.bf16.mxu0 %v12858_v34  ;;  %v12931_v56 = vld [vmem:[%s16610_s7 + $0x400] ss:$28 sps:$4 sm:$0xff]  }
 0x349   :  { %4389 = vmatprep.subr.bf16.mxu1 %v12861_v57  ;;  %4419 = vmatprep.mubr.bf16.mxu1 %v13625_v1  ;;  %v12936_v34 = vld [vmem:[%s16610_s7 + $0x164] ss:$28 sps:$4 sm:$0xff]   ;;  %v12939_v57 = vld [vmem:[%s16610_s7 + $0x3cc] ss:$28 sps:$4 sm:$0xff]  }
 0x34b   :  { %4355 = vmatpush1.bf16.msra.mxu0 %v12856_v58  ;;  %v12934_v58 = vld [vmem:[%s16610_s7 + $0x160] ss:$28 sps:$4 sm:$0xff]  }
 0x34c   :  { %4390 = vmatpush1.bf16.msra.mxu1 %v12859_v59  ;;  %4356 = vmatprep.subr.bf16.mxu0 %v12864_v63  ;;  %v12937_v59 = vld [vmem:[%s16610_s7 + $0x3c8] ss:$28 sps:$4 sm:$0xff]  }
 0x34d   :  { %4391 = vmatprep.subr.bf16.mxu1 %v12867_v2  ;;  %v12942_v63 = vld [vmem:[%s16610_s7 + $0x12c] ss:$28 sps:$4 sm:$0xff]   ;;  %v12945_v2 = vld [vmem:[%s16610_s7 + $0x394] ss:$28 sps:$4 sm:$0xff]  }
 0x34f   :  { %4357 = vmatpush1.bf16.msra.mxu0 %v12862_v62  ;;  %v12940_v62 = vld [vmem:[%s16610_s7 + $0x128] ss:$28 sps:$4 sm:$0xff]  }
 0x350   :  { %4392 = vmatpush1.bf16.msra.mxu1 %v12865_v50  ;;  %4358 = vmatprep.subr.bf16.mxu0 %v12870_v3  ;;  %v12943_v50 = vld [vmem:[%s16610_s7 + $0x390] ss:$28 sps:$4 sm:$0xff]  }
 0x351   :  { %4393 = vmatprep.subr.bf16.mxu1 %v12873_v4  ;;  %v12948_v3 = vld [vmem:[%s16610_s7 + $0xf4] ss:$28 sps:$4 sm:$0xff]   ;;  %v12951_v4 = vld [vmem:[%s16610_s7 + $0x6dc] ss:$28 sps:$4 sm:$0xff]  }
 0x353   :  { %4359 = vmatpush1.bf16.msra.mxu0 %v12868_v5  ;;  %v12946_v5 = vld [vmem:[%s16610_s7 + $0xf0] ss:$28 sps:$4 sm:$0xff]  }
 0x354   :  { %4394 = vmatpush1.bf16.msra.mxu1 %v12871_v6  ;;  %4360 = vmatprep.subr.bf16.mxu0 %v12876_v7  ;;  %v12949_v6 = vld [vmem:[%s16610_s7 + $0x6d8] ss:$28 sps:$4 sm:$0xff]  }
 0x355   :  { %4395 = vmatprep.subr.bf16.mxu1 %v12879_v9  ;;  %v12954_v7 = vld [vmem:[%s16610_s7 + $0xbc] ss:$28 sps:$4 sm:$0xff]  }
 0x357   :  { %4361 = vmatpush1.bf16.msra.mxu0 %v12874_v14  ;;  %v12957_v14 = vld [vmem:[%s16610_s7 + $0x6a4] ss:$28 sps:$4 sm:$0xff]  }
 0x358   :  { %4396 = vmatpush1.bf16.msra.mxu1 %v12877_v15  ;;  %4362 = vmatprep.subr.bf16.mxu0 %v12882_v16  ;;  %v12952_v16 = vld [vmem:[%s16610_s7 + $0xb8] ss:$28 sps:$4 sm:$0xff]  }
 0x359   :  { %4397 = vmatprep.subr.bf16.mxu1 %v12885_v17  ;;  %v12955_v17 = vld [vmem:[%s16610_s7 + $0x6a0] ss:$28 sps:$4 sm:$0xff]  }
 0x35b   :  { %4363 = vmatpush2.bf16.msra.mxu0 %v12880_v18  ;;  %v12960_v18 = vld [vmem:[%s16610_s7 + $0x84] ss:$28 sps:$4 sm:$0xff]  }
 0x35c   :  { %4398 = vmatpush1.bf16.msra.mxu1 %v12883_v19  ;;  %4364 = vmatprep.subr.bf16.mxu0 %v12888_v20  ;;  %v12963_v20 = vld [vmem:[%s16610_s7 + $0x66c] ss:$28 sps:$4 sm:$0xff]  }
 0x35d   :  { %4399 = vmatprep.subr.bf16.mxu1 %v12891_v21 }
 0x35f   :  { %4365 = vmatpush2.bf16.msra.mxu0 %v12886_v22  ;;  %v12958_v22 = vld [vmem:[%s16610_s7 + $0x80] ss:$28 sps:$4 sm:$0xff]  }
 0x360   :  { %4400 = vmatpush1.bf16.msra.mxu1 %v12889_v23  ;;  %4366 = vmatprep.subr.bf16.mxu0 %v12894_v27  ;;  %v12961_v23 = vld [vmem:[%s16610_s7 + $0x668] ss:$28 sps:$4 sm:$0xff]  }
 0x361   :  { %4401 = vmatprep.subr.bf16.mxu1 %v12897_v28  ;;  %v12966_v27 = vld [vmem:[%s16610_s7 + $0x4c] ss:$28 sps:$4 sm:$0xff]   ;;  %v12969_v28 = vld [vmem:[%s16610_s7 + $0x634] ss:$28 sps:$4 sm:$0xff]  }
 0x363   :  { %4367 = vmatpush2.bf16.msra.mxu0 %v12892_v29  ;;  %v12964_v29 = vld [vmem:[%s16610_s7 + $0x48] ss:$28 sps:$4 sm:$0xff]  }
 0x364   :  { %4402 = vmatpush1.bf16.msra.mxu1 %v12895_v30  ;;  %4368 = vmatprep.subr.bf16.mxu0 %v12900_v31  ;;  %v12967_v30 = vld [vmem:[%s16610_s7 + $0x630] ss:$28 sps:$4 sm:$0xff]  }
 0x365   :  { %4469 = vmatprep.subr.bf16.mxu1 %v12903_v32  ;;  %v12972_v31 = vld [vmem:[%s16610_s7 + $0x14] ss:$28 sps:$4 sm:$0xff]   ;;  %v12975_v32 = vld [vmem:[%s16610_s7 + $0x5fc] ss:$28 sps:$4 sm:$0xff]  }
 0x367   :  { %4369 = vmatpush2.bf16.msra.mxu0 %v12898_v52  ;;  %4420 = vmatmul.mubr.bf16.vlgmr.msra.gmra.mxu1 %v14543_v40  ;;  %v12970_v52 = vld [vmem:[%s16610_s7 + $0x10] ss:$28 sps:$4 sm:$0xff]  }
 0x368   :  { %4470 = vmatpush1.bf16.msra.mxu1 %v12901_v33  ;;  %4501 = vmatprep.mubr.bf16.mxu1 %v14449_v60  ;;  %v12973_v33 = vld [vmem:[%s16610_s7 + $0x5f8] ss:$28 sps:$4 sm:$0xff]  }
 0x369   :  { %4370 = vmatprep.subr.bf16.mxu0 %v12906_v35  ;;  %4471 = vmatprep.subr.bf16.mxu1 %v12909_v61  ;;  %v12978_v35 = vld [vmem:[%s16610_s7 + $0x35c] ss:$28 sps:$4 sm:$0xff]   ;;  %v12981_v61 = vld [vmem:[%s16610_s7 + $0x5c4] ss:$28 sps:$4 sm:$0xff]  }
 0x36b   :  { %4371 = vmatpush2.bf16.msra.mxu0 %v12904_v36  ;;  %v12976_v36 = vld [vmem:[%s16610_s7 + $0x358] ss:$28 sps:$4 sm:$0xff]  }
 0x36c   :  { %4472 = vmatpush1.bf16.msra.mxu1 %v12907_v37  ;;  %4372 = vmatprep.subr.bf16.mxu0 %v12912_v38  ;;  %v12979_v37 = vld [vmem:[%s16610_s7 + $0x5c0] ss:$28 sps:$4 sm:$0xff]  }
 0x36d   :  { %4473 = vmatprep.subr.bf16.mxu1 %v12915_v39  ;;  %v12984_v38 = vld [vmem:[%s16610_s7 + $0x324] ss:$28 sps:$4 sm:$0xff]   ;;  %v12987_v39 = vld [vmem:[%s16610_s7 + $0x58c] ss:$28 sps:$4 sm:$0xff]  }
 0x36f   :  { %4373 = vmatpush2.bf16.msra.mxu0 %v12910_v42  ;;  %v12982_v42 = vld [vmem:[%s16610_s7 + $0x320] ss:$28 sps:$4 sm:$0xff]  }
 0x370   :  { %4474 = vmatpush1.bf16.msra.mxu1 %v12913_v43  ;;  %4374 = vmatprep.subr.bf16.mxu0 %v12918_v45  ;;  %v12985_v43 = vld [vmem:[%s16610_s7 + $0x588] ss:$28 sps:$4 sm:$0xff]  }
 0x371   :  { %4475 = vmatprep.subr.bf16.mxu1 %v12921_v46  ;;  %v12990_v45 = vld [vmem:[%s16610_s7 + $0x2ec] ss:$28 sps:$4 sm:$0xff]   ;;  %v12993_v46 = vld [vmem:[%s16610_s7 + $0x554] ss:$28 sps:$4 sm:$0xff]  }
 0x373   :  { %4375 = vmatpush2.bf16.msra.mxu0 %v12916_v47  ;;  %v12988_v47 = vld [vmem:[%s16610_s7 + $0x2e8] ss:$28 sps:$4 sm:$0xff]  }
 0x374   :  { %4476 = vmatpush1.bf16.msra.mxu1 %v12919_v48  ;;  %4376 = vmatprep.subr.bf16.mxu0 %v12924_v49  ;;  %v12991_v48 = vld [vmem:[%s16610_s7 + $0x550] ss:$28 sps:$4 sm:$0xff]  }
 0x375   :  { %4477 = vmatprep.subr.bf16.mxu1 %v12927_v41  ;;  %v12996_v49 = vld [vmem:[%s16610_s7 + $0x2b4] ss:$28 sps:$4 sm:$0xff]   ;;  %v12997_v41 = vld [vmem:[%s16610_s7 + $0x360] ss:$28 sps:$4 sm:$0xff]  }
 0x377   :  { %4377 = vmatpush2.bf16.msra.mxu0 %v12922_v51  ;;  %v12994_v51 = vld [vmem:[%s16610_s7 + $0x2b0] ss:$28 sps:$4 sm:$0xff]  }
 0x378   :  { %4478 = vmatpush1.bf16.msra.mxu1 %v12925_v44  ;;  %4428 = vmatprep.subr.bf16.mxu0 %v12930_v53  ;;  %v12998_v44 = vld [vmem:[%s16610_s7 + $0x1a0] ss:$28 sps:$4 sm:$0xff]  }
 0x379   :  { %4479 = vmatprep.subr.bf16.mxu1 %v12933_v54  ;;  %v13001_v53 = vld [vmem:[%s16610_s7 + $0x27c] ss:$28 sps:$4 sm:$0xff]   ;;  %v13002_v54 = vld [vmem:[%s16610_s7 + $0x328] ss:$28 sps:$4 sm:$0xff]  }
 0x37a   :  { %4379 = vmatmul.mubr.bf16.vlgmr.msra.gmra.mxu0 %v14454_v0 }
 0x37b   :  { %4429 = vmatpush1.bf16.msra.mxu0 %v12928_v55  ;;  %4460 = vmatprep.mubr.bf16.mxu0 %v14388_v24  ;;  %v12999_v55 = vld [vmem:[%s16610_s7 + $0x278] ss:$28 sps:$4 sm:$0xff]  }
 0x37c   :  { %4480 = vmatpush1.bf16.msra.mxu1 %v12931_v56  ;;  %4430 = vmatprep.subr.bf16.mxu0 %v12936_v34  ;;  %v13003_v56 = vld [vmem:[%s16610_s7 + $0x168] ss:$28 sps:$4 sm:$0xff]  }
 0x37d   :  { %4481 = vmatprep.subr.bf16.mxu1 %v12939_v57  ;;  %v13006_v34 = vld [vmem:[%s16610_s7 + $0x244] ss:$28 sps:$4 sm:$0xff]   ;;  %v13007_v57 = vld [vmem:[%s16610_s7 + $0x2f0] ss:$28 sps:$4 sm:$0xff]  }
 0x37f   :  { %4431 = vmatpush1.bf16.msra.mxu0 %v12934_v58  ;;  %v13004_v58 = vld [vmem:[%s16610_s7 + $0x240] ss:$28 sps:$4 sm:$0xff]  }
 0x380   :  { %4482 = vmatpush1.bf16.msra.mxu1 %v12937_v59  ;;  %4432 = vmatprep.subr.bf16.mxu0 %v12942_v63  ;;  %v13011_v59 = vld [vmem:[%s16610_s7 + $0x20c] ss:$28 sps:$4 sm:$0xff]   ;;  %v13012_v63 = vld [vmem:[%s16610_s7 + $0x2b8] ss:$28 sps:$4 sm:$0xff]  }
 0x381   :  { %4483 = vmatprep.subr.bf16.mxu1 %v12945_v2  ;;  %v13009_v2 = vld [vmem:[%s16610_s7 + $0x208] ss:$28 sps:$4 sm:$0xff]  }
 0x383   :  { %4433 = vmatpush1.bf16.msra.mxu0 %v12940_v62  ;;  %v13013_v62 = vld [vmem:[%s16610_s7 + $0xf8] ss:$28 sps:$4 sm:$0xff]  }
 0x384   :  { %4484 = vmatpush1.bf16.msra.mxu1 %v12943_v50  ;;  %4434 = vmatprep.subr.bf16.mxu0 %v12948_v3  ;;  %v13016_v50 = vld [vmem:[%s16610_s7 + $0x1d4] ss:$28 sps:$4 sm:$0xff]   ;;  %v13017_v3 = vld [vmem:[%s16610_s7 + $0x280] ss:$28 sps:$4 sm:$0xff]  }
 0x385   :  { %v14787_v9 = vpop.f32.mrf.mxu0  ;;  %4485 = vmatprep.subr.bf16.mxu1 %v12951_v4  ;;  %v13014_v4 = vld [vmem:[%s16610_s7 + $0x1d0] ss:$28 sps:$4 sm:$0xff]  }
 0x387   :  { %4435 = vmatpush1.bf16.msra.mxu0 %v12946_v5  ;;  %v14792_v15 = vpop.f32.mrf.mxu0  ;;  %v13018_v5 = vld [vmem:[%s16610_s7 + $0xc0] ss:$28 sps:$4 sm:$0xff]  }
 0x388   :  { %4486 = vmatpush2.bf16.msra.mxu1 %v12949_v6  ;;  %4436 = vmatprep.subr.bf16.mxu0 %v12954_v7  ;;  %v13021_v6 = vld [vmem:[%s16610_s7 + $0x89c] ss:$28 sps:$4 sm:$0xff]   ;;  %v13022_v7 = vld [vmem:[%s16610_s7 + $0x248] ss:$28 sps:$4 sm:$0xff]  }
 0x389   :  { %v4220_v19 = vpop.f32.mrf.mxu0  ;;  %4487 = vmatprep.subr.bf16.mxu1 %v12957_v14  ;;  %v13019_v14 = vld [vmem:[%s16610_s7 + $0x898] ss:$28 sps:$4 sm:$0xff]  }
 0x38a   :  { %v13024_v19 = vld [vmem:[%s16610_s7 + $0x860] ss:$28 sps:$4 sm:$0xff]  }
 0x38b   :  { %4437 = vmatpush1.bf16.msra.mxu0 %v12952_v16  ;;  %v4221_v21 = vpop.f32.mrf.mxu0  ;;  %v13023_v16 = vld [vmem:[%s16610_s7 + $0x88] ss:$28 sps:$4 sm:$0xff]  }
 0x38c   :  { %4488 = vmatpush2.bf16.msra.mxu1 %v12955_v17  ;;  %4438 = vmatprep.subr.bf16.mxu0 %v12960_v18  ;;  %v13026_v17 = vld [vmem:[%s16610_s7 + $0x864] ss:$28 sps:$4 sm:$0xff]   ;;  %v13027_v18 = vld [vmem:[%s16610_s7 + $0x210] ss:$28 sps:$4 sm:$0xff]  }
 0x38d   :  { %4489 = vmatprep.subr.bf16.mxu1 %v12963_v20  ;;  %v13028_v20 = vld [vmem:[%s16610_s7 + $0x50] ss:$28 sps:$4 sm:$0xff]  }
 0x38e   :  { %v13031_v21 = vld [vmem:[%s16610_s7 + $0x82c] ss:$28 sps:$4 sm:$0xff]  }
 0x38f   :  { %4439 = vmatpush1.bf16.msra.mxu0 %v12958_v22  ;;  %v13032_v22 = vld [vmem:[%s16610_s7 + $0x1d8] ss:$28 sps:$4 sm:$0xff]  }
 0x390   :  { %4490 = vmatpush2.bf16.msra.mxu1 %v12961_v23  ;;  %4440 = vmatprep.subr.bf16.mxu0 %v12966_v27  ;;  %v14969_v23 = vld [vmem:[%s16611_s8] sm:$0x7f] }
 0x391   :  { %4491 = vmatprep.subr.bf16.mxu1 %v12969_v28  ;;  %v13029_v27 = vld [vmem:[%s16610_s7 + $0x828] ss:$28 sps:$4 sm:$0xff]   ;;  %v13033_v28 = vld [vmem:[%s16610_s7 + $0x18] ss:$28 sps:$4 sm:$0xff]  }
 0x393   :  { %4441 = vmatpush1.bf16.msra.mxu0 %v12964_v29  ;;  %v13036_v29 = vld [vmem:[%s16610_s7 + $0x7f4] ss:$28 sps:$4 sm:$0xff]  }
 0x394   :  { %4492 = vmatpush2.bf16.msra.mxu1 %v12967_v30  ;;  %4442 = vmatprep.subr.bf16.mxu0 %v12972_v31  ;;  %v2710_v30 = vrot.slane %v14969_v23, %v13926_v10  ;;  %v13034_v31 = vld [vmem:[%s16610_s7 + $0x7f0] ss:$28 sps:$4 sm:$0xff]  }
 0x395   :  { %4493 = vmatprep.subr.bf16.mxu1 %v12975_v32  ;;  %v13037_v32 = vld [vmem:[%s16610_s7 + $0x8a0] ss:$28 sps:$4 sm:$0xff]  }
 0x397   :  { %4443 = vmatpush1.bf16.msra.mxu0 %v12970_v52  ;;  %v13040_v52 = vld [vmem:[%s16610_s7 + $0x7bc] ss:$28 sps:$4 sm:$0xff]  }
 0x398   :  { %4494 = vmatpush2.bf16.msra.mxu1 %v12973_v33  ;;  %4444 = vmatprep.subr.bf16.mxu0 %v12978_v35  ;;  %v13626_v33 = vmov 0.0   ;;  %v4217_v35 = vadd.f32 %v14787_v9, %v2710_v30  ;;  %v13044_v9 = vld [vmem:[%s16610_s7 + $0x784] ss:$28 sps:$4 sm:$0xff]   ;;  %v13073_v30 = vld [vmem:[#allocation5 + $0x188] ss:$28 sps:$4 sm:$0xff]  }
 0x399   :  { %4495 = vmatprep.subr.bf16.mxu1 %v12981_v61 }
 0x39b   :  { %4445 = vmatpush2.bf16.msra.mxu0 %v12976_v36  ;;  %v13038_v36 = vld [vmem:[%s16610_s7 + $0x7b8] ss:$28 sps:$4 sm:$0xff]  }
 0x39c   :  { %4496 = vmatpush2.bf16.msra.mxu1 %v12979_v37  ;;  %4446 = vmatprep.subr.bf16.mxu0 %v12984_v38  ;;  %v13041_v38 = vld [vmem:[%s16610_s7 + $0x868] ss:$28 sps:$4 sm:$0xff]  }
 0x39d   :  { %4497 = vmatprep.subr.bf16.mxu1 %v12987_v39 }
 0x39f   :  { %4447 = vmatpush2.bf16.msra.mxu0 %v12982_v42  ;;  %v13042_v42 = vld [vmem:[%s16610_s7 + $0x780] ss:$28 sps:$4 sm:$0xff]  }
 0x3a0   :  { %4498 = vmatpush2.bf16.msra.mxu1 %v12985_v43  ;;  %4448 = vmatprep.subr.bf16.mxu0 %v12990_v45  ;;  %v13045_v43 = vld [vmem:[%s16610_s7 + $0x830] ss:$28 sps:$4 sm:$0xff]  }
 0x3a1   :  { %4499 = vmatprep.subr.bf16.mxu1 %v12993_v46  ;;  %v13048_v45 = vld [vmem:[%s16610_s7 + $0x74c] ss:$28 sps:$4 sm:$0xff]  }
 0x3a3   :  { %4449 = vmatpush2.bf16.msra.mxu0 %v12988_v47  ;;  %v13046_v47 = vld [vmem:[%s16610_s7 + $0x748] ss:$28 sps:$4 sm:$0xff]  }
 0x3a4   :  { %4500 = vmatpush2.bf16.msra.mxu1 %v12991_v48  ;;  %4450 = vmatprep.subr.bf16.mxu0 %v12996_v49  ;;  %v13049_v48 = vld [vmem:[%s16610_s7 + $0x7f8] ss:$28 sps:$4 sm:$0xff]  }
 0x3a5   :  { %12118 = vmatprep.subr.bf16.mxu1 %v12997_v41  ;;  %v13052_v49 = vld [vmem:[%s16610_s7 + $0x714] ss:$28 sps:$4 sm:$0xff]  }
 0x3a6   :  { %v13050_v41 = vld [vmem:[%s16610_s7 + $0x710] ss:$28 sps:$4 sm:$0xff]  }
 0x3a7   :  { %4451 = vmatpush2.bf16.msra.mxu0 %v12994_v51  ;;  %4502 = vmatmul.mubr.bf16.vlgmr.msra.gmra.mxu1 %v14454_v0  ;;  %v13053_v51 = vld [vmem:[%s16610_s7 + $0x7c0] ss:$28 sps:$4 sm:$0xff]  }
 0x3a8   :  { %12119 = vmatpush3.bf16.msra.mxu1 %v12998_v44  ;;  %4583 = vmatprep.mubr.bf16.mxu1 %v14388_v24  ;;  %v13008_v24 = vld [vmem:[%s16610_s7 + $0x130] ss:$28 sps:$4 sm:$0xff]   ;;  %v13054_v44 = vld [vmem:[%s16610_s7 + $0x6e0] ss:$28 sps:$4 sm:$0xff]  }
 0x3a9   :  { %4452 = vmatprep.subr.bf16.mxu0 %v13001_v53  ;;  %12120 = vmatprep.subr.bf16.mxu1 %v13002_v54  ;;  %v13055_v53 = vld [vmem:[%s16610_s7 + $0x520] ss:$28 sps:$4 sm:$0xff]   ;;  %v13056_v54 = vld [vmem:[%s16610_s7 + $0x788] ss:$28 sps:$4 sm:$0xff]  }
 0x3ab   :  { %4453 = vmatpush2.bf16.msra.mxu0 %v12999_v55  ;;  %v13057_v55 = vld [vmem:[%s16610_s7 + $0x6a8] ss:$28 sps:$4 sm:$0xff]  }
 0x3ac   :  { %12121 = vmatpush3.bf16.msra.mxu1 %v13003_v56  ;;  %4454 = vmatprep.subr.bf16.mxu0 %v13006_v34  ;;  %v13058_v56 = vld [vmem:[%s16610_s7 + $0x4e8] ss:$28 sps:$4 sm:$0xff]   ;;  %v13059_v34 = vld [vmem:[%s16610_s7 + $0x750] ss:$28 sps:$4 sm:$0xff]  }
 0x3ad   :  { %12122 = vmatprep.subr.bf16.mxu1 %v13007_v57  ;;  %v13060_v57 = vld [vmem:[%s16610_s7 + $0x670] ss:$28 sps:$4 sm:$0xff]  }
 0x3af   :  { %4455 = vmatpush2.bf16.msra.mxu0 %v13004_v58  ;;  %v13062_v58 = vld [vmem:[%s16610_s7 + $0x718] ss:$28 sps:$4 sm:$0xff]  }
 0x3b0   :  { %12123 = vmatpush3.bf16.msra.mxu1 %v13008_v24  ;;  %4456 = vmatprep.subr.bf16.mxu0 %v13011_v59  ;;  %v13063_v24 = vld [vmem:[%s16610_s7 + $0x638] ss:$28 sps:$4 sm:$0xff]  }
 0x3b1   :  { %12124 = vmatprep.subr.bf16.mxu1 %v13012_v63  ;;  %v13087_v59 = vld [vmem:[#allocation5 + $0x50c] ss:$28 sps:$4 sm:$0xff]  }
 0x3b2   :  { %v13064_v63 = vld [vmem:[%s16610_s7 + $0x478] ss:$28 sps:$4 sm:$0xff]  }
 0x3b3   :  { %4457 = vmatpush2.bf16.msra.mxu0 %v13009_v2  ;;  %v13065_v2 = vld [vmem:[%s16610_s7 + $0x600] ss:$28 sps:$4 sm:$0xff]  }
 0x3b4   :  { %12125 = vmatpush3.bf16.msra.mxu1 %v13013_v62  ;;  %4458 = vmatprep.subr.bf16.mxu0 %v13016_v50  ;;  %v13085_v62 = vld [vmem:[#allocation5 + $0x508] ss:$28 sps:$4 sm:$0xff]   ;;  %v13093_v50 = vld [vmem:[#allocation5 + $0x4d4] ss:$28 sps:$4 sm:$0xff]  }
 0x3b5   :  { %12126 = vmatprep.subr.bf16.mxu1 %v13017_v3  ;;  %v13066_v3 = vld [vmem:[%s16610_s7 + $0x440] ss:$28 sps:$4 sm:$0xff]  }
 0x3b7   :  { %4459 = vmatpush2.bf16.msra.mxu0 %v13014_v4  ;;  %v13067_v4 = vld [vmem:[%s16610_s7 + $0x5c8] ss:$28 sps:$4 sm:$0xff]  }
 0x3b8   :  { %12127 = vmatpush3.bf16.msra.mxu1 %v13018_v5  ;;  %4510 = vmatprep.subr.bf16.mxu0 %v13021_v6  ;;  %v13091_v5 = vld [vmem:[#allocation5 + $0x4d0] ss:$28 sps:$4 sm:$0xff]   ;;  %v13099_v6 = vld [vmem:[#allocation5 + $0x49c] ss:$28 sps:$4 sm:$0xff]  }
 0x3b9   :  { %12128 = vmatprep.subr.bf16.mxu1 %v13022_v7  ;;  %v13068_v7 = vld [vmem:[%s16610_s7 + $0x408] ss:$28 sps:$4 sm:$0xff]  }
 0x3ba   :  { %4461 = vmatmul.mubr.bf16.vlgmr.msra.gmra.mxu0 %v14393_v26 }
 0x3bb   :  { %4511 = vmatpush1.bf16.msra.mxu0 %v13019_v14  ;;  %4542 = vmatprep.mubr.bf16.mxu0 %v13625_v1  ;;  %v13097_v14 = vld [vmem:[#allocation5 + $0x498] ss:$28 sps:$4 sm:$0xff]  }
 0x3bc   :  { %12129 = vmatpush3.bf16.msra.mxu1 %v13023_v16  ;;  %4512 = vmatprep.subr.bf16.mxu0 %v13026_v17  ;;  %v13105_v16 = vld [vmem:[#allocation5 + $0x464] ss:$28 sps:$4 sm:$0xff]  }
 0x3bd   :  { %12130 = vmatprep.subr.bf16.mxu1 %v13027_v18  ;;  %v13070_v17 = vld [vmem:[%s16610_s7 + $0x3d0] ss:$28 sps:$4 sm:$0xff]   ;;  %v13071_v18 = vld [vmem:[%s16610_s7 + $0x558] ss:$28 sps:$4 sm:$0xff]  }
 0x3bf   :  { %4513 = vmatpush1.bf16.msra.mxu0 %v13024_v19  ;;  %v13103_v19 = vld [vmem:[#allocation5 + $0x460] ss:$28 sps:$4 sm:$0xff]  }
 0x3c0   :  { %12131 = vmatpush3.bf16.msra.mxu1 %v13028_v20  ;;  %4514 = vmatprep.subr.bf16.mxu0 %v13031_v21  ;;  %v13111_v20 = vld [vmem:[#allocation5 + $0x42c] ss:$28 sps:$4 sm:$0xff]  }
 0x3c1   :  { %12132 = vmatprep.subr.bf16.mxu1 %v13032_v22  ;;  %v13072_v21 = vld [vmem:[%s16610_s7 + $0x398] ss:$28 sps:$4 sm:$0xff]  }
 0x3c2   :  { %v13075_v22 = vld [vmem:[#allocation5 + $0x18c] ss:$28 sps:$4 sm:$0xff]  }
 0x3c3   :  { %4515 = vmatpush1.bf16.msra.mxu0 %v13029_v27  ;;  %v13109_v27 = vld [vmem:[#allocation5 + $0x428] ss:$28 sps:$4 sm:$0xff]  }
 0x3c4   :  { %12133 = vmatpush3.bf16.msra.mxu1 %v13033_v28  ;;  %4516 = vmatprep.subr.bf16.mxu0 %v13036_v29  ;;  %v2714_v28 = vrot.slane %v14969_v23, %v13932_v12  ;;  %v13117_v29 = vld [vmem:[#allocation5 + $0x3f4] ss:$28 sps:$4 sm:$0xff]  }
 0x3c5   :  { %12240 = vmatprep.subr.bf16.mxu1 %v13626_v33 }
 0x3c7   :  { %4517 = vmatpush1.bf16.msra.mxu0 %v13034_v31  ;;  %4584 = vmatmul.mubr.bf16.vlgmr.msra.gmra.mxu1 %v14393_v26  ;;  %v4257_v61 = vpop.f32.mrf.mxu1  ;;  %v13078_v31 = vld [vmem:[#allocation5 + $0x154] ss:$28 sps:$4 sm:$0xff]  }
 0x3c8   :  { %v14997_v37 = vadd.f32 %v4257_v61, %v4217_v35  ;;  %12241 = vmatpush3.bf16.msra.mxu1 %v13037_v32  ;;  %4518 = vmatprep.subr.bf16.mxu0 %v13040_v52  ;;  %v13115_v32 = vld [vmem:[#allocation5 + $0x3f0] ss:$28 sps:$4 sm:$0xff]   ;;  %v4219_v52 = vadd.f32 %v14792_v15, %v2714_v28  ;;  %v13123_v35 = vld [vmem:[#allocation5 + $0x3bc] ss:$28 sps:$4 sm:$0xff]   ;;  %v13168_v28 = vld [vmem:[#allocation5 + $0x544] ss:$28 sps:$4 sm:$0xff]  }
 0x3c9   :  { %v15005_v39 = vpop.f32.mrf.mxu1  ;;  %12242 = vmatprep.subr.bf16.mxu1 %v13626_v33  ;;  %12256 = vmatprep.mubr.msk.bf16.mxu1 %vm13627_vm2, %v13626_v33 }
 0x3cb   :  { %4519 = vmatpush1.bf16.msra.mxu0 %v13038_v36  ;;  %v4261_v26 = vpop.f32.mrf.mxu1  ;;  %v4260_v36 = vadd.f32 %v15005_v39, %v4219_v52  ;;  %v13138_v52 = vld [vmem:[#allocation5 + $0x26c] ss:$28 sps:$4 sm:$0xff]  }
 0x3cc   :  { %12243 = vmatpush3.bf16.msra.mxu1 %v13041_v38  ;;  %4520 = vmatprep.subr.bf16.mxu0 %v13044_v9  ;;  %v13076_v38 = vld [vmem:[#allocation5 + $0x150] ss:$28 sps:$4 sm:$0xff]   ;;  %v13081_v26 = vld [vmem:[#allocation5 + $0x11c] ss:$28 sps:$4 sm:$0xff]  }
 0x3cd   :  { %v4262_v46 = vpop.f32.mrf.mxu1  ;;  %12244 = vmatprep.subr.bf16.mxu1 %v13626_v33 }
 0x3cf   :  { %4521 = vmatpush1.bf16.msra.mxu0 %v13042_v42  ;;  %v13121_v42 = vld [vmem:[#allocation5 + $0x3b8] ss:$28 sps:$4 sm:$0xff]  }
 0x3d0   :  { %12245 = vmatpush3.bf16.msra.mxu1 %v13045_v43  ;;  %4522 = vmatprep.subr.bf16.mxu0 %v13048_v45  ;;  %v13129_v45 = vld [vmem:[#allocation5 + $0x384] ss:$28 sps:$4 sm:$0xff]  }
 0x3d1   :  { %12246 = vmatprep.subr.bf16.mxu1 %v13626_v33 }
 0x3d3   :  { %4523 = vmatpush1.bf16.msra.mxu0 %v13046_v47  ;;  %v13079_v47 = vld [vmem:[#allocation5 + $0x118] ss:$28 sps:$4 sm:$0xff]  }
 0x3d4   :  { %12247 = vmatpush3.bf16.msra.mxu1 %v13049_v48  ;;  %4524 = vmatprep.subr.bf16.mxu0 %v13052_v49  ;;  %v13127_v49 = vld [vmem:[#allocation5 + $0x380] ss:$28 sps:$4 sm:$0xff]  }
 0x3d5   :  { %12248 = vmatprep.subr.bf16.mxu1 %v13626_v33 }
 0x3d7   :  { %4525 = vmatpush1.bf16.msra.mxu0 %v13050_v41  ;;  %v13135_v41 = vld [vmem:[#allocation5 + $0x6cc] ss:$28 sps:$4 sm:$0xff]  }
 0x3d8   :  { %12249 = vmatpush3.bf16.msra.mxu1 %v13053_v51  ;;  %12140 = vmatprep.subr.bf16.mxu0 %v13054_v44  ;;  %v13082_v51 = vld [vmem:[#allocation5 + $0xe0] ss:$28 sps:$4 sm:$0xff]   ;;  %v13090_v44 = vld [vmem:[#allocation5 + $0xac] ss:$28 sps:$4 sm:$0xff]  }
 0x3d9   :  { %12250 = vmatprep.subr.bf16.mxu1 %v13626_v33 }
 0x3da   :  { %4543 = vmatmul.mubr.bf16.vlgmr.msra.gmra.mxu0 %v14543_v40 }
 0x3db   :  { %12141 = vmatpush3.bf16.msra.mxu0 %v13055_v53  ;;  %4623 = vmatprep.mubr.bf16.mxu0 %v14449_v60  ;;  %v13061_v60 = vld [vmem:[%s16610_s7 + $0x4b0] ss:$28 sps:$4 sm:$0xff]   ;;  %v13133_v53 = vld [vmem:[#allocation5 + $0x6c8] ss:$28 sps:$4 sm:$0xff]  }
 0x3dc   :  { %12251 = vmatpush3.bf16.msra.mxu1 %v13056_v54  ;;  %12142 = vmatprep.subr.bf16.mxu0 %v13057_v55  ;;  %v13141_v54 = vld [vmem:[#allocation5 + $0x694] ss:$28 sps:$4 sm:$0xff]  }
 0x3dd   :  { %12252 = vmatprep.subr.bf16.mxu1 %v13626_v33 }
 0x3df   :  { %12143 = vmatpush3.bf16.msra.mxu0 %v13058_v56  ;;  %v13088_v56 = vld [vmem:[#allocation5 + $0xa8] ss:$28 sps:$4 sm:$0xff]  }
 0x3e0   :  { %12253 = vmatpush3.bf16.msra.mxu1 %v13059_v34  ;;  %12144 = vmatprep.subr.bf16.mxu0 %v13060_v57  ;;  %v13096_v34 = vld [vmem:[#allocation5 + $0x74] ss:$28 sps:$4 sm:$0xff]  }
 0x3e1   :  { %12254 = vmatprep.subr.bf16.mxu1 %v13626_v33  ;;  %v13139_v57 = vld [vmem:[#allocation5 + $0x690] ss:$28 sps:$4 sm:$0xff]  }
 0x3e3   :  { %12145 = vmatpush3.bf16.msra.mxu0 %v13061_v60 }
 0x3e4   :  { %12255 = vmatpush3.bf16.msra.mxu1 %v13062_v58  ;;  %12146 = vmatprep.subr.bf16.mxu0 %v13063_v24  ;;  %v13147_v58 = vld [vmem:[#allocation5 + $0x65c] ss:$28 sps:$4 sm:$0xff]  }
 0x3e5   :  { %6967 = vmatprep.subr.bf16.mxu1 %v13087_v59  ;;  %v13094_v59 = vld [vmem:[#allocation5 + $0x70] ss:$28 sps:$4 sm:$0xff]  }
 0x3e7   :  { %12147 = vmatpush3.bf16.msra.mxu0 %v13064_v63  ;;  %12257 = vmatmul.mubr.bf16.vlgmr.msra.gmra.mxu1 %v14543_v40  ;;  %v13069_v40 = vld [vmem:[%s16610_s7 + $0x590] ss:$28 sps:$4 sm:$0xff]  }
 0x3e8   :  { %12148 = vmatprep.subr.bf16.mxu0 %v13065_v2  ;;  %6968 = vmatpush1.bf16.msra.mxu1 %v13085_v62  ;;  %v13102_v63 = vld [vmem:[#allocation5 + $0x3c] ss:$28 sps:$4 sm:$0xff]  }
 0x3e9   :  { %6969 = vmatprep.subr.bf16.mxu1 %v13093_v50  ;;  %v13145_v2 = vld [vmem:[#allocation5 + $0x658] ss:$28 sps:$4 sm:$0xff]   ;;  %v13153_v50 = vld [vmem:[#allocation5 + $0x624] ss:$28 sps:$4 sm:$0xff]  }
 0x3eb   :  { %12149 = vmatpush3.bf16.msra.mxu0 %v13066_v3  ;;  %v13100_v3 = vld [vmem:[#allocation5 + $0x38] ss:$28 sps:$4 sm:$0xff]  }
 0x3ec   :  { %12150 = vmatprep.subr.bf16.mxu0 %v13067_v4  ;;  %6970 = vmatpush1.bf16.msra.mxu1 %v13091_v5  ;;  %v13108_v4 = vld [vmem:[#allocation5 + $0x4] ss:$28 sps:$4 sm:$0xff]  }
 0x3ed   :  { %6971 = vmatprep.subr.bf16.mxu1 %v13099_v6  ;;  %v13151_v5 = vld [vmem:[#allocation5 + $0x620] ss:$28 sps:$4 sm:$0xff]   ;;  %v13159_v6 = vld [vmem:[#allocation5 + $0x5ec] ss:$28 sps:$4 sm:$0xff]  }
 0x3ef   :  { %12151 = vmatpush3.bf16.msra.mxu0 %v13068_v7  ;;  %v13106_v7 = vld [vmem:[#allocation5] ss:$28 sps:$4 sm:$0xff]  }
 0x3f0   :  { %12152 = vmatprep.subr.bf16.mxu0 %v13069_v40  ;;  %6972 = vmatpush1.bf16.msra.mxu1 %v13097_v14  ;;  %v13114_v40 = vld [vmem:[#allocation5 + $0x34c] ss:$28 sps:$4 sm:$0xff]  }
 0x3f1   :  { %6973 = vmatprep.subr.bf16.mxu1 %v13105_v16  ;;  %v13157_v14 = vld [vmem:[#allocation5 + $0x5e8] ss:$28 sps:$4 sm:$0xff]   ;;  %v13162_v16 = vld [vmem:[#allocation5 + $0x5b4] ss:$28 sps:$4 sm:$0xff]  }
 0x3f3   :  { %12153 = vmatpush3.bf16.msra.mxu0 %v13070_v17  ;;  %v13112_v17 = vld [vmem:[#allocation5 + $0x348] ss:$28 sps:$4 sm:$0xff]  }
 0x3f4   :  { %12154 = vmatprep.subr.bf16.mxu0 %v13071_v18  ;;  %6974 = vmatpush1.bf16.msra.mxu1 %v13103_v19  ;;  %v13120_v18 = vld [vmem:[#allocation5 + $0x314] ss:$28 sps:$4 sm:$0xff]  }
 0x3f5   :  { %6975 = vmatprep.subr.bf16.mxu1 %v13111_v20  ;;  %v13160_v19 = vld [vmem:[#allocation5 + $0x5b0] ss:$28 sps:$4 sm:$0xff]   ;;  %v13165_v20 = vld [vmem:[#allocation5 + $0x57c] ss:$28 sps:$4 sm:$0xff]  }
 0x3f7   :  { %12155 = vmatpush3.bf16.msra.mxu0 %v13072_v21  ;;  %v13118_v21 = vld [vmem:[#allocation5 + $0x310] ss:$28 sps:$4 sm:$0xff]  }
 0x3f8   :  { %6926 = vmatprep.subr.bf16.mxu0 %v13075_v22  ;;  %6976 = vmatpush1.bf16.msra.mxu1 %v13109_v27  ;;  %v13126_v22 = vld [vmem:[#allocation5 + $0x2dc] ss:$28 sps:$4 sm:$0xff]  }
 0x3f9   :  { %6977 = vmatprep.subr.bf16.mxu1 %v13117_v29  ;;  %v13163_v27 = vld [vmem:[#allocation5 + $0x578] ss:$28 sps:$4 sm:$0xff]  }
 0x3fa   :  { %4624 = vmatmul.mubr.bf16.vlgmr.msra.gmra.mxu0 %v14454_v0  ;;  %v15104_v61 = vpop.f32.mrf.mxu0  ;;  %v13084_v0 = vld [vmem:[#allocation5 + $0xe4] ss:$28 sps:$4 sm:$0xff]   ;;  %v13124_v29 = vld [vmem:[#allocation5 + $0x2d8] ss:$28 sps:$4 sm:$0xff]  }
 0x3fb   :  { %6927 = vmatpush1.bf16.msra.mxu0 %v13073_v30  ;;  %v13132_v30 = vld [vmem:[#allocation5 + $0x2a4] ss:$28 sps:$4 sm:$0xff]  }
 0x3fc   :  { %v4300_v9 = vpop.f32.mrf.mxu0  ;;  %6928 = vmatprep.subr.bf16.mxu0 %v13078_v31  ;;  %6978 = vmatpush1.bf16.msra.mxu1 %v13115_v32  ;;  %v13166_v31 = vld [vmem:[#allocation5 + $0x540] ss:$28 sps:$4 sm:$0xff]  }
 0x3fd   :  { %v4301_v43 = vadd.f32 %v4300_v9, %v4260_v36  ;;  %6979 = vmatprep.subr.bf16.mxu1 %v13123_v35  ;;  %v13130_v32 = vld [vmem:[#allocation5 + $0x2a0] ss:$28 sps:$4 sm:$0xff]   ;;  %v13136_v36 = vld [vmem:[#allocation5 + $0x268] ss:$28 sps:$4 sm:$0xff]  }
 0x3fe   :  { %v4302_v46 = vpop.f32.mrf.mxu0 }
 0x3ff   :  { %v4672_v15 = vmax.f32 %v4301_v43, 0.0  ;;  %6929 = vmatpush1.bf16.msra.mxu0 %v13076_v38  ;;  %v13144_v38 = vld [vmem:[#allocation5 + $0x234] ss:$28 sps:$4 sm:$0xff]   ;;  %v13150_v43 = vld [vmem:[#allocation5 + $0x1fc] ss:$28 sps:$4 sm:$0xff]  }
 0x400   :  { %v4303_v48 = vpop.f32.mrf.mxu0  ;;  %6930 = vmatprep.subr.bf16.mxu0 %v13081_v26  ;;  %6980 = vmatpush1.bf16.msra.mxu1 %v13121_v42  ;;  %v13142_v42 = vld [vmem:[#allocation5 + $0x230] ss:$28 sps:$4 sm:$0xff]   ;;  %v13148_v46 = vld [vmem:[#allocation5 + $0x1f8] ss:$28 sps:$4 sm:$0xff]  }
 0x401   :  { %v15107_v39 = vpack.c.bf16 %v4672_v15, %v4672_v15  ;;  %6981 = vmatprep.subr.bf16.mxu1 %v13129_v45  ;;  %v4299_v15 = vadd.f32 %v15104_v61, %v14997_v37  ;;  %v13154_v48 = vld [vmem:[#allocation5 + $0x1c0] ss:$28 sps:$4 sm:$0xff]  }
 0x403   :  { %6931 = vmatpush1.bf16.msra.mxu0 %v13079_v47  ;;  %6958 = vmatprep.mubr.bf16.mxu0 %v15107_v39  ;;  %v13156_v47 = vld [vmem:[#allocation5 + $0x1c4] ss:$28 sps:$4 sm:$0xff]  }
 0x404   :  { %6932 = vmatprep.subr.bf16.mxu0 %v13084_v0  ;;  %6982 = vmatpush1.bf16.msra.mxu1 %v13127_v49  ;;  %v4671_v0 = vmax.f32 %v4299_v15, 0.0  ;;  %v13171_v49 = vld [vmem:[#allocation5 + $0x88c] ss:$28 sps:$4 sm:$0xff]  }
 0x405   :  { %6983 = vmatprep.subr.bf16.mxu1 %v13135_v41  ;;  %v2718_v41 = vrot.slane %v14969_v23, %v13929_v11 }
 0x407   :  { %v15110_v55 = vpop.f32.mrf.mxu1  ;;  %6933 = vmatpush1.bf16.msra.mxu0 %v13082_v51  ;;  %v2722_v51 = vrot.slane %v14969_v23, %v13935_v13 }
 0x408   :  { %6934 = vmatprep.subr.bf16.mxu0 %v13090_v44  ;;  %6984 = vmatpush2.bf16.msra.mxu1 %v13133_v53  ;;  %v13169_v44 = vld [vmem:[#allocation5 + $0x888] ss:$28 sps:$4 sm:$0xff]   ;;  %v15120_v53 = vpack.c.bf16 %v4671_v0, %v4671_v0  ;;  %v4340_v37 = vadd.f32 %v15110_v55, %v2718_v41  ;;  %v13213_v0 = vld [vmem:[#allocation5 + $0x8fc] ss:$28 sps:$4 sm:$0xff]  }
 0x409   :  { %v15112_v60 = vpop.f32.mrf.mxu1  ;;  %6985 = vmatprep.subr.bf16.mxu1 %v13141_v54  ;;  %v13174_v54 = vld [vmem:[#allocation5 + $0x854] ss:$28 sps:$4 sm:$0xff]  }
 0x40a   :  { %v13211_v41 = vld [vmem:[#allocation5 + $0x8f8] ss:$28 sps:$4 sm:$0xff]  }
 0x40b   :  { %v4343_v24 = vpop.f32.mrf.mxu1  ;;  %6935 = vmatpush1.bf16.msra.mxu0 %v13088_v56  ;;  %v4342_v56 = vadd.f32 %v15112_v60, %v2722_v51  ;;  %v13216_v51 = vld [vmem:[#allocation5 + $0x8c4] ss:$28 sps:$4 sm:$0xff]  }
 0x40c   :  { %6936 = vmatprep.subr.bf16.mxu0 %v13096_v34  ;;  %6986 = vmatpush2.bf16.msra.mxu1 %v13139_v57  ;;  %v13172_v57 = vld [vmem:[#allocation5 + $0x850] ss:$28 sps:$4 sm:$0xff]   ;;  %v13177_v24 = vld [vmem:[#allocation5 + $0x81c] ss:$28 sps:$4 sm:$0xff]  }
 0x40d   :  { %v4344_v62 = vpop.f32.mrf.mxu1  ;;  %6987 = vmatprep.subr.bf16.mxu1 %v13147_v58 }
 0x40f   :  { %6937 = vmatpush1.bf16.msra.mxu0 %v13094_v59 }
 0x410   :  { %6938 = vmatprep.subr.bf16.mxu0 %v13102_v63  ;;  %6988 = vmatpush2.bf16.msra.mxu1 %v13145_v2  ;;  %v13240_v2 = vld [vmem:[#allocation5 + $0xabc] ss:$28 sps:$4 sm:$0xff]  }
 0x411   :  { %6989 = vmatprep.subr.bf16.mxu1 %v13153_v50 }
 0x413   :  { %6939 = vmatpush1.bf16.msra.mxu0 %v13100_v3  ;;  %v13175_v3 = vld [vmem:[#allocation5 + $0x818] ss:$28 sps:$4 sm:$0xff]  }
 0x414   :  { %6940 = vmatprep.subr.bf16.mxu0 %v13108_v4  ;;  %6990 = vmatpush2.bf16.msra.mxu1 %v13151_v5  ;;  %v13180_v5 = vld [vmem:[#allocation5 + $0x7e4] ss:$28 sps:$4 sm:$0xff]  }
 0x415   :  { %6991 = vmatprep.subr.bf16.mxu1 %v13159_v6 }
 0x417   :  { %6941 = vmatpush1.bf16.msra.mxu0 %v13106_v7  ;;  %v13178_v7 = vld [vmem:[#allocation5 + $0x7e0] ss:$28 sps:$4 sm:$0xff]  }
 0x418   :  { %6942 = vmatprep.subr.bf16.mxu0 %v13114_v40  ;;  %6992 = vmatpush2.bf16.msra.mxu1 %v13157_v14  ;;  %v13238_v40 = vld [vmem:[#allocation5 + $0xab8] ss:$28 sps:$4 sm:$0xff]  }
 0x419   :  { %6993 = vmatprep.subr.bf16.mxu1 %v13162_v16  ;;  %v13183_v16 = vld [vmem:[#allocation5 + $0x7ac] ss:$28 sps:$4 sm:$0xff]  }
 0x41b   :  { %6943 = vmatpush2.bf16.msra.mxu0 %v13112_v17  ;;  %v13246_v17 = vld [vmem:[#allocation5 + $0xa84] ss:$28 sps:$4 sm:$0xff]  }
 0x41c   :  { %6944 = vmatprep.subr.bf16.mxu0 %v13120_v18  ;;  %6994 = vmatpush2.bf16.msra.mxu1 %v13160_v19  ;;  %v13181_v18 = vld [vmem:[#allocation5 + $0x7a8] ss:$28 sps:$4 sm:$0xff]   ;;  %v13244_v19 = vld [vmem:[#allocation5 + $0xa80] ss:$28 sps:$4 sm:$0xff]  }
 0x41d   :  { %6995 = vmatprep.subr.bf16.mxu1 %v13165_v20  ;;  %v13186_v20 = vld [vmem:[#allocation5 + $0x774] ss:$28 sps:$4 sm:$0xff]  }
 0x41f   :  { %6945 = vmatpush2.bf16.msra.mxu0 %v13118_v21  ;;  %v13252_v21 = vld [vmem:[#allocation5 + $0x194] ss:$28 sps:$4 sm:$0xff]  }
 0x420   :  { %6946 = vmatprep.subr.bf16.mxu0 %v13126_v22  ;;  %6996 = vmatpush2.bf16.msra.mxu1 %v13163_v27  ;;  %v13184_v22 = vld [vmem:[#allocation5 + $0x770] ss:$28 sps:$4 sm:$0xff]   ;;  %v13189_v27 = vld [vmem:[#allocation5 + $0x73c] ss:$28 sps:$4 sm:$0xff]  }
 0x421   :  { %6997 = vmatprep.subr.bf16.mxu1 %v13168_v28  ;;  %v13187_v28 = vld [vmem:[#allocation5 + $0x738] ss:$28 sps:$4 sm:$0xff]  }
 0x423   :  { %6947 = vmatpush2.bf16.msra.mxu0 %v13124_v29  ;;  %v13192_v29 = vld [vmem:[#allocation5 + $0x704] ss:$28 sps:$4 sm:$0xff]  }
 0x424   :  { %6948 = vmatprep.subr.bf16.mxu0 %v13132_v30  ;;  %6998 = vmatpush2.bf16.msra.mxu1 %v13166_v31  ;;  %v13190_v30 = vld [vmem:[#allocation5 + $0x700] ss:$28 sps:$4 sm:$0xff]   ;;  %v13195_v31 = vld [vmem:[#allocation5 + $0xa4c] ss:$28 sps:$4 sm:$0xff]  }
 0x425   :  { %7061 = vmatprep.subr.bf16.mxu1 %v13240_v2  ;;  %v2726_v2 = vrot.slane %v14969_v23, %v14517_v25 }
 0x427   :  { %v4421_v35 = vpop.f32.mrf.mxu1  ;;  %6949 = vmatpush2.bf16.msra.mxu0 %v13130_v32  ;;  %v13193_v32 = vld [vmem:[#allocation5 + $0xa48] ss:$28 sps:$4 sm:$0xff]  }
 0x428   :  { %6950 = vmatprep.subr.bf16.mxu0 %v13138_v52  ;;  %v13198_v52 = vld [vmem:[#allocation5 + $0xa14] ss:$28 sps:$4 sm:$0xff]  }
 0x429   :  { %v4423_v9 = vpop.f32.mrf.mxu1 }
 0x42b   :  { %v4425_v26 = vpop.f32.mrf.mxu1  ;;  %6951 = vmatpush2.bf16.msra.mxu0 %v13136_v36  ;;  %v13201_v36 = vld [vmem:[#allocation5 + $0x9dc] ss:$28 sps:$4 sm:$0xff]  }
 0x42c   :  { %6952 = vmatprep.subr.bf16.mxu0 %v13144_v38  ;;  %v13199_v38 = vld [vmem:[#allocation5 + $0x9d8] ss:$28 sps:$4 sm:$0xff]   ;;  %v13202_v26 = vld [vmem:[#allocation5 + $0x9a0] ss:$28 sps:$4 sm:$0xff]  }
 0x42d   :  { %v4426_v45 = vpop.f32.mrf.mxu1 }
 0x42e   :  { %v13205_v45 = vld [vmem:[#allocation5 + $0x968] ss:$28 sps:$4 sm:$0xff]  }
 0x42f   :  { %6953 = vmatpush2.bf16.msra.mxu0 %v13142_v42  ;;  %v13207_v42 = vld [vmem:[#allocation5 + $0x96c] ss:$28 sps:$4 sm:$0xff]  }
 0x430   :  { %6954 = vmatprep.subr.bf16.mxu0 %v13150_v43 }
 0x433   :  { %6955 = vmatpush2.bf16.msra.mxu0 %v13148_v46  ;;  %v13210_v46 = vld [vmem:[#allocation5 + $0x934] ss:$28 sps:$4 sm:$0xff]  }
 0x434   :  { %6956 = vmatprep.subr.bf16.mxu0 %v13156_v47 }
 0x437   :  { %6957 = vmatpush2.bf16.msra.mxu0 %v13154_v48  ;;  %v13208_v48 = vld [vmem:[#allocation5 + $0x930] ss:$28 sps:$4 sm:$0xff]  }
 0x438   :  { %7008 = vmatprep.subr.bf16.mxu0 %v13171_v49 }
 0x43a   :  { %v4380_v61 = vpop.f32.mrf.mxu0  ;;  %6959 = vmatmul.mubr.bf16.vlgmr.msra.gmra.mxu0 %v15120_v53 }
 0x43b   :  { %v4381_v34 = vadd.f32 %v4380_v61, %v4340_v37  ;;  %7009 = vmatpush1.bf16.msra.mxu0 %v13169_v44  ;;  %v13214_v44 = vld [vmem:[#allocation5 + $0x8c0] ss:$28 sps:$4 sm:$0xff]  }
 0x43c   :  { %v4382_v58 = vpop.f32.mrf.mxu0  ;;  %7010 = vmatprep.subr.bf16.mxu0 %v13174_v54  ;;  %v13219_v54 = vld [vmem:[#allocation5 + $0x514] ss:$28 sps:$4 sm:$0xff]  }
 0x43d   :  { %v4422_v59 = vadd.f32 %v4421_v35, %v4381_v34  ;;  %v4383_v63 = vadd.f32 %v4382_v58, %v4342_v56  ;;  %v13196_v35 = vld [vmem:[#allocation5 + $0xa10] ss:$28 sps:$4 sm:$0xff]  }
 0x43e   :  { %v4384_v62 = vpop.f32.mrf.mxu0 }
 0x43f   :  { %v4424_v50 = vadd.f32 %v4423_v9, %v4383_v63  ;;  %7011 = vmatpush1.bf16.msra.mxu0 %v13172_v57  ;;  %v4673_v55 = vmax.f32 %v4422_v59, 0.0  ;;  %v13204_v9 = vld [vmem:[#allocation5 + $0x9a4] ss:$28 sps:$4 sm:$0xff]   ;;  %v15133_v63 = vsub.s32 5, %v13920_v8 }
 0x440   :  { %v4385_v4 = vpop.f32.mrf.mxu0  ;;  %7012 = vmatprep.subr.bf16.mxu0 %v13177_v24 }
 0x441   :  { %v4674_v6 = vmax.f32 %v4424_v50, 0.0  ;;  %v15127_v14 = vpack.c.bf16 %v4673_v55, %v4673_v55  ;;  %v2730_v62 = vrot.slane %v14969_v23, %v15133_v63 }
 0x443   :  { %v15125_v60 = vpack.c.bf16 %v4674_v6, %v4674_v6  ;;  %7013 = vmatpush1.bf16.msra.mxu0 %v13175_v3 }
 0x444   :  { %7014 = vmatprep.subr.bf16.mxu0 %v13180_v5 }
 0x445   :  { %6999 = vmatprep.mubr.bf16.mxu1 %v15125_v60 }
 0x446   :  { %7000 = vmatmul.mubr.bf16.vlgmr.msra.gmra.mxu1 %v15127_v14 }
 0x447   :  { %7015 = vmatpush1.bf16.msra.mxu0 %v13178_v7  ;;  %7062 = vmatpush1.bf16.msra.mxu1 %v13238_v40 }
 0x448   :  { %7016 = vmatprep.subr.bf16.mxu0 %v13183_v16  ;;  %7063 = vmatprep.subr.bf16.mxu1 %v13246_v17 }
 0x449   :  { %7081 = vmatprep.mubr.bf16.mxu1 %v13625_v1 }
 0x44b   :  { %7017 = vmatpush1.bf16.msra.mxu0 %v13181_v18  ;;  %7064 = vmatpush1.bf16.msra.mxu1 %v13244_v19 }
 0x44c   :  { %7018 = vmatprep.subr.bf16.mxu0 %v13186_v20  ;;  %7090 = vmatprep.subr.bf16.mxu1 %v13252_v21  ;;  %v13217_v21 = vld [vmem:[#allocation5 + $0x510] ss:$28 sps:$4 sm:$0xff]  }
 0x44f   :  { %7019 = vmatpush1.bf16.msra.mxu0 %v13184_v22 }
 0x450   :  { %7020 = vmatprep.subr.bf16.mxu0 %v13189_v27  ;;  %v13222_v27 = vld [vmem:[#allocation5 + $0x4dc] ss:$28 sps:$4 sm:$0xff]  }
 0x453   :  { %7021 = vmatpush1.bf16.msra.mxu0 %v13187_v28  ;;  %v13220_v28 = vld [vmem:[#allocation5 + $0x4d8] ss:$28 sps:$4 sm:$0xff]  }
 0x454   :  { %7022 = vmatprep.subr.bf16.mxu0 %v13192_v29  ;;  %v13225_v29 = vld [vmem:[#allocation5 + $0x4a4] ss:$28 sps:$4 sm:$0xff]  }
 0x457   :  { %7023 = vmatpush1.bf16.msra.mxu0 %v13190_v30 }
 0x458   :  { %7024 = vmatprep.subr.bf16.mxu0 %v13195_v31 }
 0x45b   :  { %7025 = vmatpush2.bf16.msra.mxu0 %v13193_v32  ;;  %v13223_v32 = vld [vmem:[#allocation5 + $0x4a0] ss:$28 sps:$4 sm:$0xff]  }
 0x45c   :  { %7026 = vmatprep.subr.bf16.mxu0 %v13198_v52  ;;  %v13228_v52 = vld [vmem:[#allocation5 + $0x46c] ss:$28 sps:$4 sm:$0xff]  }
 0x45f   :  { %7027 = vmatpush2.bf16.msra.mxu0 %v13196_v35 }
 0x460   :  { %7028 = vmatprep.subr.bf16.mxu0 %v13201_v36 }
 0x463   :  { %7029 = vmatpush2.bf16.msra.mxu0 %v13199_v38  ;;  %v13226_v38 = vld [vmem:[#allocation5 + $0x468] ss:$28 sps:$4 sm:$0xff]  }
 0x464   :  { %7030 = vmatprep.subr.bf16.mxu0 %v13204_v9  ;;  %v13231_v9 = vld [vmem:[#allocation5 + $0x434] ss:$28 sps:$4 sm:$0xff]  }
 0x467   :  { %v4503_v43 = vpop.f32.mrf.mxu1  ;;  %7031 = vmatpush2.bf16.msra.mxu0 %v13202_v26  ;;  %v13229_v26 = vld [vmem:[#allocation5 + $0x430] ss:$28 sps:$4 sm:$0xff]  }
 0x468   :  { %7032 = vmatprep.subr.bf16.mxu0 %v13207_v42  ;;  %v13234_v42 = vld [vmem:[#allocation5 + $0x3fc] ss:$28 sps:$4 sm:$0xff]  }
 0x469   :  { %v4505_v15 = vpop.f32.mrf.mxu1 }
 0x46b   :  { %v4507_v47 = vpop.f32.mrf.mxu1  ;;  %7033 = vmatpush2.bf16.msra.mxu0 %v13205_v45  ;;  %v13232_v45 = vld [vmem:[#allocation5 + $0x3f8] ss:$28 sps:$4 sm:$0xff]  }
 0x46c   :  { %7034 = vmatprep.subr.bf16.mxu0 %v13210_v46  ;;  %v13237_v46 = vld [vmem:[#allocation5 + $0x3c4] ss:$28 sps:$4 sm:$0xff]  }
 0x46d   :  { %v4508_v49 = vpop.f32.mrf.mxu1 }
 0x46e   :  { %v13243_v49 = vld [vmem:[#allocation5 + $0x38c] ss:$28 sps:$4 sm:$0xff]  }
 0x46f   :  { %7035 = vmatpush2.bf16.msra.mxu0 %v13208_v48  ;;  %v13235_v48 = vld [vmem:[#allocation5 + $0x3c0] ss:$28 sps:$4 sm:$0xff]  }
 0x470   :  { %7036 = vmatprep.subr.bf16.mxu0 %v13213_v0 }
 0x473   :  { %7037 = vmatpush2.bf16.msra.mxu0 %v13211_v41 }
 0x474   :  { %7038 = vmatprep.subr.bf16.mxu0 %v13216_v51 }
 0x477   :  { %7039 = vmatpush2.bf16.msra.mxu0 %v13214_v44 }
 0x478   :  { %7131 = vmatprep.subr.bf16.mxu0 %v13219_v54  ;;  %v13241_v54 = vld [vmem:[#allocation5 + $0x388] ss:$28 sps:$4 sm:$0xff]  }
 0x47a   :  { %v4462_v37 = vpop.f32.mrf.mxu0 }
 0x47b   :  { %v4463_v50 = vadd.f32 %v4462_v37, %v2726_v2 }
 0x47c   :  { %v4464_v61 = vpop.f32.mrf.mxu0 }
 0x47d   :  { %v4465_v3 = vadd.f32 %v4464_v61, %v2730_v62  ;;  %v4504_v55 = vadd.f32 %v4503_v43, %v4463_v50  ;;  %v15147_v43 = vsub.s32 6, %v13920_v8  ;;  %v13249_v61 = vld [vmem:[#allocation5 + $0x6d4] ss:$28 sps:$4 sm:$0xff]   ;;  %v13258_v50 = vld [vmem:[#allocation5 + $0x15c] ss:$28 sps:$4 sm:$0xff]  }
 0x47e   :  { %v4466_v56 = vpop.f32.mrf.mxu0  ;;  %v13253_v62 = vld [vmem:[#allocation5 + $0x698] ss:$28 sps:$4 sm:$0xff]  }
 0x47f   :  { %v4506_v6 = vadd.f32 %v4505_v15, %v4465_v3  ;;  %v2734_v15 = vrot.slane %v14969_v23, %v15147_v43  ;;  %v13255_v23 = vld [vmem:[#allocation5 + $0x69c] ss:$28 sps:$4 sm:$0xff]   ;;  %v13261_v3 = vld [vmem:[#allocation5 + $0x664] ss:$28 sps:$4 sm:$0xff]  }
 0x480   :  { %v4467_v34 = vpop.f32.mrf.mxu0 }
 0x487   :  { %v12134_v57 = vpop.f32.mrf.mxu1 }
 0x489   :  { %v12135_v58 = vpop.f32.mrf.mxu1 }
 0x48a   :  { %v12136_v47 = vadd.f32 %v12135_v58, %v12134_v57  ;;  %v13250_v58 = vld [vmem:[#allocation5 + $0x190] ss:$28 sps:$4 sm:$0xff]  }
 0x48b   :  { %v12137_v24 = vpop.f32.mrf.mxu1 }
 0x48c   :  { %v4586_v51 = vadd.f32 %v12136_v47, %v2734_v15  ;;  %v13300_v15 = vld [vmem:[#allocation5 + $0x354] ss:$28 sps:$4 sm:$0xff]   ;;  %v13303_v47 = vld [vmem:[#allocation5 + $0xa8c] ss:$28 sps:$4 sm:$0xff]  }
 0x48d   :  { %v12138_v59 = vpop.f32.mrf.mxu1 }
 0x48e   :  { %v13247_v59 = vld [vmem:[#allocation5 + $0x6d0] ss:$28 sps:$4 sm:$0xff]  }
 0x49a   :  { %v4544_v4 = vpop.f32.mrf.mxu0 }
 0x49b   :  { %v4545_v5 = vadd.f32 %v4544_v4, %v4504_v55  ;;  %v13256_v55 = vld [vmem:[#allocation5 + $0x158] ss:$28 sps:$4 sm:$0xff]   ;;  %v13259_v4 = vld [vmem:[#allocation5 + $0x660] ss:$28 sps:$4 sm:$0xff]  }
 0x49c   :  { %v4546_v7 = vpop.f32.mrf.mxu0 }
 0x49d   :  { %v4547_v40 = vadd.f32 %v4546_v7, %v4506_v6  ;;  %v4675_v16 = vmax.f32 %v4545_v5, 0.0  ;;  %v13264_v5 = vld [vmem:[#allocation5 + $0x124] ss:$28 sps:$4 sm:$0xff]   ;;  %v13267_v6 = vld [vmem:[#allocation5 + $0x62c] ss:$28 sps:$4 sm:$0xff]  }
 0x49e   :  { %v4548_v17 = vpop.f32.mrf.mxu0  ;;  %v13262_v7 = vld [vmem:[#allocation5 + $0x120] ss:$28 sps:$4 sm:$0xff]  }
 0x49f   :  { %v4676_v18 = vmax.f32 %v4547_v40, 0.0  ;;  %v15141_v22 = vpack.c.bf16 %v4675_v16, %v4675_v16  ;;  %v13265_v40 = vld [vmem:[#allocation5 + $0x628] ss:$28 sps:$4 sm:$0xff]   ;;  %v13273_v17 = vld [vmem:[#allocation5 + $0x5f4] ss:$28 sps:$4 sm:$0xff]  }
 0x4a0   :  { %v4549_v19 = vpop.f32.mrf.mxu0  ;;  %v13270_v16 = vld [vmem:[#allocation5 + $0xec] ss:$28 sps:$4 sm:$0xff]  }
 0x4a1   :  { %v15139_v20 = vpack.c.bf16 %v4676_v18, %v4676_v18  ;;  %v13268_v18 = vld [vmem:[#allocation5 + $0xe8] ss:$28 sps:$4 sm:$0xff]   ;;  %v13271_v19 = vld [vmem:[#allocation5 + $0x5f0] ss:$28 sps:$4 sm:$0xff]  }
 0x4a3   :  { %7040 = vmatprep.mubr.bf16.mxu0 %v15139_v20 }
 0x4a4   :  { %7041 = vmatmul.mubr.bf16.vlgmr.msra.gmra.mxu0 %v15141_v22 }
 0x4a5   :  { %7132 = vmatpush1.bf16.msra.mxu0 %v13217_v21  ;;  %7163 = vmatprep.mubr.bf16.mxu0 %v15125_v60  ;;  %v13276_v21 = vld [vmem:[#allocation5 + $0xb4] ss:$28 sps:$4 sm:$0xff]  }
 0x4a6   :  { %7133 = vmatprep.subr.bf16.mxu0 %v13222_v27  ;;  %v13279_v27 = vld [vmem:[#allocation5 + $0x5bc] ss:$28 sps:$4 sm:$0xff]  }
 0x4a7   :  { %v4665_v30 = vpop.f32.mrf.mxu1 }
 0x4a9   :  { %7134 = vmatpush1.bf16.msra.mxu0 %v13220_v28  ;;  %v12258_v31 = vpop.f32.mrf.mxu1  ;;  %v13274_v28 = vld [vmem:[#allocation5 + $0xb0] ss:$28 sps:$4 sm:$0xff]  }
 0x4aa   :  { %7135 = vmatprep.subr.bf16.mxu0 %v13225_v29  ;;  %v13277_v29 = vld [vmem:[#allocation5 + $0x5b8] ss:$28 sps:$4 sm:$0xff]   ;;  %v13285_v31 = vld [vmem:[#allocation5 + $0x584] ss:$28 sps:$4 sm:$0xff]  }
 0x4ab   :  { %v4668_v35 = vpop.f32.mrf.mxu1 }
 0x4ac   :  { %v13288_v35 = vld [vmem:[#allocation5 + $0x44] ss:$28 sps:$4 sm:$0xff]  }
 0x4ad   :  { %7136 = vmatpush1.bf16.msra.mxu0 %v13223_v32  ;;  %v12259_v36 = vpop.f32.mrf.mxu1  ;;  %v13280_v32 = vld [vmem:[#allocation5 + $0x78] ss:$28 sps:$4 sm:$0xff]  }
 0x4ae   :  { %7137 = vmatprep.subr.bf16.mxu0 %v13228_v52  ;;  %v13283_v52 = vld [vmem:[#allocation5 + $0x580] ss:$28 sps:$4 sm:$0xff]   ;;  %v13291_v36 = vld [vmem:[#allocation5 + $0x54c] ss:$28 sps:$4 sm:$0xff]  }
 0x4b1   :  { %7138 = vmatpush1.bf16.msra.mxu0 %v13226_v38  ;;  %v13286_v38 = vld [vmem:[#allocation5 + $0x40] ss:$28 sps:$4 sm:$0xff]  }
 0x4b2   :  { %7139 = vmatprep.subr.bf16.mxu0 %v13231_v9  ;;  %v13289_v9 = vld [vmem:[#allocation5 + $0x548] ss:$28 sps:$4 sm:$0xff]  }
 0x4b5   :  { %7140 = vmatpush1.bf16.msra.mxu0 %v13229_v26  ;;  %v13294_v26 = vld [vmem:[#allocation5 + $0xc] ss:$28 sps:$4 sm:$0xff]  }
 0x4b6   :  { %7141 = vmatprep.subr.bf16.mxu0 %v13234_v42  ;;  %v13297_v42 = vld [vmem:[#allocation5 + $0xac4] ss:$28 sps:$4 sm:$0xff]  }
 0x4b9   :  { %7142 = vmatpush1.bf16.msra.mxu0 %v13232_v45  ;;  %v13292_v45 = vld [vmem:[#allocation5 + $0x8] ss:$28 sps:$4 sm:$0xff]  }
 0x4ba   :  { %v12156_v0 = vpop.f32.mrf.mxu0  ;;  %7143 = vmatprep.subr.bf16.mxu0 %v13237_v46  ;;  %v13295_v46 = vld [vmem:[#allocation5 + $0xac0] ss:$28 sps:$4 sm:$0xff]  }
 0x4bc   :  { %v12157_v41 = vpop.f32.mrf.mxu0 }
 0x4bd   :  { %v12158_v44 = vadd.f32 %v12157_v41, %v12156_v0  ;;  %7144 = vmatpush1.bf16.msra.mxu0 %v13235_v48  ;;  %v13298_v48 = vld [vmem:[#allocation5 + $0x350] ss:$28 sps:$4 sm:$0xff]   ;;  %v13301_v0 = vld [vmem:[#allocation5 + $0xa88] ss:$28 sps:$4 sm:$0xff]   ;;  %v13309_v41 = vld [vmem:[#allocation5 + $0x19c] ss:$28 sps:$4 sm:$0xff]  }
 0x4be   :  { %v12159_v37 = vpop.f32.mrf.mxu0  ;;  %7145 = vmatprep.subr.bf16.mxu0 %v13243_v49  ;;  %v13306_v49 = vld [vmem:[#allocation5 + $0x31c] ss:$28 sps:$4 sm:$0xff]  }
 0x4bf   :  { %v4626_v56 = vadd.f32 %v12158_v44, %v4586_v51  ;;  %v13304_v51 = vld [vmem:[#allocation5 + $0x318] ss:$28 sps:$4 sm:$0xff]   ;;  %v13315_v37 = vld [vmem:[#allocation5 + $0x164] ss:$28 sps:$4 sm:$0xff]  }
 0x4c0   :  { %v12160_v34 = vpop.f32.mrf.mxu0  ;;  %v13307_v44 = vld [vmem:[#allocation5 + $0x198] ss:$28 sps:$4 sm:$0xff]  }
 0x4c1   :  { %v4666_v24 = vadd.f32 %v4665_v30, %v4626_v56  ;;  %7146 = vmatpush1.bf16.msra.mxu0 %v13241_v54  ;;  %v13282_v30 = vld [vmem:[#allocation5 + $0x7c] ss:$28 sps:$4 sm:$0xff]   ;;  %v13312_v54 = vld [vmem:[#allocation5 + $0x2e4] ss:$28 sps:$4 sm:$0xff]   ;;  %v13318_v34 = vld [vmem:[#allocation5 + $0x2ac] ss:$28 sps:$4 sm:$0xff]  }
 0x4c2   :  { %7147 = vmatprep.subr.bf16.mxu0 %v13249_v61  ;;  %v13310_v61 = vld [vmem:[#allocation5 + $0x2e0] ss:$28 sps:$4 sm:$0xff]  }
 0x4c3   :  { %v4677_v57 = vmax.f32 %v4666_v24, 0.0  ;;  %v13313_v56 = vld [vmem:[#allocation5 + $0x160] ss:$28 sps:$4 sm:$0xff]   ;;  %v13321_v24 = vld [vmem:[#allocation5 + $0x12c] ss:$28 sps:$4 sm:$0xff]  }
 0x4c5   :  { %v15151_v2 = vpack.c.bf16 %v4677_v57, %v4677_v57  ;;  %7148 = vmatpush2.bf16.msra.mxu0 %v13247_v59  ;;  %v13316_v59 = vld [vmem:[#allocation5 + $0x2a8] ss:$28 sps:$4 sm:$0xff]   ;;  %v13324_v57 = vld [vmem:[#allocation5 + $0x274] ss:$28 sps:$4 sm:$0xff]  }
 0x4c6   :  { %7149 = vmatprep.subr.bf16.mxu0 %v13255_v23  ;;  %v13319_v23 = vld [vmem:[#allocation5 + $0x128] ss:$28 sps:$4 sm:$0xff]  }
 0x4c7   :  { %11687 = vmatmul.mubr.msk.bf16.vlgmr.msra.gmra.mxu1 %vm6922_vm3, %v15151_v2 }
 0x4c8   :  { %7091 = vmatpush1.bf16.msra.mxu1 %v13250_v58  ;;  %7122 = vmatprep.mubr.bf16.mxu1 %v15107_v39  ;;  %v13327_v58 = vld [vmem:[#allocation5 + $0xf4] ss:$28 sps:$4 sm:$0xff]  }
 0x4c9   :  { %7150 = vmatpush2.bf16.msra.mxu0 %v13253_v62  ;;  %7092 = vmatprep.subr.bf16.mxu1 %v13258_v50  ;;  %v13322_v62 = vld [vmem:[#allocation5 + $0x270] ss:$28 sps:$4 sm:$0xff]  }
 0x4ca   :  { %7151 = vmatprep.subr.bf16.mxu0 %v13261_v3  ;;  %v13325_v50 = vld [vmem:[#allocation5 + $0xf0] ss:$28 sps:$4 sm:$0xff]   ;;  %v13330_v3 = vld [vmem:[#allocation5 + $0x23c] ss:$28 sps:$4 sm:$0xff]  }
 0x4cc   :  { %7093 = vmatpush1.bf16.msra.mxu1 %v13256_v55  ;;  %v13333_v55 = vld [vmem:[#allocation5 + $0xbc] ss:$28 sps:$4 sm:$0xff]  }
 0x4cd   :  { %7152 = vmatpush2.bf16.msra.mxu0 %v13259_v4  ;;  %7094 = vmatprep.subr.bf16.mxu1 %v13264_v5  ;;  %v13328_v4 = vld [vmem:[#allocation5 + $0x238] ss:$28 sps:$4 sm:$0xff]  }
 0x4ce   :  { %7153 = vmatprep.subr.bf16.mxu0 %v13267_v6  ;;  %v13331_v5 = vld [vmem:[#allocation5 + $0xb8] ss:$28 sps:$4 sm:$0xff]   ;;  %v13336_v6 = vld [vmem:[#allocation5 + $0x204] ss:$28 sps:$4 sm:$0xff]  }
 0x4d0   :  { %7095 = vmatpush1.bf16.msra.mxu1 %v13262_v7 }
 0x4d1   :  { %7154 = vmatpush2.bf16.msra.mxu0 %v13265_v40  ;;  %7096 = vmatprep.subr.bf16.mxu1 %v13270_v16  ;;  %v13339_v40 = vld [vmem:[#allocation5 + $0x84] ss:$28 sps:$4 sm:$0xff]  }
 0x4d2   :  { %7155 = vmatprep.subr.bf16.mxu0 %v13273_v17  ;;  %v13334_v17 = vld [vmem:[#allocation5 + $0x200] ss:$28 sps:$4 sm:$0xff]  }
 0x4d4   :  { %7097 = vmatpush1.bf16.msra.mxu1 %v13268_v18  ;;  %v13337_v18 = vld [vmem:[#allocation5 + $0x80] ss:$28 sps:$4 sm:$0xff]  }
 0x4d5   :  { %7156 = vmatpush2.bf16.msra.mxu0 %v13271_v19  ;;  %7098 = vmatprep.subr.bf16.mxu1 %v13276_v21  ;;  %v13342_v19 = vld [vmem:[#allocation5 + $0x1cc] ss:$28 sps:$4 sm:$0xff]  }
 0x4d6   :  { %7157 = vmatprep.subr.bf16.mxu0 %v13279_v27  ;;  %v5085_v21 = vld [vmem:[%s16613_s10] sm:$0x7f] }
 0x4d8   :  { %7099 = vmatpush1.bf16.msra.mxu1 %v13274_v28  ;;  %v13345_v28 = vld [vmem:[#allocation5 + $0x4c] ss:$28 sps:$4 sm:$0xff]  }
 0x4d9   :  { %7158 = vmatpush2.bf16.msra.mxu0 %v13277_v29  ;;  %7100 = vmatprep.subr.bf16.mxu1 %v13282_v30  ;;  %v13340_v30 = vld [vmem:[#allocation5 + $0x1c8] ss:$28 sps:$4 sm:$0xff]  }
 0x4da   :  { %7159 = vmatprep.subr.bf16.mxu0 %v13285_v31  ;;  %v5090_v31 = vrot.slane %v5085_v21, %v13926_v10 }
 0x4dc   :  { %7101 = vmatpush1.bf16.msra.mxu1 %v13280_v32  ;;  %v13343_v32 = vld [vmem:[#allocation5 + $0x48] ss:$28 sps:$4 sm:$0xff]  }
 0x4dd   :  { %7160 = vmatpush2.bf16.msra.mxu0 %v13283_v52  ;;  %7102 = vmatprep.subr.bf16.mxu1 %v13288_v35  ;;  %v13348_v52 = vld [vmem:[#allocation5 + $0x894] ss:$28 sps:$4 sm:$0xff]  }
 0x4de   :  { %7161 = vmatprep.subr.bf16.mxu0 %v13291_v36  ;;  %v13351_v35 = vld [vmem:[#allocation5 + $0x14] ss:$28 sps:$4 sm:$0xff]   ;;  %v5094_v36 = vrot.slane %v5085_v21, %v13932_v12  ;;  %v13391_v21 = vld [vmem:[#allocation5 + $0x208] ss:$28 sps:$4 sm:$0xff]  }
 0x4e0   :  { %7103 = vmatpush1.bf16.msra.mxu1 %v13286_v38  ;;  %v13346_v38 = vld [vmem:[#allocation5 + $0x890] ss:$28 sps:$4 sm:$0xff]  }
 0x4e1   :  { %7162 = vmatpush2.bf16.msra.mxu0 %v13289_v9  ;;  %7104 = vmatprep.subr.bf16.mxu1 %v13294_v26  ;;  %v13349_v26 = vld [vmem:[#allocation5 + $0x10] ss:$28 sps:$4 sm:$0xff]  }
 0x4e2   :  { %7225 = vmatprep.subr.bf16.mxu0 %v13297_v42  ;;  %v13354_v42 = vld [vmem:[#allocation5 + $0x85c] ss:$28 sps:$4 sm:$0xff]  }
 0x4e4   :  { %7105 = vmatpush1.bf16.msra.mxu1 %v13292_v45  ;;  %7164 = vmatmul.mubr.bf16.vlgmr.msra.gmra.mxu0 %v15127_v14 }
 0x4e5   :  { %7226 = vmatpush1.bf16.msra.mxu0 %v13295_v46  ;;  %7106 = vmatprep.subr.bf16.mxu1 %v13300_v15  ;;  %v13357_v46 = vld [vmem:[#allocation5 + $0x35c] ss:$28 sps:$4 sm:$0xff]  }
 0x4e6   :  { %7227 = vmatprep.subr.bf16.mxu0 %v13303_v47  ;;  %7245 = vmatprep.mubr.bf16.mxu0 %v13625_v1 }
 0x4e8   :  { %7107 = vmatpush2.bf16.msra.mxu1 %v13298_v48 }
 0x4e9   :  { %7228 = vmatpush1.bf16.msra.mxu0 %v13301_v0  ;;  %7108 = vmatprep.subr.bf16.mxu1 %v13306_v49  ;;  %v13352_v0 = vld [vmem:[#allocation5 + $0x858] ss:$28 sps:$4 sm:$0xff]  }
 0x4ea   :  { %7254 = vmatprep.subr.bf16.mxu0 %v13309_v41  ;;  %v13355_v41 = vld [vmem:[#allocation5 + $0x358] ss:$28 sps:$4 sm:$0xff]  }
 0x4ec   :  { %7109 = vmatpush2.bf16.msra.mxu1 %v13304_v51  ;;  %11688 = vmatmul.mubr.msk.bf16.vlgmr.msra.gmra.mxu0 %vm6922_vm3, %v15151_v2  ;;  %v13360_v51 = vld [vmem:[#allocation5 + $0x824] ss:$28 sps:$4 sm:$0xff]  }
 0x4ed   :  { %7255 = vmatpush1.bf16.msra.mxu0 %v13307_v44  ;;  %7286 = vmatprep.mubr.bf16.mxu0 %v15107_v39 }
 0x4ee   :  { %7110 = vmatprep.subr.bf16.mxu1 %v13312_v54  ;;  %7256 = vmatprep.subr.bf16.mxu0 %v13315_v37  ;;  %v13363_v54 = vld [vmem:[#allocation5 + $0x324] ss:$28 sps:$4 sm:$0xff]  }
 0x4f0   :  { %7111 = vmatpush2.bf16.msra.mxu1 %v13310_v61  ;;  %v13358_v61 = vld [vmem:[#allocation5 + $0x820] ss:$28 sps:$4 sm:$0xff]  }
 0x4f1   :  { %7257 = vmatpush1.bf16.msra.mxu0 %v13313_v56  ;;  %7112 = vmatprep.subr.bf16.mxu1 %v13318_v34  ;;  %v13361_v56 = vld [vmem:[#allocation5 + $0x320] ss:$28 sps:$4 sm:$0xff]   ;;  %v13366_v34 = vld [vmem:[#allocation5 + $0x7ec] ss:$28 sps:$4 sm:$0xff]  }
 0x4f2   :  { %7258 = vmatprep.subr.bf16.mxu0 %v13321_v24  ;;  %v13369_v24 = vld [vmem:[#allocation5 + $0x2ec] ss:$28 sps:$4 sm:$0xff]  }
 0x4f4   :  { %7113 = vmatpush2.bf16.msra.mxu1 %v13316_v59  ;;  %v13364_v59 = vld [vmem:[#allocation5 + $0x7e8] ss:$28 sps:$4 sm:$0xff]  }
 0x4f5   :  { %7259 = vmatpush1.bf16.msra.mxu0 %v13319_v23  ;;  %7114 = vmatprep.subr.bf16.mxu1 %v13324_v57  ;;  %v13367_v23 = vld [vmem:[#allocation5 + $0x2e8] ss:$28 sps:$4 sm:$0xff]   ;;  %v13372_v57 = vld [vmem:[#allocation5 + $0x7b4] ss:$28 sps:$4 sm:$0xff]  }
 0x4f6   :  { %7260 = vmatprep.subr.bf16.mxu0 %v13327_v58  ;;  %v13375_v58 = vld [vmem:[#allocation5 + $0x2b4] ss:$28 sps:$4 sm:$0xff]  }
 0x4f8   :  { %7115 = vmatpush2.bf16.msra.mxu1 %v13322_v62  ;;  %v13370_v62 = vld [vmem:[#allocation5 + $0x7b0] ss:$28 sps:$4 sm:$0xff]  }
 0x4f9   :  { %7261 = vmatpush1.bf16.msra.mxu0 %v13325_v50  ;;  %7116 = vmatprep.subr.bf16.mxu1 %v13330_v3  ;;  %v13373_v50 = vld [vmem:[#allocation5 + $0x2b0] ss:$28 sps:$4 sm:$0xff]   ;;  %v13378_v3 = vld [vmem:[#allocation5 + $0x77c] ss:$28 sps:$4 sm:$0xff]  }
 0x4fa   :  { %v6960_v7 = vpop.f32.mrf.mxu0  ;;  %7262 = vmatprep.subr.bf16.mxu0 %v13333_v55  ;;  %v13381_v55 = vld [vmem:[#allocation5 + $0x27c] ss:$28 sps:$4 sm:$0xff]  }
 0x4fb   :  { %v6961_v9 = vadd.f32 %v6960_v7, %v5090_v31  ;;  %v13387_v7 = vld [vmem:[#allocation5 + $0x244] ss:$28 sps:$4 sm:$0xff]   ;;  %v13402_v31 = vld [vmem:[#allocation5 + $0xa1c] ss:$28 sps:$4 sm:$0xff]  }
 0x4fc   :  { %7117 = vmatpush2.bf16.msra.mxu1 %v13328_v4  ;;  %v6962_v16 = vpop.f32.mrf.mxu0  ;;  %v13376_v4 = vld [vmem:[#allocation5 + $0x778] ss:$28 sps:$4 sm:$0xff]  }
 0x4fd   :  { %7263 = vmatpush1.bf16.msra.mxu0 %v13331_v5  ;;  %7118 = vmatprep.subr.bf16.mxu1 %v13336_v6  ;;  %v6963_v15 = vadd.f32 %v6962_v16, %v5094_v36  ;;  %v13379_v5 = vld [vmem:[#allocation5 + $0x278] ss:$28 sps:$4 sm:$0xff]   ;;  %v13384_v6 = vld [vmem:[#allocation5 + $0x744] ss:$28 sps:$4 sm:$0xff]  }
 0x4fe   :  { %v6964_v27 = vpop.f32.mrf.mxu0  ;;  %7264 = vmatprep.subr.bf16.mxu0 %v13339_v40  ;;  %v13382_v40 = vld [vmem:[#allocation5 + $0x740] ss:$28 sps:$4 sm:$0xff]  }
 0x4ff   :  { %v13385_v16 = vld [vmem:[#allocation5 + $0x240] ss:$28 sps:$4 sm:$0xff]   ;;  %v13396_v27 = vld [vmem:[#allocation5 + $0xa54] ss:$28 sps:$4 sm:$0xff]  }
 0x500   :  { %7119 = vmatpush2.bf16.msra.mxu1 %v13334_v17  ;;  %v6965_v29 = vpop.f32.mrf.mxu0  ;;  %v13390_v17 = vld [vmem:[#allocation5 + $0x70c] ss:$28 sps:$4 sm:$0xff]   ;;  %v13408_v36 = vld [vmem:[#allocation5 + $0x9e4] ss:$28 sps:$4 sm:$0xff]  }
 0x501   :  { %7265 = vmatpush1.bf16.msra.mxu0 %v13337_v18  ;;  %7120 = vmatprep.subr.bf16.mxu1 %v13342_v19  ;;  %v13393_v18 = vld [vmem:[#allocation5 + $0x20c] ss:$28 sps:$4 sm:$0xff]  }
 0x502   :  { %7266 = vmatprep.subr.bf16.mxu0 %v13345_v28  ;;  %v13388_v19 = vld [vmem:[#allocation5 + $0x708] ss:$28 sps:$4 sm:$0xff]   ;;  %v13399_v28 = vld [vmem:[#allocation5 + $0x1d4] ss:$28 sps:$4 sm:$0xff]  }
 0x503   :  { %v13394_v29 = vld [vmem:[#allocation5 + $0xa50] ss:$28 sps:$4 sm:$0xff]  }
 0x504   :  { %7121 = vmatpush2.bf16.msra.mxu1 %v13340_v30  ;;  %v13397_v30 = vld [vmem:[#allocation5 + $0x1d0] ss:$28 sps:$4 sm:$0xff]  }
 0x505   :  { %7267 = vmatpush1.bf16.msra.mxu0 %v13343_v32  ;;  %7172 = vmatprep.subr.bf16.mxu1 %v13348_v52  ;;  %v13405_v32 = vld [vmem:[#allocation5 + $0x89c] ss:$28 sps:$4 sm:$0xff]  }
 0x506   :  { %v7001_v45 = vpop.f32.mrf.mxu1  ;;  %7268 = vmatprep.subr.bf16.mxu0 %v13351_v35  ;;  %v13400_v52 = vld [vmem:[#allocation5 + $0xa18] ss:$28 sps:$4 sm:$0xff]  }
 0x507   :  { %v15166_v47 = vadd.f32 %v7001_v45, %v6961_v9  ;;  %7123 = vmatmul.mubr.bf16.vlgmr.msra.gmra.mxu1 %v15120_v53  ;;  %v13403_v35 = vld [vmem:[#allocation5 + $0x898] ss:$28 sps:$4 sm:$0xff]   ;;  %v13406_v9 = vld [vmem:[#allocation5 + $0x9e0] ss:$28 sps:$4 sm:$0xff]   ;;  %v13417_v45 = vld [vmem:[#allocation5 + $0x82c] ss:$28 sps:$4 sm:$0xff]  }
 0x508   :  { %7173 = vmatpush1.bf16.msra.mxu1 %v13346_v38  ;;  %7204 = vmatprep.mubr.bf16.mxu1 %v15139_v20  ;;  %v7003_v48 = vpop.f32.mrf.mxu1  ;;  %v13411_v38 = vld [vmem:[#allocation5 + $0x864] ss:$28 sps:$4 sm:$0xff]  }
 0x509   :  { %v15170_v49 = vadd.f32 %v7003_v48, %v6963_v15  ;;  %7269 = vmatpush1.bf16.msra.mxu0 %v13349_v26  ;;  %7174 = vmatprep.subr.bf16.mxu1 %v13354_v42  ;;  %v13409_v26 = vld [vmem:[#allocation5 + $0x860] ss:$28 sps:$4 sm:$0xff]   ;;  %v13414_v42 = vld [vmem:[#allocation5 + $0x9ac] ss:$28 sps:$4 sm:$0xff]   ;;  %v13420_v48 = vld [vmem:[#allocation5 + $0x974] ss:$28 sps:$4 sm:$0xff]  }
 0x50a   :  { %v7005_v44 = vpop.f32.mrf.mxu1  ;;  %7270 = vmatprep.subr.bf16.mxu0 %v13357_v46  ;;  %v13412_v46 = vld [vmem:[#allocation5 + $0x9a8] ss:$28 sps:$4 sm:$0xff]  }
 0x50b   :  { %v13415_v15 = vld [vmem:[#allocation5 + $0x828] ss:$28 sps:$4 sm:$0xff]   ;;  %v13426_v44 = vld [vmem:[#allocation5 + $0x93c] ss:$28 sps:$4 sm:$0xff]  }
 0x50c   :  { %7175 = vmatpush1.bf16.msra.mxu1 %v13352_v0  ;;  %v7006_v37 = vpop.f32.mrf.mxu1  ;;  %v13423_v0 = vld [vmem:[#allocation5 + $0x7f4] ss:$28 sps:$4 sm:$0xff]  }
 0x50d   :  { %7271 = vmatpush2.bf16.msra.mxu0 %v13355_v41  ;;  %7176 = vmatprep.subr.bf16.mxu1 %v13360_v51  ;;  %v13418_v41 = vld [vmem:[#allocation5 + $0x970] ss:$28 sps:$4 sm:$0xff]   ;;  %v13424_v37 = vld [vmem:[#allocation5 + $0x938] ss:$28 sps:$4 sm:$0xff]  }
 0x50e   :  { %7272 = vmatprep.subr.bf16.mxu0 %v13363_v54  ;;  %v13421_v51 = vld [vmem:[#allocation5 + $0x7f0] ss:$28 sps:$4 sm:$0xff]   ;;  %v13429_v54 = vld [vmem:[#allocation5 + $0x7bc] ss:$28 sps:$4 sm:$0xff]  }
 0x510   :  { %7177 = vmatpush1.bf16.msra.mxu1 %v13358_v61  ;;  %v13427_v61 = vld [vmem:[#allocation5 + $0x7b8] ss:$28 sps:$4 sm:$0xff]  }
 0x511   :  { %7273 = vmatpush2.bf16.msra.mxu0 %v13361_v56  ;;  %7178 = vmatprep.subr.bf16.mxu1 %v13366_v34  ;;  %v13432_v56 = vld [vmem:[#allocation5 + $0x904] ss:$28 sps:$4 sm:$0xff]  }
 0x512   :  { %7274 = vmatprep.subr.bf16.mxu0 %v13369_v24  ;;  %v13435_v34 = vld [vmem:[#allocation5 + $0x784] ss:$28 sps:$4 sm:$0xff]  }
 0x513   :  { %v13430_v24 = vld [vmem:[#allocation5 + $0x900] ss:$28 sps:$4 sm:$0xff]  }
 0x514   :  { %7179 = vmatpush1.bf16.msra.mxu1 %v13364_v59  ;;  %v13433_v59 = vld [vmem:[#allocation5 + $0x780] ss:$28 sps:$4 sm:$0xff]  }
 0x515   :  { %7275 = vmatpush2.bf16.msra.mxu0 %v13367_v23  ;;  %7180 = vmatprep.subr.bf16.mxu1 %v13372_v57  ;;  %v13438_v23 = vld [vmem:[#allocation5 + $0x8cc] ss:$28 sps:$4 sm:$0xff]  }
 0x516   :  { %7276 = vmatprep.subr.bf16.mxu0 %v13375_v58  ;;  %v13441_v57 = vld [vmem:[#allocation5 + $0x74c] ss:$28 sps:$4 sm:$0xff]  }
 0x517   :  { %v13436_v58 = vld [vmem:[#allocation5 + $0x8c8] ss:$28 sps:$4 sm:$0xff]  }
 0x518   :  { %7181 = vmatpush1.bf16.msra.mxu1 %v13370_v62  ;;  %v13439_v62 = vld [vmem:[#allocation5 + $0x748] ss:$28 sps:$4 sm:$0xff]  }
 0x519   :  { %7277 = vmatpush2.bf16.msra.mxu0 %v13373_v50  ;;  %7182 = vmatprep.subr.bf16.mxu1 %v13378_v3  ;;  %v13444_v50 = vld [vmem:[#allocation5 + $0x51c] ss:$28 sps:$4 sm:$0xff]   ;;  %v13447_v3 = vld [vmem:[#allocation5 + $0x714] ss:$28 sps:$4 sm:$0xff]  }
 0x51a   :  { %7278 = vmatprep.subr.bf16.mxu0 %v13381_v55  ;;  %v13442_v55 = vld [vmem:[#allocation5 + $0x518] ss:$28 sps:$4 sm:$0xff]  }
 0x51c   :  { %7183 = vmatpush1.bf16.msra.mxu1 %v13376_v4  ;;  %v13445_v4 = vld [vmem:[#allocation5 + $0x710] ss:$28 sps:$4 sm:$0xff]  }
 0x51d   :  { %7279 = vmatpush2.bf16.msra.mxu0 %v13379_v5  ;;  %7184 = vmatprep.subr.bf16.mxu1 %v13384_v6  ;;  %v13450_v5 = vld [vmem:[#allocation5 + $0x4e4] ss:$28 sps:$4 sm:$0xff]   ;;  %v13453_v6 = vld [vmem:[#allocation5 + $0xa5c] ss:$28 sps:$4 sm:$0xff]  }
 0x51e   :  { %7280 = vmatprep.subr.bf16.mxu0 %v13387_v7  ;;  %v13448_v7 = vld [vmem:[#allocation5 + $0x4e0] ss:$28 sps:$4 sm:$0xff]  }
 0x520   :  { %7185 = vmatpush1.bf16.msra.mxu1 %v13382_v40  ;;  %v13451_v40 = vld [vmem:[#allocation5 + $0xa58] ss:$28 sps:$4 sm:$0xff]  }
 0x521   :  { %7281 = vmatpush2.bf16.msra.mxu0 %v13385_v16  ;;  %7186 = vmatprep.subr.bf16.mxu1 %v13390_v17  ;;  %v13456_v16 = vld [vmem:[#allocation5 + $0x4ac] ss:$28 sps:$4 sm:$0xff]   ;;  %v13459_v17 = vld [vmem:[#allocation5 + $0xa24] ss:$28 sps:$4 sm:$0xff]  }
 0x522   :  { %7282 = vmatprep.subr.bf16.mxu0 %v13393_v18  ;;  %v13454_v18 = vld [vmem:[#allocation5 + $0x4a8] ss:$28 sps:$4 sm:$0xff]  }
 0x524   :  { %7187 = vmatpush1.bf16.msra.mxu1 %v13388_v19  ;;  %v13457_v19 = vld [vmem:[#allocation5 + $0xa20] ss:$28 sps:$4 sm:$0xff]  }
 0x525   :  { %7283 = vmatpush2.bf16.msra.mxu0 %v13391_v21  ;;  %7188 = vmatprep.subr.bf16.mxu1 %v13396_v27  ;;  %v13462_v21 = vld [vmem:[#allocation5 + $0x474] ss:$28 sps:$4 sm:$0xff]   ;;  %v13465_v27 = vld [vmem:[#allocation5 + $0x9ec] ss:$28 sps:$4 sm:$0xff]  }
 0x526   :  { %7284 = vmatprep.subr.bf16.mxu0 %v13399_v28  ;;  %v13460_v28 = vld [vmem:[#allocation5 + $0x470] ss:$28 sps:$4 sm:$0xff]  }
 0x528   :  { %7189 = vmatpush2.bf16.msra.mxu1 %v13394_v29  ;;  %v13463_v29 = vld [vmem:[#allocation5 + $0x9e8] ss:$28 sps:$4 sm:$0xff]  }
 0x529   :  { %7285 = vmatpush2.bf16.msra.mxu0 %v13397_v30  ;;  %7190 = vmatprep.subr.bf16.mxu1 %v13402_v31  ;;  %v13468_v30 = vld [vmem:[#allocation5 + $0x43c] ss:$28 sps:$4 sm:$0xff]   ;;  %v13471_v31 = vld [vmem:[#allocation5 + $0x9b4] ss:$28 sps:$4 sm:$0xff]  }
 0x52a   :  { %7336 = vmatprep.subr.bf16.mxu0 %v13405_v32  ;;  %v13466_v32 = vld [vmem:[#allocation5 + $0x438] ss:$28 sps:$4 sm:$0xff]  }
 0x52c   :  { %7191 = vmatpush2.bf16.msra.mxu1 %v13400_v52  ;;  %7287 = vmatmul.mubr.bf16.vlgmr.msra.gmra.mxu0 %v15120_v53  ;;  %v13469_v52 = vld [vmem:[#allocation5 + $0x9b0] ss:$28 sps:$4 sm:$0xff]  }
 0x52d   :  { %7337 = vmatpush1.bf16.msra.mxu0 %v13403_v35  ;;  %7368 = vmatprep.mubr.bf16.mxu0 %v15139_v20  ;;  %v13474_v35 = vld [vmem:[#allocation5 + $0x404] ss:$28 sps:$4 sm:$0xff]  }
 0x52e   :  { %7192 = vmatprep.subr.bf16.mxu1 %v13408_v36  ;;  %7338 = vmatprep.subr.bf16.mxu0 %v13411_v38  ;;  %v13477_v36 = vld [vmem:[#allocation5 + $0x97c] ss:$28 sps:$4 sm:$0xff]  }
 0x52f   :  { %v13472_v38 = vld [vmem:[#allocation5 + $0x400] ss:$28 sps:$4 sm:$0xff]  }
 0x530   :  { %7193 = vmatpush2.bf16.msra.mxu1 %v13406_v9  ;;  %v13475_v9 = vld [vmem:[#allocation5 + $0x978] ss:$28 sps:$4 sm:$0xff]  }
 0x531   :  { %7339 = vmatpush1.bf16.msra.mxu0 %v13409_v26  ;;  %7194 = vmatprep.subr.bf16.mxu1 %v13414_v42  ;;  %v13480_v26 = vld [vmem:[#allocation5 + $0x3cc] ss:$28 sps:$4 sm:$0xff]   ;;  %v13483_v42 = vld [vmem:[#allocation5 + $0x944] ss:$28 sps:$4 sm:$0xff]  }
 0x532   :  { %7340 = vmatprep.subr.bf16.mxu0 %v13417_v45  ;;  %v13478_v45 = vld [vmem:[#allocation5 + $0x3c8] ss:$28 sps:$4 sm:$0xff]  }
 0x534   :  { %7195 = vmatpush2.bf16.msra.mxu1 %v13412_v46  ;;  %v13481_v46 = vld [vmem:[#allocation5 + $0x940] ss:$28 sps:$4 sm:$0xff]  }
 0x535   :  { %7341 = vmatpush1.bf16.msra.mxu0 %v13415_v15  ;;  %7196 = vmatprep.subr.bf16.mxu1 %v13420_v48  ;;  %v13486_v15 = vld [vmem:[#allocation5 + $0x394] ss:$28 sps:$4 sm:$0xff]   ;;  %v13489_v48 = vld [vmem:[#allocation5 + $0x90c] ss:$28 sps:$4 sm:$0xff]  }
 0x536   :  { %7342 = vmatprep.subr.bf16.mxu0 %v13423_v0  ;;  %v13484_v0 = vld [vmem:[#allocation5 + $0x390] ss:$28 sps:$4 sm:$0xff]  }
 0x538   :  { %7197 = vmatpush2.bf16.msra.mxu1 %v13418_v41  ;;  %v13487_v41 = vld [vmem:[#allocation5 + $0x908] ss:$28 sps:$4 sm:$0xff]  }
 0x539   :  { %7343 = vmatpush1.bf16.msra.mxu0 %v13421_v51  ;;  %7198 = vmatprep.subr.bf16.mxu1 %v13426_v44  ;;  %v13492_v51 = vld [vmem:[#allocation5 + $0x6dc] ss:$28 sps:$4 sm:$0xff]   ;;  %v13495_v44 = vld [vmem:[#allocation5 + $0x8d4] ss:$28 sps:$4 sm:$0xff]  }
 0x53a   :  { %7344 = vmatprep.subr.bf16.mxu0 %v13429_v54 }
 0x53c   :  { %7199 = vmatpush2.bf16.msra.mxu1 %v13424_v37  ;;  %v13490_v37 = vld [vmem:[#allocation5 + $0x6d8] ss:$28 sps:$4 sm:$0xff]  }
 0x53d   :  { %7345 = vmatpush1.bf16.msra.mxu0 %v13427_v61  ;;  %7200 = vmatprep.subr.bf16.mxu1 %v13432_v56  ;;  %v13493_v56 = vld [vmem:[#allocation5 + $0x8d0] ss:$28 sps:$4 sm:$0xff]  }
 0x53e   :  { %7346 = vmatprep.subr.bf16.mxu0 %v13435_v34  ;;  %v13498_v34 = vld [vmem:[#allocation5 + $0x6a4] ss:$28 sps:$4 sm:$0xff]  }
 0x540   :  { %7201 = vmatpush2.bf16.msra.mxu1 %v13430_v24 }
 0x541   :  { %7347 = vmatpush1.bf16.msra.mxu0 %v13433_v59  ;;  %7202 = vmatprep.subr.bf16.mxu1 %v13438_v23  ;;  %v13499_v59 = vld [vmem:[#allocation5 + $0x6e0] ss:$28 sps:$4 sm:$0xff]  }
 0x542   :  { %7348 = vmatprep.subr.bf16.mxu0 %v13441_v57 }
 0x544   :  { %7203 = vmatpush2.bf16.msra.mxu1 %v13436_v58  ;;  %v13496_v58 = vld [vmem:[#allocation5 + $0x6a0] ss:$28 sps:$4 sm:$0xff]  }
 0x545   :  { %7349 = vmatpush1.bf16.msra.mxu0 %v13439_v62  ;;  %7295 = vmatprep.subr.bf16.mxu1 %v13444_v50  ;;  %v13500_v62 = vld [vmem:[#allocation5 + $0x520] ss:$28 sps:$4 sm:$0xff]  }
 0x546   :  { %7350 = vmatprep.subr.bf16.mxu0 %v13447_v3  ;;  %v13504_v3 = vld [vmem:[#allocation5 + $0x6a8] ss:$28 sps:$4 sm:$0xff]  }
 0x547   :  { %7205 = vmatmul.mubr.bf16.vlgmr.msra.gmra.mxu1 %v15141_v22 }
 0x548   :  { %7296 = vmatpush1.bf16.msra.mxu1 %v13442_v55  ;;  %7327 = vmatprep.mubr.bf16.mxu1 %v15125_v60  ;;  %v13501_v55 = vld [vmem:[#allocation5 + $0x668] ss:$28 sps:$4 sm:$0xff]  }
 0x549   :  { %7351 = vmatpush1.bf16.msra.mxu0 %v13445_v4  ;;  %7297 = vmatprep.subr.bf16.mxu1 %v13450_v5  ;;  %v13505_v4 = vld [vmem:[#allocation5 + $0x4e8] ss:$28 sps:$4 sm:$0xff]   ;;  %v13509_v5 = vld [vmem:[#allocation5 + $0x670] ss:$28 sps:$4 sm:$0xff]  }
 0x54a   :  { %7352 = vmatprep.subr.bf16.mxu0 %v13453_v6  ;;  %v13506_v6 = vld [vmem:[#allocation5 + $0x630] ss:$28 sps:$4 sm:$0xff]  }
 0x54c   :  { %7298 = vmatpush1.bf16.msra.mxu1 %v13448_v7  ;;  %v13510_v7 = vld [vmem:[#allocation5 + $0x4b0] ss:$28 sps:$4 sm:$0xff]  }
 0x54d   :  { %7353 = vmatpush2.bf16.msra.mxu0 %v13451_v40  ;;  %7299 = vmatprep.subr.bf16.mxu1 %v13456_v16  ;;  %v13513_v40 = vld [vmem:[#allocation5 + $0x5fc] ss:$28 sps:$4 sm:$0xff]  }
 0x54e   :  { %7354 = vmatprep.subr.bf16.mxu0 %v13459_v17  ;;  %v13514_v16 = vld [vmem:[#allocation5 + $0x638] ss:$28 sps:$4 sm:$0xff]  }
 0x54f   :  { %v13511_v17 = vld [vmem:[#allocation5 + $0x5f8] ss:$28 sps:$4 sm:$0xff]  }
 0x550   :  { %7300 = vmatpush1.bf16.msra.mxu1 %v13454_v18  ;;  %v13515_v18 = vld [vmem:[#allocation5 + $0x478] ss:$28 sps:$4 sm:$0xff]  }
 0x551   :  { %7355 = vmatpush2.bf16.msra.mxu0 %v13457_v19  ;;  %7301 = vmatprep.subr.bf16.mxu1 %v13462_v21  ;;  %v13518_v19 = vld [vmem:[#allocation5 + $0x5c4] ss:$28 sps:$4 sm:$0xff]  }
 0x552   :  { %7356 = vmatprep.subr.bf16.mxu0 %v13465_v27  ;;  %v13516_v21 = vld [vmem:[#allocation5 + $0x5c0] ss:$28 sps:$4 sm:$0xff]  }
 0x553   :  { %v13520_v27 = vld [vmem:[#allocation5 + $0x440] ss:$28 sps:$4 sm:$0xff]  }
 0x554   :  { %7302 = vmatpush1.bf16.msra.mxu1 %v13460_v28  ;;  %v13523_v28 = vld [vmem:[#allocation5 + $0x58c] ss:$28 sps:$4 sm:$0xff]  }
 0x555   :  { %7357 = vmatpush2.bf16.msra.mxu0 %v13463_v29  ;;  %7303 = vmatprep.subr.bf16.mxu1 %v13468_v30  ;;  %v13524_v29 = vld [vmem:[#allocation5 + $0x5c8] ss:$28 sps:$4 sm:$0xff]  }
 0x556   :  { %7358 = vmatprep.subr.bf16.mxu0 %v13471_v31  ;;  %v13521_v30 = vld [vmem:[#allocation5 + $0x588] ss:$28 sps:$4 sm:$0xff]  }
 0x557   :  { %v13525_v31 = vld [vmem:[#allocation5 + $0x408] ss:$28 sps:$4 sm:$0xff]  }
 0x558   :  { %7304 = vmatpush1.bf16.msra.mxu1 %v13466_v32  ;;  %v13528_v32 = vld [vmem:[#allocation5 + $0x554] ss:$28 sps:$4 sm:$0xff]  }
 0x559   :  { %7359 = vmatpush2.bf16.msra.mxu0 %v13469_v52  ;;  %7305 = vmatprep.subr.bf16.mxu1 %v13474_v35  ;;  %v13529_v52 = vld [vmem:[#allocation5 + $0x590] ss:$28 sps:$4 sm:$0xff]  }
 0x55a   :  { %7360 = vmatprep.subr.bf16.mxu0 %v13477_v36  ;;  %v13526_v35 = vld [vmem:[#allocation5 + $0x550] ss:$28 sps:$4 sm:$0xff]  }
 0x55b   :  { %v13530_v36 = vld [vmem:[#allocation5 + $0x3d0] ss:$28 sps:$4 sm:$0xff]  }
 0x55c   :  { %7306 = vmatpush1.bf16.msra.mxu1 %v13472_v38  ;;  %v13533_v38 = vld [vmem:[#allocation5 + $0xacc] ss:$28 sps:$4 sm:$0xff]  }
 0x55d   :  { %7361 = vmatpush2.bf16.msra.mxu0 %v13475_v9  ;;  %7307 = vmatprep.subr.bf16.mxu1 %v13480_v26  ;;  %v13534_v9 = vld [vmem:[#allocation5 + $0x558] ss:$28 sps:$4 sm:$0xff]   ;;  %v13531_v26 = vld [vmem:[#allocation5 + $0xac8] ss:$28 sps:$4 sm:$0xff]  }
 0x55e   :  { %7362 = vmatprep.subr.bf16.mxu0 %v13483_v42  ;;  %v13535_v42 = vld [vmem:[#allocation5 + $0x398] ss:$28 sps:$4 sm:$0xff]  }
 0x560   :  { %7308 = vmatpush1.bf16.msra.mxu1 %v13478_v45  ;;  %v13538_v45 = vld [vmem:[#allocation5 + $0xa94] ss:$28 sps:$4 sm:$0xff]  }
 0x561   :  { %7363 = vmatpush2.bf16.msra.mxu0 %v13481_v46  ;;  %7309 = vmatprep.subr.bf16.mxu1 %v13486_v15 }
 0x562   :  { %7364 = vmatprep.subr.bf16.mxu0 %v13489_v48  ;;  %v13536_v48 = vld [vmem:[#allocation5 + $0xa90] ss:$28 sps:$4 sm:$0xff]  }
 0x564   :  { %7310 = vmatpush1.bf16.msra.mxu1 %v13484_v0  ;;  %v7042_v54 = vpop.f32.mrf.mxu0 }
 0x565   :  { %v15177_v61 = vadd.f32 %v7042_v54, %v15166_v47  ;;  %7365 = vmatpush2.bf16.msra.mxu0 %v13487_v41  ;;  %7311 = vmatprep.subr.bf16.mxu1 %v13492_v51  ;;  %v13503_v47 = vld [vmem:[#allocation5 + $0x66c] ss:$28 sps:$4 sm:$0xff]   ;;  %v13540_v51 = vld [vmem:[#allocation5 + $0x360] ss:$28 sps:$4 sm:$0xff]  }
 0x566   :  { %v7044_v24 = vpop.f32.mrf.mxu0  ;;  %7366 = vmatprep.subr.bf16.mxu0 %v13495_v44  ;;  %v13539_v41 = vld [vmem:[#allocation5 + $0xad0] ss:$28 sps:$4 sm:$0xff]  }
 0x567   :  { %v15180_v23 = vadd.f32 %v7044_v24, %v15170_v49  ;;  %v13508_v49 = vld [vmem:[#allocation5 + $0x634] ss:$28 sps:$4 sm:$0xff]  }
 0x568   :  { %7312 = vmatpush2.bf16.msra.mxu1 %v13490_v37  ;;  %v7046_v57 = vpop.f32.mrf.mxu0  ;;  %v7776_v37 = vld [vmem:[%s16614_s11 + $0x5c0] sm:$0xff] }
 0x569   :  { %7367 = vmatpush2.bf16.msra.mxu0 %v13493_v56  ;;  %7313 = vmatprep.subr.bf16.mxu1 %v13498_v34  ;;  %v13541_v56 = vld [vmem:[#allocation5 + $0x1a0] ss:$28 sps:$4 sm:$0xff]   ;;  %v13542_v24 = vld [vmem:[#allocation5 + $0xa98] ss:$28 sps:$4 sm:$0xff]  }
 0x56a   :  { %v7047_v50 = vpop.f32.mrf.mxu0  ;;  %12193 = vmatprep.subr.bf16.mxu0 %v13499_v59  ;;  %v13543_v59 = vld [vmem:[#allocation5 + $0x328] ss:$28 sps:$4 sm:$0xff]   ;;  %v7768_v57 = vld [vmem:[%s16614_s11 + $0x580] sm:$0xff] }
 0x56c   :  { %7314 = vmatpush2.bf16.msra.mxu1 %v13496_v58  ;;  %7369 = vmatmul.mubr.bf16.vlgmr.msra.gmra.mxu0 %v15141_v22  ;;  %v13544_v58 = vld [vmem:[#allocation5 + $0x168] ss:$28 sps:$4 sm:$0xff]  }
 0x56d   :  { %12194 = vmatpush3.bf16.msra.mxu0 %v13500_v62  ;;  %7490 = vmatprep.mubr.bf16.mxu0 %v15125_v60  ;;  %v13519_v60 = vld [vmem:[#allocation5 + $0x600] ss:$28 sps:$4 sm:$0xff]   ;;  %v13545_v62 = vld [vmem:[#allocation5 + $0x2f0] ss:$28 sps:$4 sm:$0xff]  }
 0x56e   :  { %7315 = vmatprep.subr.bf16.mxu1 %v13503_v47  ;;  %12195 = vmatprep.subr.bf16.mxu0 %v13504_v3  ;;  %v7760_v47 = vld [vmem:[%s16614_s11 + $0x540] sm:$0xff] }
 0x56f   :  { %v7764_v3 = vld [vmem:[%s16614_s11 + $0x560] sm:$0xff] }
 0x570   :  { %7316 = vmatpush2.bf16.msra.mxu1 %v13501_v55  ;;  %v13547_v55 = vld [vmem:[#allocation5 + $0x2b8] ss:$28 sps:$4 sm:$0xff]  }
 0x571   :  { %12196 = vmatpush3.bf16.msra.mxu0 %v13505_v4  ;;  %7317 = vmatprep.subr.bf16.mxu1 %v13508_v49  ;;  %v11860_v49 = vcombine.high %v7760_v47, %v7764_v3 }
 0x572   :  { %12197 = vmatprep.subr.bf16.mxu0 %v13509_v5  ;;  %v7752_v5 = vld [vmem:[%s16614_s11 + $0x500] sm:$0xff] }
 0x574   :  { %7318 = vmatpush2.bf16.msra.mxu1 %v13506_v6  ;;  %v7756_v6 = vld [vmem:[%s16614_s11 + $0x520] sm:$0xff] }
 0x575   :  { %12198 = vmatpush3.bf16.msra.mxu0 %v13510_v7  ;;  %7319 = vmatprep.subr.bf16.mxu1 %v13513_v40  ;;  %v13548_v7 = vld [vmem:[#allocation5 + $0xf8] ss:$28 sps:$4 sm:$0xff]   ;;  %v13549_v40 = vld [vmem:[#allocation5 + $0x280] ss:$28 sps:$4 sm:$0xff]  }
 0x576   :  { %12199 = vmatprep.subr.bf16.mxu0 %v13514_v16  ;;  %v11852_v16 = vcombine.high %v7752_v5, %v7756_v6 }
 0x578   :  { %7320 = vmatpush2.bf16.msra.mxu1 %v13511_v17  ;;  %v7744_v17 = vld [vmem:[%s16614_s11 + $0x4c0] sm:$0xff] }
 0x579   :  { %12200 = vmatpush3.bf16.msra.mxu0 %v13515_v18  ;;  %7321 = vmatprep.subr.bf16.mxu1 %v13518_v19  ;;  %v7748_v18 = vld [vmem:[%s16614_s11 + $0x4e0] sm:$0xff]  ;;  %v13550_v19 = vld [vmem:[#allocation5 + $0xc0] ss:$28 sps:$4 sm:$0xff]  }
 0x57a   :  { %12201 = vmatprep.subr.bf16.mxu0 %v13519_v60  ;;  %v13551_v60 = vld [vmem:[#allocation5 + $0x248] ss:$28 sps:$4 sm:$0xff]  }
 0x57c   :  { %7322 = vmatpush2.bf16.msra.mxu1 %v13516_v21  ;;  %v11851_v21 = vcombine.low %v7752_v5, %v7756_v6  ;;  %v7828_v5 = vld [vmem:[%s16614_s11 + $0x760] sm:$0xff] }
 0x57d   :  { %12202 = vmatpush3.bf16.msra.mxu0 %v13520_v27  ;;  %7323 = vmatprep.subr.bf16.mxu1 %v13523_v28  ;;  %v11844_v27 = vcombine.high %v7744_v17, %v7748_v18  ;;  %v7736_v28 = vld [vmem:[%s16614_s11 + $0x480] sm:$0xff] }
 0x57e   :  { %12203 = vmatprep.subr.bf16.mxu0 %v13524_v29  ;;  %v7740_v29 = vld [vmem:[%s16614_s11 + $0x4a0] sm:$0xff] }
 0x57f   :  { %v13562_v6 = vld [vmem:[#allocation5 + $0x830] ss:$28 sps:$4 sm:$0xff]  }
 0x580   :  { %7324 = vmatpush2.bf16.msra.mxu1 %v13521_v30  ;;  %v13552_v30 = vld [vmem:[#allocation5 + $0x88] ss:$28 sps:$4 sm:$0xff]  }
 0x581   :  { %12204 = vmatpush3.bf16.msra.mxu0 %v13525_v31  ;;  %7325 = vmatprep.subr.bf16.mxu1 %v13528_v32  ;;  %v13553_v31 = vld [vmem:[#allocation5 + $0x210] ss:$28 sps:$4 sm:$0xff]   ;;  %v11843_v32 = vcombine.low %v7744_v17, %v7748_v18  ;;  %v13564_v17 = vld [vmem:[#allocation5 + $0x7f8] ss:$28 sps:$4 sm:$0xff]   ;;  %v13565_v18 = vld [vmem:[#allocation5 + $0x980] ss:$28 sps:$4 sm:$0xff]  }
 0x582   :  { %12205 = vmatprep.subr.bf16.mxu0 %v13529_v52  ;;  %v11836_v52 = vcombine.high %v7736_v28, %v7740_v29 }
 0x584   :  { %7326 = vmatpush2.bf16.msra.mxu1 %v13526_v35  ;;  %v7728_v35 = vld [vmem:[%s16614_s11 + $0x440] sm:$0xff] }
 0x585   :  { %12206 = vmatpush3.bf16.msra.mxu0 %v13530_v36  ;;  %7389 = vmatprep.subr.bf16.mxu1 %v13533_v38  ;;  %v7732_v36 = vld [vmem:[%s16614_s11 + $0x460] sm:$0xff] }
 0x586   :  { %12207 = vmatprep.subr.bf16.mxu0 %v13534_v9  ;;  %v13554_v9 = vld [vmem:[#allocation5 + $0x50] ss:$28 sps:$4 sm:$0xff]  }
 0x587   :  { %7328 = vmatmul.mubr.bf16.vlgmr.msra.gmra.mxu1 %v15127_v14  ;;  %v7083_v46 = vpop.f32.mrf.mxu1 }
 0x588   :  { %v15186_v15 = vadd.f32 %v7083_v46, %v15177_v61  ;;  %7390 = vmatpush1.bf16.msra.mxu1 %v13531_v26  ;;  %7409 = vmatprep.mubr.bf16.mxu1 %v13625_v1  ;;  %v7780_v61 = vld [vmem:[%s16614_s11 + $0x5e0] sm:$0xff]  ;;  %v11828_v46 = vcombine.high %v7728_v35, %v7732_v36 }
 0x589   :  { %12208 = vmatpush3.bf16.msra.mxu0 %v13535_v42  ;;  %v7085_v0 = vpop.f32.mrf.mxu1  ;;  %7391 = vmatprep.subr.bf16.mxu1 %v13538_v45  ;;  %v13555_v26 = vld [vmem:[#allocation5 + $0x1d8] ss:$28 sps:$4 sm:$0xff]   ;;  %v11835_v42 = vcombine.low %v7736_v28, %v7740_v29  ;;  %v13566_v28 = vld [vmem:[#allocation5 + $0x7c0] ss:$28 sps:$4 sm:$0xff]   ;;  %v13567_v29 = vld [vmem:[#allocation5 + $0x948] ss:$28 sps:$4 sm:$0xff]  }
 0x58a   :  { %v15190_v44 = vadd.f32 %v7085_v0, %v15180_v23  ;;  %12260 = vmatprep.subr.bf16.mxu0 %v13626_v33  ;;  %v11876_v23 = vcombine.high %v7776_v37, %v7780_v61  ;;  %v7724_v0 = vld [vmem:[%s16614_s11 + $0x420] sm:$0xff] }
 0x58b   :  { %v7087_v54 = vpop.f32.mrf.mxu1 }
 0x58c   :  { %7392 = vmatpush1.bf16.msra.mxu1 %v13536_v48  ;;  %7491 = vmatmul.mubr.bf16.vlgmr.msra.gmra.mxu0 %v15127_v14  ;;  %v7772_v14 = vld [vmem:[%s16614_s11 + $0x5a0] sm:$0xff]  ;;  %v13557_v54 = vld [vmem:[#allocation5 + $0xa60] ss:$28 sps:$4 sm:$0xff]  }
 0x58d   :  { %12261 = vmatpush3.bf16.msra.mxu0 %v13539_v41  ;;  %v7088_v34 = vpop.f32.mrf.mxu1  ;;  %12171 = vmatprep.subr.bf16.mxu1 %v13540_v51  ;;  %v11868_v50 = vcombine.high %v7768_v57, %v7772_v14  ;;  %v11867_v4 = vcombine.low %v7768_v57, %v7772_v14  ;;  %v7720_v48 = vld [vmem:[%s16614_s11 + $0x400] sm:$0xff]  ;;  %v13559_v57 = vld [vmem:[#allocation5 + $0xa28] ss:$28 sps:$4 sm:$0xff]  }
 0x58e   :  { %12262 = vmatprep.subr.bf16.mxu0 %v13626_v33  ;;  %12264 = vmatprep.mubr.msk.bf16.mxu0 %vm13627_vm2, %v13626_v33  ;;  %v11875_v33 = vcombine.low %v7776_v37, %v7780_v61  ;;  %v13556_v51 = vld [vmem:[#allocation5 + $0x18] ss:$28 sps:$4 sm:$0xff]   ;;  %v11827_v37 = vcombine.low %v7728_v35, %v7732_v36  ;;  %v11819_v14 = vcombine.low %v7720_v48, %v7724_v0  ;;  %v13568_v35 = vld [vmem:[#allocation5 + $0x788] ss:$28 sps:$4 sm:$0xff]   ;;  %v13569_v36 = vld [vmem:[#allocation5 + $0x910] ss:$28 sps:$4 sm:$0xff]  }
 0x58f   :  { %11689 = vmatmul.mubr.msk.bf16.vlgmr.msra.gmra.mxu1 %vm6922_vm3, %v15151_v2  ;;  %v7840_v34 = vld [vmem:[%s16614_s11 + $0x7c0] sm:$0xff] }
 0x590   :  { %12172 = vmatpush3.bf16.msra.mxu1 %v13541_v56  ;;  %7450 = vmatprep.mubr.bf16.mxu1 %v15107_v39  ;;  %v13546_v39 = vld [vmem:[#allocation5 + $0x130] ss:$28 sps:$4 sm:$0xff]   ;;  %v11820_v56 = vcombine.high %v7720_v48, %v7724_v0  ;;  %v13571_v0 = vld [vmem:[#allocation5 + $0x8d8] ss:$28 sps:$4 sm:$0xff]  }
 0x591   :  { %12263 = vmatpush3.bf16.msra.mxu0 %v13542_v24  ;;  %12173 = vmatprep.subr.bf16.mxu1 %v13543_v59  ;;  %v7844_v24 = vld [vmem:[%s16614_s11 + $0x7e0] sm:$0xff] }
 0x592   :  { %10078 = vmatprep.subr.bf16.mxu0 %v11876_v23  ;;  %v13558_v23 = vld [vmem:[#allocation5 + $0x8a0] ss:$28 sps:$4 sm:$0xff]   ;;  %v13570_v48 = vld [vmem:[#allocation5 + $0x750] ss:$28 sps:$4 sm:$0xff]  }
 0x594   :  { %12174 = vmatpush3.bf16.msra.mxu1 %v13544_v58  ;;  %12265 = vmatmul.mubr.msk.bf16.vlgmr.msra.gmra.mxu0 %vm6922_vm3, %v15151_v2  ;;  %v11859_v2 = vcombine.low %v7760_v47, %v7764_v3  ;;  %v13560_v3 = vld [vmem:[#allocation5 + $0x868] ss:$28 sps:$4 sm:$0xff]  }
 0x595   :  { %12175 = vmatprep.subr.bf16.mxu1 %v13545_v62  ;;  %10079 = vmatpush1.bf16.msra.mxu0 %v11875_v33  ;;  %v11940_v62 = vcombine.high %v7840_v34, %v7844_v24  ;;  %v7832_v33 = vld [vmem:[%s16614_s11 + $0x780] sm:$0xff] }
 0x596   :  { %10080 = vmatprep.subr.bf16.mxu0 %v11868_v50  ;;  %v7836_v50 = vld [vmem:[%s16614_s11 + $0x7a0] sm:$0xff] }
 0x598   :  { %12176 = vmatpush3.bf16.msra.mxu1 %v13546_v39  ;;  %v13561_v39 = vld [vmem:[#allocation5 + $0x9f0] ss:$28 sps:$4 sm:$0xff]  }
 0x599   :  { %12177 = vmatprep.subr.bf16.mxu1 %v13547_v55  ;;  %10081 = vmatpush1.bf16.msra.mxu0 %v11867_v4  ;;  %v11939_v55 = vcombine.low %v7840_v34, %v7844_v24  ;;  %v7788_v34 = vld [vmem:[%s16614_s11 + $0x620] sm:$0xff] }
 0x59a   :  { %10082 = vmatprep.subr.bf16.mxu0 %v11860_v49  ;;  %v7824_v49 = vld [vmem:[%s16614_s11 + $0x740] sm:$0xff] }
 0x59b   :  { %v13572_v24 = vld [vmem:[#allocation5 + $0x718] ss:$28 sps:$4 sm:$0xff]  }
 0x59c   :  { %12178 = vmatpush3.bf16.msra.mxu1 %v13548_v7  ;;  %v11931_v7 = vcombine.low %v7832_v33, %v7836_v50 }
 0x59d   :  { %12179 = vmatprep.subr.bf16.mxu1 %v13549_v40  ;;  %10083 = vmatpush1.bf16.msra.mxu0 %v11859_v2  ;;  %v11924_v40 = vcombine.high %v7824_v49, %v7828_v5  ;;  %v7816_v2 = vld [vmem:[%s16614_s11 + $0x700] sm:$0xff] }
 0x59e   :  { %10084 = vmatprep.subr.bf16.mxu0 %v11852_v16  ;;  %v7820_v16 = vld [vmem:[%s16614_s11 + $0x720] sm:$0xff] }
 0x5a0   :  { %12180 = vmatpush3.bf16.msra.mxu1 %v13550_v19  ;;  %v11923_v19 = vcombine.low %v7824_v49, %v7828_v5  ;;  %v7636_v5 = vld [vmem:[%s16614_s11 + $0x160] sm:$0xff] }
 0x5a1   :  { %12181 = vmatprep.subr.bf16.mxu1 %v13551_v60  ;;  %10085 = vmatpush1.bf16.msra.mxu0 %v11851_v21  ;;  %v11916_v60 = vcombine.high %v7816_v2, %v7820_v16  ;;  %v7808_v21 = vld [vmem:[%s16614_s11 + $0x6c0] sm:$0xff] }
 0x5a2   :  { %10086 = vmatprep.subr.bf16.mxu0 %v11844_v27  ;;  %v7812_v27 = vld [vmem:[%s16614_s11 + $0x6e0] sm:$0xff] }
 0x5a4   :  { %v15244_v38 = vpop.f32.mrf.mxu0  ;;  %12182 = vmatpush3.bf16.msra.mxu1 %v13552_v30  ;;  %v11915_v30 = vcombine.low %v7816_v2, %v7820_v16 }
 0x5a5   :  { %12183 = vmatprep.subr.bf16.mxu1 %v13553_v31  ;;  %10087 = vmatpush1.bf16.msra.mxu0 %v11843_v32  ;;  %v11908_v31 = vcombine.high %v7808_v21, %v7812_v27  ;;  %v7800_v32 = vld [vmem:[%s16614_s11 + $0x680] sm:$0xff] }
 0x5a6   :  { %v15246_v45 = vpop.f32.mrf.mxu0  ;;  %10088 = vmatprep.subr.bf16.mxu0 %v11836_v52  ;;  %v7804_v52 = vld [vmem:[%s16614_s11 + $0x6a0] sm:$0xff] }
 0x5a8   :  { %v7169_v41 = vpop.f32.mrf.mxu0  ;;  %12184 = vmatpush3.bf16.msra.mxu1 %v13554_v9  ;;  %v11907_v9 = vcombine.low %v7808_v21, %v7812_v27  ;;  %v7612_v21 = vld [vmem:[%s16614_s11 + $0xa0] sm:$0xff] }
 0x5a9   :  { %12185 = vmatprep.subr.bf16.mxu1 %v13555_v26  ;;  %10089 = vmatpush1.bf16.msra.mxu0 %v11835_v42  ;;  %v11900_v26 = vcombine.high %v7800_v32, %v7804_v52  ;;  %v7792_v42 = vld [vmem:[%s16614_s11 + $0x640] sm:$0xff]  ;;  %v11899_v41 = vcombine.low %v7800_v32, %v7804_v52 }
 0x5aa   :  { %v7170_v61 = vpop.f32.mrf.mxu0  ;;  %10090 = vmatprep.subr.bf16.mxu0 %v11828_v46  ;;  %v7796_v46 = vld [vmem:[%s16614_s11 + $0x660] sm:$0xff] }
 0x5ab   :  { %v7592_v52 = vld [vmem:[%s16614_s11] sm:$0xff] }
 0x5ac   :  { %v15260_v59 = vpop.f32.mrf.mxu0  ;;  %12186 = vmatpush3.bf16.msra.mxu1 %v13556_v51  ;;  %v7648_v51 = vld [vmem:[%s16614_s11 + $0x1c0] sm:$0xff] }
 0x5ad   :  { %12215 = vmatprep.subr.bf16.mxu1 %v13557_v54  ;;  %10091 = vmatpush1.bf16.msra.mxu0 %v11827_v37  ;;  %v7652_v54 = vld [vmem:[%s16614_s11 + $0x1e0] sm:$0xff]  ;;  %v11892_v37 = vcombine.high %v7792_v42, %v7796_v46 }
 0x5ae   :  { %v15262_v58 = vpop.f32.mrf.mxu0  ;;  %10092 = vmatprep.subr.bf16.mxu0 %v11820_v56  ;;  %v7784_v56 = vld [vmem:[%s16614_s11 + $0x600] sm:$0xff] }
 0x5af   :  { %7451 = vmatmul.mubr.bf16.vlgmr.msra.gmra.mxu1 %v15120_v53  ;;  %v11932_v53 = vcombine.high %v7832_v33, %v7836_v50  ;;  %v7640_v33 = vld [vmem:[%s16614_s11 + $0x180] sm:$0xff] }
 0x5b0   :  { %v7251_v47 = vpop.f32.mrf.mxu0  ;;  %12216 = vmatpush3.bf16.msra.mxu1 %v13558_v23  ;;  %7530 = vmatprep.mubr.bf16.mxu1 %v15139_v20  ;;  %v13563_v20 = vld [vmem:[#allocation5 + $0x9b8] ss:$28 sps:$4 sm:$0xff]  }
 0x5b1   :  { %12217 = vmatprep.subr.bf16.mxu1 %v13559_v57  ;;  %10093 = vmatpush1.bf16.msra.mxu0 %v11819_v14  ;;  %v11748_v57 = vcombine.high %v7648_v51, %v7652_v54  ;;  %v11891_v14 = vcombine.low %v7792_v42, %v7796_v46  ;;  %v7644_v50 = vld [vmem:[%s16614_s11 + $0x1a0] sm:$0xff]  ;;  %v11884_v47 = vcombine.high %v7784_v56, %v7788_v34 }
 0x5b2   :  { %v7252_v4 = vpop.f32.mrf.mxu0  ;;  %10094 = vmatprep.subr.bf16.mxu0 %v11940_v62  ;;  %v7579_v62 = vmax.f32 %v15190_v44, 0.0  ;;  %v7632_v44 = vld [vmem:[%s16614_s11 + $0x140] sm:$0xff] }
 0x5b3   :  { %v11740_v4 = vcombine.high %v7640_v33, %v7644_v50  ;;  %v11731_v2 = vcombine.low %v7632_v44, %v7636_v5  ;;  %v7716_v42 = vld [vmem:[%s16614_s11 + $0x3e0] sm:$0xff] }
 0x5b4   :  { %12218 = vmatpush3.bf16.msra.mxu1 %v13560_v3  ;;  %v15325_v49 = vpack.c.bf16 %v7579_v62, %v7579_v62 }
 0x5b5   :  { %12219 = vmatprep.subr.bf16.mxu1 %v13561_v39  ;;  %10095 = vmatpush2.bf16.msra.mxu0 %v11939_v55  ;;  %v11747_v39 = vcombine.low %v7648_v51, %v7652_v54 }
 0x5b6   :  { %10096 = vmatprep.subr.bf16.mxu0 %v11932_v53  ;;  %v11883_v53 = vcombine.low %v7784_v56, %v7788_v34  ;;  %v7696_v34 = vld [vmem:[%s16614_s11 + $0x340] sm:$0xff] }
 0x5b8   :  { %12220 = vmatpush3.bf16.msra.mxu1 %v13562_v6  ;;  %v11739_v6 = vcombine.low %v7640_v33, %v7644_v50  ;;  %v7688_v50 = vld [vmem:[%s16614_s11 + $0x300] sm:$0xff] }
 0x5b9   :  { %12221 = vmatprep.subr.bf16.mxu1 %v13563_v20  ;;  %10097 = vmatpush2.bf16.msra.mxu0 %v11931_v7  ;;  %v11732_v20 = vcombine.high %v7632_v44, %v7636_v5  ;;  %v7624_v7 = vld [vmem:[%s16614_s11 + $0x100] sm:$0xff] }
 0x5ba   :  { %10098 = vmatprep.subr.bf16.mxu0 %v11924_v40  ;;  %v7628_v40 = vld [vmem:[%s16614_s11 + $0x120] sm:$0xff] }
 0x5bb   :  { %v11724_v16 = vcombine.high %v7624_v7, %v7628_v40  ;;  %v7672_v5 = vld [vmem:[%s16614_s11 + $0x280] sm:$0xff] }
 0x5bc   :  { %12222 = vmatpush3.bf16.msra.mxu1 %v13564_v17  ;;  %v7620_v17 = vld [vmem:[%s16614_s11 + $0xe0] sm:$0xff] }
 0x5bd   :  { %12223 = vmatprep.subr.bf16.mxu1 %v13565_v18  ;;  %10099 = vmatpush2.bf16.msra.mxu0 %v11923_v19  ;;  %v11723_v18 = vcombine.low %v7624_v7, %v7628_v40  ;;  %v15408_v40 = vld [vmem:[%s16613_s10] sm:$0x7f] }
 0x5be   :  { %10100 = vmatprep.subr.bf16.mxu0 %v11916_v60  ;;  %v7608_v60 = vld [vmem:[%s16614_s11 + $0x80] sm:$0xff] }
 0x5c0   :  { %12224 = vmatpush3.bf16.msra.mxu1 %v13566_v28  ;;  %v11708_v28 = vcombine.high %v7608_v60, %v7612_v21 }
 0x5c1   :  { %12225 = vmatprep.subr.bf16.mxu1 %v13567_v29  ;;  %10101 = vmatpush2.bf16.msra.mxu0 %v11915_v30  ;;  %v7600_v29 = vld [vmem:[%s16614_s11 + $0x40] sm:$0xff] }
 0x5c2   :  { %10102 = vmatprep.subr.bf16.mxu0 %v11908_v31  ;;  %v7604_v30 = vld [vmem:[%s16614_s11 + $0x60] sm:$0xff]  ;;  %v11707_v31 = vcombine.low %v7608_v60, %v7612_v21 }
 0x5c3   :  { %v11700_v32 = vcombine.high %v7600_v29, %v7604_v30  ;;  %v7656_v21 = vld [vmem:[%s16614_s11 + $0x200] sm:$0xff] }
 0x5c4   :  { %12226 = vmatpush3.bf16.msra.mxu1 %v13568_v35  ;;  %v7596_v35 = vld [vmem:[%s16614_s11 + $0x20] sm:$0xff] }
 0x5c5   :  { %12227 = vmatprep.subr.bf16.mxu1 %v13569_v36  ;;  %10103 = vmatpush2.bf16.msra.mxu0 %v11907_v9  ;;  %v11699_v36 = vcombine.low %v7600_v29, %v7604_v30  ;;  %v11692_v9 = vcombine.high %v7592_v52, %v7596_v35  ;;  %v11691_v46 = vcombine.low %v7592_v52, %v7596_v35 }
 0x5c6   :  { %10104 = vmatprep.subr.bf16.mxu0 %v11900_v26  ;;  %v7712_v26 = vld [vmem:[%s16614_s11 + $0x3c0] sm:$0xff] }
 0x5c7   :  { %v15308_v61 = vpop.f32.mrf.mxu1  ;;  %v11811_v54 = vcombine.low %v7712_v26, %v7716_v42 }
 0x5c8   :  { %12228 = vmatpush3.bf16.msra.mxu1 %v13570_v48  ;;  %v11812_v48 = vcombine.high %v7712_v26, %v7716_v42 }
 0x5c9   :  { %v15316_v23 = vpop.f32.mrf.mxu1  ;;  %12229 = vmatprep.subr.bf16.mxu1 %v13571_v0  ;;  %10105 = vmatpush2.bf16.msra.mxu0 %v11899_v41  ;;  %v7704_v0 = vld [vmem:[%s16614_s11 + $0x380] sm:$0xff] }
 0x5ca   :  { %10106 = vmatprep.subr.bf16.mxu0 %v11892_v37  ;;  %v7708_v41 = vld [vmem:[%s16614_s11 + $0x3a0] sm:$0xff] }
 0x5cb   :  { %v7128_v3 = vpop.f32.mrf.mxu1  ;;  %v11804_v37 = vcombine.high %v7704_v0, %v7708_v41 }
 0x5cc   :  { %12230 = vmatpush3.bf16.msra.mxu1 %v13572_v24  ;;  %v7700_v24 = vld [vmem:[%s16614_s11 + $0x360] sm:$0xff] }
 0x5cd   :  { %v7129_v55 = vpop.f32.mrf.mxu1  ;;  %10037 = vmatprep.subr.bf16.mxu1 %v11748_v57  ;;  %10107 = vmatpush2.bf16.msra.mxu0 %v11891_v14  ;;  %v11803_v14 = vcombine.low %v7704_v0, %v7708_v41  ;;  %v11796_v62 = vcombine.high %v7696_v34, %v7700_v24  ;;  %v11795_v3 = vcombine.low %v7696_v34, %v7700_v24  ;;  %v7900_v0 = vld [vmem:[%s16614_s11 + $0x9a0] sm:$0xff] }
 0x5ce   :  { %10108 = vmatprep.subr.bf16.mxu0 %v11884_v47  ;;  %v7692_v47 = vld [vmem:[%s16614_s11 + $0x320] sm:$0xff] }
 0x5cf   :  { %7531 = vmatmul.mubr.bf16.vlgmr.msra.gmra.mxu1 %v15141_v22  ;;  %v7616_v22 = vld [vmem:[%s16614_s11 + $0xc0] sm:$0xff] }
 0x5d0   :  { %10038 = vmatpush1.bf16.msra.mxu1 %v11747_v39  ;;  %10069 = vmatprep.mubr.bf16.mxu1 %v15325_v49  ;;  %v11716_v19 = vcombine.high %v7616_v22, %v7620_v17  ;;  %v11715_v27 = vcombine.low %v7616_v22, %v7620_v17  ;;  %v11788_v39 = vcombine.high %v7688_v50, %v7692_v47  ;;  %v7680_v55 = vld [vmem:[%s16614_s11 + $0x2c0] sm:$0xff] }
 0x5d1   :  { %10039 = vmatprep.subr.bf16.mxu1 %v11740_v4  ;;  %10109 = vmatpush2.bf16.msra.mxu0 %v11883_v53  ;;  %v7684_v4 = vld [vmem:[%s16614_s11 + $0x2e0] sm:$0xff]  ;;  %v11787_v53 = vcombine.low %v7688_v50, %v7692_v47  ;;  %v5102_v17 = vrot.slane %v15408_v40, %v13935_v13 }
 0x5d2   :  { %v11780_v44 = vcombine.high %v7680_v55, %v7684_v4  ;;  %v7668_v22 = vld [vmem:[%s16614_s11 + $0x260] sm:$0xff] }
 0x5d3   :  { %v7984_v47 = vld [vmem:[%s16614_s11 + $0xc40] sm:$0xff] }
 0x5d4   :  { %10040 = vmatpush1.bf16.msra.mxu1 %v11739_v6  ;;  %v7676_v6 = vld [vmem:[%s16614_s11 + $0x2a0] sm:$0xff] }
 0x5d5   :  { %10041 = vmatprep.subr.bf16.mxu1 %v11732_v20  ;;  %v11779_v20 = vcombine.low %v7680_v55, %v7684_v4  ;;  %v11772_v7 = vcombine.high %v7672_v5, %v7676_v6  ;;  %v7884_v55 = vld [vmem:[%s16614_s11 + $0x920] sm:$0xff] }
 0x5d8   :  { %10042 = vmatpush1.bf16.msra.mxu1 %v11731_v2  ;;  %v5098_v2 = vrot.slane %v15408_v40, %v13929_v11 }
 0x5d9   :  { %10043 = vmatprep.subr.bf16.mxu1 %v11724_v16  ;;  %v7664_v16 = vld [vmem:[%s16614_s11 + $0x240] sm:$0xff] }
 0x5da   :  { %v7125_v60 = vadd.f32 %v15308_v61, %v5098_v2  ;;  %v11763_v29 = vcombine.low %v7664_v16, %v7668_v22  ;;  %v7904_v61 = vld [vmem:[%s16614_s11 + $0x9c0] sm:$0xff] }
 0x5db   :  { %v7876_v2 = vld [vmem:[%s16614_s11 + $0x8e0] sm:$0xff] }
 0x5dc   :  { %10044 = vmatpush1.bf16.msra.mxu1 %v11723_v18  ;;  %v11771_v18 = vcombine.low %v7672_v5, %v7676_v6  ;;  %v7976_v6 = vld [vmem:[%s16614_s11 + $0xc00] sm:$0xff] }
 0x5dd   :  { %10045 = vmatprep.subr.bf16.mxu1 %v11716_v19  ;;  %v11764_v19 = vcombine.high %v7664_v16, %v7668_v22 }
 0x5e0   :  { %10046 = vmatpush1.bf16.msra.mxu1 %v11715_v27  ;;  %v7660_v27 = vld [vmem:[%s16614_s11 + $0x220] sm:$0xff] }
 0x5e1   :  { %10047 = vmatprep.subr.bf16.mxu1 %v11708_v28  ;;  %v7127_v28 = vadd.f32 %v15316_v23, %v5102_v17  ;;  %v11756_v30 = vcombine.high %v7656_v21, %v7660_v27  ;;  %v11755_v23 = vcombine.low %v7656_v21, %v7660_v27  ;;  %v7864_v21 = vld [vmem:[%s16614_s11 + $0x880] sm:$0xff] }
 0x5e2   :  { %v7868_v27 = vld [vmem:[%s16614_s11 + $0x8a0] sm:$0xff] }
 0x5e4   :  { %10048 = vmatpush1.bf16.msra.mxu1 %v11707_v31  ;;  %v7166_v31 = vadd.f32 %v15244_v38, %v7125_v60  ;;  %v15493_v60 = vld [vmem:[%s16614_s11 + $0x1e8] sm:$0xff] }
 0x5e5   :  { %10049 = vmatprep.subr.bf16.mxu1 %v11700_v32  ;;  %v7908_v32 = vld [vmem:[%s16614_s11 + $0x9e0] sm:$0xff] }
 0x5e6   :  { %v12004_v42 = vcombine.high %v7904_v61, %v7908_v32 }
 0x5e8   :  { %10050 = vmatpush1.bf16.msra.mxu1 %v11699_v36  ;;  %v7168_v36 = vadd.f32 %v15246_v45, %v7127_v28 }
 0x5e9   :  { %10051 = vmatprep.subr.bf16.mxu1 %v11692_v9  ;;  %v7578_v9 = vmax.f32 %v15186_v15, 0.0 }
 0x5eb   :  { %v15445_v15 = vpack.c.bf16 %v7578_v9, %v7578_v9 }
 0x5ec   :  { %v15377_v51 = vpop.f32.mrf.mxu0  ;;  %10052 = vmatpush1.bf16.msra.mxu1 %v11691_v46 }
 0x5ed   :  { %10053 = vmatprep.subr.bf16.mxu1 %v11812_v48  ;;  %v7896_v48 = vld [vmem:[%s16614_s11 + $0x980] sm:$0xff] }
 0x5ee   :  { %v15379_v56 = vpop.f32.mrf.mxu0 }
 0x5f0   :  { %v7292_v57 = vpop.f32.mrf.mxu0  ;;  %10054 = vmatpush2.bf16.msra.mxu1 %v11811_v54  ;;  %v12003_v54 = vcombine.low %v7904_v61, %v7908_v32  ;;  %v7856_v61 = vld [vmem:[%s16614_s11 + $0x840] sm:$0xff] }
 0x5f1   :  { %10055 = vmatprep.subr.bf16.mxu1 %v11804_v37  ;;  %v7888_v57 = vld [vmem:[%s16614_s11 + $0x940] sm:$0xff] }
 0x5f2   :  { %v7293_v33 = vpop.f32.mrf.mxu0  ;;  %v7860_v32 = vld [vmem:[%s16614_s11 + $0x860] sm:$0xff] }
 0x5f3   :  { %v11955_v9 = vcombine.low %v7856_v61, %v7860_v32 }
 0x5f4   :  { %10056 = vmatpush2.bf16.msra.mxu1 %v11803_v14  ;;  %v7892_v14 = vld [vmem:[%s16614_s11 + $0x960] sm:$0xff] }
 0x5f5   :  { %10057 = vmatprep.subr.bf16.mxu1 %v11796_v62  ;;  %v11995_v62 = vcombine.low %v7896_v48, %v7900_v0  ;;  %v11988_v50 = vcombine.high %v7888_v57, %v7892_v14 }
 0x5f8   :  { %10058 = vmatpush2.bf16.msra.mxu1 %v11795_v3  ;;  %v7988_v3 = vld [vmem:[%s16614_s11 + $0xc60] sm:$0xff] }
 0x5f9   :  { %10059 = vmatprep.subr.bf16.mxu1 %v11788_v39  ;;  %v7880_v39 = vld [vmem:[%s16614_s11 + $0x900] sm:$0xff]  ;;  %v12084_v4 = vcombine.high %v7984_v47, %v7988_v3 }
 0x5fa   :  { %v11980_v5 = vcombine.high %v7880_v39, %v7884_v55  ;;  %v11979_v17 = vcombine.low %v7880_v39, %v7884_v55 }
 0x5fb   :  { %10172 = vmatprep.subr.bf16.mxu0 %v12084_v4  ;;  %v7936_v4 = vld [vmem:[%s16614_s11 + $0xac0] sm:$0xff] }
 0x5fc   :  { %10060 = vmatpush2.bf16.msra.mxu1 %v11787_v53  ;;  %v12083_v53 = vcombine.low %v7984_v47, %v7988_v3  ;;  %v7944_v47 = vld [vmem:[%s16614_s11 + $0xb00] sm:$0xff] }
 0x5fd   :  { %10061 = vmatprep.subr.bf16.mxu1 %v11780_v44  ;;  %v11987_v44 = vcombine.low %v7888_v57, %v7892_v14  ;;  %v7948_v3 = vld [vmem:[%s16614_s11 + $0xb20] sm:$0xff] }
 0x5fe   :  { %v12044_v55 = vcombine.high %v7944_v47, %v7948_v3 }
 0x600   :  { %10062 = vmatpush2.bf16.msra.mxu1 %v11779_v20  ;;  %v7980_v20 = vld [vmem:[%s16614_s11 + $0xc20] sm:$0xff] }
 0x601   :  { %10063 = vmatprep.subr.bf16.mxu1 %v11772_v7  ;;  %v7872_v7 = vld [vmem:[%s16614_s11 + $0x8c0] sm:$0xff]  ;;  %v12076_v16 = vcombine.high %v7976_v6, %v7980_v20  ;;  %v12075_v22 = vcombine.low %v7976_v6, %v7980_v20 }
 0x602   :  { %v7928_v6 = vld [vmem:[%s16614_s11 + $0xa80] sm:$0xff] }
 0x603   :  { %v7932_v20 = vld [vmem:[%s16614_s11 + $0xaa0] sm:$0xff] }
 0x604   :  { %10064 = vmatpush2.bf16.msra.mxu1 %v11771_v18  ;;  %v11972_v18 = vcombine.high %v7872_v7, %v7876_v2 }
 0x605   :  { %10065 = vmatprep.subr.bf16.mxu1 %v11764_v19  ;;  %v15488_v19 = vld [vmem:[%s16614_s11 + $0x1c8] sm:$0xff] }
 0x606   :  { %v11749_v28 = vcombine.low %v15488_v19, %v15493_v60 }
 0x607   :  { %v7206_v52 = vpop.f32.mrf.mxu1 }
 0x608   :  { %v7207_v35 = vadd.f32 %v7206_v52, %v7166_v31  ;;  %10066 = vmatpush2.bf16.msra.mxu1 %v11763_v29  ;;  %v11750_v29 = vcombine.high %v15488_v19, %v15493_v60  ;;  %v11964_v31 = vcombine.high %v7864_v21, %v7868_v27  ;;  %v11963_v52 = vcombine.low %v7864_v21, %v7868_v27  ;;  %v7912_v21 = vld [vmem:[%s16614_s11 + $0xa00] sm:$0xff]  ;;  %v7634_v19 = vld [vmem:[%s16614_s11 + $0x150] sm:$0xff] }
 0x609   :  { %v7208_v26 = vpop.f32.mrf.mxu1  ;;  %10067 = vmatprep.subr.bf16.mxu1 %v11756_v30  ;;  %v11971_v30 = vcombine.low %v7872_v7, %v7876_v2  ;;  %v12028_v2 = vcombine.high %v7928_v6, %v7932_v20  ;;  %v7916_v27 = vld [vmem:[%s16614_s11 + $0xa20] sm:$0xff]  ;;  %v7638_v60 = vld [vmem:[%s16614_s11 + $0x170] sm:$0xff] }
 0x60a   :  { %v7248_v38 = vadd.f32 %v15260_v59, %v7207_v35  ;;  %v7209_v46 = vadd.f32 %v7208_v26, %v7168_v36  ;;  %v11996_v59 = vcombine.high %v7896_v48, %v7900_v0  ;;  %v11956_v35 = vcombine.high %v7856_v61, %v7860_v32  ;;  %v7848_v36 = vld [vmem:[%s16614_s11 + $0x800] sm:$0xff]  ;;  %v7777_v32 = vld [vmem:[%s16614_s11 + $0x5c8] sm:$0xff] }
 0x60b   :  { %v7210_v41 = vpop.f32.mrf.mxu1  ;;  %v7960_v0 = vld [vmem:[%s16614_s11 + $0xb80] sm:$0xff]  ;;  %v5110_v61 = vrot.slane %v15408_v40, %v15133_v63 }
 0x60c   :  { %v7250_v45 = vadd.f32 %v15262_v58, %v7209_v46  ;;  %10068 = vmatpush2.bf16.msra.mxu1 %v11755_v23  ;;  %v7580_v37 = vmax.f32 %v7248_v38, 0.0  ;;  %v7852_v23 = vld [vmem:[%s16614_s11 + $0x820] sm:$0xff] }
 0x60d   :  { %v7211_v34 = vpop.f32.mrf.mxu1  ;;  %10119 = vmatprep.subr.bf16.mxu1 %v12004_v42  ;;  %v11948_v26 = vcombine.high %v7848_v36, %v7852_v23  ;;  %v7968_v42 = vld [vmem:[%s16614_s11 + $0xbc0] sm:$0xff]  ;;  %v11947_v46 = vcombine.low %v7848_v36, %v7852_v23  ;;  %v12011_v23 = vcombine.low %v7912_v21, %v7916_v27 }
 0x60e   :  { %v7581_v24 = vmax.f32 %v7250_v45, 0.0  ;;  %v15456_v33 = vpack.c.bf16 %v7580_v37, %v7580_v37  ;;  %v7972_v38 = vld [vmem:[%s16614_s11 + $0xbe0] sm:$0xff] }
 0x60f   :  { %10070 = vmatmul.mubr.bf16.vlgmr.msra.gmra.mxu1 %v15445_v15  ;;  %v12068_v48 = vcombine.high %v7968_v42, %v7972_v38  ;;  %v7964_v41 = vld [vmem:[%s16614_s11 + $0xba0] sm:$0xff] }
 0x610   :  { %v15454_v58 = vpack.c.bf16 %v7581_v24, %v7581_v24  ;;  %10120 = vmatpush1.bf16.msra.mxu1 %v12003_v54  ;;  %v12067_v54 = vcombine.low %v7968_v42, %v7972_v38  ;;  %v12060_v37 = vcombine.high %v7960_v0, %v7964_v41  ;;  %v7956_v24 = vld [vmem:[%s16614_s11 + $0xb60] sm:$0xff]  ;;  %v12059_v14 = vcombine.low %v7960_v0, %v7964_v41 }
 0x611   :  { %10121 = vmatprep.subr.bf16.mxu1 %v11996_v59  ;;  %v7952_v59 = vld [vmem:[%s16614_s11 + $0xb40] sm:$0xff]  ;;  %v7291_v42 = vadd.f32 %v15379_v56, %v5110_v61  ;;  %v7749_v61 = vld [vmem:[%s16614_s11 + $0x4e8] sm:$0xff] }
 0x612   :  { %10110 = vmatprep.mubr.bf16.mxu0 %v15454_v58  ;;  %v12051_v39 = vcombine.low %v7952_v59, %v7956_v24 }
 0x613   :  { %10111 = vmatmul.mubr.bf16.vlgmr.msra.gmra.mxu0 %v15456_v33 }
 0x614   :  { %10122 = vmatpush1.bf16.msra.mxu1 %v11995_v62  ;;  %10173 = vmatpush1.bf16.msra.mxu0 %v12083_v53  ;;  %v12052_v62 = vcombine.high %v7952_v59, %v7956_v24  ;;  %v7940_v53 = vld [vmem:[%s16614_s11 + $0xae0] sm:$0xff] }
 0x615   :  { %10123 = vmatprep.subr.bf16.mxu1 %v11988_v50  ;;  %10192 = vmatprep.mubr.bf16.mxu0 %v13625_v1  ;;  %v12035_v7 = vcombine.low %v7936_v4, %v7940_v53 }
 0x616   :  { %10174 = vmatprep.subr.bf16.mxu0 %v12076_v16  ;;  %v7920_v16 = vld [vmem:[%s16614_s11 + $0xa40] sm:$0xff] }
 0x618   :  { %10124 = vmatpush1.bf16.msra.mxu1 %v11987_v44  ;;  %10175 = vmatpush1.bf16.msra.mxu0 %v12075_v22  ;;  %v12043_v44 = vcombine.low %v7944_v47, %v7948_v3  ;;  %v7924_v22 = vld [vmem:[%s16614_s11 + $0xa60] sm:$0xff] }
 0x619   :  { %10125 = vmatprep.subr.bf16.mxu1 %v11980_v5  ;;  %10201 = vmatprep.subr.bf16.mxu0 %v11750_v29  ;;  %v12036_v5 = vcombine.high %v7936_v4, %v7940_v53  ;;  %v5106_v29 = vrot.slane %v15408_v40, %v14517_v25  ;;  %v7769_v4 = vld [vmem:[%s16614_s11 + $0x588] sm:$0xff] }
 0x61b   :  { %v7289_v36 = vadd.f32 %v15377_v51, %v5106_v29 }
 0x61c   :  { %10126 = vmatpush1.bf16.msra.mxu1 %v11979_v17  ;;  %v12027_v17 = vcombine.low %v7928_v6, %v7932_v20 }
 0x61d   :  { %10127 = vmatprep.subr.bf16.mxu1 %v11972_v18  ;;  %v12020_v18 = vcombine.high %v7920_v16, %v7924_v22 }
 0x620   :  { %10128 = vmatpush1.bf16.msra.mxu1 %v11971_v30  ;;  %v12019_v30 = vcombine.low %v7920_v16, %v7924_v22  ;;  %v7765_v16 = vld [vmem:[%s16614_s11 + $0x568] sm:$0xff] }
 0x621   :  { %10129 = vmatprep.subr.bf16.mxu1 %v11964_v31  ;;  %v12012_v31 = vcombine.high %v7912_v21, %v7916_v27  ;;  %v7753_v21 = vld [vmem:[%s16614_s11 + $0x508] sm:$0xff] }
 0x622   :  { %v7757_v27 = vld [vmem:[%s16614_s11 + $0x528] sm:$0xff] }
 0x624   :  { %10130 = vmatpush1.bf16.msra.mxu1 %v11963_v52  ;;  %v7781_v52 = vld [vmem:[%s16614_s11 + $0x5e8] sm:$0xff] }
 0x625   :  { %10131 = vmatprep.subr.bf16.mxu1 %v11956_v35 }
 0x628   :  { %10132 = vmatpush1.bf16.msra.mxu1 %v11955_v9 }
 0x629   :  { %10133 = vmatprep.subr.bf16.mxu1 %v11948_v26  ;;  %v11878_v26 = vcombine.high %v7777_v32, %v7781_v52 }
 0x62c   :  { %v15529_v45 = vpop.f32.mrf.mxu0  ;;  %10134 = vmatpush1.bf16.msra.mxu1 %v11947_v46 }
 0x62d   :  { %10135 = vmatprep.subr.bf16.mxu1 %v12068_v48 }
 0x62e   :  { %v15531_v34 = vpop.f32.mrf.mxu0 }
 0x630   :  { %v7374_v57 = vpop.f32.mrf.mxu0  ;;  %10136 = vmatpush2.bf16.msra.mxu1 %v12067_v54 }
 0x631   :  { %10137 = vmatprep.subr.bf16.mxu1 %v12060_v37 }
 0x632   :  { %v7375_v50 = vpop.f32.mrf.mxu0 }
 0x634   :  { %10138 = vmatpush2.bf16.msra.mxu1 %v12059_v14 }
 0x635   :  { %10139 = vmatprep.subr.bf16.mxu1 %v12052_v62 }
 0x638   :  { %10140 = vmatpush2.bf16.msra.mxu1 %v12051_v39 }
 0x639   :  { %10141 = vmatprep.subr.bf16.mxu1 %v12044_v55 }
 0x63c   :  { %10142 = vmatpush2.bf16.msra.mxu1 %v12043_v44 }
 0x63d   :  { %10143 = vmatprep.subr.bf16.mxu1 %v12036_v5  ;;  %v11877_v5 = vcombine.low %v7777_v32, %v7781_v52  ;;  %v11853_v32 = vcombine.low %v7753_v21, %v7757_v27 }
 0x640   :  { %10144 = vmatpush2.bf16.msra.mxu1 %v12035_v7 }
 0x641   :  { %10145 = vmatprep.subr.bf16.mxu1 %v12028_v2  ;;  %v7761_v2 = vld [vmem:[%s16614_s11 + $0x548] sm:$0xff] }
 0x642   :  { %v11861_v29 = vcombine.low %v7761_v2, %v7765_v16 }
 0x644   :  { %10146 = vmatpush2.bf16.msra.mxu1 %v12027_v17 }
 0x645   :  { %10147 = vmatprep.subr.bf16.mxu1 %v12020_v18  ;;  %v11862_v18 = vcombine.high %v7761_v2, %v7765_v16 }
 0x647   :  { %v7329_v35 = vpop.f32.mrf.mxu1 }
 0x648   :  { %10148 = vmatpush2.bf16.msra.mxu1 %v12019_v30  ;;  %v7330_v38 = vadd.f32 %v7329_v35, %v7289_v36  ;;  %v11854_v30 = vcombine.high %v7753_v21, %v7757_v27  ;;  %v7737_v35 = vld [vmem:[%s16614_s11 + $0x488] sm:$0xff] }
 0x649   :  { %v7331_v9 = vpop.f32.mrf.mxu1  ;;  %10149 = vmatprep.subr.bf16.mxu1 %v12012_v31  ;;  %v7745_v31 = vld [vmem:[%s16614_s11 + $0x4c8] sm:$0xff] }
 0x64a   :  { %v7332_v48 = vadd.f32 %v7331_v9, %v7291_v42  ;;  %v7371_v37 = vadd.f32 %v15529_v45, %v7330_v38  ;;  %v7773_v45 = vld [vmem:[%s16614_s11 + $0x5a8] sm:$0xff]  ;;  %v11846_v52 = vcombine.high %v7745_v31, %v7749_v61 }
 0x64b   :  { %v7333_v46 = vpop.f32.mrf.mxu1  ;;  %v11870_v20 = vcombine.high %v7769_v4, %v7773_v45  ;;  %v11869_v17 = vcombine.low %v7769_v4, %v7773_v45  ;;  %v7741_v36 = vld [vmem:[%s16614_s11 + $0x4a8] sm:$0xff] }
 0x64c   :  { %v12209_v0 = vpop.f32.mrf.mxu0  ;;  %10150 = vmatpush2.bf16.msra.mxu1 %v12011_v23  ;;  %v7373_v14 = vadd.f32 %v15531_v34, %v7332_v48  ;;  %v11845_v23 = vcombine.low %v7745_v31, %v7749_v61  ;;  %v11838_v9 = vcombine.high %v7737_v35, %v7741_v36  ;;  %v7733_v42 = vld [vmem:[%s16614_s11 + $0x468] sm:$0xff]  ;;  %v11837_v38 = vcombine.low %v7737_v35, %v7741_v36 }
 0x64d   :  { %v7334_v41 = vpop.f32.mrf.mxu1  ;;  %10242 = vmatprep.subr.bf16.mxu1 %v11878_v26  ;;  %v7729_v26 = vld [vmem:[%s16614_s11 + $0x448] sm:$0xff] }
 0x64e   :  { %v12210_v54 = vpop.f32.mrf.mxu0  ;;  %v11830_v46 = vcombine.high %v7729_v26, %v7733_v42  ;;  %v7721_v48 = vld [vmem:[%s16614_s11 + $0x408] sm:$0xff]  ;;  %v11829_v41 = vcombine.low %v7729_v26, %v7733_v42 }
 0x64f   :  { %v15582_v59 = vadd.f32 %v12210_v54, %v12209_v0  ;;  %v7411_v51 = vpop.f32.mrf.mxu1  ;;  %v7725_v0 = vld [vmem:[%s16614_s11 + $0x428] sm:$0xff] }
 0x650   :  { %v7412_v24 = vadd.f32 %v7411_v51, %v7371_v37  ;;  %v12212_v57 = vpop.f32.mrf.mxu0  ;;  %v11822_v37 = vcombine.high %v7721_v48, %v7725_v0  ;;  %v7841_v51 = vld [vmem:[%s16614_s11 + $0x7c8] sm:$0xff] }
 0x651   :  { %v7413_v62 = vpop.f32.mrf.mxu1  ;;  %v7825_v45 = vld [vmem:[%s16614_s11 + $0x748] sm:$0xff] }
 0x652   :  { %v7414_v50 = vadd.f32 %v7413_v62, %v7373_v14  ;;  %v12213_v56 = vpop.f32.mrf.mxu0  ;;  %v7582_v47 = vmax.f32 %v7412_v24, 0.0  ;;  %v7845_v24 = vld [vmem:[%s16614_s11 + $0x7e8] sm:$0xff]  ;;  %v11821_v14 = vcombine.low %v7721_v48, %v7725_v0 }
 0x653   :  { %v7415_v3 = vpop.f32.mrf.mxu1  ;;  %v7833_v56 = vld [vmem:[%s16614_s11 + $0x788] sm:$0xff] }
 0x654   :  { %v7583_v39 = vmax.f32 %v7414_v50, 0.0  ;;  %v15585_v55 = vpop.f32.mrf.mxu0  ;;  %v15595_v6 = vpack.c.bf16 %v7582_v47, %v7582_v47  ;;  %v11942_v50 = vcombine.high %v7841_v51, %v7845_v24  ;;  %v7837_v47 = vld [vmem:[%s16614_s11 + $0x7a8] sm:$0xff] }
 0x655   :  { %v7416_v53 = vpop.f32.mrf.mxu1  ;;  %v11934_v4 = vcombine.high %v7833_v56, %v7837_v47  ;;  %v7801_v27 = vld [vmem:[%s16614_s11 + $0x688] sm:$0xff] }
 0x656   :  { %v15593_v44 = vpack.c.bf16 %v7583_v39, %v7583_v39  ;;  %v12266_v34 = vpop.f32.mrf.mxu0  ;;  %v11941_v39 = vcombine.low %v7841_v51, %v7845_v24  ;;  %v7829_v53 = vld [vmem:[%s16614_s11 + $0x768] sm:$0xff] }
 0x657   :  { %v11933_v34 = vcombine.low %v7833_v56, %v7837_v47  ;;  %v11925_v2 = vcombine.low %v7825_v45, %v7829_v53  ;;  %v7793_v61 = vld [vmem:[%s16614_s11 + $0x648] sm:$0xff] }
 0x658   :  { %v7575_v7 = vpop.f32.mrf.mxu0  ;;  %10151 = vmatprep.mubr.bf16.mxu1 %v15593_v44  ;;  %v7789_v26 = vld [vmem:[%s16614_s11 + $0x628] sm:$0xff] }
 0x659   :  { %10152 = vmatmul.mubr.bf16.vlgmr.msra.gmra.mxu1 %v15595_v6  ;;  %v7821_v7 = vld [vmem:[%s16614_s11 + $0x728] sm:$0xff] }
 0x65a   :  { %10243 = vmatpush1.bf16.msra.mxu1 %v11877_v5  ;;  %v12267_v22 = vpop.f32.mrf.mxu0  ;;  %10274 = vmatprep.mubr.bf16.mxu1 %v15454_v58  ;;  %v11926_v5 = vcombine.high %v7825_v45, %v7829_v53  ;;  %v7989_v0 = vld [vmem:[%s16614_s11 + $0xc68] sm:$0xff]  ;;  %v7650_v53 = vld [vmem:[%s16614_s11 + $0x1d0] sm:$0xff] }
 0x65b   :  { %10244 = vmatprep.subr.bf16.mxu1 %v11870_v20  ;;  %v7817_v20 = vld [vmem:[%s16614_s11 + $0x708] sm:$0xff] }
 0x65c   :  { %v11918_v16 = vcombine.high %v7817_v20, %v7821_v7  ;;  %v7809_v22 = vld [vmem:[%s16614_s11 + $0x6c8] sm:$0xff] }
 0x65e   :  { %10245 = vmatpush1.bf16.msra.mxu1 %v11869_v17  ;;  %v7813_v17 = vld [vmem:[%s16614_s11 + $0x6e8] sm:$0xff] }
 0x65f   :  { %10246 = vmatprep.subr.bf16.mxu1 %v11862_v18  ;;  %v11917_v18 = vcombine.low %v7817_v20, %v7821_v7  ;;  %v11910_v21 = vcombine.high %v7809_v22, %v7813_v17 }
 0x662   :  { %10247 = vmatpush1.bf16.msra.mxu1 %v11861_v29  ;;  %v7805_v29 = vld [vmem:[%s16614_s11 + $0x6a8] sm:$0xff] }
 0x663   :  { %10248 = vmatprep.subr.bf16.mxu1 %v11854_v30  ;;  %v11909_v30 = vcombine.low %v7809_v22, %v7813_v17  ;;  %v11902_v31 = vcombine.high %v7801_v27, %v7805_v29  ;;  %v11901_v36 = vcombine.low %v7801_v27, %v7805_v29  ;;  %v7642_v22 = vld [vmem:[%s16614_s11 + $0x190] sm:$0xff] }
 0x664   :  { %v7646_v17 = vld [vmem:[%s16614_s11 + $0x1b0] sm:$0xff] }
 0x665   :  { %v11744_v29 = vcombine.high %v7642_v22, %v7646_v17 }
 0x666   :  { %10249 = vmatpush1.bf16.msra.mxu1 %v11853_v32  ;;  %v7797_v32 = vld [vmem:[%s16614_s11 + $0x668] sm:$0xff] }
 0x667   :  { %10250 = vmatprep.subr.bf16.mxu1 %v11846_v52  ;;  %v5114_v52 = vrot.slane %v15408_v40, %v15147_v43  ;;  %v7985_v40 = vld [vmem:[%s16614_s11 + $0xc48] sm:$0xff] }
 0x66a   :  { %10251 = vmatpush1.bf16.msra.mxu1 %v11845_v23  ;;  %v11894_v23 = vcombine.high %v7793_v61, %v7797_v32 }
 0x66b   :  { %10252 = vmatprep.subr.bf16.mxu1 %v11838_v9  ;;  %v7785_v9 = vld [vmem:[%s16614_s11 + $0x608] sm:$0xff] }
 0x66c   :  { %v11886_v48 = vcombine.high %v7785_v9, %v7789_v26  ;;  %v11885_v51 = vcombine.low %v7785_v9, %v7789_v26  ;;  %v7630_v9 = vld [vmem:[%s16614_s11 + $0x130] sm:$0xff] }
 0x66e   :  { %10253 = vmatpush1.bf16.msra.mxu1 %v11837_v38  ;;  %v11893_v38 = vcombine.low %v7793_v61, %v7797_v32  ;;  %v11743_v61 = vcombine.low %v7642_v22, %v7646_v17  ;;  %v7594_v22 = vld [vmem:[%s16614_s11 + $0x10] sm:$0xff] }
 0x66f   :  { %v12187_v54 = vpop.f32.mrf.mxu1  ;;  %10254 = vmatprep.subr.bf16.mxu1 %v11830_v46  ;;  %v7598_v17 = vld [vmem:[%s16614_s11 + $0x30] sm:$0xff] }
 0x671   :  { %v12188_v57 = vpop.f32.mrf.mxu1 }
 0x672   :  { %10255 = vmatpush1.bf16.msra.mxu1 %v11829_v41  ;;  %v12189_v35 = vadd.f32 %v12188_v57, %v12187_v54  ;;  %v12086_v57 = vcombine.high %v7985_v40, %v7989_v0 }
 0x673   :  { %v12190_v62 = vpop.f32.mrf.mxu1  ;;  %10256 = vmatprep.subr.bf16.mxu1 %v11822_v37 }
 0x674   :  { %v7453_v42 = vadd.f32 %v12189_v35, %v5114_v52  ;;  %v7977_v62 = vld [vmem:[%s16614_s11 + $0xc08] sm:$0xff]  ;;  %v11736_v52 = vcombine.high %v7634_v19, %v7638_v60 }
 0x675   :  { %v12191_v3 = vpop.f32.mrf.mxu1  ;;  %v7617_v35 = vld [vmem:[%s16614_s11 + $0xc8] sm:$0xff] }
 0x676   :  { %10257 = vmatpush1.bf16.msra.mxu1 %v11821_v14  ;;  %v7493_v54 = vadd.f32 %v15582_v59, %v7453_v42  ;;  %v12085_v59 = vcombine.low %v7985_v40, %v7989_v0  ;;  %v11735_v42 = vcombine.low %v7634_v19, %v7638_v60  ;;  %v7613_v40 = vld [vmem:[%s16614_s11 + $0xa8] sm:$0xff]  ;;  %v7618_v0 = vld [vmem:[%s16614_s11 + $0xd0] sm:$0xff] }
 0x677   :  { %10258 = vmatprep.subr.bf16.mxu1 %v11942_v50  ;;  %v7981_v50 = vld [vmem:[%s16614_s11 + $0xc28] sm:$0xff]  ;;  %v7714_v19 = vld [vmem:[%s16614_s11 + $0x3d0] sm:$0xff] }
 0x678   :  { %v12078_v3 = vcombine.high %v7977_v62, %v7981_v50  ;;  %v7718_v60 = vld [vmem:[%s16614_s11 + $0x3f0] sm:$0xff] }
 0x67a   :  { %10259 = vmatpush2.bf16.msra.mxu1 %v11941_v39  ;;  %v7641_v39 = vld [vmem:[%s16614_s11 + $0x188] sm:$0xff] }
 0x67b   :  { %10260 = vmatprep.subr.bf16.mxu1 %v11934_v4  ;;  %v7645_v4 = vld [vmem:[%s16614_s11 + $0x1a8] sm:$0xff] }
 0x67c   :  { %v11742_v20 = vcombine.high %v7641_v39, %v7645_v4 }
 0x67e   :  { %10261 = vmatpush2.bf16.msra.mxu1 %v11933_v34 }
 0x67f   :  { %10262 = vmatprep.subr.bf16.mxu1 %v11926_v5  ;;  %v12077_v5 = vcombine.low %v7977_v62, %v7981_v50  ;;  %v7610_v62 = vld [vmem:[%s16614_s11 + $0x90] sm:$0xff] }
 0x680   :  { %v7614_v50 = vld [vmem:[%s16614_s11 + $0xb0] sm:$0xff] }
 0x682   :  { %10263 = vmatpush2.bf16.msra.mxu1 %v11925_v2  ;;  %v7633_v2 = vld [vmem:[%s16614_s11 + $0x148] sm:$0xff] }
 0x683   :  { %10264 = vmatprep.subr.bf16.mxu1 %v11918_v16  ;;  %v7637_v16 = vld [vmem:[%s16614_s11 + $0x168] sm:$0xff] }
 0x684   :  { %v11734_v27 = vcombine.high %v7633_v2, %v7637_v16 }
 0x686   :  { %10265 = vmatpush2.bf16.msra.mxu1 %v11917_v18  ;;  %v11741_v18 = vcombine.low %v7641_v39, %v7645_v4  ;;  %v7593_v39 = vld [vmem:[%s16614_s11 + $0x8] sm:$0xff] }
 0x687   :  { %10266 = vmatprep.subr.bf16.mxu1 %v11910_v21  ;;  %v7597_v4 = vld [vmem:[%s16614_s11 + $0x28] sm:$0xff] }
 0x68a   :  { %10267 = vmatpush2.bf16.msra.mxu1 %v11909_v30  ;;  %v7625_v30 = vld [vmem:[%s16614_s11 + $0x108] sm:$0xff] }
 0x68b   :  { %10268 = vmatprep.subr.bf16.mxu1 %v11902_v31  ;;  %v7629_v31 = vld [vmem:[%s16614_s11 + $0x128] sm:$0xff] }
 0x68c   :  { %v11726_v32 = vcombine.high %v7625_v30, %v7629_v31  ;;  %v11725_v26 = vcombine.low %v7625_v30, %v7629_v31  ;;  %v7705_v30 = vld [vmem:[%s16614_s11 + $0x388] sm:$0xff] }
 0x68d   :  { %v7709_v31 = vld [vmem:[%s16614_s11 + $0x3a8] sm:$0xff] }
 0x68e   :  { %10269 = vmatpush2.bf16.msra.mxu1 %v11901_v36  ;;  %v7621_v36 = vld [vmem:[%s16614_s11 + $0xe8] sm:$0xff] }
 0x68f   :  { %v12231_v46 = vpop.f32.mrf.mxu1  ;;  %10270 = vmatprep.subr.bf16.mxu1 %v11894_v23  ;;  %v7626_v23 = vld [vmem:[%s16614_s11 + $0x110] sm:$0xff] }
 0x691   :  { %v12232_v41 = vpop.f32.mrf.mxu1 }
 0x692   :  { %v12233_v37 = vadd.f32 %v12232_v41, %v12231_v46  ;;  %10271 = vmatpush2.bf16.msra.mxu1 %v11893_v38  ;;  %v11718_v38 = vcombine.high %v7617_v35, %v7621_v36  ;;  %v11728_v46 = vcombine.high %v7626_v23, %v7630_v9  ;;  %v7622_v41 = vld [vmem:[%s16614_s11 + $0xf0] sm:$0xff] }
 0x693   :  { %v12234_v24 = vpop.f32.mrf.mxu1  ;;  %10272 = vmatprep.subr.bf16.mxu1 %v11886_v48  ;;  %v7609_v48 = vld [vmem:[%s16614_s11 + $0x88] sm:$0xff] }
 0x694   :  { %v7533_v14 = vadd.f32 %v12233_v37, %v7493_v54  ;;  %v11717_v54 = vcombine.low %v7617_v35, %v7621_v36  ;;  %v11727_v37 = vcombine.low %v7626_v23, %v7630_v9  ;;  %v11720_v24 = vcombine.high %v7618_v0, %v7622_v41  ;;  %v7697_v35 = vld [vmem:[%s16614_s11 + $0x348] sm:$0xff]  ;;  %v7706_v23 = vld [vmem:[%s16614_s11 + $0x390] sm:$0xff] }
 0x695   :  { %v12235_v56 = vpop.f32.mrf.mxu1  ;;  %v7701_v36 = vld [vmem:[%s16614_s11 + $0x368] sm:$0xff]  ;;  %v7710_v9 = vld [vmem:[%s16614_s11 + $0x3b0] sm:$0xff] }
 0x696   :  { %v7573_v47 = vadd.f32 %v15585_v55, %v7533_v14  ;;  %10273 = vmatpush2.bf16.msra.mxu1 %v11885_v51  ;;  %v7654_v55 = vld [vmem:[%s16614_s11 + $0x1f0] sm:$0xff]  ;;  %v11710_v51 = vcombine.high %v7609_v48, %v7613_v40  ;;  %v7605_v14 = vld [vmem:[%s16614_s11 + $0x68] sm:$0xff]  ;;  %v11709_v56 = vcombine.low %v7609_v48, %v7613_v40 }
 0x697   :  { %10336 = vmatprep.subr.bf16.mxu1 %v12086_v57  ;;  %v11752_v7 = vcombine.high %v7650_v53, %v7654_v55  ;;  %v11751_v21 = vcombine.low %v7650_v53, %v7654_v55  ;;  %v7601_v57 = vld [vmem:[%s16614_s11 + $0x48] sm:$0xff]  ;;  %v7606_v53 = vld [vmem:[%s16614_s11 + $0x70] sm:$0xff] }
 0x698   :  { %v7584_v45 = vmax.f32 %v7573_v47, 0.0  ;;  %v11719_v47 = vcombine.low %v7618_v0, %v7622_v41  ;;  %v11701_v55 = vcombine.low %v7601_v57, %v7605_v14  ;;  %v7689_v48 = vld [vmem:[%s16614_s11 + $0x308] sm:$0xff]  ;;  %v7698_v0 = vld [vmem:[%s16614_s11 + $0x350] sm:$0xff] }
 0x699   :  { %10275 = vmatmul.mubr.bf16.vlgmr.msra.gmra.mxu1 %v15456_v33  ;;  %v7693_v40 = vld [vmem:[%s16614_s11 + $0x328] sm:$0xff]  ;;  %v7702_v41 = vld [vmem:[%s16614_s11 + $0x370] sm:$0xff] }
 0x69a   :  { %v15713_v34 = vpack.c.bf16 %v7584_v45, %v7584_v45  ;;  %10337 = vmatpush1.bf16.msra.mxu1 %v12085_v59  ;;  %10356 = vmatprep.mubr.bf16.mxu1 %v13625_v1  ;;  %v11702_v59 = vcombine.high %v7601_v57, %v7605_v14  ;;  %v7602_v45 = vld [vmem:[%s16614_s11 + $0x50] sm:$0xff]  ;;  %v7681_v57 = vld [vmem:[%s16614_s11 + $0x2c8] sm:$0xff] }
 0x69b   :  { %10338 = vmatprep.subr.bf16.mxu1 %v12078_v3  ;;  %v11712_v3 = vcombine.high %v7610_v62, %v7614_v50  ;;  %v7685_v14 = vld [vmem:[%s16614_s11 + $0x2e8] sm:$0xff] }
 0x69c   :  { %12091 = vmatmul.mubr.msk.bf16.vlgmr.msra.gmra.mxu0 %vm6922_vm3, %v15713_v34 }
 0x69d   :  { %10202 = vmatpush1.bf16.msra.mxu0 %v11749_v28  ;;  %10233 = vmatprep.mubr.bf16.mxu0 %v15325_v49  ;;  %v11733_v28 = vcombine.low %v7633_v2, %v7637_v16  ;;  %v7713_v2 = vld [vmem:[%s16614_s11 + $0x3c8] sm:$0xff] }
 0x69e   :  { %10339 = vmatpush1.bf16.msra.mxu1 %v12077_v5  ;;  %10203 = vmatprep.subr.bf16.mxu0 %v11742_v20  ;;  %v11711_v5 = vcombine.low %v7610_v62, %v7614_v50  ;;  %v11694_v20 = vcombine.high %v7593_v39, %v7597_v4  ;;  %v7717_v16 = vld [vmem:[%s16614_s11 + $0x3e8] sm:$0xff]  ;;  %v7690_v62 = vld [vmem:[%s16614_s11 + $0x310] sm:$0xff] }
 0x69f   :  { %10365 = vmatprep.subr.bf16.mxu1 %v11752_v7  ;;  %v11704_v7 = vcombine.high %v7602_v45, %v7606_v53  ;;  %v7694_v50 = vld [vmem:[%s16614_s11 + $0x330] sm:$0xff] }
 0x6a1   :  { %10204 = vmatpush1.bf16.msra.mxu0 %v11741_v18  ;;  %12092 = vmatmul.mubr.msk.bf16.vlgmr.msra.gmra.mxu1 %vm6922_vm3, %v15713_v34  ;;  %v11693_v18 = vcombine.low %v7593_v39, %v7597_v4  ;;  %v7673_v39 = vld [vmem:[%s16614_s11 + $0x288] sm:$0xff] }
 0x6a2   :  { %10366 = vmatpush1.bf16.msra.mxu1 %v11751_v21  ;;  %10397 = vmatprep.mubr.bf16.mxu1 %v15325_v49  ;;  %v11703_v21 = vcombine.low %v7602_v45, %v7606_v53  ;;  %v7677_v4 = vld [vmem:[%s16614_s11 + $0x2a8] sm:$0xff]  ;;  %v7682_v45 = vld [vmem:[%s16614_s11 + $0x2d0] sm:$0xff] }
 0x6a3   :  { %10205 = vmatprep.subr.bf16.mxu0 %v11734_v27  ;;  %10367 = vmatprep.subr.bf16.mxu1 %v11744_v29  ;;  %v11814_v27 = vcombine.high %v7713_v2, %v7717_v16  ;;  %v11696_v29 = vcombine.high %v7594_v22, %v7598_v17  ;;  %v7686_v53 = vld [vmem:[%s16614_s11 + $0x2f0] sm:$0xff] }
 0x6a5   :  { %10206 = vmatpush1.bf16.msra.mxu0 %v11733_v28  ;;  %v11813_v28 = vcombine.low %v7713_v2, %v7717_v16  ;;  %v11784_v2 = vcombine.high %v7682_v45, %v7686_v53  ;;  %v7665_v16 = vld [vmem:[%s16614_s11 + $0x248] sm:$0xff] }
 0x6a6   :  { %10368 = vmatpush1.bf16.msra.mxu1 %v11743_v61  ;;  %10207 = vmatprep.subr.bf16.mxu0 %v11726_v32  ;;  %v11695_v61 = vcombine.low %v7594_v22, %v7598_v17  ;;  %v11806_v32 = vcombine.high %v7705_v30, %v7709_v31  ;;  %v7669_v22 = vld [vmem:[%s16614_s11 + $0x268] sm:$0xff]  ;;  %v7674_v17 = vld [vmem:[%s16614_s11 + $0x290] sm:$0xff] }
 0x6a7   :  { %10369 = vmatprep.subr.bf16.mxu1 %v11736_v52  ;;  %v11816_v52 = vcombine.high %v7714_v19, %v7718_v60 }
 0x6a9   :  { %10208 = vmatpush1.bf16.msra.mxu0 %v11725_v26  ;;  %v11805_v26 = vcombine.low %v7705_v30, %v7709_v31  ;;  %v11766_v30 = vcombine.high %v7665_v16, %v7669_v22 }
 0x6aa   :  { %10370 = vmatpush1.bf16.msra.mxu1 %v11735_v42  ;;  %10209 = vmatprep.subr.bf16.mxu0 %v11718_v38  ;;  %v11815_v42 = vcombine.low %v7714_v19, %v7718_v60  ;;  %v11798_v38 = vcombine.high %v7697_v35, %v7701_v36  ;;  %v7657_v60 = vld [vmem:[%s16614_s11 + $0x208] sm:$0xff] }
 0x6ab   :  { %10371 = vmatprep.subr.bf16.mxu1 %v11728_v46  ;;  %v11808_v46 = vcombine.high %v7706_v23, %v7710_v9 }
 0x6ad   :  { %10210 = vmatpush1.bf16.msra.mxu0 %v11717_v54  ;;  %v11797_v54 = vcombine.low %v7697_v35, %v7701_v36  ;;  %v11765_v36 = vcombine.low %v7665_v16, %v7669_v22  ;;  %v7898_v16 = vld [vmem:[%s16614_s11 + $0x990] sm:$0xff] }
 0x6ae   :  { %10372 = vmatpush1.bf16.msra.mxu1 %v11727_v37  ;;  %10211 = vmatprep.subr.bf16.mxu0 %v11710_v51  ;;  %v11807_v37 = vcombine.low %v7706_v23, %v7710_v9  ;;  %v11790_v51 = vcombine.high %v7689_v48, %v7693_v40  ;;  %v7902_v22 = vld [vmem:[%s16614_s11 + $0x9b0] sm:$0xff] }
 0x6af   :  { %10373 = vmatprep.subr.bf16.mxu1 %v11720_v24  ;;  %v11800_v24 = vcombine.high %v7698_v0, %v7702_v41 }
 0x6b1   :  { %10212 = vmatpush1.bf16.msra.mxu0 %v11709_v56  ;;  %v11789_v56 = vcombine.low %v7689_v48, %v7693_v40  ;;  %v7905_v48 = vld [vmem:[%s16614_s11 + $0x9c8] sm:$0xff] }
 0x6b2   :  { %10374 = vmatpush1.bf16.msra.mxu1 %v11719_v47  ;;  %10213 = vmatprep.subr.bf16.mxu0 %v11702_v59  ;;  %v11799_v47 = vcombine.low %v7698_v0, %v7702_v41  ;;  %v11782_v59 = vcombine.high %v7681_v57, %v7685_v14  ;;  %v7909_v40 = vld [vmem:[%s16614_s11 + $0x9e8] sm:$0xff] }
 0x6b3   :  { %10375 = vmatprep.subr.bf16.mxu1 %v11712_v3  ;;  %v11792_v3 = vcombine.high %v7690_v62, %v7694_v50 }
 0x6b5   :  { %10214 = vmatpush1.bf16.msra.mxu0 %v11701_v55  ;;  %v11781_v55 = vcombine.low %v7681_v57, %v7685_v14 }
 0x6b6   :  { %10376 = vmatpush1.bf16.msra.mxu1 %v11711_v5  ;;  %10215 = vmatprep.subr.bf16.mxu0 %v11694_v20  ;;  %v11791_v5 = vcombine.low %v7690_v62, %v7694_v50  ;;  %v11774_v20 = vcombine.high %v7673_v39, %v7677_v4  ;;  %v12006_v50 = vcombine.high %v7905_v48, %v7909_v40 }
 0x6b7   :  { %10377 = vmatprep.subr.bf16.mxu1 %v11704_v7  ;;  %v7992_v7 = vld [vmem:[%s16615_s12] sm:$0xff] }
 0x6b9   :  { %10216 = vmatpush1.bf16.msra.mxu0 %v11693_v18  ;;  %v7678_v18 = vld [vmem:[%s16614_s11 + $0x2b0] sm:$0xff] }
 0x6ba   :  { %10378 = vmatpush1.bf16.msra.mxu1 %v11703_v21  ;;  %10217 = vmatprep.subr.bf16.mxu0 %v11814_v27  ;;  %v11773_v21 = vcombine.low %v7673_v39, %v7677_v4  ;;  %v7997_v27 = vrot.slane %v7992_v7, %v13926_v10  ;;  %v11776_v19 = vcombine.high %v7674_v17, %v7678_v18  ;;  %v7906_v39 = vld [vmem:[%s16614_s11 + $0x9d0] sm:$0xff] }
 0x6bb   :  { %10379 = vmatprep.subr.bf16.mxu1 %v11696_v29  ;;  %v11783_v29 = vcombine.low %v7682_v45, %v7686_v53  ;;  %v11775_v9 = vcombine.low %v7674_v17, %v7678_v18  ;;  %v7910_v4 = vld [vmem:[%s16614_s11 + $0x9f0] sm:$0xff]  ;;  %v12005_v53 = vcombine.low %v7905_v48, %v7909_v40  ;;  %v7869_v48 = vld [vmem:[%s16614_s11 + $0x8a8] sm:$0xff] }
 0x6bc   :  { %v12007_v18 = vcombine.low %v7906_v39, %v7910_v4  ;;  %v7874_v40 = vld [vmem:[%s16614_s11 + $0x8d0] sm:$0xff] }
 0x6bd   :  { %10218 = vmatpush2.bf16.msra.mxu0 %v11813_v28  ;;  %v7661_v28 = vld [vmem:[%s16614_s11 + $0x228] sm:$0xff] }
 0x6be   :  { %10380 = vmatpush1.bf16.msra.mxu1 %v11695_v61  ;;  %10219 = vmatprep.subr.bf16.mxu0 %v11806_v32  ;;  %v8001_v61 = vrot.slane %v7992_v7, %v13932_v12  ;;  %v7666_v32 = vld [vmem:[%s16614_s11 + $0x250] sm:$0xff]  ;;  %v11757_v57 = vcombine.low %v7657_v60, %v7661_v28  ;;  %v7889_v7 = vld [vmem:[%s16614_s11 + $0x948] sm:$0xff] }
 0x6bf   :  { %10381 = vmatprep.subr.bf16.mxu1 %v11816_v52  ;;  %v7670_v52 = vld [vmem:[%s16614_s11 + $0x270] sm:$0xff] }
 0x6c0   :  { %v11767_v62 = vcombine.low %v7666_v32, %v7670_v52 }
 0x6c1   :  { %10220 = vmatpush2.bf16.msra.mxu0 %v11805_v26  ;;  %v11758_v26 = vcombine.high %v7657_v60, %v7661_v28  ;;  %v11999_v28 = vcombine.low %v7898_v16, %v7902_v22 }
 0x6c2   :  { %10382 = vmatpush2.bf16.msra.mxu1 %v11815_v42  ;;  %10221 = vmatprep.subr.bf16.mxu0 %v11798_v38 }
 0x6c3   :  { %10383 = vmatprep.subr.bf16.mxu1 %v11808_v46  ;;  %v11768_v46 = vcombine.high %v7666_v32, %v7670_v52  ;;  %v7873_v52 = vld [vmem:[%s16614_s11 + $0x8c8] sm:$0xff] }
 0x6c5   :  { %10222 = vmatpush2.bf16.msra.mxu0 %v11797_v54  ;;  %v7658_v54 = vld [vmem:[%s16614_s11 + $0x210] sm:$0xff] }
 0x6c6   :  { %10384 = vmatpush2.bf16.msra.mxu1 %v11807_v37  ;;  %10223 = vmatprep.subr.bf16.mxu0 %v11790_v51  ;;  %v7662_v37 = vld [vmem:[%s16614_s11 + $0x230] sm:$0xff] }
 0x6c7   :  { %10385 = vmatprep.subr.bf16.mxu1 %v11800_v24 }
 0x6c9   :  { %10224 = vmatpush2.bf16.msra.mxu0 %v11789_v56 }
 0x6ca   :  { %10386 = vmatpush2.bf16.msra.mxu1 %v11799_v47  ;;  %10225 = vmatprep.subr.bf16.mxu0 %v11782_v59  ;;  %v11760_v47 = vcombine.high %v7658_v54, %v7662_v37  ;;  %v7897_v59 = vld [vmem:[%s16614_s11 + $0x988] sm:$0xff] }
 0x6cb   :  { %10387 = vmatprep.subr.bf16.mxu1 %v11792_v3  ;;  %v7901_v3 = vld [vmem:[%s16614_s11 + $0x9a8] sm:$0xff] }
 0x6cc   :  { %v11997_v17 = vcombine.low %v7897_v59, %v7901_v3 }
 0x6cd   :  { %10226 = vmatpush2.bf16.msra.mxu0 %v11781_v55  ;;  %v11759_v55 = vcombine.low %v7658_v54, %v7662_v37 }
 0x6ce   :  { %10388 = vmatpush2.bf16.msra.mxu1 %v11791_v5  ;;  %10227 = vmatprep.subr.bf16.mxu0 %v11774_v20  ;;  %v11998_v5 = vcombine.high %v7897_v59, %v7901_v3  ;;  %v12008_v20 = vcombine.high %v7906_v39, %v7910_v4  ;;  %v7849_v4 = vld [vmem:[%s16614_s11 + $0x808] sm:$0xff] }
 0x6cf   :  { %v10071_v31 = vpop.f32.mrf.mxu1  ;;  %10389 = vmatprep.subr.bf16.mxu1 %v11784_v2  ;;  %v7893_v2 = vld [vmem:[%s16614_s11 + $0x968] sm:$0xff] }
 0x6d0   :  { %v10072_v23 = vadd.f32 %v10071_v31, %v7997_v27  ;;  %v12000_v27 = vcombine.high %v7898_v16, %v7902_v22  ;;  %v7890_v31 = vld [vmem:[%s16614_s11 + $0x950] sm:$0xff]  ;;  %v11989_v60 = vcombine.low %v7889_v7, %v7893_v2  ;;  %v7969_v16 = vld [vmem:[%s16614_s11 + $0xbc8] sm:$0xff] }
 0x6d1   :  { %10228 = vmatpush2.bf16.msra.mxu0 %v11773_v21  ;;  %v10073_v35 = vpop.f32.mrf.mxu1  ;;  %v11990_v21 = vcombine.high %v7889_v7, %v7893_v2  ;;  %v7973_v22 = vld [vmem:[%s16614_s11 + $0xbe8] sm:$0xff] }
 0x6d2   :  { %10390 = vmatpush2.bf16.msra.mxu1 %v11783_v29  ;;  %10229 = vmatprep.subr.bf16.mxu0 %v11766_v30  ;;  %v10074_v0 = vadd.f32 %v10073_v35, %v8001_v61  ;;  %v7881_v29 = vld [vmem:[%s16614_s11 + $0x908] sm:$0xff] }
 0x6d3   :  { %v10075_v42 = vpop.f32.mrf.mxu1  ;;  %v10112_v38 = vpop.f32.mrf.mxu0  ;;  %10391 = vmatprep.subr.bf16.mxu1 %v11776_v19  ;;  %v7885_v30 = vld [vmem:[%s16614_s11 + $0x928] sm:$0xff]  ;;  %v7894_v19 = vld [vmem:[%s16614_s11 + $0x970] sm:$0xff] }
 0x6d4   :  { %v15904_v41 = vadd.f32 %v10112_v38, %v10072_v23  ;;  %v11982_v61 = vcombine.high %v7881_v29, %v7885_v30  ;;  %v11992_v32 = vcombine.high %v7890_v31, %v7894_v19  ;;  %v7877_v35 = vld [vmem:[%s16614_s11 + $0x8e8] sm:$0xff]  ;;  %v7886_v23 = vld [vmem:[%s16614_s11 + $0x930] sm:$0xff] }
 0x6d5   :  { %10230 = vmatpush2.bf16.msra.mxu0 %v11765_v36  ;;  %v10076_v51 = vpop.f32.mrf.mxu1  ;;  %v10114_v24 = vpop.f32.mrf.mxu0  ;;  %v7882_v36 = vld [vmem:[%s16614_s11 + $0x910] sm:$0xff]  ;;  %v11974_v42 = vcombine.high %v7873_v52, %v7877_v35  ;;  %v11973_v54 = vcombine.low %v7873_v52, %v7877_v35 }
 0x6d6   :  { %v15912_v14 = vadd.f32 %v10114_v24, %v10074_v0  ;;  %10392 = vmatpush2.bf16.msra.mxu1 %v11775_v9  ;;  %10231 = vmatprep.subr.bf16.mxu0 %v11758_v26  ;;  %v11981_v9 = vcombine.low %v7881_v29, %v7885_v30  ;;  %v11991_v26 = vcombine.low %v7890_v31, %v7894_v19  ;;  %v7878_v0 = vld [vmem:[%s16614_s11 + $0x8f0] sm:$0xff]  ;;  %v7961_v31 = vld [vmem:[%s16614_s11 + $0xb88] sm:$0xff] }
 0x6d7   :  { %v10116_v56 = vpop.f32.mrf.mxu0  ;;  %10393 = vmatprep.subr.bf16.mxu1 %v11768_v46  ;;  %v11984_v38 = vcombine.high %v7882_v36, %v7886_v23  ;;  %v7865_v46 = vld [vmem:[%s16614_s11 + $0x888] sm:$0xff]  ;;  %v11983_v37 = vcombine.low %v7882_v36, %v7886_v23  ;;  %v11976_v24 = vcombine.high %v7874_v40, %v7878_v0  ;;  %v11975_v59 = vcombine.low %v7874_v40, %v7878_v0 }
 0x6d8   :  { %v11966_v51 = vcombine.high %v7865_v46, %v7869_v48  ;;  %v7870_v56 = vld [vmem:[%s16614_s11 + $0x8b0] sm:$0xff]  ;;  %v12070_v29 = vcombine.high %v7969_v16, %v7973_v22  ;;  %v7965_v19 = vld [vmem:[%s16614_s11 + $0xba8] sm:$0xff] }
 0x6d9   :  { %10232 = vmatpush2.bf16.msra.mxu0 %v11757_v57  ;;  %v10117_v45 = vpop.f32.mrf.mxu0  ;;  %v7857_v57 = vld [vmem:[%s16614_s11 + $0x848] sm:$0xff]  ;;  %v12062_v52 = vcombine.high %v7961_v31, %v7965_v19 }
 0x6da   :  { %10394 = vmatpush2.bf16.msra.mxu1 %v11767_v62  ;;  %10283 = vmatprep.subr.bf16.mxu0 %v12006_v50  ;;  %v7861_v62 = vld [vmem:[%s16614_s11 + $0x868] sm:$0xff]  ;;  %v7866_v50 = vld [vmem:[%s16614_s11 + $0x890] sm:$0xff] }
 0x6db   :  { %10395 = vmatprep.subr.bf16.mxu1 %v11760_v47  ;;  %v11965_v47 = vcombine.low %v7865_v46, %v7869_v48  ;;  %v11958_v3 = vcombine.high %v7857_v57, %v7861_v62  ;;  %v11968_v39 = vcombine.high %v7866_v50, %v7870_v56  ;;  %v7853_v45 = vld [vmem:[%s16614_s11 + $0x828] sm:$0xff] }
 0x6dc   :  { %10234 = vmatmul.mubr.bf16.vlgmr.msra.gmra.mxu0 %v15445_v15  ;;  %v11950_v7 = vcombine.high %v7849_v4, %v7853_v45  ;;  %v7953_v36 = vld [vmem:[%s16614_s11 + $0xb48] sm:$0xff] }
 0x6dd   :  { %10284 = vmatpush1.bf16.msra.mxu0 %v12005_v53  ;;  %10315 = vmatprep.mubr.bf16.mxu0 %v15593_v44  ;;  %v7858_v53 = vld [vmem:[%s16614_s11 + $0x850] sm:$0xff]  ;;  %v7957_v23 = vld [vmem:[%s16614_s11 + $0xb68] sm:$0xff] }
 0x6de   :  { %10396 = vmatpush2.bf16.msra.mxu1 %v11759_v55  ;;  %10285 = vmatprep.subr.bf16.mxu0 %v11998_v5  ;;  %v7862_v55 = vld [vmem:[%s16614_s11 + $0x870] sm:$0xff]  ;;  %v11957_v5 = vcombine.low %v7857_v57, %v7861_v62  ;;  %v12054_v46 = vcombine.high %v7953_v36, %v7957_v23  ;;  %v7945_v40 = vld [vmem:[%s16614_s11 + $0xb08] sm:$0xff] }
 0x6df   :  { %10447 = vmatprep.subr.bf16.mxu1 %v12008_v20  ;;  %v11967_v20 = vcombine.low %v7866_v50, %v7870_v56  ;;  %v11960_v2 = vcombine.high %v7858_v53, %v7862_v55  ;;  %v7949_v0 = vld [vmem:[%s16614_s11 + $0xb28] sm:$0xff] }
 0x6e0   :  { %v12046_v57 = vcombine.high %v7945_v40, %v7949_v0  ;;  %v7937_v50 = vld [vmem:[%s16614_s11 + $0xac8] sm:$0xff] }
 0x6e1   :  { %10286 = vmatpush1.bf16.msra.mxu0 %v11997_v17  ;;  %10398 = vmatmul.mubr.bf16.vlgmr.msra.gmra.mxu1 %v15445_v15  ;;  %v7850_v17 = vld [vmem:[%s16614_s11 + $0x810] sm:$0xff]  ;;  %v7941_v56 = vld [vmem:[%s16614_s11 + $0xae8] sm:$0xff] }
 0x6e2   :  { %10448 = vmatpush1.bf16.msra.mxu1 %v12007_v18  ;;  %10479 = vmatprep.mubr.bf16.mxu1 %v15593_v44  ;;  %v7854_v18 = vld [vmem:[%s16614_s11 + $0x830] sm:$0xff] }
 0x6e3   :  { %10287 = vmatprep.subr.bf16.mxu0 %v11990_v21  ;;  %10449 = vmatprep.subr.bf16.mxu1 %v12000_v27  ;;  %v11949_v21 = vcombine.low %v7849_v4, %v7853_v45  ;;  %v11959_v27 = vcombine.low %v7858_v53, %v7862_v55  ;;  %v11952_v30 = vcombine.high %v7850_v17, %v7854_v18  ;;  %v7929_v53 = vld [vmem:[%s16614_s11 + $0xa88] sm:$0xff] }
 0x6e4   :  { %v12038_v4 = vcombine.high %v7937_v50, %v7941_v56  ;;  %v7933_v55 = vld [vmem:[%s16614_s11 + $0xaa8] sm:$0xff] }
 0x6e5   :  { %10288 = vmatpush1.bf16.msra.mxu0 %v11989_v60  ;;  %v7970_v60 = vld [vmem:[%s16614_s11 + $0xbd0] sm:$0xff] }
 0x6e6   :  { %10450 = vmatpush1.bf16.msra.mxu1 %v11999_v28  ;;  %10289 = vmatprep.subr.bf16.mxu0 %v11982_v61  ;;  %v7974_v28 = vld [vmem:[%s16614_s11 + $0xbf0] sm:$0xff]  ;;  %v12069_v61 = vcombine.low %v7969_v16, %v7973_v22  ;;  %v12030_v16 = vcombine.high %v7929_v53, %v7933_v55 }
 0x6e7   :  { %10451 = vmatprep.subr.bf16.mxu1 %v11992_v32  ;;  %v11951_v32 = vcombine.low %v7850_v17, %v7854_v18  ;;  %v12072_v35 = vcombine.high %v7970_v60, %v7974_v28  ;;  %v7921_v17 = vld [vmem:[%s16614_s11 + $0xa48] sm:$0xff] }
 0x6e8   :  { %v7925_v18 = vld [vmem:[%s16614_s11 + $0xa68] sm:$0xff] }
 0x6e9   :  { %10290 = vmatpush1.bf16.msra.mxu0 %v11981_v9  ;;  %v7962_v9 = vld [vmem:[%s16614_s11 + $0xb90] sm:$0xff] }
 0x6ea   :  { %10452 = vmatpush1.bf16.msra.mxu1 %v11991_v26  ;;  %10291 = vmatprep.subr.bf16.mxu0 %v11974_v42  ;;  %v7966_v26 = vld [vmem:[%s16614_s11 + $0xbb0] sm:$0xff]  ;;  %v12061_v42 = vcombine.low %v7961_v31, %v7965_v19  ;;  %v12022_v31 = vcombine.high %v7921_v17, %v7925_v18 }
 0x6eb   :  { %10453 = vmatprep.subr.bf16.mxu1 %v11984_v38  ;;  %v12071_v38 = vcombine.low %v7970_v60, %v7974_v28  ;;  %v12064_v48 = vcombine.high %v7962_v9, %v7966_v26  ;;  %v7913_v60 = vld [vmem:[%s16614_s11 + $0xa08] sm:$0xff] }
 0x6ec   :  { %v7917_v28 = vld [vmem:[%s16614_s11 + $0xa28] sm:$0xff] }
 0x6ed   :  { %10292 = vmatpush1.bf16.msra.mxu0 %v11973_v54  ;;  %v7954_v54 = vld [vmem:[%s16614_s11 + $0xb50] sm:$0xff] }
 0x6ee   :  { %10454 = vmatpush1.bf16.msra.mxu1 %v11983_v37  ;;  %10293 = vmatprep.subr.bf16.mxu0 %v11966_v51  ;;  %v7958_v37 = vld [vmem:[%s16614_s11 + $0xb70] sm:$0xff]  ;;  %v12053_v51 = vcombine.low %v7953_v36, %v7957_v23  ;;  %v12014_v36 = vcombine.high %v7913_v60, %v7917_v28 }
 0x6ef   :  { %10455 = vmatprep.subr.bf16.mxu1 %v11976_v24  ;;  %v12063_v24 = vcombine.low %v7962_v9, %v7966_v26  ;;  %v12056_v62 = vcombine.high %v7954_v54, %v7958_v37  ;;  %v7778_v9 = vld [vmem:[%s16614_s11 + $0x5d0] sm:$0xff] }
 0x6f0   :  { %v7782_v26 = vld [vmem:[%s16614_s11 + $0x5f0] sm:$0xff] }
 0x6f1   :  { %10294 = vmatpush1.bf16.msra.mxu0 %v11965_v47  ;;  %v7946_v47 = vld [vmem:[%s16614_s11 + $0xb10] sm:$0xff] }
 0x6f2   :  { %10456 = vmatpush1.bf16.msra.mxu1 %v11975_v59  ;;  %10295 = vmatprep.subr.bf16.mxu0 %v11958_v3  ;;  %v7950_v59 = vld [vmem:[%s16614_s11 + $0xb30] sm:$0xff]  ;;  %v12045_v3 = vcombine.low %v7945_v40, %v7949_v0  ;;  %v11880_v40 = vcombine.high %v7778_v9, %v7782_v26 }
 0x6f3   :  { %10457 = vmatprep.subr.bf16.mxu1 %v11968_v39  ;;  %v12055_v39 = vcombine.low %v7954_v54, %v7958_v37  ;;  %v12048_v45 = vcombine.high %v7946_v47, %v7950_v59  ;;  %v7770_v54 = vld [vmem:[%s16614_s11 + $0x590] sm:$0xff] }
 0x6f4   :  { %v7774_v37 = vld [vmem:[%s16614_s11 + $0x5b0] sm:$0xff] }
 0x6f5   :  { %10296 = vmatpush1.bf16.msra.mxu0 %v11957_v5  ;;  %v7938_v5 = vld [vmem:[%s16614_s11 + $0xad0] sm:$0xff] }
 0x6f6   :  { %10458 = vmatpush1.bf16.msra.mxu1 %v11967_v20  ;;  %10297 = vmatprep.subr.bf16.mxu0 %v11950_v7  ;;  %v7942_v20 = vld [vmem:[%s16614_s11 + $0xaf0] sm:$0xff]  ;;  %v12037_v7 = vcombine.low %v7937_v50, %v7941_v56 }
 0x6f7   :  { %10459 = vmatprep.subr.bf16.mxu1 %v11960_v2  ;;  %v12047_v2 = vcombine.low %v7946_v47, %v7950_v59  ;;  %v12040_v22 = vcombine.high %v7938_v5, %v7942_v20  ;;  %v11872_v47 = vcombine.high %v7770_v54, %v7774_v37 }
 0x6f9   :  { %10298 = vmatpush1.bf16.msra.mxu0 %v11949_v21  ;;  %v7930_v21 = vld [vmem:[%s16614_s11 + $0xa90] sm:$0xff] }
 0x6fa   :  { %10460 = vmatpush1.bf16.msra.mxu1 %v11959_v27  ;;  %10299 = vmatprep.subr.bf16.mxu0 %v12070_v29  ;;  %v7934_v27 = vld [vmem:[%s16614_s11 + $0xab0] sm:$0xff]  ;;  %v12029_v29 = vcombine.low %v7929_v53, %v7933_v55  ;;  %v7775_v53 = vld [vmem:[%s16614_s11 + $0x5b8] sm:$0xff] }
 0x6fb   :  { %10461 = vmatprep.subr.bf16.mxu1 %v11952_v30  ;;  %v12039_v30 = vcombine.low %v7938_v5, %v7942_v20  ;;  %v12032_v19 = vcombine.high %v7930_v21, %v7934_v27 }
 0x6fd   :  { %10300 = vmatpush2.bf16.msra.mxu0 %v12069_v61  ;;  %v7922_v61 = vld [vmem:[%s16614_s11 + $0xa50] sm:$0xff] }
 0x6fe   :  { %10462 = vmatpush1.bf16.msra.mxu1 %v11951_v32  ;;  %10301 = vmatprep.subr.bf16.mxu0 %v12062_v52  ;;  %v7926_v32 = vld [vmem:[%s16614_s11 + $0xa70] sm:$0xff]  ;;  %v12021_v52 = vcombine.low %v7921_v17, %v7925_v18  ;;  %v7763_v17 = vld [vmem:[%s16614_s11 + $0x558] sm:$0xff] }
 0x6ff   :  { %10463 = vmatprep.subr.bf16.mxu1 %v12072_v35  ;;  %v12031_v35 = vcombine.low %v7930_v21, %v7934_v27  ;;  %v12024_v23 = vcombine.high %v7922_v61, %v7926_v32  ;;  %v7767_v18 = vld [vmem:[%s16614_s11 + $0x578] sm:$0xff] }
 0x701   :  { %10302 = vmatpush2.bf16.msra.mxu0 %v12061_v42  ;;  %v7914_v42 = vld [vmem:[%s16614_s11 + $0xa10] sm:$0xff] }
 0x702   :  { %10464 = vmatpush2.bf16.msra.mxu1 %v12071_v38  ;;  %10303 = vmatprep.subr.bf16.mxu0 %v12054_v46  ;;  %v7918_v38 = vld [vmem:[%s16614_s11 + $0xa30] sm:$0xff]  ;;  %v12013_v46 = vcombine.low %v7913_v60, %v7917_v28  ;;  %v7755_v60 = vld [vmem:[%s16614_s11 + $0x518] sm:$0xff] }
 0x703   :  { %10465 = vmatprep.subr.bf16.mxu1 %v12064_v48  ;;  %v12023_v48 = vcombine.low %v7922_v61, %v7926_v32  ;;  %v12016_v0 = vcombine.high %v7914_v42, %v7918_v38  ;;  %v12015_v56 = vcombine.low %v7914_v42, %v7918_v38  ;;  %v11865_v61 = vcombine.low %v7763_v17, %v7767_v18 }
 0x705   :  { %10304 = vmatpush2.bf16.msra.mxu0 %v12053_v51  ;;  %v7779_v51 = vld [vmem:[%s16614_s11 + $0x5d8] sm:$0xff] }
 0x706   :  { %10466 = vmatpush2.bf16.msra.mxu1 %v12063_v24  ;;  %10305 = vmatprep.subr.bf16.mxu0 %v12046_v57  ;;  %v7783_v24 = vld [vmem:[%s16614_s11 + $0x5f8] sm:$0xff] }
 0x707   :  { %10467 = vmatprep.subr.bf16.mxu1 %v12056_v62  ;;  %v11879_v62 = vcombine.low %v7778_v9, %v7782_v26  ;;  %v11881_v5 = vcombine.low %v7779_v51, %v7783_v24  ;;  %v7751_v9 = vld [vmem:[%s16614_s11 + $0x4f8] sm:$0xff] }
 0x709   :  { %10306 = vmatpush2.bf16.msra.mxu0 %v12045_v3  ;;  %v11882_v3 = vcombine.high %v7779_v51, %v7783_v24 }
 0x70a   :  { %10468 = vmatpush2.bf16.msra.mxu1 %v12055_v39  ;;  %10307 = vmatprep.subr.bf16.mxu0 %v12038_v4  ;;  %v7762_v39 = vld [vmem:[%s16614_s11 + $0x550] sm:$0xff] }
 0x70b   :  { %10469 = vmatprep.subr.bf16.mxu1 %v12048_v45  ;;  %v7771_v45 = vld [vmem:[%s16614_s11 + $0x598] sm:$0xff] }
 0x70c   :  { %v11873_v27 = vcombine.low %v7771_v45, %v7775_v53 }
 0x70d   :  { %10308 = vmatpush2.bf16.msra.mxu0 %v12037_v7 }
 0x70e   :  { %10470 = vmatpush2.bf16.msra.mxu1 %v12047_v2  ;;  %10309 = vmatprep.subr.bf16.mxu0 %v12030_v16  ;;  %v11874_v2 = vcombine.high %v7771_v45, %v7775_v53  ;;  %v7754_v16 = vld [vmem:[%s16614_s11 + $0x510] sm:$0xff] }
 0x70f   :  { %10471 = vmatprep.subr.bf16.mxu1 %v12040_v22  ;;  %v7758_v22 = vld [vmem:[%s16614_s11 + $0x530] sm:$0xff] }
 0x710   :  { %v11855_v28 = vcombine.low %v7754_v16, %v7758_v22  ;;  %v7842_v53 = vld [vmem:[%s16614_s11 + $0x7d0] sm:$0xff] }
 0x711   :  { %10310 = vmatpush2.bf16.msra.mxu0 %v12029_v29  ;;  %v11856_v29 = vcombine.high %v7754_v16, %v7758_v22  ;;  %v7834_v22 = vld [vmem:[%s16614_s11 + $0x790] sm:$0xff] }
 0x712   :  { %10472 = vmatpush2.bf16.msra.mxu1 %v12039_v30  ;;  %10311 = vmatprep.subr.bf16.mxu0 %v12022_v31  ;;  %v11866_v30 = vcombine.high %v7763_v17, %v7767_v18  ;;  %v7746_v31 = vld [vmem:[%s16614_s11 + $0x4d0] sm:$0xff]  ;;  %v7843_v18 = vld [vmem:[%s16614_s11 + $0x7d8] sm:$0xff] }
 0x713   :  { %10473 = vmatprep.subr.bf16.mxu1 %v12032_v19  ;;  %v7750_v19 = vld [vmem:[%s16614_s11 + $0x4f0] sm:$0xff] }
 0x714   :  { %v11848_v32 = vcombine.high %v7746_v31, %v7750_v19  ;;  %v11847_v26 = vcombine.low %v7746_v31, %v7750_v19  ;;  %v7838_v17 = vld [vmem:[%s16614_s11 + $0x7b0] sm:$0xff] }
 0x715   :  { %10312 = vmatpush2.bf16.msra.mxu0 %v12021_v52  ;;  %v7826_v19 = vld [vmem:[%s16614_s11 + $0x750] sm:$0xff] }
 0x716   :  { %10474 = vmatpush2.bf16.msra.mxu1 %v12031_v35  ;;  %10313 = vmatprep.subr.bf16.mxu0 %v12014_v36  ;;  %v7738_v35 = vld [vmem:[%s16614_s11 + $0x490] sm:$0xff] }
 0x717   :  { %10475 = vmatprep.subr.bf16.mxu1 %v12024_v23  ;;  %v7742_v36 = vld [vmem:[%s16614_s11 + $0x4b0] sm:$0xff]  ;;  %v7747_v23 = vld [vmem:[%s16614_s11 + $0x4d8] sm:$0xff] }
 0x718   :  { %v11840_v38 = vcombine.high %v7738_v35, %v7742_v36  ;;  %v11849_v51 = vcombine.low %v7747_v23, %v7751_v9 }
 0x719   :  { %10314 = vmatpush2.bf16.msra.mxu0 %v12013_v46  ;;  %v10153_v57 = vpop.f32.mrf.mxu1  ;;  %v11850_v46 = vcombine.high %v7747_v23, %v7751_v9  ;;  %v7822_v23 = vld [vmem:[%s16614_s11 + $0x730] sm:$0xff]  ;;  %v7827_v9 = vld [vmem:[%s16614_s11 + $0x758] sm:$0xff] }
 0x71a   :  { %v16123_v50 = vadd.f32 %v10153_v57, %v15904_v41  ;;  %10476 = vmatpush2.bf16.msra.mxu1 %v12023_v48  ;;  %10406 = vmatprep.subr.bf16.mxu0 %v11880_v40  ;;  %v7766_v41 = vld [vmem:[%s16614_s11 + $0x570] sm:$0xff] }
 0x71b   :  { %v10155_v59 = vpop.f32.mrf.mxu1  ;;  %10477 = vmatprep.subr.bf16.mxu1 %v12016_v0  ;;  %v11864_v7 = vcombine.high %v7762_v39, %v7766_v41  ;;  %v11863_v21 = vcombine.low %v7762_v39, %v7766_v41  ;;  %v7730_v48 = vld [vmem:[%s16614_s11 + $0x450] sm:$0xff]  ;;  %v7739_v0 = vld [vmem:[%s16614_s11 + $0x498] sm:$0xff] }
 0x71c   :  { %v16129_v4 = vadd.f32 %v10155_v59, %v15912_v14  ;;  %10316 = vmatmul.mubr.bf16.vlgmr.msra.gmra.mxu0 %v15595_v6  ;;  %v11871_v14 = vcombine.low %v7770_v54, %v7774_v37  ;;  %v7734_v40 = vld [vmem:[%s16614_s11 + $0x470] sm:$0xff]  ;;  %v7743_v54 = vld [vmem:[%s16614_s11 + $0x4b8] sm:$0xff]  ;;  %v11839_v37 = vcombine.low %v7738_v35, %v7742_v36 }
 0x71d   :  { %10407 = vmatpush1.bf16.msra.mxu0 %v11879_v62  ;;  %10438 = vmatprep.mubr.bf16.mxu0 %v15454_v58  ;;  %v10157_v55 = vpop.f32.mrf.mxu1  ;;  %v11832_v24 = vcombine.high %v7730_v48, %v7734_v40  ;;  %v11842_v57 = vcombine.high %v7739_v0, %v7743_v54  ;;  %v7722_v62 = vld [vmem:[%s16614_s11 + $0x410] sm:$0xff]  ;;  %v7735_v59 = vld [vmem:[%s16614_s11 + $0x478] sm:$0xff]  ;;  %v11841_v39 = vcombine.low %v7739_v0, %v7743_v54 }
 0x71e   :  { %10478 = vmatpush2.bf16.msra.mxu1 %v12015_v56  ;;  %10408 = vmatprep.subr.bf16.mxu0 %v11872_v47  ;;  %v7726_v56 = vld [vmem:[%s16614_s11 + $0x430] sm:$0xff]  ;;  %v7731_v47 = vld [vmem:[%s16614_s11 + $0x458] sm:$0xff] }
 0x71f   :  { %v10158_v20 = vpop.f32.mrf.mxu1  ;;  %10570 = vmatprep.subr.bf16.mxu1 %v11882_v3  ;;  %v11831_v3 = vcombine.low %v7730_v48, %v7734_v40  ;;  %v11824_v41 = vcombine.high %v7722_v62, %v7726_v56  ;;  %v11834_v45 = vcombine.high %v7731_v47, %v7735_v59  ;;  %v7846_v55 = vld [vmem:[%s16614_s11 + $0x7f0] sm:$0xff]  ;;  %v7819_v54 = vld [vmem:[%s16614_s11 + $0x718] sm:$0xff] }
 0x720   :  { %v11823_v20 = vcombine.low %v7722_v62, %v7726_v56  ;;  %v7818_v36 = vld [vmem:[%s16614_s11 + $0x710] sm:$0xff] }
 0x721   :  { %10409 = vmatpush1.bf16.msra.mxu0 %v11871_v14  ;;  %10480 = vmatmul.mubr.bf16.vlgmr.msra.gmra.mxu1 %v15595_v6  ;;  %v7723_v14 = vld [vmem:[%s16614_s11 + $0x418] sm:$0xff]  ;;  %v7810_v40 = vld [vmem:[%s16614_s11 + $0x6d0] sm:$0xff] }
 0x722   :  { %10571 = vmatpush1.bf16.msra.mxu1 %v11881_v5  ;;  %10602 = vmatprep.mubr.bf16.mxu1 %v15454_v58  ;;  %v7759_v58 = vld [vmem:[%s16614_s11 + $0x538] sm:$0xff]  ;;  %v7814_v0 = vld [vmem:[%s16614_s11 + $0x6f0] sm:$0xff] }
 0x723   :  { %10410 = vmatprep.subr.bf16.mxu0 %v11864_v7  ;;  %10572 = vmatprep.subr.bf16.mxu1 %v11874_v2  ;;  %v11858_v52 = vcombine.high %v7755_v60, %v7759_v58  ;;  %v11857_v42 = vcombine.low %v7755_v60, %v7759_v58  ;;  %v7727_v5 = vld [vmem:[%s16614_s11 + $0x438] sm:$0xff]  ;;  %v11833_v7 = vcombine.low %v7731_v47, %v7735_v59  ;;  %v7830_v60 = vld [vmem:[%s16614_s11 + $0x770] sm:$0xff] }
 0x724   :  { %v11944_v2 = vcombine.high %v7842_v53, %v7846_v55  ;;  %v11826_v16 = vcombine.high %v7723_v14, %v7727_v5  ;;  %v7835_v58 = vld [vmem:[%s16614_s11 + $0x798] sm:$0xff]  ;;  %v7802_v56 = vld [vmem:[%s16614_s11 + $0x690] sm:$0xff] }
 0x725   :  { %10411 = vmatpush1.bf16.msra.mxu0 %v11863_v21  ;;  %v7847_v21 = vld [vmem:[%s16614_s11 + $0x7f8] sm:$0xff]  ;;  %v7806_v47 = vld [vmem:[%s16614_s11 + $0x6b0] sm:$0xff] }
 0x726   :  { %10573 = vmatpush1.bf16.msra.mxu1 %v11873_v27  ;;  %10412 = vmatprep.subr.bf16.mxu0 %v11856_v29  ;;  %v11943_v27 = vcombine.low %v7842_v53, %v7846_v55  ;;  %v11825_v29 = vcombine.low %v7723_v14, %v7727_v5  ;;  %v11946_v31 = vcombine.high %v7843_v18, %v7847_v21  ;;  %v7811_v59 = vld [vmem:[%s16614_s11 + $0x6d8] sm:$0xff]  ;;  %v7794_v55 = vld [vmem:[%s16614_s11 + $0x650] sm:$0xff] }
 0x727   :  { %10574 = vmatprep.subr.bf16.mxu1 %v11866_v30  ;;  %v11936_v30 = vcombine.high %v7834_v22, %v7838_v17  ;;  %v7798_v14 = vld [vmem:[%s16614_s11 + $0x670] sm:$0xff]  ;;  %v7803_v5 = vld [vmem:[%s16614_s11 + $0x698] sm:$0xff] }
 0x729   :  { %10413 = vmatpush1.bf16.msra.mxu0 %v11855_v28  ;;  %v7839_v28 = vld [vmem:[%s16614_s11 + $0x7b8] sm:$0xff] }
 0x72a   :  { %10575 = vmatpush1.bf16.msra.mxu1 %v11865_v61  ;;  %10414 = vmatprep.subr.bf16.mxu0 %v11848_v32  ;;  %v11935_v61 = vcombine.low %v7834_v22, %v7838_v17  ;;  %v11945_v32 = vcombine.low %v7843_v18, %v7847_v21  ;;  %v11938_v35 = vcombine.high %v7835_v58, %v7839_v28  ;;  %v7786_v17 = vld [vmem:[%s16614_s11 + $0x610] sm:$0xff]  ;;  %v7795_v21 = vld [vmem:[%s16614_s11 + $0x658] sm:$0xff] }
 0x72b   :  { %10576 = vmatprep.subr.bf16.mxu1 %v11858_v52  ;;  %v11928_v52 = vcombine.high %v7826_v19, %v7830_v60  ;;  %v7790_v18 = vld [vmem:[%s16614_s11 + $0x630] sm:$0xff] }
 0x72d   :  { %10415 = vmatpush1.bf16.msra.mxu0 %v11847_v26  ;;  %v7831_v26 = vld [vmem:[%s16614_s11 + $0x778] sm:$0xff] }
 0x72e   :  { %10577 = vmatpush1.bf16.msra.mxu1 %v11857_v42  ;;  %10416 = vmatprep.subr.bf16.mxu0 %v11840_v38  ;;  %v11927_v42 = vcombine.low %v7826_v19, %v7830_v60  ;;  %v11937_v38 = vcombine.low %v7835_v58, %v7839_v28  ;;  %v11930_v48 = vcombine.high %v7827_v9, %v7831_v26  ;;  %v7986_v60 = vld [vmem:[%s16614_s11 + $0xc50] sm:$0xff]  ;;  %v7787_v28 = vld [vmem:[%s16614_s11 + $0x618] sm:$0xff] }
 0x72f   :  { %10578 = vmatprep.subr.bf16.mxu1 %v11850_v46  ;;  %v11920_v46 = vcombine.high %v7818_v36, %v7822_v23  ;;  %v7990_v58 = vld [vmem:[%s16614_s11 + $0xc70] sm:$0xff] }
 0x731   :  { %10417 = vmatpush1.bf16.msra.mxu0 %v11839_v37  ;;  %v7823_v37 = vld [vmem:[%s16614_s11 + $0x738] sm:$0xff] }
 0x732   :  { %10579 = vmatpush1.bf16.msra.mxu1 %v11849_v51  ;;  %10418 = vmatprep.subr.bf16.mxu0 %v11832_v24  ;;  %v11919_v51 = vcombine.low %v7818_v36, %v7822_v23  ;;  %v11929_v24 = vcombine.low %v7827_v9, %v7831_v26  ;;  %v11922_v62 = vcombine.high %v7819_v54, %v7823_v37  ;;  %v7978_v23 = vld [vmem:[%s16614_s11 + $0xc10] sm:$0xff]  ;;  %v7987_v26 = vld [vmem:[%s16614_s11 + $0xc58] sm:$0xff] }
 0x733   :  { %10580 = vmatprep.subr.bf16.mxu1 %v11842_v57  ;;  %v11912_v57 = vcombine.high %v7810_v40, %v7814_v0  ;;  %v7982_v9 = vld [vmem:[%s16614_s11 + $0xc30] sm:$0xff] }
 0x735   :  { %10419 = vmatpush1.bf16.msra.mxu0 %v11831_v3  ;;  %v7815_v3 = vld [vmem:[%s16614_s11 + $0x6f8] sm:$0xff] }
 0x736   :  { %10581 = vmatpush1.bf16.msra.mxu1 %v11841_v39  ;;  %10420 = vmatprep.subr.bf16.mxu0 %v11824_v41  ;;  %v11911_v39 = vcombine.low %v7810_v40, %v7814_v0  ;;  %v11921_v41 = vcombine.low %v7819_v54, %v7823_v37  ;;  %v11914_v53 = vcombine.high %v7811_v59, %v7815_v3  ;;  %v16331_v54 = vld [vmem:[%s16616_s13] sm:$0xff] }
 0x737   :  { %10582 = vmatprep.subr.bf16.mxu1 %v11834_v45  ;;  %v11904_v45 = vcombine.high %v7802_v56, %v7806_v47  ;;  %v12080_v40 = vcombine.high %v7978_v23, %v7982_v9 }
 0x739   :  { %10421 = vmatpush1.bf16.msra.mxu0 %v11823_v20  ;;  %v7807_v20 = vld [vmem:[%s16614_s11 + $0x6b8] sm:$0xff] }
 0x73a   :  { %10583 = vmatpush1.bf16.msra.mxu1 %v11833_v7  ;;  %10422 = vmatprep.subr.bf16.mxu0 %v11944_v2  ;;  %v11903_v7 = vcombine.low %v7802_v56, %v7806_v47  ;;  %v11913_v2 = vcombine.low %v7811_v59, %v7815_v3  ;;  %v11906_v22 = vcombine.high %v7803_v5, %v7807_v20  ;;  %v7983_v56 = vld [vmem:[%s16614_s11 + $0xc38] sm:$0xff] }
 0x73b   :  { %10584 = vmatprep.subr.bf16.mxu1 %v11826_v16  ;;  %v11896_v16 = vcombine.high %v7794_v55, %v7798_v14  ;;  %v12079_v3 = vcombine.low %v7978_v23, %v7982_v9  ;;  %v7611_v9 = vld [vmem:[%s16614_s11 + $0x98] sm:$0xff] }
 0x73d   :  { %10423 = vmatpush2.bf16.msra.mxu0 %v11943_v27  ;;  %v7799_v27 = vld [vmem:[%s16614_s11 + $0x678] sm:$0xff] }
 0x73e   :  { %10585 = vmatpush1.bf16.msra.mxu1 %v11825_v29  ;;  %10424 = vmatprep.subr.bf16.mxu0 %v11936_v30  ;;  %v11895_v29 = vcombine.low %v7794_v55, %v7798_v14  ;;  %v11905_v30 = vcombine.low %v7803_v5, %v7807_v20  ;;  %v11898_v19 = vcombine.high %v7795_v21, %v7799_v27 }
 0x73f   :  { %10586 = vmatprep.subr.bf16.mxu1 %v11946_v31  ;;  %v11888_v31 = vcombine.high %v7786_v17, %v7790_v18  ;;  %v10710_v5 = vrot.slane %v16331_v54, %v13932_v12 }
 0x741   :  { %10425 = vmatpush2.bf16.msra.mxu0 %v11935_v61  ;;  %v7791_v61 = vld [vmem:[%s16614_s11 + $0x638] sm:$0xff] }
 0x742   :  { %10587 = vmatpush2.bf16.msra.mxu1 %v11945_v32  ;;  %10426 = vmatprep.subr.bf16.mxu0 %v11928_v52  ;;  %v11887_v32 = vcombine.low %v7786_v17, %v7790_v18  ;;  %v11897_v52 = vcombine.low %v7795_v21, %v7799_v27  ;;  %v11890_v36 = vcombine.high %v7787_v28, %v7791_v61 }
 0x743   :  { %10588 = vmatprep.subr.bf16.mxu1 %v11938_v35  ;;  %v12088_v35 = vcombine.high %v7986_v60, %v7990_v58 }
 0x745   :  { %10427 = vmatpush2.bf16.msra.mxu0 %v11927_v42  ;;  %v7991_v42 = vld [vmem:[%s16614_s11 + $0xc78] sm:$0xff] }
 0x746   :  { %10589 = vmatpush2.bf16.msra.mxu1 %v11937_v38  ;;  %10428 = vmatprep.subr.bf16.mxu0 %v11920_v46  ;;  %v12087_v46 = vcombine.low %v7986_v60, %v7990_v58  ;;  %v12090_v37 = vcombine.high %v7987_v26, %v7991_v42 }
 0x747   :  { %10590 = vmatprep.subr.bf16.mxu1 %v11930_v48  ;;  %v11889_v48 = vcombine.low %v7787_v28, %v7791_v61  ;;  %v7627_v28 = vld [vmem:[%s16614_s11 + $0x118] sm:$0xff] }
 0x748   :  { %v7631_v61 = vld [vmem:[%s16614_s11 + $0x138] sm:$0xff] }
 0x749   :  { %10429 = vmatpush2.bf16.msra.mxu0 %v11919_v51  ;;  %v7651_v51 = vld [vmem:[%s16614_s11 + $0x1d8] sm:$0xff] }
 0x74a   :  { %10591 = vmatpush2.bf16.msra.mxu1 %v11929_v24  ;;  %10430 = vmatprep.subr.bf16.mxu0 %v11912_v57  ;;  %v7655_v24 = vld [vmem:[%s16614_s11 + $0x1f8] sm:$0xff] }
 0x74b   :  { %10592 = vmatprep.subr.bf16.mxu1 %v11922_v62  ;;  %v7979_v62 = vld [vmem:[%s16614_s11 + $0xc18] sm:$0xff] }
 0x74c   :  { %v12082_v20 = vcombine.high %v7979_v62, %v7983_v56  ;;  %v12081_v17 = vcombine.low %v7979_v62, %v7983_v56  ;;  %v7715_v56 = vld [vmem:[%s16614_s11 + $0x3d8] sm:$0xff] }
 0x74d   :  { %10431 = vmatpush2.bf16.msra.mxu0 %v11911_v39  ;;  %v10706_v39 = vrot.slane %v16331_v54, %v13926_v10  ;;  %v7647_v10 = vld [vmem:[%s16614_s11 + $0x1b8] sm:$0xff] }
 0x74e   :  { %10593 = vmatpush2.bf16.msra.mxu1 %v11921_v41  ;;  %10432 = vmatprep.subr.bf16.mxu0 %v11904_v45  ;;  %v12089_v45 = vcombine.low %v7987_v26, %v7991_v42 }
 0x74f   :  { %10594 = vmatprep.subr.bf16.mxu1 %v11914_v53  ;;  %v11754_v53 = vcombine.high %v7651_v51, %v7655_v24 }
 0x751   :  { %10433 = vmatpush2.bf16.msra.mxu0 %v11903_v7  ;;  %v7643_v7 = vld [vmem:[%s16614_s11 + $0x198] sm:$0xff] }
 0x752   :  { %10595 = vmatpush2.bf16.msra.mxu1 %v11913_v2  ;;  %10434 = vmatprep.subr.bf16.mxu0 %v11896_v16  ;;  %v11746_v18 = vcombine.high %v7643_v7, %v7647_v10  ;;  %v11745_v60 = vcombine.low %v7643_v7, %v7647_v10  ;;  %v7695_v7 = vld [vmem:[%s16614_s11 + $0x338] sm:$0xff] }
 0x753   :  { %10596 = vmatprep.subr.bf16.mxu1 %v11906_v22 }
 0x755   :  { %10435 = vmatpush2.bf16.msra.mxu0 %v11895_v29 }
 0x756   :  { %10597 = vmatpush2.bf16.msra.mxu1 %v11905_v30  ;;  %10436 = vmatprep.subr.bf16.mxu0 %v11888_v31  ;;  %v7635_v30 = vld [vmem:[%s16614_s11 + $0x158] sm:$0xff] }
 0x757   :  { %10598 = vmatprep.subr.bf16.mxu1 %v11898_v19 }
 0x759   :  { %v16324_v38 = vpop.f32.mrf.mxu1  ;;  %10437 = vmatpush2.bf16.msra.mxu0 %v11887_v32 }
 0x75a   :  { %10599 = vmatpush2.bf16.msra.mxu1 %v11897_v52  ;;  %10500 = vmatprep.subr.bf16.mxu0 %v12088_v35  ;;  %v7619_v52 = vld [vmem:[%s16614_s11 + $0xd8] sm:$0xff] }
 0x75b   :  { %v16326_v0 = vpop.f32.mrf.mxu1  ;;  %10600 = vmatprep.subr.bf16.mxu1 %v11890_v36  ;;  %v7623_v35 = vld [vmem:[%s16614_s11 + $0xf8] sm:$0xff]  ;;  %v11729_v36 = vcombine.low %v7627_v28, %v7631_v61 }
 0x75c   :  { %10439 = vmatmul.mubr.bf16.vlgmr.msra.gmra.mxu0 %v15456_v33  ;;  %v10194_v57 = vpop.f32.mrf.mxu0  ;;  %v11722_v23 = vcombine.high %v7619_v52, %v7623_v35  ;;  %v11721_v26 = vcombine.low %v7619_v52, %v7623_v35  ;;  %v7911_v52 = vld [vmem:[%s16614_s11 + $0x9f8] sm:$0xff] }
 0x75d   :  { %v10195_v47 = vadd.f32 %v10194_v57, %v16123_v50  ;;  %v10280_v59 = vpop.f32.mrf.mxu1  ;;  %10501 = vmatpush1.bf16.msra.mxu0 %v12087_v46  ;;  %10520 = vmatprep.mubr.bf16.mxu0 %v13625_v1  ;;  %v7603_v46 = vld [vmem:[%s16614_s11 + $0x58] sm:$0xff] }
 0x75e   :  { %10601 = vmatpush2.bf16.msra.mxu1 %v11889_v48  ;;  %v10196_v41 = vpop.f32.mrf.mxu0  ;;  %10502 = vmatprep.subr.bf16.mxu0 %v12080_v40  ;;  %v7607_v48 = vld [vmem:[%s16614_s11 + $0x78] sm:$0xff] }
 0x75f   :  { %v10693_v55 = vmax.f32 %v10195_v47, 0.0  ;;  %v10197_v14 = vadd.f32 %v10196_v41, %v16129_v4  ;;  %v10281_v50 = vpop.f32.mrf.mxu1  ;;  %10664 = vmatprep.subr.bf16.mxu1 %v12090_v37  ;;  %v11753_v4 = vcombine.low %v7651_v51, %v7655_v24  ;;  %v11706_v37 = vcombine.high %v7603_v46, %v7607_v48  ;;  %v7595_v51 = vld [vmem:[%s16614_s11 + $0x18] sm:$0xff] }
 0x760   :  { %v10198_v2 = vpop.f32.mrf.mxu0  ;;  %v7599_v24 = vld [vmem:[%s16614_s11 + $0x38] sm:$0xff]  ;;  %v11705_v57 = vcombine.low %v7603_v46, %v7607_v48 }
 0x761   :  { %v10694_v16 = vmax.f32 %v10197_v14, 0.0  ;;  %v16359_v22 = vpop.f32.mrf.mxu1  ;;  %10503 = vmatpush1.bf16.msra.mxu0 %v12079_v3  ;;  %10603 = vmatmul.mubr.bf16.vlgmr.msra.gmra.mxu1 %v15456_v33  ;;  %v10743_v21 = vmul.f32 %v10706_v39, %v10693_v55  ;;  %v7639_v33 = vld [vmem:[%s16614_s11 + $0x178] sm:$0xff]  ;;  %v11698_v62 = vcombine.high %v7595_v51, %v7599_v24  ;;  %v11697_v59 = vcombine.low %v7595_v51, %v7599_v24 }
 0x762   :  { %10665 = vmatpush1.bf16.msra.mxu1 %v12089_v45  ;;  %v10199_v12 = vpop.f32.mrf.mxu0  ;;  %10529 = vmatprep.subr.bf16.mxu0 %v11754_v53  ;;  %v11737_v32 = vcombine.low %v7635_v30, %v7639_v33  ;;  %v7719_v47 = vld [vmem:[%s16614_s11 + $0x3f8] sm:$0xff] }
 0x763   :  { %v10744_v27 = vmul.f32 %v10710_v5, %v10694_v16  ;;  %v16362_v29 = vpop.f32.mrf.mxu1  ;;  %10666 = vmatprep.subr.bf16.mxu1 %v12082_v20  ;;  %10684 = vmatprep.mubr.bf16.mxu1 %v13625_v1  ;;  %v11738_v1 = vcombine.high %v7635_v30, %v7639_v33  ;;  %v11818_v3 = vcombine.high %v7715_v56, %v7719_v47  ;;  %v7707_v39 = vld [vmem:[%s16614_s11 + $0x398] sm:$0xff] }
 0x764   :  { %12093 = vmatmul.mubr.msk.bf16.vlgmr.msra.gmra.mxu0 %vm6922_vm3, %v15713_v34  ;;  %v7711_v41 = vld [vmem:[%s16614_s11 + $0x3b8] sm:$0xff]  ;;  %v11817_v45 = vcombine.low %v7715_v56, %v7719_v47 }
 0x765   :  { %v16373_v31 = vadd.f32 %v10744_v27, %v10743_v21  ;;  %v10362_v19 = vpop.f32.mrf.mxu1  ;;  %10530 = vmatpush1.bf16.msra.mxu0 %v11753_v4  ;;  %10561 = vmatprep.mubr.bf16.mxu0 %v15325_v49  ;;  %v11730_v49 = vcombine.high %v7627_v28, %v7631_v61  ;;  %v11810_v53 = vcombine.high %v7707_v39, %v7711_v41  ;;  %v7699_v55 = vld [vmem:[%s16614_s11 + $0x358] sm:$0xff] }
 0x766   :  { %10667 = vmatpush1.bf16.msra.mxu1 %v12081_v17  ;;  %10531 = vmatprep.subr.bf16.mxu0 %v11746_v18  ;;  %v7703_v14 = vld [vmem:[%s16614_s11 + $0x378] sm:$0xff]  ;;  %v11809_v5 = vcombine.low %v7707_v39, %v7711_v41 }
 0x767   :  { %v10363_v58 = vpop.f32.mrf.mxu1  ;;  %v11802_v50 = vcombine.high %v7699_v55, %v7703_v14  ;;  %v7691_v20 = vld [vmem:[%s16614_s11 + $0x318] sm:$0xff]  ;;  %v11801_v10 = vcombine.low %v7699_v55, %v7703_v14 }
 0x768   :  { %v11794_v2 = vcombine.high %v7691_v20, %v7695_v7  ;;  %v7683_v16 = vld [vmem:[%s16614_s11 + $0x2d8] sm:$0xff]  ;;  %v11793_v12 = vcombine.low %v7691_v20, %v7695_v7 }
 0x769   :  { %10532 = vmatpush1.bf16.msra.mxu0 %v11745_v60  ;;  %12094 = vmatmul.mubr.msk.bf16.vlgmr.msra.gmra.mxu1 %vm6922_vm3, %v15713_v34  ;;  %v7615_v34 = vld [vmem:[%s16614_s11 + $0xb8] sm:$0xff] }
 0x76a   :  { %10533 = vmatprep.subr.bf16.mxu0 %v11738_v1  ;;  %v11714_v42 = vcombine.high %v7611_v9, %v7615_v34  ;;  %v11713_v40 = vcombine.low %v7611_v9, %v7615_v34  ;;  %v7687_v4 = vld [vmem:[%s16614_s11 + $0x2f8] sm:$0xff] }
 0x76b   :  { %v11786_v17 = vcombine.high %v7683_v16, %v7687_v4  ;;  %v7675_v18 = vld [vmem:[%s16614_s11 + $0x298] sm:$0xff]  ;;  %v11785_v27 = vcombine.low %v7683_v16, %v7687_v4 }
 0x76c   :  { %v7679_v21 = vld [vmem:[%s16614_s11 + $0x2b8] sm:$0xff] }
 0x76d   :  { %10534 = vmatpush1.bf16.msra.mxu0 %v11737_v32  ;;  %v11778_v30 = vcombine.high %v7675_v18, %v7679_v21  ;;  %v7667_v33 = vld [vmem:[%s16614_s11 + $0x258] sm:$0xff]  ;;  %v11777_v60 = vcombine.low %v7675_v18, %v7679_v21 }
 0x76e   :  { %10535 = vmatprep.subr.bf16.mxu0 %v11730_v49  ;;  %v7671_v19 = vld [vmem:[%s16614_s11 + $0x278] sm:$0xff] }
 0x76f   :  { %v11770_v1 = vcombine.high %v7667_v33, %v7671_v19  ;;  %v7659_v58 = vld [vmem:[%s16614_s11 + $0x218] sm:$0xff]  ;;  %v11769_v61 = vcombine.low %v7667_v33, %v7671_v19 }
 0x770   :  { %v7663_v28 = vld [vmem:[%s16614_s11 + $0x238] sm:$0xff] }
 0x771   :  { %10536 = vmatpush1.bf16.msra.mxu0 %v11729_v36  ;;  %v11762_v32 = vcombine.high %v7659_v58, %v7663_v28  ;;  %v7907_v49 = vld [vmem:[%s16614_s11 + $0x9d8] sm:$0xff]  ;;  %v11761_v36 = vcombine.low %v7659_v58, %v7663_v28 }
 0x772   :  { %10537 = vmatprep.subr.bf16.mxu0 %v11722_v23  ;;  %v12010_v9 = vcombine.high %v7907_v49, %v7911_v52  ;;  %v7899_v34 = vld [vmem:[%s16614_s11 + $0x998] sm:$0xff]  ;;  %v12009_v48 = vcombine.low %v7907_v49, %v7911_v52 }
 0x773   :  { %v7891_v24 = vld [vmem:[%s16614_s11 + $0x958] sm:$0xff] }
 0x774   :  { %v7887_v39 = vld [vmem:[%s16614_s11 + $0x938] sm:$0xff] }
 0x775   :  { %10538 = vmatpush1.bf16.msra.mxu0 %v11721_v26  ;;  %v7903_v26 = vld [vmem:[%s16614_s11 + $0x9b8] sm:$0xff] }
 0x776   :  { %10539 = vmatprep.subr.bf16.mxu0 %v11714_v42  ;;  %v12001_v56 = vcombine.low %v7899_v34, %v7903_v26  ;;  %v7867_v14 = vld [vmem:[%s16614_s11 + $0x898] sm:$0xff] }
 0x777   :  { %v7859_v7 = vld [vmem:[%s16614_s11 + $0x858] sm:$0xff] }
 0x778   :  { %v7851_v4 = vld [vmem:[%s16614_s11 + $0x818] sm:$0xff] }
 0x779   :  { %10540 = vmatpush1.bf16.msra.mxu0 %v11713_v40  ;;  %v7971_v21 = vld [vmem:[%s16614_s11 + $0xbd8] sm:$0xff] }
 0x77a   :  { %10541 = vmatprep.subr.bf16.mxu0 %v11706_v37  ;;  %v12002_v37 = vcombine.high %v7899_v34, %v7903_v26  ;;  %v7963_v19 = vld [vmem:[%s16614_s11 + $0xb98] sm:$0xff] }
 0x77b   :  { %v7955_v28 = vld [vmem:[%s16614_s11 + $0xb58] sm:$0xff] }
 0x77c   :  { %v7947_v52 = vld [vmem:[%s16614_s11 + $0xb18] sm:$0xff] }
 0x77d   :  { %10542 = vmatpush1.bf16.msra.mxu0 %v11705_v57  ;;  %v7895_v57 = vld [vmem:[%s16614_s11 + $0x978] sm:$0xff] }
 0x77e   :  { %10543 = vmatprep.subr.bf16.mxu0 %v11698_v62  ;;  %v11994_v47 = vcombine.high %v7891_v24, %v7895_v57  ;;  %v11993_v41 = vcombine.low %v7891_v24, %v7895_v57  ;;  %v7939_v26 = vld [vmem:[%s16614_s11 + $0xad8] sm:$0xff] }
 0x77f   :  { %v7935_v24 = vld [vmem:[%s16614_s11 + $0xab8] sm:$0xff] }
 0x781   :  { %10544 = vmatpush1.bf16.msra.mxu0 %v11697_v59 }
 0x782   :  { %10545 = vmatprep.subr.bf16.mxu0 %v11818_v3  ;;  %v7883_v3 = vld [vmem:[%s16614_s11 + $0x918] sm:$0xff] }
 0x785   :  { %10546 = vmatpush2.bf16.msra.mxu0 %v11817_v45  ;;  %v7879_v45 = vld [vmem:[%s16614_s11 + $0x8f8] sm:$0xff] }
 0x786   :  { %10547 = vmatprep.subr.bf16.mxu0 %v11810_v53  ;;  %v11985_v53 = vcombine.low %v7883_v3, %v7887_v39 }
 0x789   :  { %10548 = vmatpush2.bf16.msra.mxu0 %v11809_v5  ;;  %v7871_v5 = vld [vmem:[%s16614_s11 + $0x8b8] sm:$0xff] }
 0x78a   :  { %10549 = vmatprep.subr.bf16.mxu0 %v11802_v50  ;;  %v11970_v20 = vcombine.high %v7867_v14, %v7871_v5 }
 0x78d   :  { %10550 = vmatpush2.bf16.msra.mxu0 %v11801_v10  ;;  %v7863_v10 = vld [vmem:[%s16614_s11 + $0x878] sm:$0xff] }
 0x78e   :  { %10551 = vmatprep.subr.bf16.mxu0 %v11794_v2  ;;  %v11969_v2 = vcombine.low %v7867_v14, %v7871_v5  ;;  %v11962_v16 = vcombine.high %v7859_v7, %v7863_v10 }
 0x791   :  { %10552 = vmatpush2.bf16.msra.mxu0 %v11793_v12  ;;  %v7855_v12 = vld [vmem:[%s16614_s11 + $0x838] sm:$0xff] }
 0x792   :  { %10553 = vmatprep.subr.bf16.mxu0 %v11786_v17  ;;  %v11961_v17 = vcombine.low %v7859_v7, %v7863_v10  ;;  %v11954_v18 = vcombine.high %v7851_v4, %v7855_v12 }
 0x795   :  { %10554 = vmatpush2.bf16.msra.mxu0 %v11785_v27  ;;  %v7975_v27 = vld [vmem:[%s16614_s11 + $0xbf8] sm:$0xff] }
 0x796   :  { %10555 = vmatprep.subr.bf16.mxu0 %v11778_v30  ;;  %v11953_v30 = vcombine.low %v7851_v4, %v7855_v12  ;;  %v12074_v33 = vcombine.high %v7971_v21, %v7975_v27  ;;  %v10714_v4 = vrot.slane %v16331_v54, %v13929_v11 }
 0x799   :  { %10556 = vmatpush2.bf16.msra.mxu0 %v11777_v60  ;;  %v7967_v60 = vld [vmem:[%s16614_s11 + $0xbb8] sm:$0xff] }
 0x79a   :  { %10557 = vmatprep.subr.bf16.mxu0 %v11770_v1  ;;  %v12073_v1 = vcombine.low %v7971_v21, %v7975_v27  ;;  %v12066_v58 = vcombine.high %v7963_v19, %v7967_v60 }
 0x79c   :  { %v16462_v35 = vpop.f32.mrf.mxu0 }
 0x79d   :  { %10558 = vmatpush2.bf16.msra.mxu0 %v11769_v61  ;;  %v7959_v61 = vld [vmem:[%s16614_s11 + $0xb78] sm:$0xff] }
 0x79e   :  { %v16464_v23 = vpop.f32.mrf.mxu0  ;;  %10559 = vmatprep.subr.bf16.mxu0 %v11762_v32  ;;  %v12065_v32 = vcombine.low %v7963_v19, %v7967_v60  ;;  %v12058_v49 = vcombine.high %v7955_v28, %v7959_v61 }
 0x7a0   :  { %v10239_v42 = vpop.f32.mrf.mxu0 }
 0x7a1   :  { %v16472_v46 = vpop.f32.mrf.mxu1  ;;  %10560 = vmatpush2.bf16.msra.mxu0 %v11761_v36  ;;  %v7951_v36 = vld [vmem:[%s16614_s11 + $0xb38] sm:$0xff] }
 0x7a2   :  { %v10240_v40 = vpop.f32.mrf.mxu0  ;;  %10611 = vmatprep.subr.bf16.mxu0 %v12010_v9  ;;  %v12057_v9 = vcombine.low %v7955_v28, %v7959_v61  ;;  %v12050_v34 = vcombine.high %v7947_v52, %v7951_v36  ;;  %v7943_v42 = vld [vmem:[%s16614_s11 + $0xaf8] sm:$0xff] }
 0x7a3   :  { %v16474_v51 = vpop.f32.mrf.mxu1  ;;  %v12042_v40 = vcombine.high %v7939_v26, %v7943_v42  ;;  %v12041_v57 = vcombine.low %v7939_v26, %v7943_v42 }
 0x7a4   :  { %10562 = vmatmul.mubr.bf16.vlgmr.msra.gmra.mxu0 %v15445_v15  ;;  %v11986_v15 = vcombine.high %v7883_v3, %v7887_v39  ;;  %v7927_v3 = vld [vmem:[%s16614_s11 + $0xa78] sm:$0xff] }
 0x7a5   :  { %v10403_v62 = vpop.f32.mrf.mxu1  ;;  %10612 = vmatpush1.bf16.msra.mxu0 %v12009_v48  ;;  %10643 = vmatprep.mubr.bf16.mxu0 %v15593_v44  ;;  %v7875_v44 = vld [vmem:[%s16614_s11 + $0x8d8] sm:$0xff]  ;;  %v12049_v48 = vcombine.low %v7947_v52, %v7951_v36 }
 0x7a6   :  { %10613 = vmatprep.subr.bf16.mxu0 %v12002_v37  ;;  %v11978_v55 = vcombine.high %v7875_v44, %v7879_v45  ;;  %v11977_v50 = vcombine.low %v7875_v44, %v7879_v45  ;;  %v7931_v37 = vld [vmem:[%s16614_s11 + $0xa98] sm:$0xff] }
 0x7a7   :  { %v10404_v59 = vpop.f32.mrf.mxu1  ;;  %v12034_v62 = vcombine.high %v7931_v37, %v7935_v24  ;;  %v7915_v45 = vld [vmem:[%s16614_s11 + $0xa18] sm:$0xff] }
 0x7a8   :  { %v7923_v59 = vld [vmem:[%s16614_s11 + $0xa58] sm:$0xff] }
 0x7a9   :  { %10614 = vmatpush1.bf16.msra.mxu0 %v12001_v56  ;;  %v16553_v56 = vld [vmem:[%s16615_s12] sm:$0xff]  ;;  %v12025_v14 = vcombine.low %v7923_v59, %v7927_v3 }
 0x7aa   :  { %10615 = vmatprep.subr.bf16.mxu0 %v11994_v47  ;;  %v8005_v47 = vrot.slane %v16553_v56, %v13929_v11  ;;  %v8009_v39 = vrot.slane %v16553_v56, %v13935_v13 }
 0x7ac   :  { %v10236_v44 = vadd.f32 %v16462_v35, %v8005_v47 }
 0x7ad   :  { %10616 = vmatpush1.bf16.msra.mxu0 %v11993_v41  ;;  %v12033_v41 = vcombine.low %v7931_v37, %v7935_v24 }
 0x7ae   :  { %10617 = vmatprep.subr.bf16.mxu0 %v11986_v15  ;;  %v12026_v15 = vcombine.high %v7923_v59, %v7927_v3 }
 0x7b1   :  { %10618 = vmatpush1.bf16.msra.mxu0 %v11985_v53  ;;  %v7919_v53 = vld [vmem:[%s16614_s11 + $0xa38] sm:$0xff] }
 0x7b2   :  { %10619 = vmatprep.subr.bf16.mxu0 %v11978_v55  ;;  %v10238_v55 = vadd.f32 %v16464_v23, %v8009_v39  ;;  %v12018_v5 = vcombine.high %v7915_v45, %v7919_v53  ;;  %v12017_v10 = vcombine.low %v7915_v45, %v7919_v53 }
 0x7b4   :  { %v10279_v35 = vadd.f32 %v16326_v0, %v10238_v55 }
 0x7b5   :  { %10620 = vmatpush1.bf16.msra.mxu0 %v11977_v50  ;;  %v10277_v50 = vadd.f32 %v16324_v38, %v10236_v44  ;;  %v10718_v38 = vrot.slane %v16331_v54, %v13935_v13  ;;  %v8017_v13 = vrot.slane %v16553_v56, %v15133_v63 }
 0x7b6   :  { %10621 = vmatprep.subr.bf16.mxu0 %v11970_v20 }
 0x7b7   :  { %v10402_v61 = vadd.f32 %v16474_v51, %v8017_v13  ;;  %v10726_v51 = vrot.slane %v16331_v54, %v15133_v63  ;;  %v8021_v63 = vrot.slane %v16553_v56, %v15147_v43 }
 0x7b9   :  { %10622 = vmatpush1.bf16.msra.mxu0 %v11969_v2 }
 0x7ba   :  { %10623 = vmatprep.subr.bf16.mxu0 %v11962_v16 }
 0x7bd   :  { %10624 = vmatpush1.bf16.msra.mxu0 %v11961_v17 }
 0x7be   :  { %10625 = vmatprep.subr.bf16.mxu0 %v11954_v18 }
 0x7c1   :  { %10626 = vmatpush1.bf16.msra.mxu0 %v11953_v30 }
 0x7c2   :  { %10627 = vmatprep.subr.bf16.mxu0 %v12074_v33 }
 0x7c5   :  { %10628 = vmatpush2.bf16.msra.mxu0 %v12073_v1 }
 0x7c6   :  { %10629 = vmatprep.subr.bf16.mxu0 %v12066_v58 }
 0x7c9   :  { %10630 = vmatpush2.bf16.msra.mxu0 %v12065_v32 }
 0x7ca   :  { %10631 = vmatprep.subr.bf16.mxu0 %v12058_v49 }
 0x7cd   :  { %10632 = vmatpush2.bf16.msra.mxu0 %v12057_v9 }
 0x7ce   :  { %10633 = vmatprep.subr.bf16.mxu0 %v12050_v34 }
 0x7d1   :  { %10634 = vmatpush2.bf16.msra.mxu0 %v12049_v48 }
 0x7d2   :  { %10635 = vmatprep.subr.bf16.mxu0 %v12042_v40  ;;  %v10722_v40 = vrot.slane %v16331_v54, %v14517_v25 }
 0x7d5   :  { %10636 = vmatpush2.bf16.msra.mxu0 %v12041_v57 }
 0x7d6   :  { %10637 = vmatprep.subr.bf16.mxu0 %v12034_v62 }
 0x7d9   :  { %10638 = vmatpush2.bf16.msra.mxu0 %v12033_v41 }
 0x7da   :  { %10639 = vmatprep.subr.bf16.mxu0 %v12026_v15 }
 0x7dc   :  { %v10317_v20 = vpop.f32.mrf.mxu0 }
 0x7dd   :  { %v10318_v7 = vadd.f32 %v10317_v20, %v10277_v50  ;;  %10640 = vmatpush2.bf16.msra.mxu0 %v12025_v14 }
 0x7de   :  { %v10319_v2 = vpop.f32.mrf.mxu0  ;;  %10641 = vmatprep.subr.bf16.mxu0 %v12018_v5 }
 0x7df   :  { %v10359_v16 = vadd.f32 %v16359_v22, %v10318_v7  ;;  %v10320_v23 = vadd.f32 %v10319_v2, %v10279_v35  ;;  %v8024_v7 = vsub.s32 7, %v13920_v8 }
 0x7e0   :  { %v10321_v12 = vpop.f32.mrf.mxu0 }
 0x7e1   :  { %v10695_v17 = vmax.f32 %v10359_v16, 0.0  ;;  %v10361_v18 = vadd.f32 %v16362_v29, %v10320_v23  ;;  %v10481_v21 = vpop.f32.mrf.mxu1  ;;  %10642 = vmatpush2.bf16.msra.mxu0 %v12017_v10  ;;  %v8013_v29 = vrot.slane %v16553_v56, %v14517_v25  ;;  %v8025_v35 = vrot.slane %v16553_v56, %v8024_v7 }
 0x7e2   :  { %v10322_v27 = vpop.f32.mrf.mxu0 }
 0x7e3   :  { %v10745_v0 = vmul.f32 %v10714_v4, %v10695_v17  ;;  %v10696_v30 = vmax.f32 %v10361_v18, 0.0  ;;  %v10483_v33 = vpop.f32.mrf.mxu1  ;;  %v10400_v58 = vadd.f32 %v16472_v46, %v8013_v29 }
 0x7e4   :  { %10644 = vmatmul.mubr.bf16.vlgmr.msra.gmra.mxu0 %v15595_v6 }
 0x7e5   :  { %v10752_v22 = vadd.f32 %v16373_v31, %v10745_v0  ;;  %v10746_v19 = vmul.f32 %v10718_v38, %v10696_v30  ;;  %v10485_v11 = vpop.f32.mrf.mxu1  ;;  %v10734_v30 = vrot.slane %v16331_v54, %v8024_v7 }
 0x7e7   :  { %v10486_v60 = vpop.f32.mrf.mxu1  ;;  %v10753_v1 = vadd.f32 %v10752_v22, %v10746_v19 }
 0x81c   :  { %v10440_v28 = vpop.f32.mrf.mxu0 }
 0x81d   :  { %v10441_v32 = vadd.f32 %v10440_v28, %v10400_v58 }
 0x81e   :  { %v10442_v49 = vpop.f32.mrf.mxu0 }
 0x81f   :  { %v10443_v6 = vadd.f32 %v10442_v49, %v10402_v61  ;;  %v10482_v52 = vadd.f32 %v10481_v21, %v10441_v32  ;;  %v10730_v21 = vrot.slane %v16331_v54, %v15147_v43 }
 0x820   :  { %v10444_v31 = vpop.f32.mrf.mxu0 }
 0x821   :  { %v10604_v36 = vpop.f32.mrf.mxu1  ;;  %v10484_v9 = vadd.f32 %v10483_v33, %v10443_v6 }
 0x822   :  { %v10445_v34 = vpop.f32.mrf.mxu0 }
 0x823   :  { %v10606_v26 = vpop.f32.mrf.mxu1 }
 0x824   :  { %v10522_v42 = vpop.f32.mrf.mxu0 }
 0x825   :  { %v10523_v48 = vadd.f32 %v10522_v42, %v10482_v52  ;;  %v10608_v37 = vpop.f32.mrf.mxu1 }
 0x826   :  { %v10524_v24 = vpop.f32.mrf.mxu0 }
 0x827   :  { %v10697_v46 = vmax.f32 %v10523_v48, 0.0  ;;  %v10525_v57 = vadd.f32 %v10524_v24, %v10484_v9  ;;  %v10609_v62 = vpop.f32.mrf.mxu1 }
 0x828   :  { %v10526_v47 = vpop.f32.mrf.mxu0 }
 0x829   :  { %v10747_v59 = vmul.f32 %v10722_v40, %v10697_v46  ;;  %v10698_v3 = vmax.f32 %v10525_v57, 0.0  ;;  %v10686_v39 = vpop.f32.mrf.mxu1 }
 0x82a   :  { %v10527_v41 = vpop.f32.mrf.mxu0 }
 0x82b   :  { %v10754_v15 = vadd.f32 %v10753_v1, %v10747_v59  ;;  %v10748_v44 = vmul.f32 %v10726_v51, %v10698_v3  ;;  %v10688_v45 = vpop.f32.mrf.mxu1  ;;  %v12095_v1 = vld [vmem:[#allocation2] ss:$0 sm:$0xff] }
 0x82d   :  { %v10690_v53 = vpop.f32.mrf.mxu1  ;;  %v10755_v55 = vadd.f32 %v10754_v15, %v10748_v44 }
 0x82f   :  { %v10691_v14 = vpop.f32.mrf.mxu1 }
 0x864   :  { %v10563_v25 = vpop.f32.mrf.mxu0 }
 0x865   :  { %v10564_v10 = vadd.f32 %v10563_v25, %v8021_v63 }
 0x866   :  { %v10565_v5 = vpop.f32.mrf.mxu0 }
 0x867   :  { %v10566_v2 = vadd.f32 %v10565_v5, %v8025_v35  ;;  %v10605_v16 = vadd.f32 %v10604_v36, %v10564_v10 }
 0x868   :  { %v10567_v50 = vpop.f32.mrf.mxu0 }
 0x869   :  { %v10607_v12 = vadd.f32 %v10606_v26, %v10566_v2 }
 0x86a   :  { %v10568_v20 = vpop.f32.mrf.mxu0 }
 0x8a4   :  { %v10645_v4 = vpop.f32.mrf.mxu0 }
 0x8a5   :  { %v10646_v23 = vadd.f32 %v10645_v4, %v10605_v16 }
 0x8a6   :  { %v10647_v17 = vpop.f32.mrf.mxu0 }
 0x8a7   :  { %v10687_v18 = vadd.f32 %v10686_v39, %v10646_v23  ;;  %v10648_v38 = vadd.f32 %v10647_v17, %v10607_v12 }
 0x8a8   :  { %v10649_v27 = vpop.f32.mrf.mxu0 }
 0x8a9   :  { %v10699_v0 = vmax.f32 %v10687_v18, 0.0  ;;  %v10689_v8 = vadd.f32 %v10688_v45, %v10648_v38 }
 0x8aa   :  { %v10650_v33 = vpop.f32.mrf.mxu0 }
 0x8ab   :  { %v10700_v22 = vmax.f32 %v10689_v8, 0.0  ;;  %v10749_v56 = vmul.f32 %v10730_v21, %v10699_v0 }
 0x8ad   :  { %v10750_v19 = vmul.f32 %v10734_v30, %v10700_v22  ;;  %v10756_v11 = vadd.f32 %v10755_v55, %v10749_v56 }
 0x8af   :  { %v10757_v60 = vadd.f32 %v10756_v11, %v10750_v19 }
 0x8b1   :  { %10758 = vadd.xlane.f32.xlu0 %v10757_v60 }
 0x93a   :  { %v10759_v29 = vpop.xlane.xlu0 %10758 }
 0x93b   :  { %v10767_v13 = vadd.f32 %v12095_v1, %v10759_v29 }
 0x93d   :  { %10769 = vst.msk [vmem:[%s16618_s15] sm:$0xff] %vm10768_vm4, %v10767_v13 }
 0x93e   :  { %10774 = vsyncpa [#allocation4], 1 }
 0x93f   :  { %10775 = vsyncpa [#allocation6], 1 }

</bundles_post_ra>
